<compile_context>
chip_gen: v5e
topology: v5e:2x2
jax: 0.10.0
libtpu: 0.0.40
codegen_flags: <defaults>
</compile_context>

<pallas_src>
import functools

import jax
import jax.numpy as jnp
from jax.experimental import pallas as pl
from jax.experimental.pallas import tpu as pltpu

_BN_EPS = 1e-5
_LANES = 128


def _round_up(x, m):
    return (x + m - 1) // m * m


# ---------------------------------------------------------------------------
# Fused kernel: conv_kernel -> xorr_kernel -> conv_search -> xorr_search
#               (+ kernel_part, BN, ReLU) -> conv3x3(pad=1)+bias -> BN -> ReLU
# One grid step == one batch element; everything stays in VMEM.
# ---------------------------------------------------------------------------
def _fused_kernel(kflat_ref, sflat_ref, wck_ref, wcs_ref, wxk_ref, wxs_ref,
                  wxa_ref, sb_ref, o_ref, k_sc, s_sc, g_sc, *,
                  wp_k, wp_s, m1, m2, m3, m4, m5, g_off, wo):
    cp = o_ref.shape[-1]

    def conv(src_ref, m_rows, wstride, kh, kw, w_ref, base0=0):
        """Tap-decomposed VALID conv on a flattened (rows, C) activation."""
        acc = jnp.zeros((m_rows, cp), jnp.float32)
        for t in range(kh * kw):        # static unroll -> static slice offsets
            i, j = divmod(t, kw)
            lhs = src_ref[pl.ds(base0 + i * wstride + j, m_rows), :]
            acc = acc + jnp.dot(lhs.astype(jnp.bfloat16), w_ref[t],
                                preferred_element_type=jnp.float32)
        return acc

    # Zero scratches: g_sc's zero border is REQUIRED by the pad=1 conv; the
    # others keep the (discarded) wrap-around lanes finite & deterministic.
    k_sc[...] = jnp.zeros_like(k_sc)
    s_sc[...] = jnp.zeros_like(s_sc)
    g_sc[...] = jnp.zeros_like(g_sc)

    scale_k, bias_k = sb_ref[0:1], sb_ref[1:2]
    scale_s, bias_s = sb_ref[2:3], sb_ref[3:4]
    bias_xk = sb_ref[4:5]
    scale_a1, bias_a1 = sb_ref[5:6], sb_ref[6:7]
    scale_a2, bias_a2 = sb_ref[7:8], sb_ref[8:9]

    # ---- template branch ---------------------------------------------------
    # conv_kernel: Conv3x3 (no bias) + BN + ReLU
    a = conv(kflat_ref, m1, wp_k, 3, 3, wck_ref)
    k_sc[pl.ds(0, m1), :] = jnp.maximum(a * scale_k + bias_k, 0.0)

    # xorr_kernel: Conv5x5 + bias (template reduces to 1x1 -> per-image vector)
    b = conv(k_sc, m2, wp_k, 5, 5, wxk_ref)
    kernel_part = b[0:1, :] + bias_xk                       # (1, Cp) f32

    # ---- search branch -----------------------------------------------------
    # conv_search: Conv3x3 (no bias) + BN + ReLU
    c = conv(sflat_ref, m3, wp_s, 3, 3, wcs_ref)
    s_sc[pl.ds(0, m3), :] = jnp.maximum(c * scale_s + bias_s, 0.0)

    # xorr_search: Conv5x5 (no bias); fused  f = search_part + kernel_part,
    # then xorr_activate stage 1: BN + ReLU.
    d = conv(s_sc, m4, wp_s, 5, 5, wxs_ref)
    g = jnp.maximum((d + kernel_part) * scale_a1 + bias_a1, 0.0)

    # Mask wrap-around columns of the flattened layout and drop g into a
    # zero-bordered scratch so the pad=1 conv below sees true zero padding.
    col = jax.lax.broadcasted_iota(jnp.int32, (m4, cp), 0) % wp_s
    g_sc[pl.ds(g_off, m4), :] = jnp.where(col < wo, g, 0.0)

    # xorr_activate stage 2: Conv3x3(pad=1, bias) + BN + ReLU
    # (conv bias pre-folded into bias_a2 on the host side).
    e = conv(g_sc, m5, wp_s, 3, 3, wxa_ref, base0=g_off - wp_s - 1)
    o_ref[...] = jnp.maximum(e * scale_a2 + bias_a2, 0.0).astype(o_ref.dtype)


# ---------------------------------------------------------------------------
# Host-side glue: BN folding, weight/activation packing, pallas_call wrapper.
# ---------------------------------------------------------------------------
def bn_fold(gamma, beta, mean, var):
    scale = gamma / jnp.sqrt(var + _BN_EPS)
    return scale, beta - mean * scale


def _prep_w(w_hwio, cin_pad, cp):
    kh, kw, cin, cout = w_hwio.shape
    w = jnp.pad(w_hwio.astype(jnp.float32),
                ((0, 0), (0, 0), (0, cin_pad - cin), (0, cp - cout)))
    return w.reshape(kh * kw, cin_pad, cp).astype(jnp.bfloat16)


def _flatten_rows(x_nhwc, rows):
    n, h, w, c = x_nhwc.shape
    x = x_nhwc.reshape(n, h * w, c)
    return jnp.pad(x, ((0, 0), (0, rows - h * w), (0, 0)))


def depthwise_xcorr_forward(params, kernel_nchw, search_nchw):
    hidden = params['xorr_search_w'].shape[-1]
    cp = _round_up(hidden, _LANES)

    k_img = jnp.transpose(kernel_nchw, (0, 2, 3, 1)).astype(jnp.float32)
    s_img = jnp.transpose(search_nchw, (0, 2, 3, 1)).astype(jnp.float32)
    n, hk, wk, cin = k_img.shape
    _, hs, ws, _ = s_img.shape
    cin8 = _round_up(cin, 8)
    k_img = jnp.pad(k_img, ((0, 0), (0, 0), (0, 0), (0, cin8 - cin)))
    s_img = jnp.pad(s_img, ((0, 0), (0, 0), (0, 0), (0, cin8 - cin)))

    # Spatial bookkeeping: all convs are VALID except the final pad=1 3x3.
    hk1, wk1 = hk - 2, wk - 2            # after conv_kernel 3x3
    hk2, wk2 = hk1 - 4, wk1 - 4          # after xorr_kernel 5x5
    assert (hk2, wk2) == (1, 1), "template must reduce to 1x1 (broadcast add)"
    hs1, ws1 = hs - 2, ws - 2            # after conv_search 3x3
    hs2, ws2 = hs1 - 4, ws1 - 4          # after xorr_search 5x5 == final size

    wp_k, wp_s = wk, ws                  # flattened row strides of each branch
    m1 = hk1 * wp_k                      # conv_kernel rows   (stride wp_k)
    m2 = _round_up(hk2 * wp_k, 8)        # xorr_kernel rows computed (row 0 kept)
    m3 = hs1 * wp_s                      # conv_search rows   (stride wp_s)
    m4 = hs2 * wp_s                      # xorr_search rows   (stride wp_s)
    m5 = hs2 * wp_s                      # final conv rows    (stride wp_s)
    g_off = _round_up(wp_s + 1, 16)      # zero-border offset inside g scratch

    rk = _round_up(m1 + 2 * wp_k + 2, 8)                  # kflat rows
    rs = _round_up(m3 + 2 * wp_s + 2, 8)                  # sflat rows
    r_k = _round_up(max(m1, m2 + 4 * wp_k + 4), 8)        # k scratch rows
    r_s = _round_up(max(m3, m4 + 4 * wp_s + 4), 8)        # s scratch rows
    r_g = _round_up(max(g_off + m4,
                        m5 + (g_off - wp_s - 1) + 2 * wp_s + 2), 8)

    kflat = _flatten_rows(k_img, rk)
    sflat = _flatten_rows(s_img, rs)

    w_ck = _prep_w(params['conv_kernel_w'], cin8, cp)
    w_cs = _prep_w(params['conv_search_w'], cin8, cp)
    w_xk = _prep_w(params['xorr_kernel_w'], cp, cp)
    w_xs = _prep_w(params['xorr_search_w'], cp, cp)
    w_xa = _prep_w(params['xorr_act_w'], cp, cp)

    sc_k, b_k = bn_fold(**params['bn_k'])
    sc_s, b_s = bn_fold(**params['bn_s'])
    sc_a1, b_a1 = bn_fold(**params['bn_a1'])
    sc_a2, b_a2 = bn_fold(**params['bn_a2'])

    def padv(v, fill=0.0):
        return jnp.pad(v.astype(jnp.float32), (0, cp - hidden),
                       constant_values=fill)

    sb = jnp.stack([
        padv(sc_k, 1.0), padv(b_k),
        padv(sc_s, 1.0), padv(b_s),
        padv(params['xorr_kernel_b']),
        padv(sc_a1, 1.0), padv(b_a1),
        padv(sc_a2, 1.0), padv(sc_a2 * params['xorr_act_b'] + b_a2),
    ])                                                    # (9, Cp) f32

    kern = functools.partial(_fused_kernel, wp_k=wp_k, wp_s=wp_s,
                             m1=m1, m2=m2, m3=m3, m4=m4, m5=m5,
                             g_off=g_off, wo=ws2)

    flops = 2 * n * (m1 * cin8 * cp * 9 + m2 * cp * cp * 25
                     + m3 * cin8 * cp * 9 + m4 * cp * cp * 25
                     + m5 * cp * cp * 9)
    bytes_accessed = int(4 * (kflat.size + sflat.size + sb.size + n * m5 * cp)
                         + 2 * (w_ck.size + w_cs.size + w_xk.size
                                + w_xs.size + w_xa.size))

    out = pl.pallas_call(
        kern,
        out_shape=jax.ShapeDtypeStruct((n, m5, cp), jnp.float32),
        grid_spec=pltpu.PrefetchScalarGridSpec(
            num_scalar_prefetch=0,
            grid=(n,),
            in_specs=[
                pl.BlockSpec((None, rk, cin8), lambda b: (b, 0, 0)),
                pl.BlockSpec((None, rs, cin8), lambda b: (b, 0, 0)),
                pl.BlockSpec((9, cin8, cp), lambda b: (0, 0, 0)),
                pl.BlockSpec((9, cin8, cp), lambda b: (0, 0, 0)),
                pl.BlockSpec((25, cp, cp), lambda b: (0, 0, 0)),
                pl.BlockSpec((25, cp, cp), lambda b: (0, 0, 0)),
                pl.BlockSpec((9, cp, cp), lambda b: (0, 0, 0)),
                pl.BlockSpec((9, cp), lambda b: (0, 0)),
            ],
            out_specs=pl.BlockSpec((None, m5, cp), lambda b: (b, 0, 0)),
            scratch_shapes=[
                pltpu.VMEM((r_k, cp), jnp.float32),
                pltpu.VMEM((r_s, cp), jnp.float32),
                pltpu.VMEM((r_g, cp), jnp.float32),
            ]),
        compiler_params=pltpu.CompilerParams(
            dimension_semantics=("parallel",),
            vmem_limit_bytes=32 << 20),
        cost_estimate=pl.CostEstimate(flops=flops, transcendentals=0,
                                      bytes_accessed=bytes_accessed),
    )(kflat, sflat, w_ck, w_cs, w_xk, w_xs, w_xa, sb)

    # (N, hs2*wp_s, Cp): drop wrap-around columns & lane-padding channels.
    out = out.reshape(n, hs2, wp_s, cp)[:, :, :ws2, :hidden]
    return jnp.transpose(out, (0, 3, 1, 2))               # NHWC -> NCHW


# ---------------------------------------------------------------------------
# Parameter init + pure-JAX reference (for a norm-relative sanity check).
# ---------------------------------------------------------------------------
def init_params(key, in_channels, hidden, kernel_size=3):
    keys = iter(jax.random.split(key, 32))

    def w(shape, s=0.1):
        return jax.random.normal(next(keys), shape, jnp.float32) * s

    def bn():
        return dict(gamma=1.0 + w((hidden,), 0.05),
                    beta=w((hidden,), 0.05),
                    mean=w((hidden,), 0.05),
                    var=1.0 + jnp.abs(w((hidden,), 0.05)))

    return dict(
        conv_kernel_w=w((kernel_size, kernel_size, in_channels, hidden)),
        bn_k=bn(),
        conv_search_w=w((kernel_size, kernel_size, in_channels, hidden)),
        bn_s=bn(),
        xorr_kernel_w=w((5, 5, hidden, hidden)),
        xorr_kernel_b=w((hidden,), 0.05),
        xorr_search_w=w((5, 5, hidden, hidden)),
        bn_a1=bn(),
        xorr_act_w=w((3, 3, hidden, hidden)),
        xorr_act_b=w((hidden,), 0.05),
        bn_a2=bn(),
    )


def reference_forward(params, kernel_nchw, search_nchw):
    def conv(x, w, pad=0):
        return jax.lax.conv_general_dilated(
            x, w, window_strides=(1, 1), padding=[(pad, pad), (pad, pad)],
            dimension_numbers=("NHWC", "HWIO", "NHWC"))

    def bn_relu(x, bn):
        s, b = bn_fold(**bn)
        return jnp.maximum(x * s + b, 0.0)

    k = jnp.transpose(kernel_nchw, (0, 2, 3, 1))
    s = jnp.transpose(search_nchw, (0, 2, 3, 1))
    k = bn_relu(conv(k, params['conv_kernel_w']), params['bn_k'])
    kernel_part = conv(k, params['xorr_kernel_w']) + params['xorr_kernel_b']
    s = bn_relu(conv(s, params['conv_search_w']), params['bn_s'])
    search_part = conv(s, params['xorr_search_w'])
    f = bn_relu(search_part + kernel_part, params['bn_a1'])
    y = conv(f, params['xorr_act_w'], pad=1) + params['xorr_act_b']
    y = bn_relu(y, params['bn_a2'])
    return jnp.transpose(y, (0, 3, 1, 2))


# ---------------------------------------------------------------------------
if __name__ == "__main__":
    key = jax.random.PRNGKey(0)
    k_in, k_srch, k_par = jax.random.split(key, 3)

    in_channels, hidden = 4, 32
    # Template 7x7 -> (3x3) 5x5 -> (5x5) 1x1, broadcast over the search map:
    # 16x16 -> (3x3) 14x14 -> (5x5) 10x10 -> (3x3 pad=1) 10x10.
    kernel_in = jax.random.normal(k_in, (2, in_channels, 7, 7), jnp.float32)
    search_in = jax.random.normal(k_srch, (2, in_channels, 16, 16), jnp.float32)

    params = init_params(k_par, in_channels, hidden, kernel_size=3)

    fwd = jax.jit(depthwise_xcorr_forward)
    out = fwd(params, kernel_in, search_in)
    jax.block_until_ready(out)

    assert out.shape == (2, hidden, 10, 10), out.shape
    assert out.dtype == jnp.float32

    ref = jax.jit(reference_forward)(params, kernel_in, search_in)
    rel_err = float(jnp.linalg.norm(out - ref) / (jnp.linalg.norm(ref) + 1e-12))
    assert rel_err < 0.08, f"relative error too large: {rel_err}"

    print("KERNEL_OK")
</pallas_src>

<mosaic_0001>
module attributes {stable_mosaic.version = 11 : i64} {
  func.func @_fused_kernel(%arg0: i32, %arg1: memref<1x56x8xf32, #tpu.memory_space<vmem>>, %arg2: memref<1x264x8xf32, #tpu.memory_space<vmem>>, %arg3: memref<9x8x128xbf16, #tpu.memory_space<vmem>>, %arg4: memref<9x8x128xbf16, #tpu.memory_space<vmem>>, %arg5: memref<25x128x128xbf16, #tpu.memory_space<vmem>>, %arg6: memref<25x128x128xbf16, #tpu.memory_space<vmem>>, %arg7: memref<9x128x128xbf16, #tpu.memory_space<vmem>>, %arg8: memref<9x128xf32, #tpu.memory_space<vmem>>, %arg9: memref<1x160x128xf32, #tpu.memory_space<vmem>>, %arg10: memref<40x128xf32, #tpu.memory_space<vmem>>, %arg11: memref<232x128xf32, #tpu.memory_space<vmem>>, %arg12: memref<216x128xf32, #tpu.memory_space<vmem>>) attributes {dimension_semantics = [#tpu.dimension_semantics<parallel>], iteration_bounds = array<i64: 2>, scalar_prefetch = 0 : i64, scratch_operands = 3 : i64, tpu.core_type = #tpu.core_type<tc>, window_params = [{transform_indices = @transform_0, window_bounds = array<i64: 1, 56, 8>}, {transform_indices = @transform_1, window_bounds = array<i64: 1, 264, 8>}, {pipeline_mode = #tpu.pipeline_mode<synchronous>, transform_indices = @transform_2, window_bounds = array<i64: 9, 8, 128>}, {pipeline_mode = #tpu.pipeline_mode<synchronous>, transform_indices = @transform_3, window_bounds = array<i64: 9, 8, 128>}, {pipeline_mode = #tpu.pipeline_mode<synchronous>, transform_indices = @transform_4, window_bounds = array<i64: 25, 128, 128>}, {pipeline_mode = #tpu.pipeline_mode<synchronous>, transform_indices = @transform_5, window_bounds = array<i64: 25, 128, 128>}, {pipeline_mode = #tpu.pipeline_mode<synchronous>, transform_indices = @transform_6, window_bounds = array<i64: 9, 128, 128>}, {pipeline_mode = #tpu.pipeline_mode<synchronous>, transform_indices = @transform_7, window_bounds = array<i64: 9, 128>}, {transform_indices = @transform_8, window_bounds = array<i64: 1, 160, 128>}]} {
    %cst = arith.constant 0.000000e+00 : f32
    %0 = vector.broadcast %cst : f32 to vector<40x128xf32>
    %c0 = arith.constant 0 : index
    %c0_0 = arith.constant 0 : index
    %1 = vector.load %arg10[%c0, %c0_0] : memref<40x128xf32, #tpu.memory_space<vmem>>, vector<40x128xf32>
    tpu.vector_store %arg10[%c0, %c0_0], %0 {strides = array<i32>} : memref<40x128xf32, #tpu.memory_space<vmem>>, vector<40x128xf32>,
    %cst_1 = arith.constant 0.000000e+00 : f32
    %2 = vector.broadcast %cst_1 : f32 to vector<232x128xf32>
    %c0_2 = arith.constant 0 : index
    %c0_3 = arith.constant 0 : index
    %3 = vector.load %arg11[%c0_2, %c0_3] : memref<232x128xf32, #tpu.memory_space<vmem>>, vector<232x128xf32>
    tpu.vector_store %arg11[%c0_2, %c0_3], %2 {strides = array<i32>} : memref<232x128xf32, #tpu.memory_space<vmem>>, vector<232x128xf32>,
    %cst_4 = arith.constant 0.000000e+00 : f32
    %4 = vector.broadcast %cst_4 : f32 to vector<216x128xf32>
    %c0_5 = arith.constant 0 : index
    %c0_6 = arith.constant 0 : index
    %5 = vector.load %arg12[%c0_5, %c0_6] : memref<216x128xf32, #tpu.memory_space<vmem>>, vector<216x128xf32>
    tpu.vector_store %arg12[%c0_5, %c0_6], %4 {strides = array<i32>} : memref<216x128xf32, #tpu.memory_space<vmem>>, vector<216x128xf32>,
    %c0_7 = arith.constant 0 : index
    %c0_8 = arith.constant 0 : index
    %6 = vector.load %arg8[%c0_7, %c0_8] : memref<9x128xf32, #tpu.memory_space<vmem>>, vector<1x128xf32>
    %c1 = arith.constant 1 : index
    %c0_9 = arith.constant 0 : index
    %7 = vector.load %arg8[%c1, %c0_9] : memref<9x128xf32, #tpu.memory_space<vmem>>, vector<1x128xf32>
    %c2 = arith.constant 2 : index
    %c0_10 = arith.constant 0 : index
    %8 = vector.load %arg8[%c2, %c0_10] : memref<9x128xf32, #tpu.memory_space<vmem>>, vector<1x128xf32>
    %c3 = arith.constant 3 : index
    %c0_11 = arith.constant 0 : index
    %9 = vector.load %arg8[%c3, %c0_11] : memref<9x128xf32, #tpu.memory_space<vmem>>, vector<1x128xf32>
    %c4 = arith.constant 4 : index
    %c0_12 = arith.constant 0 : index
    %10 = vector.load %arg8[%c4, %c0_12] : memref<9x128xf32, #tpu.memory_space<vmem>>, vector<1x128xf32>
    %c5 = arith.constant 5 : index
    %c0_13 = arith.constant 0 : index
    %11 = vector.load %arg8[%c5, %c0_13] : memref<9x128xf32, #tpu.memory_space<vmem>>, vector<1x128xf32>
    %c6 = arith.constant 6 : index
    %c0_14 = arith.constant 0 : index
    %12 = vector.load %arg8[%c6, %c0_14] : memref<9x128xf32, #tpu.memory_space<vmem>>, vector<1x128xf32>
    %c7 = arith.constant 7 : index
    %c0_15 = arith.constant 0 : index
    %13 = vector.load %arg8[%c7, %c0_15] : memref<9x128xf32, #tpu.memory_space<vmem>>, vector<1x128xf32>
    %c8 = arith.constant 8 : index
    %c0_16 = arith.constant 0 : index
    %14 = vector.load %arg8[%c8, %c0_16] : memref<9x128xf32, #tpu.memory_space<vmem>>, vector<1x128xf32>
    %cst_17 = arith.constant 0.000000e+00 : f32
    %15 = vector.broadcast %cst_17 : f32 to vector<35x128xf32>
    %c0_18 = arith.constant 0 : index
    %c0_19 = arith.constant 0 : index
    %c0_20 = arith.constant 0 : index
    %16 = vector.load %arg1[%c0_18, %c0_19, %c0_20] : memref<1x56x8xf32, #tpu.memory_space<vmem>>, vector<1x35x8xf32>
    %17 = vector.shape_cast %16 : vector<1x35x8xf32> to vector<35x8xf32>
    %18 = arith.truncf %17 : vector<35x8xf32> to vector<35x8xbf16>
    %c0_21 = arith.constant 0 : index
    %c0_22 = arith.constant 0 : index
    %c0_23 = arith.constant 0 : index
    %19 = vector.load %arg3[%c0_21, %c0_22, %c0_23] : memref<9x8x128xbf16, #tpu.memory_space<vmem>>, vector<1x8x128xbf16>
    %20 = vector.shape_cast %19 : vector<1x8x128xbf16> to vector<8x128xbf16>
    %cst_24 = arith.constant dense<0.000000e+00> : vector<35x128xf32>
    %21 = tpu.matmul %18, %20, %cst_24 {dimension_numbers = #tpu.dot_dimension_numbers<[1], [0], [0], [1], [0, 0, 1, 1], [], []>} : vector<35x8xbf16>, vector<8x128xbf16>, vector<35x128xf32> -> vector<35x128xf32>
    %22 = arith.addf %15, %21 : vector<35x128xf32>
    %c0_25 = arith.constant 0 : index
    %c1_26 = arith.constant 1 : index
    %c0_27 = arith.constant 0 : index
    %23 = vector.load %arg1[%c0_25, %c1_26, %c0_27] : memref<1x56x8xf32, #tpu.memory_space<vmem>>, vector<1x35x8xf32>
    %24 = vector.shape_cast %23 : vector<1x35x8xf32> to vector<35x8xf32>
    %25 = arith.truncf %24 : vector<35x8xf32> to vector<35x8xbf16>
    %c1_28 = arith.constant 1 : index
    %c0_29 = arith.constant 0 : index
    %c0_30 = arith.constant 0 : index
    %26 = vector.load %arg3[%c1_28, %c0_29, %c0_30] : memref<9x8x128xbf16, #tpu.memory_space<vmem>>, vector<1x8x128xbf16>
    %27 = vector.shape_cast %26 : vector<1x8x128xbf16> to vector<8x128xbf16>
    %cst_31 = arith.constant dense<0.000000e+00> : vector<35x128xf32>
    %28 = tpu.matmul %25, %27, %cst_31 {dimension_numbers = #tpu.dot_dimension_numbers<[1], [0], [0], [1], [0, 0, 1, 1], [], []>} : vector<35x8xbf16>, vector<8x128xbf16>, vector<35x128xf32> -> vector<35x128xf32>
    %29 = arith.addf %22, %28 : vector<35x128xf32>
    %c0_32 = arith.constant 0 : index
    %c2_33 = arith.constant 2 : index
    %c0_34 = arith.constant 0 : index
    %30 = vector.load %arg1[%c0_32, %c2_33, %c0_34] : memref<1x56x8xf32, #tpu.memory_space<vmem>>, vector<1x35x8xf32>
    %31 = vector.shape_cast %30 : vector<1x35x8xf32> to vector<35x8xf32>
    %32 = arith.truncf %31 : vector<35x8xf32> to vector<35x8xbf16>
    %c2_35 = arith.constant 2 : index
    %c0_36 = arith.constant 0 : index
    %c0_37 = arith.constant 0 : index
    %33 = vector.load %arg3[%c2_35, %c0_36, %c0_37] : memref<9x8x128xbf16, #tpu.memory_space<vmem>>, vector<1x8x128xbf16>
    %34 = vector.shape_cast %33 : vector<1x8x128xbf16> to vector<8x128xbf16>
    %cst_38 = arith.constant dense<0.000000e+00> : vector<35x128xf32>
    %35 = tpu.matmul %32, %34, %cst_38 {dimension_numbers = #tpu.dot_dimension_numbers<[1], [0], [0], [1], [0, 0, 1, 1], [], []>} : vector<35x8xbf16>, vector<8x128xbf16>, vector<35x128xf32> -> vector<35x128xf32>
    %36 = arith.addf %29, %35 : vector<35x128xf32>
    %c0_39 = arith.constant 0 : index
    %c7_40 = arith.constant 7 : index
    %c0_41 = arith.constant 0 : index
    %37 = vector.load %arg1[%c0_39, %c7_40, %c0_41] : memref<1x56x8xf32, #tpu.memory_space<vmem>>, vector<1x35x8xf32>
    %38 = vector.shape_cast %37 : vector<1x35x8xf32> to vector<35x8xf32>
    %39 = arith.truncf %38 : vector<35x8xf32> to vector<35x8xbf16>
    %c3_42 = arith.constant 3 : index
    %c0_43 = arith.constant 0 : index
    %c0_44 = arith.constant 0 : index
    %40 = vector.load %arg3[%c3_42, %c0_43, %c0_44] : memref<9x8x128xbf16, #tpu.memory_space<vmem>>, vector<1x8x128xbf16>
    %41 = vector.shape_cast %40 : vector<1x8x128xbf16> to vector<8x128xbf16>
    %cst_45 = arith.constant dense<0.000000e+00> : vector<35x128xf32>
    %42 = tpu.matmul %39, %41, %cst_45 {dimension_numbers = #tpu.dot_dimension_numbers<[1], [0], [0], [1], [0, 0, 1, 1], [], []>} : vector<35x8xbf16>, vector<8x128xbf16>, vector<35x128xf32> -> vector<35x128xf32>
    %43 = arith.addf %36, %42 : vector<35x128xf32>
    %c0_46 = arith.constant 0 : index
    %c8_47 = arith.constant 8 : index
    %c0_48 = arith.constant 0 : index
    %44 = vector.load %arg1[%c0_46, %c8_47, %c0_48] : memref<1x56x8xf32, #tpu.memory_space<vmem>>, vector<1x35x8xf32>
    %45 = vector.shape_cast %44 : vector<1x35x8xf32> to vector<35x8xf32>
    %46 = arith.truncf %45 : vector<35x8xf32> to vector<35x8xbf16>
    %c4_49 = arith.constant 4 : index
    %c0_50 = arith.constant 0 : index
    %c0_51 = arith.constant 0 : index
    %47 = vector.load %arg3[%c4_49, %c0_50, %c0_51] : memref<9x8x128xbf16, #tpu.memory_space<vmem>>, vector<1x8x128xbf16>
    %48 = vector.shape_cast %47 : vector<1x8x128xbf16> to vector<8x128xbf16>
    %cst_52 = arith.constant dense<0.000000e+00> : vector<35x128xf32>
    %49 = tpu.matmul %46, %48, %cst_52 {dimension_numbers = #tpu.dot_dimension_numbers<[1], [0], [0], [1], [0, 0, 1, 1], [], []>} : vector<35x8xbf16>, vector<8x128xbf16>, vector<35x128xf32> -> vector<35x128xf32>
    %50 = arith.addf %43, %49 : vector<35x128xf32>
    %c0_53 = arith.constant 0 : index
    %c9 = arith.constant 9 : index
    %c0_54 = arith.constant 0 : index
    %51 = vector.load %arg1[%c0_53, %c9, %c0_54] : memref<1x56x8xf32, #tpu.memory_space<vmem>>, vector<1x35x8xf32>
    %52 = vector.shape_cast %51 : vector<1x35x8xf32> to vector<35x8xf32>
    %53 = arith.truncf %52 : vector<35x8xf32> to vector<35x8xbf16>
    %c5_55 = arith.constant 5 : index
    %c0_56 = arith.constant 0 : index
    %c0_57 = arith.constant 0 : index
    %54 = vector.load %arg3[%c5_55, %c0_56, %c0_57] : memref<9x8x128xbf16, #tpu.memory_space<vmem>>, vector<1x8x128xbf16>
    %55 = vector.shape_cast %54 : vector<1x8x128xbf16> to vector<8x128xbf16>
    %cst_58 = arith.constant dense<0.000000e+00> : vector<35x128xf32>
    %56 = tpu.matmul %53, %55, %cst_58 {dimension_numbers = #tpu.dot_dimension_numbers<[1], [0], [0], [1], [0, 0, 1, 1], [], []>} : vector<35x8xbf16>, vector<8x128xbf16>, vector<35x128xf32> -> vector<35x128xf32>
    %57 = arith.addf %50, %56 : vector<35x128xf32>
    %c0_59 = arith.constant 0 : index
    %c14 = arith.constant 14 : index
    %c0_60 = arith.constant 0 : index
    %58 = vector.load %arg1[%c0_59, %c14, %c0_60] : memref<1x56x8xf32, #tpu.memory_space<vmem>>, vector<1x35x8xf32>
    %59 = vector.shape_cast %58 : vector<1x35x8xf32> to vector<35x8xf32>
    %60 = arith.truncf %59 : vector<35x8xf32> to vector<35x8xbf16>
    %c6_61 = arith.constant 6 : index
    %c0_62 = arith.constant 0 : index
    %c0_63 = arith.constant 0 : index
    %61 = vector.load %arg3[%c6_61, %c0_62, %c0_63] : memref<9x8x128xbf16, #tpu.memory_space<vmem>>, vector<1x8x128xbf16>
    %62 = vector.shape_cast %61 : vector<1x8x128xbf16> to vector<8x128xbf16>
    %cst_64 = arith.constant dense<0.000000e+00> : vector<35x128xf32>
    %63 = tpu.matmul %60, %62, %cst_64 {dimension_numbers = #tpu.dot_dimension_numbers<[1], [0], [0], [1], [0, 0, 1, 1], [], []>} : vector<35x8xbf16>, vector<8x128xbf16>, vector<35x128xf32> -> vector<35x128xf32>
    %64 = arith.addf %57, %63 : vector<35x128xf32>
    %c0_65 = arith.constant 0 : index
    %c15 = arith.constant 15 : index
    %c0_66 = arith.constant 0 : index
    %65 = vector.load %arg1[%c0_65, %c15, %c0_66] : memref<1x56x8xf32, #tpu.memory_space<vmem>>, vector<1x35x8xf32>
    %66 = vector.shape_cast %65 : vector<1x35x8xf32> to vector<35x8xf32>
    %67 = arith.truncf %66 : vector<35x8xf32> to vector<35x8xbf16>
    %c7_67 = arith.constant 7 : index
    %c0_68 = arith.constant 0 : index
    %c0_69 = arith.constant 0 : index
    %68 = vector.load %arg3[%c7_67, %c0_68, %c0_69] : memref<9x8x128xbf16, #tpu.memory_space<vmem>>, vector<1x8x128xbf16>
    %69 = vector.shape_cast %68 : vector<1x8x128xbf16> to vector<8x128xbf16>
    %cst_70 = arith.constant dense<0.000000e+00> : vector<35x128xf32>
    %70 = tpu.matmul %67, %69, %cst_70 {dimension_numbers = #tpu.dot_dimension_numbers<[1], [0], [0], [1], [0, 0, 1, 1], [], []>} : vector<35x8xbf16>, vector<8x128xbf16>, vector<35x128xf32> -> vector<35x128xf32>
    %71 = arith.addf %64, %70 : vector<35x128xf32>
    %c0_71 = arith.constant 0 : index
    %c16 = arith.constant 16 : index
    %c0_72 = arith.constant 0 : index
    %72 = vector.load %arg1[%c0_71, %c16, %c0_72] : memref<1x56x8xf32, #tpu.memory_space<vmem>>, vector<1x35x8xf32>
    %73 = vector.shape_cast %72 : vector<1x35x8xf32> to vector<35x8xf32>
    %74 = arith.truncf %73 : vector<35x8xf32> to vector<35x8xbf16>
    %c8_73 = arith.constant 8 : index
    %c0_74 = arith.constant 0 : index
    %c0_75 = arith.constant 0 : index
    %75 = vector.load %arg3[%c8_73, %c0_74, %c0_75] : memref<9x8x128xbf16, #tpu.memory_space<vmem>>, vector<1x8x128xbf16>
    %76 = vector.shape_cast %75 : vector<1x8x128xbf16> to vector<8x128xbf16>
    %cst_76 = arith.constant dense<0.000000e+00> : vector<35x128xf32>
    %77 = tpu.matmul %74, %76, %cst_76 {dimension_numbers = #tpu.dot_dimension_numbers<[1], [0], [0], [1], [0, 0, 1, 1], [], []>} : vector<35x8xbf16>, vector<8x128xbf16>, vector<35x128xf32> -> vector<35x128xf32>
    %78 = arith.addf %71, %77 : vector<35x128xf32>
    %79 = vector.broadcast %6 : vector<1x128xf32> to vector<35x128xf32>
    %80 = arith.mulf %78, %79 : vector<35x128xf32>
    %81 = vector.broadcast %7 : vector<1x128xf32> to vector<35x128xf32>
    %82 = arith.addf %80, %81 : vector<35x128xf32>
    %cst_77 = arith.constant 0.000000e+00 : f32
    %83 = vector.broadcast %cst_77 : f32 to vector<35x128xf32>
    %84 = arith.maximumf %82, %83 : vector<35x128xf32>
    %c0_78 = arith.constant 0 : index
    %c0_79 = arith.constant 0 : index
    %85 = vector.load %arg10[%c0_78, %c0_79] : memref<40x128xf32, #tpu.memory_space<vmem>>, vector<35x128xf32>
    tpu.vector_store %arg10[%c0_78, %c0_79], %84 {strides = array<i32>} : memref<40x128xf32, #tpu.memory_space<vmem>>, vector<35x128xf32>,
    %cst_80 = arith.constant 0.000000e+00 : f32
    %86 = vector.broadcast %cst_80 : f32 to vector<8x128xf32>
    %c0_81 = arith.constant 0 : index
    %c0_82 = arith.constant 0 : index
    %87 = vector.load %arg10[%c0_81, %c0_82] : memref<40x128xf32, #tpu.memory_space<vmem>>, vector<8x128xf32>
    %88 = arith.truncf %87 : vector<8x128xf32> to vector<8x128xbf16>
    %c0_83 = arith.constant 0 : index
    %c0_84 = arith.constant 0 : index
    %c0_85 = arith.constant 0 : index
    %89 = vector.load %arg5[%c0_83, %c0_84, %c0_85] : memref<25x128x128xbf16, #tpu.memory_space<vmem>>, vector<1x128x128xbf16>
    %90 = vector.shape_cast %89 : vector<1x128x128xbf16> to vector<128x128xbf16>
    %cst_86 = arith.constant dense<0.000000e+00> : vector<8x128xf32>
    %91 = tpu.matmul %88, %90, %cst_86 {dimension_numbers = #tpu.dot_dimension_numbers<[1], [0], [0], [1], [0, 0, 1, 1], [], []>} : vector<8x128xbf16>, vector<128x128xbf16>, vector<8x128xf32> -> vector<8x128xf32>
    %92 = arith.addf %86, %91 : vector<8x128xf32>
    %c1_87 = arith.constant 1 : index
    %c0_88 = arith.constant 0 : index
    %93 = vector.load %arg10[%c1_87, %c0_88] : memref<40x128xf32, #tpu.memory_space<vmem>>, vector<8x128xf32>
    %94 = arith.truncf %93 : vector<8x128xf32> to vector<8x128xbf16>
    %c1_89 = arith.constant 1 : index
    %c0_90 = arith.constant 0 : index
    %c0_91 = arith.constant 0 : index
    %95 = vector.load %arg5[%c1_89, %c0_90, %c0_91] : memref<25x128x128xbf16, #tpu.memory_space<vmem>>, vector<1x128x128xbf16>
    %96 = vector.shape_cast %95 : vector<1x128x128xbf16> to vector<128x128xbf16>
    %cst_92 = arith.constant dense<0.000000e+00> : vector<8x128xf32>
    %97 = tpu.matmul %94, %96, %cst_92 {dimension_numbers = #tpu.dot_dimension_numbers<[1], [0], [0], [1], [0, 0, 1, 1], [], []>} : vector<8x128xbf16>, vector<128x128xbf16>, vector<8x128xf32> -> vector<8x128xf32>
    %98 = arith.addf %92, %97 : vector<8x128xf32>
    %c2_93 = arith.constant 2 : index
    %c0_94 = arith.constant 0 : index
    %99 = vector.load %arg10[%c2_93, %c0_94] : memref<40x128xf32, #tpu.memory_space<vmem>>, vector<8x128xf32>
    %100 = arith.truncf %99 : vector<8x128xf32> to vector<8x128xbf16>
    %c2_95 = arith.constant 2 : index
    %c0_96 = arith.constant 0 : index
    %c0_97 = arith.constant 0 : index
    %101 = vector.load %arg5[%c2_95, %c0_96, %c0_97] : memref<25x128x128xbf16, #tpu.memory_space<vmem>>, vector<1x128x128xbf16>
    %102 = vector.shape_cast %101 : vector<1x128x128xbf16> to vector<128x128xbf16>
    %cst_98 = arith.constant dense<0.000000e+00> : vector<8x128xf32>
    %103 = tpu.matmul %100, %102, %cst_98 {dimension_numbers = #tpu.dot_dimension_numbers<[1], [0], [0], [1], [0, 0, 1, 1], [], []>} : vector<8x128xbf16>, vector<128x128xbf16>, vector<8x128xf32> -> vector<8x128xf32>
    %104 = arith.addf %98, %103 : vector<8x128xf32>
    %c3_99 = arith.constant 3 : index
    %c0_100 = arith.constant 0 : index
    %105 = vector.load %arg10[%c3_99, %c0_100] : memref<40x128xf32, #tpu.memory_space<vmem>>, vector<8x128xf32>
    %106 = arith.truncf %105 : vector<8x128xf32> to vector<8x128xbf16>
    %c3_101 = arith.constant 3 : index
    %c0_102 = arith.constant 0 : index
    %c0_103 = arith.constant 0 : index
    %107 = vector.load %arg5[%c3_101, %c0_102, %c0_103] : memref<25x128x128xbf16, #tpu.memory_space<vmem>>, vector<1x128x128xbf16>
    %108 = vector.shape_cast %107 : vector<1x128x128xbf16> to vector<128x128xbf16>
    %cst_104 = arith.constant dense<0.000000e+00> : vector<8x128xf32>
    %109 = tpu.matmul %106, %108, %cst_104 {dimension_numbers = #tpu.dot_dimension_numbers<[1], [0], [0], [1], [0, 0, 1, 1], [], []>} : vector<8x128xbf16>, vector<128x128xbf16>, vector<8x128xf32> -> vector<8x128xf32>
    %110 = arith.addf %104, %109 : vector<8x128xf32>
    %c4_105 = arith.constant 4 : index
    %c0_106 = arith.constant 0 : index
    %111 = vector.load %arg10[%c4_105, %c0_106] : memref<40x128xf32, #tpu.memory_space<vmem>>, vector<8x128xf32>
    %112 = arith.truncf %111 : vector<8x128xf32> to vector<8x128xbf16>
    %c4_107 = arith.constant 4 : index
    %c0_108 = arith.constant 0 : index
    %c0_109 = arith.constant 0 : index
    %113 = vector.load %arg5[%c4_107, %c0_108, %c0_109] : memref<25x128x128xbf16, #tpu.memory_space<vmem>>, vector<1x128x128xbf16>
    %114 = vector.shape_cast %113 : vector<1x128x128xbf16> to vector<128x128xbf16>
    %cst_110 = arith.constant dense<0.000000e+00> : vector<8x128xf32>
    %115 = tpu.matmul %112, %114, %cst_110 {dimension_numbers = #tpu.dot_dimension_numbers<[1], [0], [0], [1], [0, 0, 1, 1], [], []>} : vector<8x128xbf16>, vector<128x128xbf16>, vector<8x128xf32> -> vector<8x128xf32>
    %116 = arith.addf %110, %115 : vector<8x128xf32>
    %c7_111 = arith.constant 7 : index
    %c0_112 = arith.constant 0 : index
    %117 = vector.load %arg10[%c7_111, %c0_112] : memref<40x128xf32, #tpu.memory_space<vmem>>, vector<8x128xf32>
    %118 = arith.truncf %117 : vector<8x128xf32> to vector<8x128xbf16>
    %c5_113 = arith.constant 5 : index
    %c0_114 = arith.constant 0 : index
    %c0_115 = arith.constant 0 : index
    %119 = vector.load %arg5[%c5_113, %c0_114, %c0_115] : memref<25x128x128xbf16, #tpu.memory_space<vmem>>, vector<1x128x128xbf16>
    %120 = vector.shape_cast %119 : vector<1x128x128xbf16> to vector<128x128xbf16>
    %cst_116 = arith.constant dense<0.000000e+00> : vector<8x128xf32>
    %121 = tpu.matmul %118, %120, %cst_116 {dimension_numbers = #tpu.dot_dimension_numbers<[1], [0], [0], [1], [0, 0, 1, 1], [], []>} : vector<8x128xbf16>, vector<128x128xbf16>, vector<8x128xf32> -> vector<8x128xf32>
    %122 = arith.addf %116, %121 : vector<8x128xf32>
    %c8_117 = arith.constant 8 : index
    %c0_118 = arith.constant 0 : index
    %123 = vector.load %arg10[%c8_117, %c0_118] : memref<40x128xf32, #tpu.memory_space<vmem>>, vector<8x128xf32>
    %124 = arith.truncf %123 : vector<8x128xf32> to vector<8x128xbf16>
    %c6_119 = arith.constant 6 : index
    %c0_120 = arith.constant 0 : index
    %c0_121 = arith.constant 0 : index
    %125 = vector.load %arg5[%c6_119, %c0_120, %c0_121] : memref<25x128x128xbf16, #tpu.memory_space<vmem>>, vector<1x128x128xbf16>
    %126 = vector.shape_cast %125 : vector<1x128x128xbf16> to vector<128x128xbf16>
    %cst_122 = arith.constant dense<0.000000e+00> : vector<8x128xf32>
    %127 = tpu.matmul %124, %126, %cst_122 {dimension_numbers = #tpu.dot_dimension_numbers<[1], [0], [0], [1], [0, 0, 1, 1], [], []>} : vector<8x128xbf16>, vector<128x128xbf16>, vector<8x128xf32> -> vector<8x128xf32>
    %128 = arith.addf %122, %127 : vector<8x128xf32>
    %c9_123 = arith.constant 9 : index
    %c0_124 = arith.constant 0 : index
    %129 = vector.load %arg10[%c9_123, %c0_124] : memref<40x128xf32, #tpu.memory_space<vmem>>, vector<8x128xf32>
    %130 = arith.truncf %129 : vector<8x128xf32> to vector<8x128xbf16>
    %c7_125 = arith.constant 7 : index
    %c0_126 = arith.constant 0 : index
    %c0_127 = arith.constant 0 : index
    %131 = vector.load %arg5[%c7_125, %c0_126, %c0_127] : memref<25x128x128xbf16, #tpu.memory_space<vmem>>, vector<1x128x128xbf16>
    %132 = vector.shape_cast %131 : vector<1x128x128xbf16> to vector<128x128xbf16>
    %cst_128 = arith.constant dense<0.000000e+00> : vector<8x128xf32>
    %133 = tpu.matmul %130, %132, %cst_128 {dimension_numbers = #tpu.dot_dimension_numbers<[1], [0], [0], [1], [0, 0, 1, 1], [], []>} : vector<8x128xbf16>, vector<128x128xbf16>, vector<8x128xf32> -> vector<8x128xf32>
    %134 = arith.addf %128, %133 : vector<8x128xf32>
    %c10 = arith.constant 10 : index
    %c0_129 = arith.constant 0 : index
    %135 = vector.load %arg10[%c10, %c0_129] : memref<40x128xf32, #tpu.memory_space<vmem>>, vector<8x128xf32>
    %136 = arith.truncf %135 : vector<8x128xf32> to vector<8x128xbf16>
    %c8_130 = arith.constant 8 : index
    %c0_131 = arith.constant 0 : index
    %c0_132 = arith.constant 0 : index
    %137 = vector.load %arg5[%c8_130, %c0_131, %c0_132] : memref<25x128x128xbf16, #tpu.memory_space<vmem>>, vector<1x128x128xbf16>
    %138 = vector.shape_cast %137 : vector<1x128x128xbf16> to vector<128x128xbf16>
    %cst_133 = arith.constant dense<0.000000e+00> : vector<8x128xf32>
    %139 = tpu.matmul %136, %138, %cst_133 {dimension_numbers = #tpu.dot_dimension_numbers<[1], [0], [0], [1], [0, 0, 1, 1], [], []>} : vector<8x128xbf16>, vector<128x128xbf16>, vector<8x128xf32> -> vector<8x128xf32>
    %140 = arith.addf %134, %139 : vector<8x128xf32>
    %c11 = arith.constant 11 : index
    %c0_134 = arith.constant 0 : index
    %141 = vector.load %arg10[%c11, %c0_134] : memref<40x128xf32, #tpu.memory_space<vmem>>, vector<8x128xf32>
    %142 = arith.truncf %141 : vector<8x128xf32> to vector<8x128xbf16>
    %c9_135 = arith.constant 9 : index
    %c0_136 = arith.constant 0 : index
    %c0_137 = arith.constant 0 : index
    %143 = vector.load %arg5[%c9_135, %c0_136, %c0_137] : memref<25x128x128xbf16, #tpu.memory_space<vmem>>, vector<1x128x128xbf16>
    %144 = vector.shape_cast %143 : vector<1x128x128xbf16> to vector<128x128xbf16>
    %cst_138 = arith.constant dense<0.000000e+00> : vector<8x128xf32>
    %145 = tpu.matmul %142, %144, %cst_138 {dimension_numbers = #tpu.dot_dimension_numbers<[1], [0], [0], [1], [0, 0, 1, 1], [], []>} : vector<8x128xbf16>, vector<128x128xbf16>, vector<8x128xf32> -> vector<8x128xf32>
    %146 = arith.addf %140, %145 : vector<8x128xf32>
    %c14_139 = arith.constant 14 : index
    %c0_140 = arith.constant 0 : index
    %147 = vector.load %arg10[%c14_139, %c0_140] : memref<40x128xf32, #tpu.memory_space<vmem>>, vector<8x128xf32>
    %148 = arith.truncf %147 : vector<8x128xf32> to vector<8x128xbf16>
    %c10_141 = arith.constant 10 : index
    %c0_142 = arith.constant 0 : index
    %c0_143 = arith.constant 0 : index
    %149 = vector.load %arg5[%c10_141, %c0_142, %c0_143] : memref<25x128x128xbf16, #tpu.memory_space<vmem>>, vector<1x128x128xbf16>
    %150 = vector.shape_cast %149 : vector<1x128x128xbf16> to vector<128x128xbf16>
    %cst_144 = arith.constant dense<0.000000e+00> : vector<8x128xf32>
    %151 = tpu.matmul %148, %150, %cst_144 {dimension_numbers = #tpu.dot_dimension_numbers<[1], [0], [0], [1], [0, 0, 1, 1], [], []>} : vector<8x128xbf16>, vector<128x128xbf16>, vector<8x128xf32> -> vector<8x128xf32>
    %152 = arith.addf %146, %151 : vector<8x128xf32>
    %c15_145 = arith.constant 15 : index
    %c0_146 = arith.constant 0 : index
    %153 = vector.load %arg10[%c15_145, %c0_146] : memref<40x128xf32, #tpu.memory_space<vmem>>, vector<8x128xf32>
    %154 = arith.truncf %153 : vector<8x128xf32> to vector<8x128xbf16>
    %c11_147 = arith.constant 11 : index
    %c0_148 = arith.constant 0 : index
    %c0_149 = arith.constant 0 : index
    %155 = vector.load %arg5[%c11_147, %c0_148, %c0_149] : memref<25x128x128xbf16, #tpu.memory_space<vmem>>, vector<1x128x128xbf16>
    %156 = vector.shape_cast %155 : vector<1x128x128xbf16> to vector<128x128xbf16>
    %cst_150 = arith.constant dense<0.000000e+00> : vector<8x128xf32>
    %157 = tpu.matmul %154, %156, %cst_150 {dimension_numbers = #tpu.dot_dimension_numbers<[1], [0], [0], [1], [0, 0, 1, 1], [], []>} : vector<8x128xbf16>, vector<128x128xbf16>, vector<8x128xf32> -> vector<8x128xf32>
    %158 = arith.addf %152, %157 : vector<8x128xf32>
    %c16_151 = arith.constant 16 : index
    %c0_152 = arith.constant 0 : index
    %159 = vector.load %arg10[%c16_151, %c0_152] : memref<40x128xf32, #tpu.memory_space<vmem>>, vector<8x128xf32>
    %160 = arith.truncf %159 : vector<8x128xf32> to vector<8x128xbf16>
    %c12 = arith.constant 12 : index
    %c0_153 = arith.constant 0 : index
    %c0_154 = arith.constant 0 : index
    %161 = vector.load %arg5[%c12, %c0_153, %c0_154] : memref<25x128x128xbf16, #tpu.memory_space<vmem>>, vector<1x128x128xbf16>
    %162 = vector.shape_cast %161 : vector<1x128x128xbf16> to vector<128x128xbf16>
    %cst_155 = arith.constant dense<0.000000e+00> : vector<8x128xf32>
    %163 = tpu.matmul %160, %162, %cst_155 {dimension_numbers = #tpu.dot_dimension_numbers<[1], [0], [0], [1], [0, 0, 1, 1], [], []>} : vector<8x128xbf16>, vector<128x128xbf16>, vector<8x128xf32> -> vector<8x128xf32>
    %164 = arith.addf %158, %163 : vector<8x128xf32>
    %c17 = arith.constant 17 : index
    %c0_156 = arith.constant 0 : index
    %165 = vector.load %arg10[%c17, %c0_156] : memref<40x128xf32, #tpu.memory_space<vmem>>, vector<8x128xf32>
    %166 = arith.truncf %165 : vector<8x128xf32> to vector<8x128xbf16>
    %c13 = arith.constant 13 : index
    %c0_157 = arith.constant 0 : index
    %c0_158 = arith.constant 0 : index
    %167 = vector.load %arg5[%c13, %c0_157, %c0_158] : memref<25x128x128xbf16, #tpu.memory_space<vmem>>, vector<1x128x128xbf16>
    %168 = vector.shape_cast %167 : vector<1x128x128xbf16> to vector<128x128xbf16>
    %cst_159 = arith.constant dense<0.000000e+00> : vector<8x128xf32>
    %169 = tpu.matmul %166, %168, %cst_159 {dimension_numbers = #tpu.dot_dimension_numbers<[1], [0], [0], [1], [0, 0, 1, 1], [], []>} : vector<8x128xbf16>, vector<128x128xbf16>, vector<8x128xf32> -> vector<8x128xf32>
    %170 = arith.addf %164, %169 : vector<8x128xf32>
    %c18 = arith.constant 18 : index
    %c0_160 = arith.constant 0 : index
    %171 = vector.load %arg10[%c18, %c0_160] : memref<40x128xf32, #tpu.memory_space<vmem>>, vector<8x128xf32>
    %172 = arith.truncf %171 : vector<8x128xf32> to vector<8x128xbf16>
    %c14_161 = arith.constant 14 : index
    %c0_162 = arith.constant 0 : index
    %c0_163 = arith.constant 0 : index
    %173 = vector.load %arg5[%c14_161, %c0_162, %c0_163] : memref<25x128x128xbf16, #tpu.memory_space<vmem>>, vector<1x128x128xbf16>
    %174 = vector.shape_cast %173 : vector<1x128x128xbf16> to vector<128x128xbf16>
    %cst_164 = arith.constant dense<0.000000e+00> : vector<8x128xf32>
    %175 = tpu.matmul %172, %174, %cst_164 {dimension_numbers = #tpu.dot_dimension_numbers<[1], [0], [0], [1], [0, 0, 1, 1], [], []>} : vector<8x128xbf16>, vector<128x128xbf16>, vector<8x128xf32> -> vector<8x128xf32>
    %176 = arith.addf %170, %175 : vector<8x128xf32>
    %c21 = arith.constant 21 : index
    %c0_165 = arith.constant 0 : index
    %177 = vector.load %arg10[%c21, %c0_165] : memref<40x128xf32, #tpu.memory_space<vmem>>, vector<8x128xf32>
    %178 = arith.truncf %177 : vector<8x128xf32> to vector<8x128xbf16>
    %c15_166 = arith.constant 15 : index
    %c0_167 = arith.constant 0 : index
    %c0_168 = arith.constant 0 : index
    %179 = vector.load %arg5[%c15_166, %c0_167, %c0_168] : memref<25x128x128xbf16, #tpu.memory_space<vmem>>, vector<1x128x128xbf16>
    %180 = vector.shape_cast %179 : vector<1x128x128xbf16> to vector<128x128xbf16>
    %cst_169 = arith.constant dense<0.000000e+00> : vector<8x128xf32>
    %181 = tpu.matmul %178, %180, %cst_169 {dimension_numbers = #tpu.dot_dimension_numbers<[1], [0], [0], [1], [0, 0, 1, 1], [], []>} : vector<8x128xbf16>, vector<128x128xbf16>, vector<8x128xf32> -> vector<8x128xf32>
    %182 = arith.addf %176, %181 : vector<8x128xf32>
    %c22 = arith.constant 22 : index
    %c0_170 = arith.constant 0 : index
    %183 = vector.load %arg10[%c22, %c0_170] : memref<40x128xf32, #tpu.memory_space<vmem>>, vector<8x128xf32>
    %184 = arith.truncf %183 : vector<8x128xf32> to vector<8x128xbf16>
    %c16_171 = arith.constant 16 : index
    %c0_172 = arith.constant 0 : index
    %c0_173 = arith.constant 0 : index
    %185 = vector.load %arg5[%c16_171, %c0_172, %c0_173] : memref<25x128x128xbf16, #tpu.memory_space<vmem>>, vector<1x128x128xbf16>
    %186 = vector.shape_cast %185 : vector<1x128x128xbf16> to vector<128x128xbf16>
    %cst_174 = arith.constant dense<0.000000e+00> : vector<8x128xf32>
    %187 = tpu.matmul %184, %186, %cst_174 {dimension_numbers = #tpu.dot_dimension_numbers<[1], [0], [0], [1], [0, 0, 1, 1], [], []>} : vector<8x128xbf16>, vector<128x128xbf16>, vector<8x128xf32> -> vector<8x128xf32>
    %188 = arith.addf %182, %187 : vector<8x128xf32>
    %c23 = arith.constant 23 : index
    %c0_175 = arith.constant 0 : index
    %189 = vector.load %arg10[%c23, %c0_175] : memref<40x128xf32, #tpu.memory_space<vmem>>, vector<8x128xf32>
    %190 = arith.truncf %189 : vector<8x128xf32> to vector<8x128xbf16>
    %c17_176 = arith.constant 17 : index
    %c0_177 = arith.constant 0 : index
    %c0_178 = arith.constant 0 : index
    %191 = vector.load %arg5[%c17_176, %c0_177, %c0_178] : memref<25x128x128xbf16, #tpu.memory_space<vmem>>, vector<1x128x128xbf16>
    %192 = vector.shape_cast %191 : vector<1x128x128xbf16> to vector<128x128xbf16>
    %cst_179 = arith.constant dense<0.000000e+00> : vector<8x128xf32>
    %193 = tpu.matmul %190, %192, %cst_179 {dimension_numbers = #tpu.dot_dimension_numbers<[1], [0], [0], [1], [0, 0, 1, 1], [], []>} : vector<8x128xbf16>, vector<128x128xbf16>, vector<8x128xf32> -> vector<8x128xf32>
    %194 = arith.addf %188, %193 : vector<8x128xf32>
    %c24 = arith.constant 24 : index
    %c0_180 = arith.constant 0 : index
    %195 = vector.load %arg10[%c24, %c0_180] : memref<40x128xf32, #tpu.memory_space<vmem>>, vector<8x128xf32>
    %196 = arith.truncf %195 : vector<8x128xf32> to vector<8x128xbf16>
    %c18_181 = arith.constant 18 : index
    %c0_182 = arith.constant 0 : index
    %c0_183 = arith.constant 0 : index
    %197 = vector.load %arg5[%c18_181, %c0_182, %c0_183] : memref<25x128x128xbf16, #tpu.memory_space<vmem>>, vector<1x128x128xbf16>
    %198 = vector.shape_cast %197 : vector<1x128x128xbf16> to vector<128x128xbf16>
    %cst_184 = arith.constant dense<0.000000e+00> : vector<8x128xf32>
    %199 = tpu.matmul %196, %198, %cst_184 {dimension_numbers = #tpu.dot_dimension_numbers<[1], [0], [0], [1], [0, 0, 1, 1], [], []>} : vector<8x128xbf16>, vector<128x128xbf16>, vector<8x128xf32> -> vector<8x128xf32>
    %200 = arith.addf %194, %199 : vector<8x128xf32>
    %c25 = arith.constant 25 : index
    %c0_185 = arith.constant 0 : index
    %201 = vector.load %arg10[%c25, %c0_185] : memref<40x128xf32, #tpu.memory_space<vmem>>, vector<8x128xf32>
    %202 = arith.truncf %201 : vector<8x128xf32> to vector<8x128xbf16>
    %c19 = arith.constant 19 : index
    %c0_186 = arith.constant 0 : index
    %c0_187 = arith.constant 0 : index
    %203 = vector.load %arg5[%c19, %c0_186, %c0_187] : memref<25x128x128xbf16, #tpu.memory_space<vmem>>, vector<1x128x128xbf16>
    %204 = vector.shape_cast %203 : vector<1x128x128xbf16> to vector<128x128xbf16>
    %cst_188 = arith.constant dense<0.000000e+00> : vector<8x128xf32>
    %205 = tpu.matmul %202, %204, %cst_188 {dimension_numbers = #tpu.dot_dimension_numbers<[1], [0], [0], [1], [0, 0, 1, 1], [], []>} : vector<8x128xbf16>, vector<128x128xbf16>, vector<8x128xf32> -> vector<8x128xf32>
    %206 = arith.addf %200, %205 : vector<8x128xf32>
    %c28 = arith.constant 28 : index
    %c0_189 = arith.constant 0 : index
    %207 = vector.load %arg10[%c28, %c0_189] : memref<40x128xf32, #tpu.memory_space<vmem>>, vector<8x128xf32>
    %208 = arith.truncf %207 : vector<8x128xf32> to vector<8x128xbf16>
    %c20 = arith.constant 20 : index
    %c0_190 = arith.constant 0 : index
    %c0_191 = arith.constant 0 : index
    %209 = vector.load %arg5[%c20, %c0_190, %c0_191] : memref<25x128x128xbf16, #tpu.memory_space<vmem>>, vector<1x128x128xbf16>
    %210 = vector.shape_cast %209 : vector<1x128x128xbf16> to vector<128x128xbf16>
    %cst_192 = arith.constant dense<0.000000e+00> : vector<8x128xf32>
    %211 = tpu.matmul %208, %210, %cst_192 {dimension_numbers = #tpu.dot_dimension_numbers<[1], [0], [0], [1], [0, 0, 1, 1], [], []>} : vector<8x128xbf16>, vector<128x128xbf16>, vector<8x128xf32> -> vector<8x128xf32>
    %212 = arith.addf %206, %211 : vector<8x128xf32>
    %c29 = arith.constant 29 : index
    %c0_193 = arith.constant 0 : index
    %213 = vector.load %arg10[%c29, %c0_193] : memref<40x128xf32, #tpu.memory_space<vmem>>, vector<8x128xf32>
    %214 = arith.truncf %213 : vector<8x128xf32> to vector<8x128xbf16>
    %c21_194 = arith.constant 21 : index
    %c0_195 = arith.constant 0 : index
    %c0_196 = arith.constant 0 : index
    %215 = vector.load %arg5[%c21_194, %c0_195, %c0_196] : memref<25x128x128xbf16, #tpu.memory_space<vmem>>, vector<1x128x128xbf16>
    %216 = vector.shape_cast %215 : vector<1x128x128xbf16> to vector<128x128xbf16>
    %cst_197 = arith.constant dense<0.000000e+00> : vector<8x128xf32>
    %217 = tpu.matmul %214, %216, %cst_197 {dimension_numbers = #tpu.dot_dimension_numbers<[1], [0], [0], [1], [0, 0, 1, 1], [], []>} : vector<8x128xbf16>, vector<128x128xbf16>, vector<8x128xf32> -> vector<8x128xf32>
    %218 = arith.addf %212, %217 : vector<8x128xf32>
    %c30 = arith.constant 30 : index
    %c0_198 = arith.constant 0 : index
    %219 = vector.load %arg10[%c30, %c0_198] : memref<40x128xf32, #tpu.memory_space<vmem>>, vector<8x128xf32>
    %220 = arith.truncf %219 : vector<8x128xf32> to vector<8x128xbf16>
    %c22_199 = arith.constant 22 : index
    %c0_200 = arith.constant 0 : index
    %c0_201 = arith.constant 0 : index
    %221 = vector.load %arg5[%c22_199, %c0_200, %c0_201] : memref<25x128x128xbf16, #tpu.memory_space<vmem>>, vector<1x128x128xbf16>
    %222 = vector.shape_cast %221 : vector<1x128x128xbf16> to vector<128x128xbf16>
    %cst_202 = arith.constant dense<0.000000e+00> : vector<8x128xf32>
    %223 = tpu.matmul %220, %222, %cst_202 {dimension_numbers = #tpu.dot_dimension_numbers<[1], [0], [0], [1], [0, 0, 1, 1], [], []>} : vector<8x128xbf16>, vector<128x128xbf16>, vector<8x128xf32> -> vector<8x128xf32>
    %224 = arith.addf %218, %223 : vector<8x128xf32>
    %c31 = arith.constant 31 : index
    %c0_203 = arith.constant 0 : index
    %225 = vector.load %arg10[%c31, %c0_203] : memref<40x128xf32, #tpu.memory_space<vmem>>, vector<8x128xf32>
    %226 = arith.truncf %225 : vector<8x128xf32> to vector<8x128xbf16>
    %c23_204 = arith.constant 23 : index
    %c0_205 = arith.constant 0 : index
    %c0_206 = arith.constant 0 : index
    %227 = vector.load %arg5[%c23_204, %c0_205, %c0_206] : memref<25x128x128xbf16, #tpu.memory_space<vmem>>, vector<1x128x128xbf16>
    %228 = vector.shape_cast %227 : vector<1x128x128xbf16> to vector<128x128xbf16>
    %cst_207 = arith.constant dense<0.000000e+00> : vector<8x128xf32>
    %229 = tpu.matmul %226, %228, %cst_207 {dimension_numbers = #tpu.dot_dimension_numbers<[1], [0], [0], [1], [0, 0, 1, 1], [], []>} : vector<8x128xbf16>, vector<128x128xbf16>, vector<8x128xf32> -> vector<8x128xf32>
    %230 = arith.addf %224, %229 : vector<8x128xf32>
    %c32 = arith.constant 32 : index
    %c0_208 = arith.constant 0 : index
    %231 = vector.load %arg10[%c32, %c0_208] : memref<40x128xf32, #tpu.memory_space<vmem>>, vector<8x128xf32>
    %232 = arith.truncf %231 : vector<8x128xf32> to vector<8x128xbf16>
    %c24_209 = arith.constant 24 : index
    %c0_210 = arith.constant 0 : index
    %c0_211 = arith.constant 0 : index
    %233 = vector.load %arg5[%c24_209, %c0_210, %c0_211] : memref<25x128x128xbf16, #tpu.memory_space<vmem>>, vector<1x128x128xbf16>
    %234 = vector.shape_cast %233 : vector<1x128x128xbf16> to vector<128x128xbf16>
    %cst_212 = arith.constant dense<0.000000e+00> : vector<8x128xf32>
    %235 = tpu.matmul %232, %234, %cst_212 {dimension_numbers = #tpu.dot_dimension_numbers<[1], [0], [0], [1], [0, 0, 1, 1], [], []>} : vector<8x128xbf16>, vector<128x128xbf16>, vector<8x128xf32> -> vector<8x128xf32>
    %236 = arith.addf %230, %235 : vector<8x128xf32>
    %237 = vector.extract_strided_slice %236 {offsets = [0, 0], sizes = [1, 128], strides = [1, 1]} : vector<8x128xf32> to vector<1x128xf32>
    %238 = arith.addf %237, %10 : vector<1x128xf32>
    %cst_213 = arith.constant 0.000000e+00 : f32
    %239 = vector.broadcast %cst_213 : f32 to vector<224x128xf32>
    %c0_214 = arith.constant 0 : index
    %c0_215 = arith.constant 0 : index
    %c0_216 = arith.constant 0 : index
    %240 = vector.load %arg2[%c0_214, %c0_215, %c0_216] : memref<1x264x8xf32, #tpu.memory_space<vmem>>, vector<1x224x8xf32>
    %241 = vector.shape_cast %240 : vector<1x224x8xf32> to vector<224x8xf32>
    %242 = arith.truncf %241 : vector<224x8xf32> to vector<224x8xbf16>
    %c0_217 = arith.constant 0 : index
    %c0_218 = arith.constant 0 : index
    %c0_219 = arith.constant 0 : index
    %243 = vector.load %arg4[%c0_217, %c0_218, %c0_219] : memref<9x8x128xbf16, #tpu.memory_space<vmem>>, vector<1x8x128xbf16>
    %244 = vector.shape_cast %243 : vector<1x8x128xbf16> to vector<8x128xbf16>
    %cst_220 = arith.constant dense<0.000000e+00> : vector<224x128xf32>
    %245 = tpu.matmul %242, %244, %cst_220 {dimension_numbers = #tpu.dot_dimension_numbers<[1], [0], [0], [1], [0, 0, 1, 1], [], []>} : vector<224x8xbf16>, vector<8x128xbf16>, vector<224x128xf32> -> vector<224x128xf32>
    %246 = arith.addf %239, %245 : vector<224x128xf32>
    %c0_221 = arith.constant 0 : index
    %c1_222 = arith.constant 1 : index
    %c0_223 = arith.constant 0 : index
    %247 = vector.load %arg2[%c0_221, %c1_222, %c0_223] : memref<1x264x8xf32, #tpu.memory_space<vmem>>, vector<1x224x8xf32>
    %248 = vector.shape_cast %247 : vector<1x224x8xf32> to vector<224x8xf32>
    %249 = arith.truncf %248 : vector<224x8xf32> to vector<224x8xbf16>
    %c1_224 = arith.constant 1 : index
    %c0_225 = arith.constant 0 : index
    %c0_226 = arith.constant 0 : index
    %250 = vector.load %arg4[%c1_224, %c0_225, %c0_226] : memref<9x8x128xbf16, #tpu.memory_space<vmem>>, vector<1x8x128xbf16>
    %251 = vector.shape_cast %250 : vector<1x8x128xbf16> to vector<8x128xbf16>
    %cst_227 = arith.constant dense<0.000000e+00> : vector<224x128xf32>
    %252 = tpu.matmul %249, %251, %cst_227 {dimension_numbers = #tpu.dot_dimension_numbers<[1], [0], [0], [1], [0, 0, 1, 1], [], []>} : vector<224x8xbf16>, vector<8x128xbf16>, vector<224x128xf32> -> vector<224x128xf32>
    %253 = arith.addf %246, %252 : vector<224x128xf32>
    %c0_228 = arith.constant 0 : index
    %c2_229 = arith.constant 2 : index
    %c0_230 = arith.constant 0 : index
    %254 = vector.load %arg2[%c0_228, %c2_229, %c0_230] : memref<1x264x8xf32, #tpu.memory_space<vmem>>, vector<1x224x8xf32>
    %255 = vector.shape_cast %254 : vector<1x224x8xf32> to vector<224x8xf32>
    %256 = arith.truncf %255 : vector<224x8xf32> to vector<224x8xbf16>
    %c2_231 = arith.constant 2 : index
    %c0_232 = arith.constant 0 : index
    %c0_233 = arith.constant 0 : index
    %257 = vector.load %arg4[%c2_231, %c0_232, %c0_233] : memref<9x8x128xbf16, #tpu.memory_space<vmem>>, vector<1x8x128xbf16>
    %258 = vector.shape_cast %257 : vector<1x8x128xbf16> to vector<8x128xbf16>
    %cst_234 = arith.constant dense<0.000000e+00> : vector<224x128xf32>
    %259 = tpu.matmul %256, %258, %cst_234 {dimension_numbers = #tpu.dot_dimension_numbers<[1], [0], [0], [1], [0, 0, 1, 1], [], []>} : vector<224x8xbf16>, vector<8x128xbf16>, vector<224x128xf32> -> vector<224x128xf32>
    %260 = arith.addf %253, %259 : vector<224x128xf32>
    %c0_235 = arith.constant 0 : index
    %c16_236 = arith.constant 16 : index
    %c0_237 = arith.constant 0 : index
    %261 = vector.load %arg2[%c0_235, %c16_236, %c0_237] : memref<1x264x8xf32, #tpu.memory_space<vmem>>, vector<1x224x8xf32>
    %262 = vector.shape_cast %261 : vector<1x224x8xf32> to vector<224x8xf32>
    %263 = arith.truncf %262 : vector<224x8xf32> to vector<224x8xbf16>
    %c3_238 = arith.constant 3 : index
    %c0_239 = arith.constant 0 : index
    %c0_240 = arith.constant 0 : index
    %264 = vector.load %arg4[%c3_238, %c0_239, %c0_240] : memref<9x8x128xbf16, #tpu.memory_space<vmem>>, vector<1x8x128xbf16>
    %265 = vector.shape_cast %264 : vector<1x8x128xbf16> to vector<8x128xbf16>
    %cst_241 = arith.constant dense<0.000000e+00> : vector<224x128xf32>
    %266 = tpu.matmul %263, %265, %cst_241 {dimension_numbers = #tpu.dot_dimension_numbers<[1], [0], [0], [1], [0, 0, 1, 1], [], []>} : vector<224x8xbf16>, vector<8x128xbf16>, vector<224x128xf32> -> vector<224x128xf32>
    %267 = arith.addf %260, %266 : vector<224x128xf32>
    %c0_242 = arith.constant 0 : index
    %c17_243 = arith.constant 17 : index
    %c0_244 = arith.constant 0 : index
    %268 = vector.load %arg2[%c0_242, %c17_243, %c0_244] : memref<1x264x8xf32, #tpu.memory_space<vmem>>, vector<1x224x8xf32>
    %269 = vector.shape_cast %268 : vector<1x224x8xf32> to vector<224x8xf32>
    %270 = arith.truncf %269 : vector<224x8xf32> to vector<224x8xbf16>
    %c4_245 = arith.constant 4 : index
    %c0_246 = arith.constant 0 : index
    %c0_247 = arith.constant 0 : index
    %271 = vector.load %arg4[%c4_245, %c0_246, %c0_247] : memref<9x8x128xbf16, #tpu.memory_space<vmem>>, vector<1x8x128xbf16>
    %272 = vector.shape_cast %271 : vector<1x8x128xbf16> to vector<8x128xbf16>
    %cst_248 = arith.constant dense<0.000000e+00> : vector<224x128xf32>
    %273 = tpu.matmul %270, %272, %cst_248 {dimension_numbers = #tpu.dot_dimension_numbers<[1], [0], [0], [1], [0, 0, 1, 1], [], []>} : vector<224x8xbf16>, vector<8x128xbf16>, vector<224x128xf32> -> vector<224x128xf32>
    %274 = arith.addf %267, %273 : vector<224x128xf32>
    %c0_249 = arith.constant 0 : index
    %c18_250 = arith.constant 18 : index
    %c0_251 = arith.constant 0 : index
    %275 = vector.load %arg2[%c0_249, %c18_250, %c0_251] : memref<1x264x8xf32, #tpu.memory_space<vmem>>, vector<1x224x8xf32>
    %276 = vector.shape_cast %275 : vector<1x224x8xf32> to vector<224x8xf32>
    %277 = arith.truncf %276 : vector<224x8xf32> to vector<224x8xbf16>
    %c5_252 = arith.constant 5 : index
    %c0_253 = arith.constant 0 : index
    %c0_254 = arith.constant 0 : index
    %278 = vector.load %arg4[%c5_252, %c0_253, %c0_254] : memref<9x8x128xbf16, #tpu.memory_space<vmem>>, vector<1x8x128xbf16>
    %279 = vector.shape_cast %278 : vector<1x8x128xbf16> to vector<8x128xbf16>
    %cst_255 = arith.constant dense<0.000000e+00> : vector<224x128xf32>
    %280 = tpu.matmul %277, %279, %cst_255 {dimension_numbers = #tpu.dot_dimension_numbers<[1], [0], [0], [1], [0, 0, 1, 1], [], []>} : vector<224x8xbf16>, vector<8x128xbf16>, vector<224x128xf32> -> vector<224x128xf32>
    %281 = arith.addf %274, %280 : vector<224x128xf32>
    %c0_256 = arith.constant 0 : index
    %c32_257 = arith.constant 32 : index
    %c0_258 = arith.constant 0 : index
    %282 = vector.load %arg2[%c0_256, %c32_257, %c0_258] : memref<1x264x8xf32, #tpu.memory_space<vmem>>, vector<1x224x8xf32>
    %283 = vector.shape_cast %282 : vector<1x224x8xf32> to vector<224x8xf32>
    %284 = arith.truncf %283 : vector<224x8xf32> to vector<224x8xbf16>
    %c6_259 = arith.constant 6 : index
    %c0_260 = arith.constant 0 : index
    %c0_261 = arith.constant 0 : index
    %285 = vector.load %arg4[%c6_259, %c0_260, %c0_261] : memref<9x8x128xbf16, #tpu.memory_space<vmem>>, vector<1x8x128xbf16>
    %286 = vector.shape_cast %285 : vector<1x8x128xbf16> to vector<8x128xbf16>
    %cst_262 = arith.constant dense<0.000000e+00> : vector<224x128xf32>
    %287 = tpu.matmul %284, %286, %cst_262 {dimension_numbers = #tpu.dot_dimension_numbers<[1], [0], [0], [1], [0, 0, 1, 1], [], []>} : vector<224x8xbf16>, vector<8x128xbf16>, vector<224x128xf32> -> vector<224x128xf32>
    %288 = arith.addf %281, %287 : vector<224x128xf32>
    %c0_263 = arith.constant 0 : index
    %c33 = arith.constant 33 : index
    %c0_264 = arith.constant 0 : index
    %289 = vector.load %arg2[%c0_263, %c33, %c0_264] : memref<1x264x8xf32, #tpu.memory_space<vmem>>, vector<1x224x8xf32>
    %290 = vector.shape_cast %289 : vector<1x224x8xf32> to vector<224x8xf32>
    %291 = arith.truncf %290 : vector<224x8xf32> to vector<224x8xbf16>
    %c7_265 = arith.constant 7 : index
    %c0_266 = arith.constant 0 : index
    %c0_267 = arith.constant 0 : index
    %292 = vector.load %arg4[%c7_265, %c0_266, %c0_267] : memref<9x8x128xbf16, #tpu.memory_space<vmem>>, vector<1x8x128xbf16>
    %293 = vector.shape_cast %292 : vector<1x8x128xbf16> to vector<8x128xbf16>
    %cst_268 = arith.constant dense<0.000000e+00> : vector<224x128xf32>
    %294 = tpu.matmul %291, %293, %cst_268 {dimension_numbers = #tpu.dot_dimension_numbers<[1], [0], [0], [1], [0, 0, 1, 1], [], []>} : vector<224x8xbf16>, vector<8x128xbf16>, vector<224x128xf32> -> vector<224x128xf32>
    %295 = arith.addf %288, %294 : vector<224x128xf32>
    %c0_269 = arith.constant 0 : index
    %c34 = arith.constant 34 : index
    %c0_270 = arith.constant 0 : index
    %296 = vector.load %arg2[%c0_269, %c34, %c0_270] : memref<1x264x8xf32, #tpu.memory_space<vmem>>, vector<1x224x8xf32>
    %297 = vector.shape_cast %296 : vector<1x224x8xf32> to vector<224x8xf32>
    %298 = arith.truncf %297 : vector<224x8xf32> to vector<224x8xbf16>
    %c8_271 = arith.constant 8 : index
    %c0_272 = arith.constant 0 : index
    %c0_273 = arith.constant 0 : index
    %299 = vector.load %arg4[%c8_271, %c0_272, %c0_273] : memref<9x8x128xbf16, #tpu.memory_space<vmem>>, vector<1x8x128xbf16>
    %300 = vector.shape_cast %299 : vector<1x8x128xbf16> to vector<8x128xbf16>
    %cst_274 = arith.constant dense<0.000000e+00> : vector<224x128xf32>
    %301 = tpu.matmul %298, %300, %cst_274 {dimension_numbers = #tpu.dot_dimension_numbers<[1], [0], [0], [1], [0, 0, 1, 1], [], []>} : vector<224x8xbf16>, vector<8x128xbf16>, vector<224x128xf32> -> vector<224x128xf32>
    %302 = arith.addf %295, %301 : vector<224x128xf32>
    %303 = vector.broadcast %8 : vector<1x128xf32> to vector<224x128xf32>
    %304 = arith.mulf %302, %303 : vector<224x128xf32>
    %305 = vector.broadcast %9 : vector<1x128xf32> to vector<224x128xf32>
    %306 = arith.addf %304, %305 : vector<224x128xf32>
    %cst_275 = arith.constant 0.000000e+00 : f32
    %307 = vector.broadcast %cst_275 : f32 to vector<224x128xf32>
    %308 = arith.maximumf %306, %307 : vector<224x128xf32>
    %c0_276 = arith.constant 0 : index
    %c0_277 = arith.constant 0 : index
    %309 = vector.load %arg11[%c0_276, %c0_277] : memref<232x128xf32, #tpu.memory_space<vmem>>, vector<224x128xf32>
    tpu.vector_store %arg11[%c0_276, %c0_277], %308 {strides = array<i32>} : memref<232x128xf32, #tpu.memory_space<vmem>>, vector<224x128xf32>,
    %cst_278 = arith.constant 0.000000e+00 : f32
    %310 = vector.broadcast %cst_278 : f32 to vector<160x128xf32>
    %c0_279 = arith.constant 0 : index
    %c0_280 = arith.constant 0 : index
    %311 = vector.load %arg11[%c0_279, %c0_280] : memref<232x128xf32, #tpu.memory_space<vmem>>, vector<160x128xf32>
    %312 = arith.truncf %311 : vector<160x128xf32> to vector<160x128xbf16>
    %c0_281 = arith.constant 0 : index
    %c0_282 = arith.constant 0 : index
    %c0_283 = arith.constant 0 : index
    %313 = vector.load %arg6[%c0_281, %c0_282, %c0_283] : memref<25x128x128xbf16, #tpu.memory_space<vmem>>, vector<1x128x128xbf16>
    %314 = vector.shape_cast %313 : vector<1x128x128xbf16> to vector<128x128xbf16>
    %cst_284 = arith.constant dense<0.000000e+00> : vector<160x128xf32>
    %315 = tpu.matmul %312, %314, %cst_284 {dimension_numbers = #tpu.dot_dimension_numbers<[1], [0], [0], [1], [0, 0, 1, 1], [], []>} : vector<160x128xbf16>, vector<128x128xbf16>, vector<160x128xf32> -> vector<160x128xf32>
    %316 = arith.addf %310, %315 : vector<160x128xf32>
    %c1_285 = arith.constant 1 : index
    %c0_286 = arith.constant 0 : index
    %317 = vector.load %arg11[%c1_285, %c0_286] : memref<232x128xf32, #tpu.memory_space<vmem>>, vector<160x128xf32>
    %318 = arith.truncf %317 : vector<160x128xf32> to vector<160x128xbf16>
    %c1_287 = arith.constant 1 : index
    %c0_288 = arith.constant 0 : index
    %c0_289 = arith.constant 0 : index
    %319 = vector.load %arg6[%c1_287, %c0_288, %c0_289] : memref<25x128x128xbf16, #tpu.memory_space<vmem>>, vector<1x128x128xbf16>
    %320 = vector.shape_cast %319 : vector<1x128x128xbf16> to vector<128x128xbf16>
    %cst_290 = arith.constant dense<0.000000e+00> : vector<160x128xf32>
    %321 = tpu.matmul %318, %320, %cst_290 {dimension_numbers = #tpu.dot_dimension_numbers<[1], [0], [0], [1], [0, 0, 1, 1], [], []>} : vector<160x128xbf16>, vector<128x128xbf16>, vector<160x128xf32> -> vector<160x128xf32>
    %322 = arith.addf %316, %321 : vector<160x128xf32>
    %c2_291 = arith.constant 2 : index
    %c0_292 = arith.constant 0 : index
    %323 = vector.load %arg11[%c2_291, %c0_292] : memref<232x128xf32, #tpu.memory_space<vmem>>, vector<160x128xf32>
    %324 = arith.truncf %323 : vector<160x128xf32> to vector<160x128xbf16>
    %c2_293 = arith.constant 2 : index
    %c0_294 = arith.constant 0 : index
    %c0_295 = arith.constant 0 : index
    %325 = vector.load %arg6[%c2_293, %c0_294, %c0_295] : memref<25x128x128xbf16, #tpu.memory_space<vmem>>, vector<1x128x128xbf16>
    %326 = vector.shape_cast %325 : vector<1x128x128xbf16> to vector<128x128xbf16>
    %cst_296 = arith.constant dense<0.000000e+00> : vector<160x128xf32>
    %327 = tpu.matmul %324, %326, %cst_296 {dimension_numbers = #tpu.dot_dimension_numbers<[1], [0], [0], [1], [0, 0, 1, 1], [], []>} : vector<160x128xbf16>, vector<128x128xbf16>, vector<160x128xf32> -> vector<160x128xf32>
    %328 = arith.addf %322, %327 : vector<160x128xf32>
    %c3_297 = arith.constant 3 : index
    %c0_298 = arith.constant 0 : index
    %329 = vector.load %arg11[%c3_297, %c0_298] : memref<232x128xf32, #tpu.memory_space<vmem>>, vector<160x128xf32>
    %330 = arith.truncf %329 : vector<160x128xf32> to vector<160x128xbf16>
    %c3_299 = arith.constant 3 : index
    %c0_300 = arith.constant 0 : index
    %c0_301 = arith.constant 0 : index
    %331 = vector.load %arg6[%c3_299, %c0_300, %c0_301] : memref<25x128x128xbf16, #tpu.memory_space<vmem>>, vector<1x128x128xbf16>
    %332 = vector.shape_cast %331 : vector<1x128x128xbf16> to vector<128x128xbf16>
    %cst_302 = arith.constant dense<0.000000e+00> : vector<160x128xf32>
    %333 = tpu.matmul %330, %332, %cst_302 {dimension_numbers = #tpu.dot_dimension_numbers<[1], [0], [0], [1], [0, 0, 1, 1], [], []>} : vector<160x128xbf16>, vector<128x128xbf16>, vector<160x128xf32> -> vector<160x128xf32>
    %334 = arith.addf %328, %333 : vector<160x128xf32>
    %c4_303 = arith.constant 4 : index
    %c0_304 = arith.constant 0 : index
    %335 = vector.load %arg11[%c4_303, %c0_304] : memref<232x128xf32, #tpu.memory_space<vmem>>, vector<160x128xf32>
    %336 = arith.truncf %335 : vector<160x128xf32> to vector<160x128xbf16>
    %c4_305 = arith.constant 4 : index
    %c0_306 = arith.constant 0 : index
    %c0_307 = arith.constant 0 : index
    %337 = vector.load %arg6[%c4_305, %c0_306, %c0_307] : memref<25x128x128xbf16, #tpu.memory_space<vmem>>, vector<1x128x128xbf16>
    %338 = vector.shape_cast %337 : vector<1x128x128xbf16> to vector<128x128xbf16>
    %cst_308 = arith.constant dense<0.000000e+00> : vector<160x128xf32>
    %339 = tpu.matmul %336, %338, %cst_308 {dimension_numbers = #tpu.dot_dimension_numbers<[1], [0], [0], [1], [0, 0, 1, 1], [], []>} : vector<160x128xbf16>, vector<128x128xbf16>, vector<160x128xf32> -> vector<160x128xf32>
    %340 = arith.addf %334, %339 : vector<160x128xf32>
    %c16_309 = arith.constant 16 : index
    %c0_310 = arith.constant 0 : index
    %341 = vector.load %arg11[%c16_309, %c0_310] : memref<232x128xf32, #tpu.memory_space<vmem>>, vector<160x128xf32>
    %342 = arith.truncf %341 : vector<160x128xf32> to vector<160x128xbf16>
    %c5_311 = arith.constant 5 : index
    %c0_312 = arith.constant 0 : index
    %c0_313 = arith.constant 0 : index
    %343 = vector.load %arg6[%c5_311, %c0_312, %c0_313] : memref<25x128x128xbf16, #tpu.memory_space<vmem>>, vector<1x128x128xbf16>
    %344 = vector.shape_cast %343 : vector<1x128x128xbf16> to vector<128x128xbf16>
    %cst_314 = arith.constant dense<0.000000e+00> : vector<160x128xf32>
    %345 = tpu.matmul %342, %344, %cst_314 {dimension_numbers = #tpu.dot_dimension_numbers<[1], [0], [0], [1], [0, 0, 1, 1], [], []>} : vector<160x128xbf16>, vector<128x128xbf16>, vector<160x128xf32> -> vector<160x128xf32>
    %346 = arith.addf %340, %345 : vector<160x128xf32>
    %c17_315 = arith.constant 17 : index
    %c0_316 = arith.constant 0 : index
    %347 = vector.load %arg11[%c17_315, %c0_316] : memref<232x128xf32, #tpu.memory_space<vmem>>, vector<160x128xf32>
    %348 = arith.truncf %347 : vector<160x128xf32> to vector<160x128xbf16>
    %c6_317 = arith.constant 6 : index
    %c0_318 = arith.constant 0 : index
    %c0_319 = arith.constant 0 : index
    %349 = vector.load %arg6[%c6_317, %c0_318, %c0_319] : memref<25x128x128xbf16, #tpu.memory_space<vmem>>, vector<1x128x128xbf16>
    %350 = vector.shape_cast %349 : vector<1x128x128xbf16> to vector<128x128xbf16>
    %cst_320 = arith.constant dense<0.000000e+00> : vector<160x128xf32>
    %351 = tpu.matmul %348, %350, %cst_320 {dimension_numbers = #tpu.dot_dimension_numbers<[1], [0], [0], [1], [0, 0, 1, 1], [], []>} : vector<160x128xbf16>, vector<128x128xbf16>, vector<160x128xf32> -> vector<160x128xf32>
    %352 = arith.addf %346, %351 : vector<160x128xf32>
    %c18_321 = arith.constant 18 : index
    %c0_322 = arith.constant 0 : index
    %353 = vector.load %arg11[%c18_321, %c0_322] : memref<232x128xf32, #tpu.memory_space<vmem>>, vector<160x128xf32>
    %354 = arith.truncf %353 : vector<160x128xf32> to vector<160x128xbf16>
    %c7_323 = arith.constant 7 : index
    %c0_324 = arith.constant 0 : index
    %c0_325 = arith.constant 0 : index
    %355 = vector.load %arg6[%c7_323, %c0_324, %c0_325] : memref<25x128x128xbf16, #tpu.memory_space<vmem>>, vector<1x128x128xbf16>
    %356 = vector.shape_cast %355 : vector<1x128x128xbf16> to vector<128x128xbf16>
    %cst_326 = arith.constant dense<0.000000e+00> : vector<160x128xf32>
    %357 = tpu.matmul %354, %356, %cst_326 {dimension_numbers = #tpu.dot_dimension_numbers<[1], [0], [0], [1], [0, 0, 1, 1], [], []>} : vector<160x128xbf16>, vector<128x128xbf16>, vector<160x128xf32> -> vector<160x128xf32>
    %358 = arith.addf %352, %357 : vector<160x128xf32>
    %c19_327 = arith.constant 19 : index
    %c0_328 = arith.constant 0 : index
    %359 = vector.load %arg11[%c19_327, %c0_328] : memref<232x128xf32, #tpu.memory_space<vmem>>, vector<160x128xf32>
    %360 = arith.truncf %359 : vector<160x128xf32> to vector<160x128xbf16>
    %c8_329 = arith.constant 8 : index
    %c0_330 = arith.constant 0 : index
    %c0_331 = arith.constant 0 : index
    %361 = vector.load %arg6[%c8_329, %c0_330, %c0_331] : memref<25x128x128xbf16, #tpu.memory_space<vmem>>, vector<1x128x128xbf16>
    %362 = vector.shape_cast %361 : vector<1x128x128xbf16> to vector<128x128xbf16>
    %cst_332 = arith.constant dense<0.000000e+00> : vector<160x128xf32>
    %363 = tpu.matmul %360, %362, %cst_332 {dimension_numbers = #tpu.dot_dimension_numbers<[1], [0], [0], [1], [0, 0, 1, 1], [], []>} : vector<160x128xbf16>, vector<128x128xbf16>, vector<160x128xf32> -> vector<160x128xf32>
    %364 = arith.addf %358, %363 : vector<160x128xf32>
    %c20_333 = arith.constant 20 : index
    %c0_334 = arith.constant 0 : index
    %365 = vector.load %arg11[%c20_333, %c0_334] : memref<232x128xf32, #tpu.memory_space<vmem>>, vector<160x128xf32>
    %366 = arith.truncf %365 : vector<160x128xf32> to vector<160x128xbf16>
    %c9_335 = arith.constant 9 : index
    %c0_336 = arith.constant 0 : index
    %c0_337 = arith.constant 0 : index
    %367 = vector.load %arg6[%c9_335, %c0_336, %c0_337] : memref<25x128x128xbf16, #tpu.memory_space<vmem>>, vector<1x128x128xbf16>
    %368 = vector.shape_cast %367 : vector<1x128x128xbf16> to vector<128x128xbf16>
    %cst_338 = arith.constant dense<0.000000e+00> : vector<160x128xf32>
    %369 = tpu.matmul %366, %368, %cst_338 {dimension_numbers = #tpu.dot_dimension_numbers<[1], [0], [0], [1], [0, 0, 1, 1], [], []>} : vector<160x128xbf16>, vector<128x128xbf16>, vector<160x128xf32> -> vector<160x128xf32>
    %370 = arith.addf %364, %369 : vector<160x128xf32>
    %c32_339 = arith.constant 32 : index
    %c0_340 = arith.constant 0 : index
    %371 = vector.load %arg11[%c32_339, %c0_340] : memref<232x128xf32, #tpu.memory_space<vmem>>, vector<160x128xf32>
    %372 = arith.truncf %371 : vector<160x128xf32> to vector<160x128xbf16>
    %c10_341 = arith.constant 10 : index
    %c0_342 = arith.constant 0 : index
    %c0_343 = arith.constant 0 : index
    %373 = vector.load %arg6[%c10_341, %c0_342, %c0_343] : memref<25x128x128xbf16, #tpu.memory_space<vmem>>, vector<1x128x128xbf16>
    %374 = vector.shape_cast %373 : vector<1x128x128xbf16> to vector<128x128xbf16>
    %cst_344 = arith.constant dense<0.000000e+00> : vector<160x128xf32>
    %375 = tpu.matmul %372, %374, %cst_344 {dimension_numbers = #tpu.dot_dimension_numbers<[1], [0], [0], [1], [0, 0, 1, 1], [], []>} : vector<160x128xbf16>, vector<128x128xbf16>, vector<160x128xf32> -> vector<160x128xf32>
    %376 = arith.addf %370, %375 : vector<160x128xf32>
    %c33_345 = arith.constant 33 : index
    %c0_346 = arith.constant 0 : index
    %377 = vector.load %arg11[%c33_345, %c0_346] : memref<232x128xf32, #tpu.memory_space<vmem>>, vector<160x128xf32>
    %378 = arith.truncf %377 : vector<160x128xf32> to vector<160x128xbf16>
    %c11_347 = arith.constant 11 : index
    %c0_348 = arith.constant 0 : index
    %c0_349 = arith.constant 0 : index
    %379 = vector.load %arg6[%c11_347, %c0_348, %c0_349] : memref<25x128x128xbf16, #tpu.memory_space<vmem>>, vector<1x128x128xbf16>
    %380 = vector.shape_cast %379 : vector<1x128x128xbf16> to vector<128x128xbf16>
    %cst_350 = arith.constant dense<0.000000e+00> : vector<160x128xf32>
    %381 = tpu.matmul %378, %380, %cst_350 {dimension_numbers = #tpu.dot_dimension_numbers<[1], [0], [0], [1], [0, 0, 1, 1], [], []>} : vector<160x128xbf16>, vector<128x128xbf16>, vector<160x128xf32> -> vector<160x128xf32>
    %382 = arith.addf %376, %381 : vector<160x128xf32>
    %c34_351 = arith.constant 34 : index
    %c0_352 = arith.constant 0 : index
    %383 = vector.load %arg11[%c34_351, %c0_352] : memref<232x128xf32, #tpu.memory_space<vmem>>, vector<160x128xf32>
    %384 = arith.truncf %383 : vector<160x128xf32> to vector<160x128xbf16>
    %c12_353 = arith.constant 12 : index
    %c0_354 = arith.constant 0 : index
    %c0_355 = arith.constant 0 : index
    %385 = vector.load %arg6[%c12_353, %c0_354, %c0_355] : memref<25x128x128xbf16, #tpu.memory_space<vmem>>, vector<1x128x128xbf16>
    %386 = vector.shape_cast %385 : vector<1x128x128xbf16> to vector<128x128xbf16>
    %cst_356 = arith.constant dense<0.000000e+00> : vector<160x128xf32>
    %387 = tpu.matmul %384, %386, %cst_356 {dimension_numbers = #tpu.dot_dimension_numbers<[1], [0], [0], [1], [0, 0, 1, 1], [], []>} : vector<160x128xbf16>, vector<128x128xbf16>, vector<160x128xf32> -> vector<160x128xf32>
    %388 = arith.addf %382, %387 : vector<160x128xf32>
    %c35 = arith.constant 35 : index
    %c0_357 = arith.constant 0 : index
    %389 = vector.load %arg11[%c35, %c0_357] : memref<232x128xf32, #tpu.memory_space<vmem>>, vector<160x128xf32>
    %390 = arith.truncf %389 : vector<160x128xf32> to vector<160x128xbf16>
    %c13_358 = arith.constant 13 : index
    %c0_359 = arith.constant 0 : index
    %c0_360 = arith.constant 0 : index
    %391 = vector.load %arg6[%c13_358, %c0_359, %c0_360] : memref<25x128x128xbf16, #tpu.memory_space<vmem>>, vector<1x128x128xbf16>
    %392 = vector.shape_cast %391 : vector<1x128x128xbf16> to vector<128x128xbf16>
    %cst_361 = arith.constant dense<0.000000e+00> : vector<160x128xf32>
    %393 = tpu.matmul %390, %392, %cst_361 {dimension_numbers = #tpu.dot_dimension_numbers<[1], [0], [0], [1], [0, 0, 1, 1], [], []>} : vector<160x128xbf16>, vector<128x128xbf16>, vector<160x128xf32> -> vector<160x128xf32>
    %394 = arith.addf %388, %393 : vector<160x128xf32>
    %c36 = arith.constant 36 : index
    %c0_362 = arith.constant 0 : index
    %395 = vector.load %arg11[%c36, %c0_362] : memref<232x128xf32, #tpu.memory_space<vmem>>, vector<160x128xf32>
    %396 = arith.truncf %395 : vector<160x128xf32> to vector<160x128xbf16>
    %c14_363 = arith.constant 14 : index
    %c0_364 = arith.constant 0 : index
    %c0_365 = arith.constant 0 : index
    %397 = vector.load %arg6[%c14_363, %c0_364, %c0_365] : memref<25x128x128xbf16, #tpu.memory_space<vmem>>, vector<1x128x128xbf16>
    %398 = vector.shape_cast %397 : vector<1x128x128xbf16> to vector<128x128xbf16>
    %cst_366 = arith.constant dense<0.000000e+00> : vector<160x128xf32>
    %399 = tpu.matmul %396, %398, %cst_366 {dimension_numbers = #tpu.dot_dimension_numbers<[1], [0], [0], [1], [0, 0, 1, 1], [], []>} : vector<160x128xbf16>, vector<128x128xbf16>, vector<160x128xf32> -> vector<160x128xf32>
    %400 = arith.addf %394, %399 : vector<160x128xf32>
    %c48 = arith.constant 48 : index
    %c0_367 = arith.constant 0 : index
    %401 = vector.load %arg11[%c48, %c0_367] : memref<232x128xf32, #tpu.memory_space<vmem>>, vector<160x128xf32>
    %402 = arith.truncf %401 : vector<160x128xf32> to vector<160x128xbf16>
    %c15_368 = arith.constant 15 : index
    %c0_369 = arith.constant 0 : index
    %c0_370 = arith.constant 0 : index
    %403 = vector.load %arg6[%c15_368, %c0_369, %c0_370] : memref<25x128x128xbf16, #tpu.memory_space<vmem>>, vector<1x128x128xbf16>
    %404 = vector.shape_cast %403 : vector<1x128x128xbf16> to vector<128x128xbf16>
    %cst_371 = arith.constant dense<0.000000e+00> : vector<160x128xf32>
    %405 = tpu.matmul %402, %404, %cst_371 {dimension_numbers = #tpu.dot_dimension_numbers<[1], [0], [0], [1], [0, 0, 1, 1], [], []>} : vector<160x128xbf16>, vector<128x128xbf16>, vector<160x128xf32> -> vector<160x128xf32>
    %406 = arith.addf %400, %405 : vector<160x128xf32>
    %c49 = arith.constant 49 : index
    %c0_372 = arith.constant 0 : index
    %407 = vector.load %arg11[%c49, %c0_372] : memref<232x128xf32, #tpu.memory_space<vmem>>, vector<160x128xf32>
    %408 = arith.truncf %407 : vector<160x128xf32> to vector<160x128xbf16>
    %c16_373 = arith.constant 16 : index
    %c0_374 = arith.constant 0 : index
    %c0_375 = arith.constant 0 : index
    %409 = vector.load %arg6[%c16_373, %c0_374, %c0_375] : memref<25x128x128xbf16, #tpu.memory_space<vmem>>, vector<1x128x128xbf16>
    %410 = vector.shape_cast %409 : vector<1x128x128xbf16> to vector<128x128xbf16>
    %cst_376 = arith.constant dense<0.000000e+00> : vector<160x128xf32>
    %411 = tpu.matmul %408, %410, %cst_376 {dimension_numbers = #tpu.dot_dimension_numbers<[1], [0], [0], [1], [0, 0, 1, 1], [], []>} : vector<160x128xbf16>, vector<128x128xbf16>, vector<160x128xf32> -> vector<160x128xf32>
    %412 = arith.addf %406, %411 : vector<160x128xf32>
    %c50 = arith.constant 50 : index
    %c0_377 = arith.constant 0 : index
    %413 = vector.load %arg11[%c50, %c0_377] : memref<232x128xf32, #tpu.memory_space<vmem>>, vector<160x128xf32>
    %414 = arith.truncf %413 : vector<160x128xf32> to vector<160x128xbf16>
    %c17_378 = arith.constant 17 : index
    %c0_379 = arith.constant 0 : index
    %c0_380 = arith.constant 0 : index
    %415 = vector.load %arg6[%c17_378, %c0_379, %c0_380] : memref<25x128x128xbf16, #tpu.memory_space<vmem>>, vector<1x128x128xbf16>
    %416 = vector.shape_cast %415 : vector<1x128x128xbf16> to vector<128x128xbf16>
    %cst_381 = arith.constant dense<0.000000e+00> : vector<160x128xf32>
    %417 = tpu.matmul %414, %416, %cst_381 {dimension_numbers = #tpu.dot_dimension_numbers<[1], [0], [0], [1], [0, 0, 1, 1], [], []>} : vector<160x128xbf16>, vector<128x128xbf16>, vector<160x128xf32> -> vector<160x128xf32>
    %418 = arith.addf %412, %417 : vector<160x128xf32>
    %c51 = arith.constant 51 : index
    %c0_382 = arith.constant 0 : index
    %419 = vector.load %arg11[%c51, %c0_382] : memref<232x128xf32, #tpu.memory_space<vmem>>, vector<160x128xf32>
    %420 = arith.truncf %419 : vector<160x128xf32> to vector<160x128xbf16>
    %c18_383 = arith.constant 18 : index
    %c0_384 = arith.constant 0 : index
    %c0_385 = arith.constant 0 : index
    %421 = vector.load %arg6[%c18_383, %c0_384, %c0_385] : memref<25x128x128xbf16, #tpu.memory_space<vmem>>, vector<1x128x128xbf16>
    %422 = vector.shape_cast %421 : vector<1x128x128xbf16> to vector<128x128xbf16>
    %cst_386 = arith.constant dense<0.000000e+00> : vector<160x128xf32>
    %423 = tpu.matmul %420, %422, %cst_386 {dimension_numbers = #tpu.dot_dimension_numbers<[1], [0], [0], [1], [0, 0, 1, 1], [], []>} : vector<160x128xbf16>, vector<128x128xbf16>, vector<160x128xf32> -> vector<160x128xf32>
    %424 = arith.addf %418, %423 : vector<160x128xf32>
    %c52 = arith.constant 52 : index
    %c0_387 = arith.constant 0 : index
    %425 = vector.load %arg11[%c52, %c0_387] : memref<232x128xf32, #tpu.memory_space<vmem>>, vector<160x128xf32>
    %426 = arith.truncf %425 : vector<160x128xf32> to vector<160x128xbf16>
    %c19_388 = arith.constant 19 : index
    %c0_389 = arith.constant 0 : index
    %c0_390 = arith.constant 0 : index
    %427 = vector.load %arg6[%c19_388, %c0_389, %c0_390] : memref<25x128x128xbf16, #tpu.memory_space<vmem>>, vector<1x128x128xbf16>
    %428 = vector.shape_cast %427 : vector<1x128x128xbf16> to vector<128x128xbf16>
    %cst_391 = arith.constant dense<0.000000e+00> : vector<160x128xf32>
    %429 = tpu.matmul %426, %428, %cst_391 {dimension_numbers = #tpu.dot_dimension_numbers<[1], [0], [0], [1], [0, 0, 1, 1], [], []>} : vector<160x128xbf16>, vector<128x128xbf16>, vector<160x128xf32> -> vector<160x128xf32>
    %430 = arith.addf %424, %429 : vector<160x128xf32>
    %c64 = arith.constant 64 : index
    %c0_392 = arith.constant 0 : index
    %431 = vector.load %arg11[%c64, %c0_392] : memref<232x128xf32, #tpu.memory_space<vmem>>, vector<160x128xf32>
    %432 = arith.truncf %431 : vector<160x128xf32> to vector<160x128xbf16>
    %c20_393 = arith.constant 20 : index
    %c0_394 = arith.constant 0 : index
    %c0_395 = arith.constant 0 : index
    %433 = vector.load %arg6[%c20_393, %c0_394, %c0_395] : memref<25x128x128xbf16, #tpu.memory_space<vmem>>, vector<1x128x128xbf16>
    %434 = vector.shape_cast %433 : vector<1x128x128xbf16> to vector<128x128xbf16>
    %cst_396 = arith.constant dense<0.000000e+00> : vector<160x128xf32>
    %435 = tpu.matmul %432, %434, %cst_396 {dimension_numbers = #tpu.dot_dimension_numbers<[1], [0], [0], [1], [0, 0, 1, 1], [], []>} : vector<160x128xbf16>, vector<128x128xbf16>, vector<160x128xf32> -> vector<160x128xf32>
    %436 = arith.addf %430, %435 : vector<160x128xf32>
    %c65 = arith.constant 65 : index
    %c0_397 = arith.constant 0 : index
    %437 = vector.load %arg11[%c65, %c0_397] : memref<232x128xf32, #tpu.memory_space<vmem>>, vector<160x128xf32>
    %438 = arith.truncf %437 : vector<160x128xf32> to vector<160x128xbf16>
    %c21_398 = arith.constant 21 : index
    %c0_399 = arith.constant 0 : index
    %c0_400 = arith.constant 0 : index
    %439 = vector.load %arg6[%c21_398, %c0_399, %c0_400] : memref<25x128x128xbf16, #tpu.memory_space<vmem>>, vector<1x128x128xbf16>
    %440 = vector.shape_cast %439 : vector<1x128x128xbf16> to vector<128x128xbf16>
    %cst_401 = arith.constant dense<0.000000e+00> : vector<160x128xf32>
    %441 = tpu.matmul %438, %440, %cst_401 {dimension_numbers = #tpu.dot_dimension_numbers<[1], [0], [0], [1], [0, 0, 1, 1], [], []>} : vector<160x128xbf16>, vector<128x128xbf16>, vector<160x128xf32> -> vector<160x128xf32>
    %442 = arith.addf %436, %441 : vector<160x128xf32>
    %c66 = arith.constant 66 : index
    %c0_402 = arith.constant 0 : index
    %443 = vector.load %arg11[%c66, %c0_402] : memref<232x128xf32, #tpu.memory_space<vmem>>, vector<160x128xf32>
    %444 = arith.truncf %443 : vector<160x128xf32> to vector<160x128xbf16>
    %c22_403 = arith.constant 22 : index
    %c0_404 = arith.constant 0 : index
    %c0_405 = arith.constant 0 : index
    %445 = vector.load %arg6[%c22_403, %c0_404, %c0_405] : memref<25x128x128xbf16, #tpu.memory_space<vmem>>, vector<1x128x128xbf16>
    %446 = vector.shape_cast %445 : vector<1x128x128xbf16> to vector<128x128xbf16>
    %cst_406 = arith.constant dense<0.000000e+00> : vector<160x128xf32>
    %447 = tpu.matmul %444, %446, %cst_406 {dimension_numbers = #tpu.dot_dimension_numbers<[1], [0], [0], [1], [0, 0, 1, 1], [], []>} : vector<160x128xbf16>, vector<128x128xbf16>, vector<160x128xf32> -> vector<160x128xf32>
    %448 = arith.addf %442, %447 : vector<160x128xf32>
    %c67 = arith.constant 67 : index
    %c0_407 = arith.constant 0 : index
    %449 = vector.load %arg11[%c67, %c0_407] : memref<232x128xf32, #tpu.memory_space<vmem>>, vector<160x128xf32>
    %450 = arith.truncf %449 : vector<160x128xf32> to vector<160x128xbf16>
    %c23_408 = arith.constant 23 : index
    %c0_409 = arith.constant 0 : index
    %c0_410 = arith.constant 0 : index
    %451 = vector.load %arg6[%c23_408, %c0_409, %c0_410] : memref<25x128x128xbf16, #tpu.memory_space<vmem>>, vector<1x128x128xbf16>
    %452 = vector.shape_cast %451 : vector<1x128x128xbf16> to vector<128x128xbf16>
    %cst_411 = arith.constant dense<0.000000e+00> : vector<160x128xf32>
    %453 = tpu.matmul %450, %452, %cst_411 {dimension_numbers = #tpu.dot_dimension_numbers<[1], [0], [0], [1], [0, 0, 1, 1], [], []>} : vector<160x128xbf16>, vector<128x128xbf16>, vector<160x128xf32> -> vector<160x128xf32>
    %454 = arith.addf %448, %453 : vector<160x128xf32>
    %c68 = arith.constant 68 : index
    %c0_412 = arith.constant 0 : index
    %455 = vector.load %arg11[%c68, %c0_412] : memref<232x128xf32, #tpu.memory_space<vmem>>, vector<160x128xf32>
    %456 = arith.truncf %455 : vector<160x128xf32> to vector<160x128xbf16>
    %c24_413 = arith.constant 24 : index
    %c0_414 = arith.constant 0 : index
    %c0_415 = arith.constant 0 : index
    %457 = vector.load %arg6[%c24_413, %c0_414, %c0_415] : memref<25x128x128xbf16, #tpu.memory_space<vmem>>, vector<1x128x128xbf16>
    %458 = vector.shape_cast %457 : vector<1x128x128xbf16> to vector<128x128xbf16>
    %cst_416 = arith.constant dense<0.000000e+00> : vector<160x128xf32>
    %459 = tpu.matmul %456, %458, %cst_416 {dimension_numbers = #tpu.dot_dimension_numbers<[1], [0], [0], [1], [0, 0, 1, 1], [], []>} : vector<160x128xbf16>, vector<128x128xbf16>, vector<160x128xf32> -> vector<160x128xf32>
    %460 = arith.addf %454, %459 : vector<160x128xf32>
    %461 = vector.broadcast %238 : vector<1x128xf32> to vector<160x128xf32>
    %462 = arith.addf %460, %461 : vector<160x128xf32>
    %463 = vector.broadcast %11 : vector<1x128xf32> to vector<160x128xf32>
    %464 = arith.mulf %462, %463 : vector<160x128xf32>
    %465 = vector.broadcast %12 : vector<1x128xf32> to vector<160x128xf32>
    %466 = arith.addf %464, %465 : vector<160x128xf32>
    %cst_417 = arith.constant 0.000000e+00 : f32
    %467 = vector.broadcast %cst_417 : f32 to vector<160x128xf32>
    %468 = arith.maximumf %466, %467 : vector<160x128xf32>
    %469 = tpu.iota {dimensions = array<i32: 0>} : vector<160x128xi32>
    %c16_i32 = arith.constant 16 : i32
    %c0_i32 = arith.constant 0 : i32
    %470 = arith.cmpi eq, %c16_i32, %c0_i32 : i32
    %c1_i32 = arith.constant 1 : i32
    %471 = arith.select %470, %c1_i32, %c16_i32 : i32
    %472 = vector.broadcast %471 : i32 to vector<160x128xi32>
    %473 = arith.remsi %469, %472 : vector<160x128xi32>
    %c0_i32_418 = arith.constant 0 : i32
    %474 = vector.broadcast %c0_i32_418 : i32 to vector<160x128xi32>
    %475 = arith.cmpi ne, %473, %474 : vector<160x128xi32>
    %c0_i32_419 = arith.constant 0 : i32
    %476 = vector.broadcast %c0_i32_419 : i32 to vector<160x128xi32>
    %477 = arith.cmpi slt, %473, %476 : vector<160x128xi32>
    %c0_i32_420 = arith.constant 0 : i32
    %478 = arith.cmpi slt, %471, %c0_i32_420 : i32
    %479 = vector.broadcast %478 : i1 to vector<160x128xi1>
    %480 = vector.broadcast %479 : vector<160x128xi1> to vector<160x128xi1>
    %481 = arith.xori %477, %480 : vector<160x128xi1>
    %482 = arith.andi %481, %475 : vector<160x128xi1>
    %483 = vector.broadcast %471 : i32 to vector<160x128xi32>
    %484 = arith.addi %473, %483 : vector<160x128xi32>
    %485 = arith.select %482, %484, %473 : vector<160x128xi1>, vector<160x128xi32>
    %c10_i32 = arith.constant 10 : i32
    %486 = vector.broadcast %c10_i32 : i32 to vector<160x128xi32>
    %487 = arith.cmpi slt, %485, %486 : vector<160x128xi32>
    %cst_421 = arith.constant 0.000000e+00 : f32
    %488 = vector.broadcast %cst_421 : f32 to vector<160x128xf32>
    %489 = arith.select %487, %468, %488 : vector<160x128xi1>, vector<160x128xf32>
    %c32_422 = arith.constant 32 : index
    %c0_423 = arith.constant 0 : index
    %490 = vector.load %arg12[%c32_422, %c0_423] : memref<216x128xf32, #tpu.memory_space<vmem>>, vector<160x128xf32>
    tpu.vector_store %arg12[%c32_422, %c0_423], %489 {strides = array<i32>} : memref<216x128xf32, #tpu.memory_space<vmem>>, vector<160x128xf32>,
    %cst_424 = arith.constant 0.000000e+00 : f32
    %491 = vector.broadcast %cst_424 : f32 to vector<160x128xf32>
    %c15_425 = arith.constant 15 : index
    %c0_426 = arith.constant 0 : index
    %492 = vector.load %arg12[%c15_425, %c0_426] : memref<216x128xf32, #tpu.memory_space<vmem>>, vector<160x128xf32>
    %493 = arith.truncf %492 : vector<160x128xf32> to vector<160x128xbf16>
    %c0_427 = arith.constant 0 : index
    %c0_428 = arith.constant 0 : index
    %c0_429 = arith.constant 0 : index
    %494 = vector.load %arg7[%c0_427, %c0_428, %c0_429] : memref<9x128x128xbf16, #tpu.memory_space<vmem>>, vector<1x128x128xbf16>
    %495 = vector.shape_cast %494 : vector<1x128x128xbf16> to vector<128x128xbf16>
    %cst_430 = arith.constant dense<0.000000e+00> : vector<160x128xf32>
    %496 = tpu.matmul %493, %495, %cst_430 {dimension_numbers = #tpu.dot_dimension_numbers<[1], [0], [0], [1], [0, 0, 1, 1], [], []>} : vector<160x128xbf16>, vector<128x128xbf16>, vector<160x128xf32> -> vector<160x128xf32>
    %497 = arith.addf %491, %496 : vector<160x128xf32>
    %c16_431 = arith.constant 16 : index
    %c0_432 = arith.constant 0 : index
    %498 = vector.load %arg12[%c16_431, %c0_432] : memref<216x128xf32, #tpu.memory_space<vmem>>, vector<160x128xf32>
    %499 = arith.truncf %498 : vector<160x128xf32> to vector<160x128xbf16>
    %c1_433 = arith.constant 1 : index
    %c0_434 = arith.constant 0 : index
    %c0_435 = arith.constant 0 : index
    %500 = vector.load %arg7[%c1_433, %c0_434, %c0_435] : memref<9x128x128xbf16, #tpu.memory_space<vmem>>, vector<1x128x128xbf16>
    %501 = vector.shape_cast %500 : vector<1x128x128xbf16> to vector<128x128xbf16>
    %cst_436 = arith.constant dense<0.000000e+00> : vector<160x128xf32>
    %502 = tpu.matmul %499, %501, %cst_436 {dimension_numbers = #tpu.dot_dimension_numbers<[1], [0], [0], [1], [0, 0, 1, 1], [], []>} : vector<160x128xbf16>, vector<128x128xbf16>, vector<160x128xf32> -> vector<160x128xf32>
    %503 = arith.addf %497, %502 : vector<160x128xf32>
    %c17_437 = arith.constant 17 : index
    %c0_438 = arith.constant 0 : index
    %504 = vector.load %arg12[%c17_437, %c0_438] : memref<216x128xf32, #tpu.memory_space<vmem>>, vector<160x128xf32>
    %505 = arith.truncf %504 : vector<160x128xf32> to vector<160x128xbf16>
    %c2_439 = arith.constant 2 : index
    %c0_440 = arith.constant 0 : index
    %c0_441 = arith.constant 0 : index
    %506 = vector.load %arg7[%c2_439, %c0_440, %c0_441] : memref<9x128x128xbf16, #tpu.memory_space<vmem>>, vector<1x128x128xbf16>
    %507 = vector.shape_cast %506 : vector<1x128x128xbf16> to vector<128x128xbf16>
    %cst_442 = arith.constant dense<0.000000e+00> : vector<160x128xf32>
    %508 = tpu.matmul %505, %507, %cst_442 {dimension_numbers = #tpu.dot_dimension_numbers<[1], [0], [0], [1], [0, 0, 1, 1], [], []>} : vector<160x128xbf16>, vector<128x128xbf16>, vector<160x128xf32> -> vector<160x128xf32>
    %509 = arith.addf %503, %508 : vector<160x128xf32>
    %c31_443 = arith.constant 31 : index
    %c0_444 = arith.constant 0 : index
    %510 = vector.load %arg12[%c31_443, %c0_444] : memref<216x128xf32, #tpu.memory_space<vmem>>, vector<160x128xf32>
    %511 = arith.truncf %510 : vector<160x128xf32> to vector<160x128xbf16>
    %c3_445 = arith.constant 3 : index
    %c0_446 = arith.constant 0 : index
    %c0_447 = arith.constant 0 : index
    %512 = vector.load %arg7[%c3_445, %c0_446, %c0_447] : memref<9x128x128xbf16, #tpu.memory_space<vmem>>, vector<1x128x128xbf16>
    %513 = vector.shape_cast %512 : vector<1x128x128xbf16> to vector<128x128xbf16>
    %cst_448 = arith.constant dense<0.000000e+00> : vector<160x128xf32>
    %514 = tpu.matmul %511, %513, %cst_448 {dimension_numbers = #tpu.dot_dimension_numbers<[1], [0], [0], [1], [0, 0, 1, 1], [], []>} : vector<160x128xbf16>, vector<128x128xbf16>, vector<160x128xf32> -> vector<160x128xf32>
    %515 = arith.addf %509, %514 : vector<160x128xf32>
    %c32_449 = arith.constant 32 : index
    %c0_450 = arith.constant 0 : index
    %516 = vector.load %arg12[%c32_449, %c0_450] : memref<216x128xf32, #tpu.memory_space<vmem>>, vector<160x128xf32>
    %517 = arith.truncf %516 : vector<160x128xf32> to vector<160x128xbf16>
    %c4_451 = arith.constant 4 : index
    %c0_452 = arith.constant 0 : index
    %c0_453 = arith.constant 0 : index
    %518 = vector.load %arg7[%c4_451, %c0_452, %c0_453] : memref<9x128x128xbf16, #tpu.memory_space<vmem>>, vector<1x128x128xbf16>
    %519 = vector.shape_cast %518 : vector<1x128x128xbf16> to vector<128x128xbf16>
    %cst_454 = arith.constant dense<0.000000e+00> : vector<160x128xf32>
    %520 = tpu.matmul %517, %519, %cst_454 {dimension_numbers = #tpu.dot_dimension_numbers<[1], [0], [0], [1], [0, 0, 1, 1], [], []>} : vector<160x128xbf16>, vector<128x128xbf16>, vector<160x128xf32> -> vector<160x128xf32>
    %521 = arith.addf %515, %520 : vector<160x128xf32>
    %c33_455 = arith.constant 33 : index
    %c0_456 = arith.constant 0 : index
    %522 = vector.load %arg12[%c33_455, %c0_456] : memref<216x128xf32, #tpu.memory_space<vmem>>, vector<160x128xf32>
    %523 = arith.truncf %522 : vector<160x128xf32> to vector<160x128xbf16>
    %c5_457 = arith.constant 5 : index
    %c0_458 = arith.constant 0 : index
    %c0_459 = arith.constant 0 : index
    %524 = vector.load %arg7[%c5_457, %c0_458, %c0_459] : memref<9x128x128xbf16, #tpu.memory_space<vmem>>, vector<1x128x128xbf16>
    %525 = vector.shape_cast %524 : vector<1x128x128xbf16> to vector<128x128xbf16>
    %cst_460 = arith.constant dense<0.000000e+00> : vector<160x128xf32>
    %526 = tpu.matmul %523, %525, %cst_460 {dimension_numbers = #tpu.dot_dimension_numbers<[1], [0], [0], [1], [0, 0, 1, 1], [], []>} : vector<160x128xbf16>, vector<128x128xbf16>, vector<160x128xf32> -> vector<160x128xf32>
    %527 = arith.addf %521, %526 : vector<160x128xf32>
    %c47 = arith.constant 47 : index
    %c0_461 = arith.constant 0 : index
    %528 = vector.load %arg12[%c47, %c0_461] : memref<216x128xf32, #tpu.memory_space<vmem>>, vector<160x128xf32>
    %529 = arith.truncf %528 : vector<160x128xf32> to vector<160x128xbf16>
    %c6_462 = arith.constant 6 : index
    %c0_463 = arith.constant 0 : index
    %c0_464 = arith.constant 0 : index
    %530 = vector.load %arg7[%c6_462, %c0_463, %c0_464] : memref<9x128x128xbf16, #tpu.memory_space<vmem>>, vector<1x128x128xbf16>
    %531 = vector.shape_cast %530 : vector<1x128x128xbf16> to vector<128x128xbf16>
    %cst_465 = arith.constant dense<0.000000e+00> : vector<160x128xf32>
    %532 = tpu.matmul %529, %531, %cst_465 {dimension_numbers = #tpu.dot_dimension_numbers<[1], [0], [0], [1], [0, 0, 1, 1], [], []>} : vector<160x128xbf16>, vector<128x128xbf16>, vector<160x128xf32> -> vector<160x128xf32>
    %533 = arith.addf %527, %532 : vector<160x128xf32>
    %c48_466 = arith.constant 48 : index
    %c0_467 = arith.constant 0 : index
    %534 = vector.load %arg12[%c48_466, %c0_467] : memref<216x128xf32, #tpu.memory_space<vmem>>, vector<160x128xf32>
    %535 = arith.truncf %534 : vector<160x128xf32> to vector<160x128xbf16>
    %c7_468 = arith.constant 7 : index
    %c0_469 = arith.constant 0 : index
    %c0_470 = arith.constant 0 : index
    %536 = vector.load %arg7[%c7_468, %c0_469, %c0_470] : memref<9x128x128xbf16, #tpu.memory_space<vmem>>, vector<1x128x128xbf16>
    %537 = vector.shape_cast %536 : vector<1x128x128xbf16> to vector<128x128xbf16>
    %cst_471 = arith.constant dense<0.000000e+00> : vector<160x128xf32>
    %538 = tpu.matmul %535, %537, %cst_471 {dimension_numbers = #tpu.dot_dimension_numbers<[1], [0], [0], [1], [0, 0, 1, 1], [], []>} : vector<160x128xbf16>, vector<128x128xbf16>, vector<160x128xf32> -> vector<160x128xf32>
    %539 = arith.addf %533, %538 : vector<160x128xf32>
    %c49_472 = arith.constant 49 : index
    %c0_473 = arith.constant 0 : index
    %540 = vector.load %arg12[%c49_472, %c0_473] : memref<216x128xf32, #tpu.memory_space<vmem>>, vector<160x128xf32>
    %541 = arith.truncf %540 : vector<160x128xf32> to vector<160x128xbf16>
    %c8_474 = arith.constant 8 : index
    %c0_475 = arith.constant 0 : index
    %c0_476 = arith.constant 0 : index
    %542 = vector.load %arg7[%c8_474, %c0_475, %c0_476] : memref<9x128x128xbf16, #tpu.memory_space<vmem>>, vector<1x128x128xbf16>
    %543 = vector.shape_cast %542 : vector<1x128x128xbf16> to vector<128x128xbf16>
    %cst_477 = arith.constant dense<0.000000e+00> : vector<160x128xf32>
    %544 = tpu.matmul %541, %543, %cst_477 {dimension_numbers = #tpu.dot_dimension_numbers<[1], [0], [0], [1], [0, 0, 1, 1], [], []>} : vector<160x128xbf16>, vector<128x128xbf16>, vector<160x128xf32> -> vector<160x128xf32>
    %545 = arith.addf %539, %544 : vector<160x128xf32>
    %546 = vector.broadcast %13 : vector<1x128xf32> to vector<160x128xf32>
    %547 = arith.mulf %545, %546 : vector<160x128xf32>
    %548 = vector.broadcast %14 : vector<1x128xf32> to vector<160x128xf32>
    %549 = arith.addf %547, %548 : vector<160x128xf32>
    %cst_478 = arith.constant 0.000000e+00 : f32
    %550 = vector.broadcast %cst_478 : f32 to vector<160x128xf32>
    %551 = arith.maximumf %549, %550 : vector<160x128xf32>
    %c0_479 = arith.constant 0 : index
    %c0_480 = arith.constant 0 : index
    %c0_481 = arith.constant 0 : index
    %552 = vector.load %arg9[%c0_479, %c0_480, %c0_481] : memref<1x160x128xf32, #tpu.memory_space<vmem>>, vector<1x160x128xf32>
    %553 = vector.shape_cast %552 : vector<1x160x128xf32> to vector<160x128xf32>
    %554 = vector.shape_cast %551 : vector<160x128xf32> to vector<1x160x128xf32>
    tpu.vector_store %arg9[%c0_479, %c0_480, %c0_481], %554 {strides = array<i32>} : memref<1x160x128xf32, #tpu.memory_space<vmem>>, vector<1x160x128xf32>,
    return
  }
  func.func @transform_0(%arg0: i32) -> (i32, i32, i32) {
    %c0_i32 = arith.constant 0 : i32
    %c0_i32_0 = arith.constant 0 : i32
    %c0_i32_1 = arith.constant 0 : i32
    return %arg0, %c0_i32, %c0_i32_0 : i32, i32, i32
  }
  func.func @transform_1(%arg0: i32) -> (i32, i32, i32) {
    %c0_i32 = arith.constant 0 : i32
    %c0_i32_0 = arith.constant 0 : i32
    %c0_i32_1 = arith.constant 0 : i32
    return %arg0, %c0_i32, %c0_i32_0 : i32, i32, i32
  }
  func.func @transform_2(%arg0: i32) -> (i32, i32, i32) {
    %c0_i32 = arith.constant 0 : i32
    %c0_i32_0 = arith.constant 0 : i32
    %c0_i32_1 = arith.constant 0 : i32
    %c0_i32_2 = arith.constant 0 : i32
    return %c0_i32, %c0_i32_0, %c0_i32_1 : i32, i32, i32
  }
  func.func @transform_3(%arg0: i32) -> (i32, i32, i32) {
    %c0_i32 = arith.constant 0 : i32
    %c0_i32_0 = arith.constant 0 : i32
    %c0_i32_1 = arith.constant 0 : i32
    %c0_i32_2 = arith.constant 0 : i32
    return %c0_i32, %c0_i32_0, %c0_i32_1 : i32, i32, i32
  }
  func.func @transform_4(%arg0: i32) -> (i32, i32, i32) {
    %c0_i32 = arith.constant 0 : i32
    %c0_i32_0 = arith.constant 0 : i32
    %c0_i32_1 = arith.constant 0 : i32
    %c0_i32_2 = arith.constant 0 : i32
    return %c0_i32, %c0_i32_0, %c0_i32_1 : i32, i32, i32
  }
  func.func @transform_5(%arg0: i32) -> (i32, i32, i32) {
    %c0_i32 = arith.constant 0 : i32
    %c0_i32_0 = arith.constant 0 : i32
    %c0_i32_1 = arith.constant 0 : i32
    %c0_i32_2 = arith.constant 0 : i32
    return %c0_i32, %c0_i32_0, %c0_i32_1 : i32, i32, i32
  }
  func.func @transform_6(%arg0: i32) -> (i32, i32, i32) {
    %c0_i32 = arith.constant 0 : i32
    %c0_i32_0 = arith.constant 0 : i32
    %c0_i32_1 = arith.constant 0 : i32
    %c0_i32_2 = arith.constant 0 : i32
    return %c0_i32, %c0_i32_0, %c0_i32_1 : i32, i32, i32
  }
  func.func @transform_7(%arg0: i32) -> (i32, i32) {
    %c0_i32 = arith.constant 0 : i32
    %c0_i32_0 = arith.constant 0 : i32
    %c0_i32_1 = arith.constant 0 : i32
    return %c0_i32, %c0_i32_0 : i32, i32
  }
  func.func @transform_8(%arg0: i32) -> (i32, i32, i32) {
    %c0_i32 = arith.constant 0 : i32
    %c0_i32_0 = arith.constant 0 : i32
    %c0_i32_1 = arith.constant 0 : i32
    return %arg0, %c0_i32, %c0_i32_0 : i32, i32, i32
  }
}

</mosaic_0001>

<bundles_post_ra>
// kernel: depthwise_xcorr_forward.1
= control target key start
LH: loop header
LB: loop body
LE: loop exit
PB: predicated region body
PF: predicated region fallthrough
CT: control target
= control target key end

     0   :  { %s14681_s27 = smov 0   ;;  %s18904_s0 = inlined_call_operand.vmem [shape: f32[2,56,8], index: 0, kind: input, shape index: {}]   ;;  %s18905_s1 = inlined_call_operand.vmem [shape: f32[2,264,8], index: 1, kind: input, shape index: {}]   ;;  %s18906_s2 = inlined_call_operand.vmem [shape: bf16[9,8,128], index: 2, kind: input, shape index: {}]   ;;  %s18907_s3 = inlined_call_operand.vmem [shape: bf16[9,8,128], index: 3, kind: input, shape index: {}]   ;;  %s18908_s4 = inlined_call_operand.vmem [shape: bf16[25,128,128], index: 4, kind: input, shape index: {}]   ;;  %s18909_s5 = inlined_call_operand.vmem [shape: bf16[25,128,128], index: 5, kind: input, shape index: {}]   ;;  %s18910_s6 = inlined_call_operand.vmem [shape: bf16[9,128,128], index: 6, kind: input, shape index: {}]   ;;  %s18911_s7 = inlined_call_operand.vmem [shape: f32[9,128], index: 7, kind: input, shape index: {}]   ;;  %s18912_s8 = inlined_call_operand.vmem [shape: f32[2,160,128], index: 8, kind: output, shape index: {}]  }
   0x1 LB: > { %s11091_s28 = sadd.s32 4294967295, %s14632_s27   ;;  %p11095_p0 = scmp.ge.s32.totalorder %s14632_s27, 1  ;;  %s14632_s27 = sphi %s14681_s27, %s18_s27  }
   0x2   : > { %p272_p1 = scmp.lt.s32.totalorder %s14632_s27, 3 }
   0x4   : > { %p273_p2 = pnand %p11095_p0, %p272_p1 }
   0x6   : > { %276 = sbr.rel (%p273_p2) target bundleno = 2788 (0xae4), region = 52 }
   0xb   : > { %v405_v0 = vld [vmem:[%s18906_s2] sm:$0xf]  ;;  %vm426_vm0 = vcmask 1043456   ;;  %p311_p3 = scmp.lt.s32.totalorder %s11091_s28, 1  ;;  %v11099_v2 = vld [vmem:[%s18906_s2 + $0x4] sm:$0xf] }
   0xc   : > { %v463_v1 = vsel %vm426_vm0, %v405_v0, 0  ;;  %v428_v3 = vsel %vm426_vm0, %v11099_v2, 0  ;;  %vm416_vm1 = vcmask 64512   ;;  %v11106_v11 = vld [vmem:[%s18906_s2 + $0x8] sm:$0xf]  ;;  %vm14635_vm3 = vmmov 1  }
   0xd   : > { %472 = vmatpush.bf16.msra.mxu3 %v463_v1  ;;  %s19033_s28 = smov (!%p311_p3, %s11091_s28), 1  ;;  %437 = vmatpush.bf16.msra.mxu0 %v428_v3  ;;  %v508_v13 = vsel %vm426_vm0, %v11106_v11, 0  ;;  %v11110_v25 = vld [vmem:[%s18906_s2 + $0xc] sm:$0xf]  ;;  %v11114_v26 = vld [vmem:[%s18906_s2 + $0x10] sm:$0xf] }
   0xe   : > { %14526 = vmatpush.bf16.msra.mxu1 %v428_v3  ;;  %s14527_s11 = smul.u32 56, %s19033_s28  ;;  %v558_v27 = vsel %vm426_vm0, %v11110_v25, 0  ;;  %v608_v28 = vsel %vm426_vm0, %v11114_v26, 0  ;;  %v11122_v33 = vld [vmem:[%s18906_s2 + $0x18] sm:$0xf] }
   0xf   : > { %v708_v36 = vsel %vm426_vm0, %v11122_v33, 0  ;;  %v11118_v38 = vld [vmem:[%s18906_s2 + $0x14] sm:$0xf]  ;;  %v11126_v57 = vld [vmem:[%s18906_s2 + $0x1c] sm:$0xf]  ;;  %s14529_s24 = smul.u32 160, %s19033_s28 }
  0x10   : > { %s14703_s14 = scalar_lea.vmem %s18904_s0, %s14527_s11  ;;  %717 = vmatpush.bf16.msra.mxu2 %v708_v36  ;;  %v658_v39 = vsel %vm426_vm0, %v11118_v38, 0  ;;  %v758_v59 = vsel %vm426_vm0, %v11126_v57, 0  ;;  %v11130_v63 = vld [vmem:[%s18906_s2 + $0x20] sm:$0xf]  ;;  %v14060_v38 = vld [vmem:[%s18908_s4 + $0x30] sm:$0xff]  ;;  %s14528_s11 = smul.u32 264, %s19033_s28 }
  0x11   : > { %v397_v4 = vld [vmem:[%s14703_s14] sm:$0xff]  ;;  %v398_v5 = vld [vmem:[%s14703_s14 + $0x8] sm:$0xff]  ;;  %517 = vmatpush.bf16.msrb.mxu3 %v508_v13  ;;  %v399_v14 = vld [vmem:[%s14703_s14 + $0x10] sm:$0xff]  ;;  %617 = vmatpush.bf16.msrb.mxu0 %v608_v28  ;;  %v808_v1 = vsel %vm426_vm0, %v11130_v63, 0  ;;  %s18823_s26 = scalar_lea.vmem %s18912_s8, %s14529_s24 }
  0x12   : > { %v406_v6 = vld [vmem:[%s14703_s14 + $0x1] sm:$0xff]  ;;  %v402_v7 = vpack.c.bf16 %v398_v5, %v397_v4  ;;  %v407_v8 = vld [vmem:[%s14703_s14 + $0x9] sm:$0xff]  ;;  %v400_v15 = vld [vmem:[%s14703_s14 + $0x18] sm:$0xff]  ;;  %v593_v32 = vpack.c.bf16 %v399_v14, %v398_v5  ;;  %667 = vmatpush.bf16.msrb.mxu1 %v658_v39  ;;  %s15471_s22 = scalar_lea.vmem %s18905_s1, %s14528_s11 }
  0x13   : > { %v411_v9 = vpack.c.bf16 %v407_v8, %v406_v6  ;;  %v410_v10 = vld [vmem:[%s14703_s14 + $0x21] sm:$0x7]  ;;  %v408_v16 = vld [vmem:[%s14703_s14 + $0x11] sm:$0xff]  ;;  %v409_v17 = vld [vmem:[%s14703_s14 + $0x19] sm:$0xff]  ;;  %v14721_v18 = vpack.c.bf16 %v400_v15, %v399_v14 }
  0x14   : > { %11103 = vmatmul.msk.bf16.vlgmr.msra.gmra.mxu3 %vm416_vm1, %v402_v7  ;;  %v413_v12 = vpack.c.bf16 %v410_v10, %v410_v10  ;;  %v412_v19 = vpack.c.bf16 %v409_v17, %v408_v16  ;;  %v401_v20 = vld [vmem:[%s14703_s14 + $0x20] sm:$0x7]  ;;  %v489_v23 = vld [vmem:[%s14703_s14 + $0xa] sm:$0xff]  ;;  %v490_v29 = vld [vmem:[%s14703_s14 + $0x12] sm:$0xff]  ;;  %v643_v40 = vpack.c.bf16 %v408_v16, %v407_v8 }
  0x15   : > { %11100 = vmatmul.msk.bf16.vlgmr.msra.gmra.mxu0 %vm416_vm1, %v411_v9  ;;  %v404_v21 = vpack.c.bf16 %v401_v20, %v401_v20  ;;  %v488_v22 = vld [vmem:[%s14703_s14 + $0x2] sm:$0xff]  ;;  %567 = vmatpush.bf16.msra.mxu3 %v558_v27  ;;  %v491_v30 = vld [vmem:[%s14703_s14 + $0x1a] sm:$0xff]  ;;  %v688_v34 = vld [vmem:[%s14703_s14 + $0xe] sm:$0xff] }
  0x16   : > { %11102 = vmatmul.msk.bf16.vlgmr.msra.gmra.mxu1 %vm416_vm1, %v413_v12  ;;  %v493_v24 = vpack.c.bf16 %v489_v23, %v488_v22  ;;  %v494_v31 = vpack.c.bf16 %v491_v30, %v490_v29  ;;  %v689_v35 = vld [vmem:[%s14703_s14 + $0x16] sm:$0xff]  ;;  %v492_v41 = vld [vmem:[%s14703_s14 + $0x22] sm:$0x7]  ;;  %v691_v46 = vld [vmem:[%s14703_s14 + $0x26] sm:$0xff]  ;;  %817 = vmatpush.bf16.msra.mxu0 %v808_v1 }
  0x17   : > { %v693_v37 = vpack.c.bf16 %v689_v35, %v688_v34  ;;  %v495_v42 = vpack.c.bf16 %v492_v41, %v492_v41  ;;  %v591_v43 = vld [vmem:[%s14703_s14 + $0x20] sm:$0xff]  ;;  %v539_v51 = vld [vmem:[%s14703_s14 + $0xf] sm:$0xff]  ;;  %v592_v53 = vld [vmem:[%s14703_s14 + $0x28] sm:$0x7] }
  0x18   : > { %v594_v44 = vpack.c.bf16 %v591_v43, %v400_v15  ;;  %v690_v45 = vld [vmem:[%s14703_s14 + $0x1e] sm:$0xff]  ;;  %v538_v50 = vld [vmem:[%s14703_s14 + $0x7] sm:$0xff]  ;;  %v595_v54 = vpack.c.bf16 %v592_v53, %v592_v53  ;;  %v14076_v57 = vld [vmem:[%s18908_s4 + $0xb0] sm:$0xff] }
  0x19   : > { %11123 = vmatmul.msk.bf16.vlgmr.msra.gmra.mxu2 %vm416_vm1, %v693_v37  ;;  %v641_v47 = vld [vmem:[%s14703_s14 + $0x21] sm:$0xff]  ;;  %v694_v48 = vpack.c.bf16 %v691_v46, %v690_v45  ;;  %v543_v52 = vpack.c.bf16 %v539_v51, %v538_v50  ;;  %v692_v55 = vld [vmem:[%s14703_s14 + $0x2e] sm:$0x7]  ;;  %v642_v58 = vld [vmem:[%s14703_s14 + $0x29] sm:$0x7] }
  0x1a   : > { %v644_v49 = vpack.c.bf16 %v641_v47, %v409_v17  ;;  %v695_v56 = vpack.c.bf16 %v692_v55, %v692_v55  ;;  %v645_v60 = vpack.c.bf16 %v642_v58, %v642_v58  ;;  %v540_v61 = vld [vmem:[%s14703_s14 + $0x17] sm:$0xff]  ;;  %v541_v62 = vld [vmem:[%s14703_s14 + $0x1f] sm:$0xff]  ;;  %v542_v2 = vld [vmem:[%s14703_s14 + $0x27] sm:$0x7] }
  0x1b   : > { %v544_v0 = vpack.c.bf16 %v541_v62, %v540_v61  ;;  %v545_v3 = vpack.c.bf16 %v542_v2, %v542_v2  ;;  %v791_v8 = vld [vmem:[%s14703_s14 + $0x28] sm:$0xff]  ;;  %v743_v13 = vpack.c.bf16 %v540_v61, %v539_v51  ;;  %v792_v17 = vld [vmem:[%s14703_s14 + $0x30] sm:$0x7]  ;;  %v14061_v34 = vld [vmem:[%s18908_s4 + $0x38] sm:$0xff] }
  0x1c   : > { %v794_v9 = vpack.c.bf16 %v791_v8, %v591_v43  ;;  %1006 = vmatpush.bf16.msrb.mxu2 %v14061_v34  ;;  %v14109_v41 = vld [vmem:[%s18908_s4 + $0x1b8] sm:$0xff]  ;;  %v14058_v45 = vld [vmem:[%s18908_s4 + $0x20] sm:$0xff]  ;;  %v14108_v46 = vld [vmem:[%s18908_s4 + $0x1b0] sm:$0xff] }
  0x1d   : > { %v14077_v50 = vld [vmem:[%s18908_s4 + $0xb8] sm:$0xff]  ;;  %v14107_v53 = vld [vmem:[%s18908_s4 + $0x1a8] sm:$0xff]  ;;  %v14056_v58 = vld [vmem:[%s18908_s4 + $0x10] sm:$0xff] }
  0x1e   : > { %v14057_v51 = vld [vmem:[%s18908_s4 + $0x18] sm:$0xff]  ;;  %v14067_v61 = vld [vmem:[%s18908_s4 + $0x68] sm:$0xff] }
  0x1f   : > { %v14055_v63 = vld [vmem:[%s18908_s4 + $0x8] sm:$0xff]  ;;  %v14105_v1 = vld [vmem:[%s18908_s4 + $0x198] sm:$0xff] }
  0x20   : > { %1007 = vmatpush.bf16.msrb.mxu2 %v14060_v38  ;;  %v14093_v8 = vld [vmem:[%s18908_s4 + $0x138] sm:$0xff]  ;;  %v14071_v34 = vld [vmem:[%s18908_s4 + $0x88] sm:$0xff]  ;;  %v14140_v38 = vld [vmem:[%s18908_s4 + $0x2b0] sm:$0xff] }
  0x24   : > { %11104 = vmatmul.msk.bf16.gmra.mxu3 %vm416_vm1, %v14721_v18 }
  0x25   : > { %11101 = vmatmul.msk.bf16.gmra.mxu0 %vm416_vm1, %v412_v19  ;;  %v741_v19 = vld [vmem:[%s14703_s14 + $0x27] sm:$0xff] }
  0x26   : > { %11119 = vmatmul.msk.bf16.vlgmr.msrb.gmra.mxu1 %vm416_vm1, %v643_v40  ;;  %v14059_v40 = vld [vmem:[%s18908_s4 + $0x28] sm:$0xff] }
  0x27   : > { %1008 = vmatpush.bf16.msrb.mxu2 %v14059_v40  ;;  %v14062_v40 = vld [vmem:[%s18908_s4 + $0x40] sm:$0xff] }
  0x29   : > { %11124 = vmatmul.msk.bf16.gmra.mxu2 %vm416_vm1, %v694_v48 }
  0x2b   : > { %1009 = vmatpush.bf16.msrb.mxu2 %v14058_v45 }
  0x2f   : > { %1010 = vmatpush.bf16.msrb.mxu2 %v14057_v51  ;;  %v14139_v51 = vld [vmem:[%s18908_s4 + $0x2a8] sm:$0xff] }
  0x33   : > { %1011 = vmatpush.bf16.msrb.mxu2 %v14056_v58  ;;  %v14084_v58 = vld [vmem:[%s18908_s4 + $0xf0] sm:$0xff] }
  0x34   : > { %11105 = vmatmul.msk.bf16.gmra.mxu3 %vm416_vm1, %v404_v21  ;;  %v744_v21 = vpack.c.bf16 %v741_v19, %v541_v62  ;;  %v14075_v62 = vld [vmem:[%s18908_s4 + $0xa8] sm:$0xff] }
  0x35   : > { %11115 = vmatmul.msk.bf16.vlgmr.msrb.gmra.mxu0 %vm416_vm1, %v593_v32 }
  0x36   : > { %11120 = vmatmul.msk.bf16.gmra.mxu1 %vm416_vm1, %v644_v49  ;;  %1410 = vmatpush.bf16.msrb.mxu0 %v14109_v41  ;;  %v14069_v49 = vld [vmem:[%s18908_s4 + $0x78] sm:$0xff]  ;;  %v14070_v41 = vld [vmem:[%s18908_s4 + $0x80] sm:$0xff] }
  0x37   : > { %945 = vmatpush.bf16.msra.mxu1 %v14069_v49  ;;  %1012 = vmatpush.bf16.msrb.mxu2 %v14055_v63  ;;  %v14089_v49 = vld [vmem:[%s18908_s4 + $0x118] sm:$0xff]  ;;  %v14083_v63 = vld [vmem:[%s18908_s4 + $0xe8] sm:$0xff] }
  0x39   : > { %11125 = vmatmul.msk.bf16.gmra.mxu2 %vm416_vm1, %v695_v56  ;;  %v14068_v56 = vld [vmem:[%s18908_s4 + $0x70] sm:$0xff] }
  0x3a   : > { %1411 = vmatpush.bf16.msrb.mxu0 %v14108_v46  ;;  %v14085_v46 = vld [vmem:[%s18908_s4 + $0xf8] sm:$0xff] }
  0x3b   : > { %946 = vmatpush.bf16.msra.mxu1 %v14068_v56 }
  0x3e   : > { %1412 = vmatpush.bf16.msrb.mxu0 %v14107_v53 }
  0x3f   : > { %947 = vmatpush.bf16.msra.mxu1 %v14067_v61 }
  0x44   : > { %11107 = vmatmul.msk.bf16.vlgmr.msrb.gmra.mxu3 %vm416_vm1, %v493_v24  ;;  %v742_v24 = vld [vmem:[%s14703_s14 + $0x2f] sm:$0x7] }
  0x45   : > { %11116 = vmatmul.msk.bf16.gmra.mxu0 %vm416_vm1, %v594_v44  ;;  %767 = vmatpush.bf16.msrb.mxu3 %v758_v59  ;;  %v745_v26 = vpack.c.bf16 %v742_v24, %v742_v24  ;;  %v14106_v59 = vld [vmem:[%s18908_s4 + $0x1a0] sm:$0xff] }
  0x46   : > { %11121 = vmatmul.msk.bf16.gmra.mxu1 %vm416_vm1, %v645_v60  ;;  %1413 = vmatpush.bf16.msrb.mxu0 %v14106_v59  ;;  %v14102_v24 = vld [vmem:[%s18908_s4 + $0x180] sm:$0xff]  ;;  %v14100_v59 = vld [vmem:[%s18908_s4 + $0x170] sm:$0xff] }
  0x4a   : > { %1414 = vmatpush.bf16.msrb.mxu0 %v14105_v1  ;;  %v14099_v1 = vld [vmem:[%s18908_s4 + $0x168] sm:$0xff] }
  0x54   : > { %11108 = vmatmul.msk.bf16.gmra.mxu3 %vm416_vm1, %v494_v31 }
  0x55   : > { %11117 = vmatmul.msk.bf16.gmra.mxu0 %vm416_vm1, %v595_v54 }
  0x64   : > { %11109 = vmatmul.msk.bf16.gmra.mxu3 %vm416_vm1, %v495_v42 }
  0x65   : > { %11131 = vmatmul.msk.bf16.vlgmr.msra.gmra.mxu0 %vm416_vm1, %v14721_v18  ;;  %v795_v18 = vpack.c.bf16 %v792_v17, %v792_v17  ;;  %v14092_v17 = vld [vmem:[%s18908_s4 + $0x130] sm:$0xff] }
  0x74   : > { %11111 = vmatmul.msk.bf16.vlgmr.msra.gmra.mxu3 %vm416_vm1, %v543_v52 }
  0x75   : > { %11132 = vmatmul.msk.bf16.gmra.mxu0 %vm416_vm1, %v794_v9  ;;  %1086 = vmatpush.bf16.msra.mxu3 %v14077_v50 }
  0x79   : > { %1087 = vmatpush.bf16.msra.mxu3 %v14076_v57 }
  0x7d   : > { %1088 = vmatpush.bf16.msra.mxu3 %v14075_v62 }
  0x84   : > { %11112 = vmatmul.msk.bf16.gmra.mxu3 %vm416_vm1, %v544_v0 }
  0x85   : > { %11133 = vmatmul.msk.bf16.gmra.mxu0 %vm416_vm1, %v795_v18 }
  0x92   : > { %v439_v4 = vpop.f32.mrf.mxu0 }
  0x93   : > { %v449_v5 = vpop.f32.mrf.mxu1 }
  0x94   : > { %11113 = vmatmul.msk.bf16.gmra.mxu3 %vm416_vm1, %v545_v3 }
  0x97   : > { %v474_v6 = vpop.f32.mrf.mxu3 }
  0x98   : > { %v475_v7 = vadd.f32 %v474_v6, %v439_v4  ;;  %v14066_v4 = vld [vmem:[%s18908_s4 + $0x60] sm:$0xff] }
  0x99   : > { %v14054_v6 = vld [vmem:[%s18908_s4] sm:$0xff]  ;;  %948 = vmatpush.bf16.msra.mxu1 %v14066_v4 }
  0x9a   : > { %v14789_v10 = vpop.f32.mrf.mxu0  ;;  %1013 = vmatpush.bf16.msrb.mxu2 %v14054_v6 }
  0x9b   : > { %v451_v11 = vpop.f32.mrf.mxu1 }
  0x9c   : > { %v14820_v37 = vpop.f32.mrf.mxu2 }
  0x9e   : > { %1248 = vmatpush.bf16.msra.mxu2 %v14093_v8  ;;  %v14098_v8 = vld [vmem:[%s18908_s4 + $0x160] sm:$0xff] }
  0x9f   : > { %v14792_v12 = vpop.f32.mrf.mxu3 }
  0xa2   : > { %v444_v14 = vpop.f32.mrf.mxu0  ;;  %1249 = vmatpush.bf16.msra.mxu2 %v14092_v17 }
  0xa3   : > { %v14818_v36 = vpop.f32.mrf.mxu1 }
  0xa4   : > { %11127 = vmatmul.msk.bf16.vlgmr.msrb.gmra.mxu3 %vm416_vm1, %v743_v13  ;;  %v14837_v44 = vpop.f32.mrf.mxu2  ;;  %v14065_v13 = vld [vmem:[%s18908_s4 + $0x58] sm:$0xff] }
  0xa5   : > { %949 = vmatpush.bf16.msra.mxu1 %v14065_v13  ;;  %v14097_v13 = vld [vmem:[%s18908_s4 + $0x158] sm:$0xff] }
  0xa7   : > { %v479_v15 = vpop.f32.mrf.mxu3 }
  0xa8   : > { %v480_v16 = vadd.f32 %v479_v15, %v444_v14  ;;  %v14073_v14 = vld [vmem:[%s18908_s4 + $0x98] sm:$0xff]  ;;  %v14103_v15 = vld [vmem:[%s18908_s4 + $0x188] sm:$0xff] }
  0xaa   : > { %v14805_v29 = vpop.f32.mrf.mxu0 }
  0xab   : > { %v14835_v43 = vpop.f32.mrf.mxu1 }
  0xac   : > { %v14863_v55 = vpop.f32.mrf.mxu2 }
  0xaf   : > { %v14798_v20 = vpop.f32.mrf.mxu3 }
  0xb2   : > { %v14809_v31 = vpop.f32.mrf.mxu0 }
  0xb3   : > { %v14861_v54 = vpop.f32.mrf.mxu1 }
  0xb4   : > { %11128 = vmatmul.msk.bf16.gmra.mxu3 %vm416_vm1, %v744_v21  ;;  %v14893_v3 = vpop.f32.mrf.mxu2 }
  0xb7   : > { %v484_v22 = vpop.f32.mrf.mxu3 }
  0xb8   : > { %v485_v23 = vadd.f32 %v484_v22, %v449_v5  ;;  %v14074_v5 = vld [vmem:[%s18908_s4 + $0xa0] sm:$0xff]  ;;  %v14064_v22 = vld [vmem:[%s18908_s4 + $0x50] sm:$0xff] }
  0xb9   : > { %1089 = vmatpush.bf16.msra.mxu3 %v14074_v5  ;;  %950 = vmatpush.bf16.msra.mxu1 %v14064_v22 }
  0xba   : > { %v14816_v35 = vpop.f32.mrf.mxu0 }
  0xbb   : > { %v14891_v2 = vpop.f32.mrf.mxu1 }
  0xbd   : > { %1090 = vmatpush.bf16.msra.mxu3 %v14073_v14  ;;  %v14135_v14 = vld [vmem:[%s18908_s4 + $0x288] sm:$0xff] }
  0xbf   : > { %v486_v25 = vpop.f32.mrf.mxu3 }
  0xc0   : > { %v14936_v25 = vpop.f32.mrf.mxu2 }
  0xc2   : > { %v14833_v42 = vpop.f32.mrf.mxu0 }
  0xc3   : > { %v14924_v19 = vpop.f32.mrf.mxu1 }
  0xc4   : > { %11129 = vmatmul.msk.bf16.gmra.mxu3 %vm416_vm1, %v745_v26  ;;  %v14091_v26 = vld [vmem:[%s18908_s4 + $0x128] sm:$0xff] }
  0xc5   : > { %1250 = vmatpush.bf16.msra.mxu2 %v14091_v26 }
  0xc7   : > { %v519_v27 = vpop.f32.mrf.mxu3 }
  0xc8   : > { %v14803_v28 = vadd.f32 %v519_v27, %v475_v7  ;;  %v14104_v7 = vld [vmem:[%s18908_s4 + $0x190] sm:$0xff]  ;;  %v14141_v27 = vld [vmem:[%s18908_s4 + $0x2b8] sm:$0xff]  ;;  %v731_v50 = vpop.f32.mrf.mxu2 }
  0xc9   : > { %1415 = vmatpush.bf16.msrb.mxu0 %v14104_v7  ;;  %v14082_v7 = vld [vmem:[%s18908_s4 + $0xe0] sm:$0xff] }
  0xca   : > { %v14856_v52 = vpop.f32.mrf.mxu0 }
  0xcb   : > { %v681_v45 = vpop.f32.mrf.mxu1 }
  0xcd   : > { %1416 = vmatpush.bf16.msrb.mxu0 %v14103_v15 }
  0xcf   : > { %v14807_v30 = vpop.f32.mrf.mxu3 }
  0xd1   : > { %1417 = vmatpush.bf16.msrb.mxu0 %v14102_v24  ;;  %v477_v24 = vadd.f32 %v14792_v12, %v14789_v10  ;;  %v14078_v10 = vld [vmem:[%s18908_s4 + $0xc0] sm:$0xff] }
  0xd2   : > { %v14886_v0 = vpop.f32.mrf.mxu0  ;;  %v14094_v12 = vld [vmem:[%s18908_s4 + $0x140] sm:$0xff] }
  0xd5   : > { %1734 = vmatpush.bf16.msra.mxu0 %v14141_v27  ;;  %v14079_v27 = vld [vmem:[%s18908_s4 + $0xc8] sm:$0xff] }
  0xd7   : > { %v524_v32 = vpop.f32.mrf.mxu3 }
  0xd8   : > { %v14811_v33 = vadd.f32 %v524_v32, %v480_v16  ;;  %v14063_v32 = vld [vmem:[%s18908_s4 + $0x48] sm:$0xff] }
  0xd9   : > { %951 = vmatpush.bf16.msra.mxu1 %v14063_v32  ;;  %1735 = vmatpush.bf16.msra.mxu0 %v14140_v38 }
  0xda   : > { %v631_v16 = vpop.f32.mrf.mxu0 }
  0xdd   : > { %952 = vmatpush.bf16.msra.mxu1 %v14062_v40  ;;  %1736 = vmatpush.bf16.msra.mxu0 %v14139_v51 }
  0xdf   : > { %v14825_v39 = vpop.f32.mrf.mxu3 }
  0xe1   : > { %1167 = vmatpush.bf16.msrb.mxu1 %v14085_v46 }
  0xe2   : > { %v14979_v56 = vpop.f32.mrf.mxu0 }
  0xe5   : > { %1168 = vmatpush.bf16.msrb.mxu1 %v14084_v58 }
  0xe7   : > { %v529_v47 = vpop.f32.mrf.mxu3 }
  0xe8   : > { %v14845_v48 = vadd.f32 %v529_v47, %v485_v23  ;;  %v14072_v23 = vld [vmem:[%s18908_s4 + $0x90] sm:$0xff]  ;;  %v14101_v47 = vld [vmem:[%s18908_s4 + $0x178] sm:$0xff] }
  0xe9   : > { %1091 = vmatpush.bf16.msra.mxu3 %v14072_v23  ;;  %1169 = vmatpush.bf16.msrb.mxu1 %v14083_v63  ;;  %v14134_v23 = vld [vmem:[%s18908_s4 + $0x280] sm:$0xff]  ;;  %v14173_v63 = vld [vmem:[%s18908_s4 + $0x3b8] sm:$0xff] }
  0xea   : > { %v821_v6 = vpop.f32.mrf.mxu0 }
  0xed   : > { %1092 = vmatpush.bf16.msra.mxu3 %v14071_v34  ;;  %1170 = vmatpush.bf16.msrb.mxu1 %v14082_v7  ;;  %v534_v34 = vadd.f32 %v14807_v30, %v477_v24  ;;  %v14132_v24 = vld [vmem:[%s18908_s4 + $0x270] sm:$0xff] }
  0xef   : > { %v531_v60 = vpop.f32.mrf.mxu3 }
  0xf0   : > { %v14088_v60 = vld [vmem:[%s18908_s4 + $0x110] sm:$0xff] }
  0xf1   : > { %1093 = vmatpush.bf16.msra.mxu3 %v14070_v41  ;;  %v15075_v41 = vld [vmem:[%s18911_s7 + $0x1] ss:$0 sm:$0xff] }
  0xf2   : > { %v824_v17 = vpop.f32.mrf.mxu0 }
  0xf5   : > { %1329 = vmatpush.bf16.msrb.mxu3 %v14101_v47 }
  0xf7   : > { %v569_v9 = vpop.f32.mrf.mxu3 }
  0xf8   : > { %v583_v11 = vadd.f32 %v569_v9, %v14803_v28  ;;  %v14136_v9 = vld [vmem:[%s18908_s4 + $0x290] sm:$0xff] }
  0xf9   : > { %1330 = vmatpush.bf16.msrb.mxu3 %v14100_v59 }
  0xfa   : > { %v633_v18 = vadd.f32 %v14809_v31, %v583_v11  ;;  %v14081_v11 = vld [vmem:[%s18908_s4 + $0xd8] sm:$0xff] }
  0xfb   : > { %1171 = vmatpush.bf16.msrb.mxu1 %v14081_v11  ;;  %v14133_v11 = vld [vmem:[%s18908_s4 + $0x278] sm:$0xff] }
  0xfc   : > { %v683_v21 = vadd.f32 %v14818_v36, %v633_v18  ;;  %v14634_v36 = vmov 0.0   ;;  %v14080_v18 = vld [vmem:[%s18908_s4 + $0xd0] sm:$0xff] }
  0xfd   : > { %331 = vst [vmem:[#allocation2 + $0x20] sm:$0xff] %v14634_v36  ;;  %1331 = vmatpush.bf16.msrb.mxu3 %v14099_v1 }
  0xfe   : > { %v14945_v28 = vadd.f32 %v14820_v37, %v683_v21  ;;  %360 = vst [vmem:[#allocation3 + $0xe0] sm:$0xff] %v14634_v36  ;;  %v14090_v37 = vld [vmem:[%s18908_s4 + $0x120] sm:$0xff]  ;;  %v14096_v21 = vld [vmem:[%s18908_s4 + $0x150] sm:$0xff] }
  0xff   : > { %v14947_v31 = vpop.f32.mrf.mxu3  ;;  %362 = vst [vmem:[#allocation4 + $0x8] sm:$0xff] %v14634_v36  ;;  %1251 = vmatpush.bf16.msra.mxu2 %v14090_v37  ;;  %1172 = vmatpush.bf16.msrb.mxu1 %v14080_v18 }
 0x100   : > { %363 = vst [vmem:[#allocation4 + $0x10] sm:$0xff] %v14634_v36 }
 0x101   : > { %364 = vst [vmem:[#allocation4 + $0x18] sm:$0xff] %v14634_v36  ;;  %1332 = vmatpush.bf16.msrb.mxu3 %v14098_v8 }
 0x102   : > { %385 = vst [vmem:[#allocation4 + $0xc0] sm:$0xff] %v14634_v36 }
 0x103   : > { %386 = vst [vmem:[#allocation4 + $0xc8] sm:$0xff] %v14634_v36  ;;  %1252 = vmatpush.bf16.msra.mxu2 %v14089_v49  ;;  %1173 = vmatpush.bf16.msrb.mxu1 %v14079_v27 }
 0x104   : > { %387 = vst [vmem:[#allocation4 + $0xd0] sm:$0xff] %v14634_v36  ;;  %v826_v36 = vpop.f32.mrf.mxu0 }
 0x105   : > { %1333 = vmatpush.bf16.msrb.mxu3 %v14097_v13 }
 0x107   : > { %v574_v53 = vpop.f32.mrf.mxu3  ;;  %1253 = vmatpush.bf16.msra.mxu2 %v14088_v60  ;;  %1174 = vmatpush.bf16.msrb.mxu1 %v14078_v10  ;;  %v14115_v10 = vld [vmem:[%s18908_s4 + $0x1e8] sm:$0xff] }
 0x108   : > { %v585_v57 = vadd.f32 %v574_v53, %v14811_v33  ;;  %v14138_v33 = vld [vmem:[%s18908_s4 + $0x2a0] sm:$0xff]  ;;  %v14125_v53 = vld [vmem:[%s18908_s4 + $0x238] sm:$0xff] }
 0x109   : > { %1737 = vmatpush.bf16.msra.mxu0 %v14138_v33  ;;  %1334 = vmatpush.bf16.msrb.mxu3 %v14096_v21  ;;  %v14171_v21 = vld [vmem:[%s18908_s4 + $0x3a8] sm:$0xff] }
 0x10a   : > { %v635_v61 = vadd.f32 %v14833_v42, %v585_v57  ;;  %v14087_v42 = vld [vmem:[%s18908_s4 + $0x108] sm:$0xff] }
 0x10b   : > { %1254 = vmatpush.bf16.msra.mxu2 %v14087_v42 }
 0x10c   : > { %v685_v62 = vadd.f32 %v14861_v54, %v635_v61  ;;  %v14137_v54 = vld [vmem:[%s18908_s4 + $0x298] sm:$0xff]  ;;  %v15077_v45 = vpop.f32.mrf.mxu0 }
 0x10d   : > { %1738 = vmatpush.bf16.msra.mxu0 %v14137_v54 }
 0x10e   : > { %v15006_v4 = vadd.f32 %v14863_v55, %v685_v62  ;;  %v14086_v55 = vld [vmem:[%s18908_s4 + $0x100] sm:$0xff]  ;;  %v14123_v62 = vld [vmem:[%s18908_s4 + $0x228] sm:$0xff] }
 0x10f   : > { %v576_v5 = vpop.f32.mrf.mxu3  ;;  %1255 = vmatpush.bf16.msra.mxu2 %v14086_v55 }
 0x111   : > { %1739 = vmatpush.bf16.msra.mxu0 %v14136_v9  ;;  %v14117_v9 = vld [vmem:[%s18908_s4 + $0x1f8] sm:$0xff] }
 0x114   : > { %v831_v59 = vpop.f32.mrf.mxu0 }
 0x115   : > { %1740 = vmatpush.bf16.msra.mxu0 %v14135_v14  ;;  %v14167_v59 = vld [vmem:[%s18908_s4 + $0x388] sm:$0xff] }
 0x117   : > { %v579_v15 = vpop.f32.mrf.mxu3 }
 0x118   : > { %v587_v16 = vadd.f32 %v579_v15, %v14845_v48 }
 0x119   : > { %1741 = vmatpush.bf16.msra.mxu0 %v14134_v23 }
 0x11a   : > { %v637_v22 = vadd.f32 %v14886_v0, %v587_v16  ;;  %v14095_v0 = vld [vmem:[%s18908_s4 + $0x148] sm:$0xff] }
 0x11b   : > { %1335 = vmatpush.bf16.msrb.mxu3 %v14095_v0  ;;  %v14170_v0 = vld [vmem:[%s18908_s4 + $0x3a0] sm:$0xff] }
 0x11c   : > { %v687_v48 = vadd.f32 %v14924_v19, %v637_v22  ;;  %v584_v19 = vadd.f32 %v14947_v31, %v534_v34  ;;  %v15068_v31 = vld [vmem:[%s18911_s7] ss:$0 sm:$0xff]  ;;  %v14121_v22 = vld [vmem:[%s18908_s4 + $0x218] sm:$0xff]  ;;  %v14120_v34 = vld [vmem:[%s18908_s4 + $0x210] sm:$0xff] }
 0x11e   : > { %v15047_v26 = vadd.f32 %v14936_v25, %v687_v48  ;;  %v634_v25 = vadd.f32 %v14816_v35, %v584_v19  ;;  %v14116_v48 = vld [vmem:[%s18908_s4 + $0x1f0] sm:$0xff] }
 0x11f   : > { %v581_v32 = vpop.f32.mrf.mxu3  ;;  %1336 = vmatpush.bf16.msrb.mxu3 %v14094_v12  ;;  %v14131_v12 = vld [vmem:[%s18908_s4 + $0x268] sm:$0xff] }
 0x120   : > { %v684_v38 = vadd.f32 %v14835_v43, %v634_v25 }
 0x122   : > { %v734_v46 = vadd.f32 %v14837_v44, %v684_v38  ;;  %v14119_v38 = vld [vmem:[%s18908_s4 + $0x208] sm:$0xff] }
 0x127   : > { %v769_v37 = vpop.f32.mrf.mxu3 }
 0x128   : > { %v783_v30 = vadd.f32 %v769_v37, %v14945_v28  ;;  %v482_v28 = vadd.f32 %v14798_v20, %v14805_v29  ;;  %v14124_v29 = vld [vmem:[%s18908_s4 + $0x230] sm:$0xff] }
 0x12a   : > { %v833_v40 = vadd.f32 %v14979_v56, %v783_v30  ;;  %v536_v43 = vadd.f32 %v14825_v39, %v482_v28 }
 0x12c   : > { %v839_v35 = vmul.f32 %v15068_v31, %v833_v40  ;;  %v586_v56 = vadd.f32 %v576_v5, %v536_v43  ;;  %v14172_v5 = vld [vmem:[%s18908_s4 + $0x3b0] sm:$0xff] }
 0x12e   : > { %v845_v47 = vadd.f32 %v15075_v41, %v839_v35  ;;  %v636_v39 = vadd.f32 %v14856_v52, %v586_v56  ;;  %v14130_v35 = vld [vmem:[%s18908_s4 + $0x260] sm:$0xff] }
 0x12f   : > { %v771_v49 = vpop.f32.mrf.mxu3 }
 0x130   : > { %v850_v50 = vmax.f32 %v845_v47, 0.0  ;;  %v784_v51 = vadd.f32 %v771_v49, %v734_v46  ;;  %v686_v1 = vadd.f32 %v14891_v2, %v636_v39  ;;  %v14168_v46 = vld [vmem:[%s18908_s4 + $0x390] sm:$0xff]  ;;  %v14118_v49 = vld [vmem:[%s18908_s4 + $0x200] sm:$0xff] }
 0x132   : > { %855 = vst [vmem:[#allocation2] sm:$0xff] %v850_v50  ;;  %v834_v57 = vadd.f32 %v821_v6, %v784_v51  ;;  %v861_v58 = vpack.c.bf16 %v850_v50, %v850_v50  ;;  %v736_v6 = vadd.f32 %v14893_v3, %v686_v1  ;;  %v14129_v51 = vld [vmem:[%s18908_s4 + $0x258] sm:$0xff]  ;;  %v14155_v1 = vld [vmem:[%s18908_s4 + $0x328] sm:$0xff] }
 0x134   : > { %v840_v20 = vmul.f32 %v15068_v31, %v834_v57  ;;  %1014 = vmatmul.bf16.vlgmr.msrb.gmra.mxu2 %v861_v58  ;;  %v14157_v57 = vld [vmem:[%s18908_s4 + $0x338] sm:$0xff] }
 0x135   : > { %1572 = vmatpush.bf16.msrb.mxu2 %v14125_v53 }
 0x136   : > { %v846_v44 = vadd.f32 %v15075_v41, %v840_v20  ;;  %v14112_v20 = vld [vmem:[%s18908_s4 + $0x1d0] sm:$0xff] }
 0x137   : > { %v774_v60 = vpop.f32.mrf.mxu3 }
 0x138   : > { %v851_v61 = vmax.f32 %v846_v44, 0.0  ;;  %v785_v33 = vadd.f32 %v774_v60, %v15006_v4  ;;  %v14122_v4 = vld [vmem:[%s18908_s4 + $0x220] sm:$0xff]  ;;  %v14156_v44 = vld [vmem:[%s18908_s4 + $0x330] sm:$0xff] }
 0x139   : > { %1573 = vmatpush.bf16.msrb.mxu2 %v14124_v29  ;;  %v14128_v29 = vld [vmem:[%s18908_s4 + $0x250] sm:$0xff]  ;;  %v14166_v60 = vld [vmem:[%s18908_s4 + $0x380] sm:$0xff] }
 0x13a   : > { %856 = vst [vmem:[#allocation2 + $0x8] sm:$0xff] %v851_v61  ;;  %v835_v42 = vadd.f32 %v824_v17, %v785_v33  ;;  %v1344_v52 = vpack.c.bf16 %v851_v61, %v851_v61  ;;  %v14205_v61 = vld [vmem:[%s18908_s4 + $0x4b8] sm:$0xff]  ;;  %v14111_v33 = vld [vmem:[%s18908_s4 + $0x1c8] sm:$0xff] }
 0x13c   : > { %v841_v54 = vmul.f32 %v15068_v31, %v835_v42  ;;  %1418 = vmatmul.bf16.vlgmr.msrb.gmra.mxu0 %v1344_v52  ;;  %v14204_v42 = vld [vmem:[%s18908_s4 + $0x4b0] sm:$0xff] }
 0x13d   : > { %1574 = vmatpush.bf16.msrb.mxu2 %v14123_v62  ;;  %2058 = vmatpush.bf16.msrb.mxu0 %v14173_v63  ;;  %v14127_v62 = vld [vmem:[%s18908_s4 + $0x248] sm:$0xff] }
 0x13e   : > { %v847_v2 = vadd.f32 %v15075_v41, %v841_v54  ;;  %v14110_v54 = vld [vmem:[%s18908_s4 + $0x1c0] sm:$0xff] }
 0x13f   : > { %v776_v7 = vpop.f32.mrf.mxu3 }
 0x140   : > { %v15111_v8 = vmax.f32 %v847_v2, 0.0  ;;  %v786_v55 = vadd.f32 %v776_v7, %v736_v6  ;;  %v14165_v6 = vld [vmem:[%s18908_s4 + $0x378] sm:$0xff]  ;;  %v14154_v2 = vld [vmem:[%s18908_s4 + $0x320] sm:$0xff] }
 0x141   : > { %v878_v13 = vld [vmem:[#allocation2 + $0x1] sm:$0xff]  ;;  %1575 = vmatpush.bf16.msrb.mxu2 %v14122_v4  ;;  %2059 = vmatpush.bf16.msrb.mxu0 %v14172_v5  ;;  %v14149_v5 = vld [vmem:[%s18908_s4 + $0x2f8] sm:$0xff] }
 0x142   : > { %v1019_v14 = vld [vmem:[#allocation2 + $0x2] sm:$0xff]  ;;  %857 = vst [vmem:[#allocation2 + $0x10] sm:$0xff] %v15111_v8  ;;  %v836_v3 = vadd.f32 %v826_v36, %v786_v55  ;;  %v879_v16 = vpack.c.bf16 %v878_v13, %v878_v13 }
 0x143   : > { %v1181_v15 = vld [vmem:[#allocation2 + $0x4] sm:$0xff]  ;;  %v1020_v17 = vpack.c.bf16 %v1019_v14, %v1019_v14  ;;  %v14148_v14 = vld [vmem:[%s18908_s4 + $0x2f0] sm:$0xff] }
 0x144   : > { %v1182_v18 = vpack.c.bf16 %v1181_v15, %v1181_v15  ;;  %v842_v23 = vmul.f32 %v15068_v31, %v836_v3  ;;  %953 = vmatmul.bf16.vlgmr.msra.gmra.mxu1 %v879_v16  ;;  %v1100_v47 = vld [vmem:[#allocation2 + $0x3] sm:$0xff]  ;;  %v14164_v15 = vld [vmem:[%s18908_s4 + $0x370] sm:$0xff]  ;;  %v14153_v3 = vld [vmem:[%s18908_s4 + $0x318] sm:$0xff] }
 0x145   : > { %1094 = vmatmul.bf16.vlgmr.msra.gmra.mxu3 %v1020_v17  ;;  %1491 = vmatpush.bf16.msra.mxu1 %v14117_v9  ;;  %v1101_v53 = vpack.c.bf16 %v1100_v47, %v1100_v47  ;;  %v14126_v4 = vld [vmem:[%s18908_s4 + $0x240] sm:$0xff]  ;;  %v14203_v9 = vld [vmem:[%s18908_s4 + $0x4a8] sm:$0xff] }
 0x146   : > { %1653 = vmatpush.bf16.msra.mxu3 %v14133_v11  ;;  %v848_v27 = vadd.f32 %v15075_v41, %v842_v23  ;;  %1256 = vmatmul.bf16.vlgmr.msra.gmra.mxu2 %v1182_v18  ;;  %v14202_v16 = vld [vmem:[%s18908_s4 + $0x4a0] sm:$0xff]  ;;  %v14147_v17 = vld [vmem:[%s18908_s4 + $0x2e8] sm:$0xff] }
 0x147   : > { %2060 = vmatpush.bf16.msrb.mxu0 %v14171_v21  ;;  %v779_v32 = vpop.f32.mrf.mxu3  ;;  %1576 = vmatpush.bf16.msrb.mxu2 %v14121_v22  ;;  %v14163_v18 = vld [vmem:[%s18908_s4 + $0x368] sm:$0xff]  ;;  %v14152_v21 = vld [vmem:[%s18908_s4 + $0x310] sm:$0xff]  ;;  %v14201_v22 = vld [vmem:[%s18908_s4 + $0x498] sm:$0xff] }
 0x148   : > { %v15140_v19 = vmax.f32 %v848_v27, 0.0  ;;  %v787_v36 = vadd.f32 %v779_v32, %v15047_v26  ;;  %v14169_v26 = vld [vmem:[%s18908_s4 + $0x398] sm:$0xff]  ;;  %v14146_v23 = vld [vmem:[%s18908_s4 + $0x2e0] sm:$0xff]  ;;  %v14200_v27 = vld [vmem:[%s18908_s4 + $0x490] sm:$0xff] }
 0x149   : > { %1492 = vmatpush.bf16.msra.mxu1 %v14116_v48  ;;  %v1667_v25 = vld [vmem:[#allocation2 + $0xe] sm:$0xff]  ;;  %v14162_v48 = vld [vmem:[%s18908_s4 + $0x360] sm:$0xff]  ;;  %v14161_v32 = vld [vmem:[%s18908_s4 + $0x358] sm:$0xff] }
 0x14a   : > { %1654 = vmatpush.bf16.msra.mxu3 %v14132_v24  ;;  %858 = vst [vmem:[#allocation2 + $0x18] sm:$0xff] %v15140_v19  ;;  %v837_v37 = vadd.f32 %v15077_v45, %v787_v36  ;;  %v1668_v30 = vpack.c.bf16 %v1667_v25, %v1667_v25  ;;  %v14114_v45 = vld [vmem:[%s18908_s4 + $0x1e0] sm:$0xff]  ;;  %v1505_v58 = vld [vmem:[#allocation2 + $0xa] sm:$0xff] }
 0x14b   : > { %2061 = vmatpush.bf16.msrb.mxu0 %v14170_v0  ;;  %1577 = vmatpush.bf16.msrb.mxu2 %v14120_v34  ;;  %v1506_v39 = vpack.c.bf16 %v1505_v58, %v1505_v58  ;;  %v1424_v7 = vld [vmem:[#allocation2 + $0x9] sm:$0xff]  ;;  %v14145_v0 = vld [vmem:[%s18908_s4 + $0x2d8] sm:$0xff]  ;;  %v14150_v34 = vld [vmem:[%s18908_s4 + $0x300] sm:$0xff] }
 0x14c   : > { %v843_v40 = vmul.f32 %v15068_v31, %v837_v37  ;;  %1742 = vmatmul.bf16.vlgmr.msra.gmra.mxu0 %v1668_v30  ;;  %v1262_v31 = vld [vmem:[#allocation2 + $0x7] sm:$0xff]  ;;  %v1425_v11 = vpack.c.bf16 %v1424_v7, %v1424_v7  ;;  %v14160_v25 = vld [vmem:[%s18908_s4 + $0x350] sm:$0xff]  ;;  %v14185_v58 = vld [vmem:[%s18908_s4 + $0x418] sm:$0xff] }
 0x14d   : > { %1493 = vmatpush.bf16.msra.mxu1 %v14115_v10  ;;  %v1263_v56 = vpack.c.bf16 %v1262_v31, %v1262_v31  ;;  %v1586_v55 = vld [vmem:[#allocation2 + $0xb] sm:$0xff]  ;;  %v14189_v10 = vld [vmem:[%s18908_s4 + $0x438] sm:$0xff]  ;;  %v14198_v37 = vld [vmem:[%s18908_s4 + $0x480] sm:$0xff] }
 0x14e   : > { %1655 = vmatpush.bf16.msra.mxu3 %v14131_v12  ;;  %v849_v28 = vadd.f32 %v15075_v41, %v843_v40  ;;  %v14113_v41 = vld [vmem:[%s18908_s4 + $0x1d8] sm:$0xff]  ;;  %v1587_v13 = vpack.c.bf16 %v1586_v55, %v1586_v55  ;;  %v14151_v24 = vld [vmem:[%s18908_s4 + $0x308] sm:$0xff]  ;;  %v14144_v12 = vld [vmem:[%s18908_s4 + $0x2d0] sm:$0xff] }
 0x14f   : > { %2062 = vmatpush.bf16.msrb.mxu0 %v14169_v26  ;;  %1578 = vmatpush.bf16.msrb.mxu2 %v14119_v38  ;;  %v781_v43 = vpop.f32.mrf.mxu3  ;;  %v14199_v36 = vld [vmem:[%s18908_s4 + $0x488] sm:$0xff]  ;;  %v14188_v30 = vld [vmem:[%s18908_s4 + $0x430] sm:$0xff]  ;;  %v14237_v26 = vld [vmem:[%s18908_s4 + $0x5b8] sm:$0xff]  ;;  %v1830_v38 = vpack.c.bf16 %v15111_v8, %v15111_v8 }
 0x150   : > { %v854_v50 = vmax.f32 %v849_v28, 0.0  ;;  %v14143_v40 = vld [vmem:[%s18908_s4 + $0x2c8] sm:$0xff]  ;;  %v14236_v8 = vld [vmem:[%s18908_s4 + $0x5b0] sm:$0xff]  ;;  %v2316_v28 = vpack.c.bf16 %v15140_v19, %v15140_v19  ;;  %v14158_v47 = vld [vmem:[%s18908_s4 + $0x340] sm:$0xff] }
 0x151   : > { %1494 = vmatpush.bf16.msra.mxu1 %v14114_v45  ;;  %v1991_v63 = vld [vmem:[#allocation2 + $0x12] sm:$0xff]  ;;  %v14159_v45 = vld [vmem:[%s18908_s4 + $0x348] sm:$0xff] }
 0x152   : > { %1656 = vmatpush.bf16.msra.mxu3 %v14130_v35  ;;  %859 = vst [vmem:[#allocation2 + $0x20] sm:$0x7] %v854_v50  ;;  %v1992_v52 = vpack.c.bf16 %v1991_v63, %v1991_v63  ;;  %v14187_v35 = vld [vmem:[%s18908_s4 + $0x428] sm:$0xff]  ;;  %v14181_v31 = vld [vmem:[%s18908_s4 + $0x3f8] sm:$0xff]  ;;  %v14186_v50 = vld [vmem:[%s18908_s4 + $0x420] sm:$0xff] }
 0x153   : > { %2063 = vmatpush.bf16.msrb.mxu0 %v14168_v46  ;;  %1579 = vmatpush.bf16.msrb.mxu2 %v14118_v49  ;;  %v14142_v46 = vld [vmem:[%s18908_s4 + $0x2c0] sm:$0xff]  ;;  %v14197_v49 = vld [vmem:[%s18908_s4 + $0x478] sm:$0xff]  ;;  %v1748_v43 = vld [vmem:[#allocation2 + $0xf] sm:$0xff] }
 0x154   : > { %1175 = vmatmul.bf16.vlgmr.msrb.gmra.mxu1 %v1101_v53  ;;  %v1910_v19 = vld [vmem:[#allocation2 + $0x11] sm:$0xff] }
 0x155   : > { %1337 = vmatmul.bf16.vlgmr.msrb.gmra.mxu3 %v1263_v56  ;;  %1495 = vmatpush.bf16.msra.mxu1 %v14113_v41  ;;  %v14235_v41 = vld [vmem:[%s18908_s4 + $0x5a8] sm:$0xff]  ;;  %v1911_v53 = vpack.c.bf16 %v1910_v19, %v1910_v19  ;;  %v14180_v56 = vld [vmem:[%s18908_s4 + $0x3f0] sm:$0xff]  ;;  %v14177_v63 = vld [vmem:[%s18908_s4 + $0x3d8] sm:$0xff] }
 0x156   : > { %1657 = vmatpush.bf16.msra.mxu3 %v14129_v51  ;;  %1580 = vmatmul.bf16.vlgmr.msrb.gmra.mxu2 %v1506_v39  ;;  %v1749_v51 = vpack.c.bf16 %v1748_v43, %v1748_v43  ;;  %v14184_v39 = vld [vmem:[%s18908_s4 + $0x410] sm:$0xff]  ;;  %v14223_v43 = vld [vmem:[%s18908_s4 + $0x548] sm:$0xff]  ;;  %v2883_v19 = vld [vmem:[%s15471_s22] sm:$0xff] }
 0x157   : > { %1896 = vmatpush.bf16.msra.mxu2 %v14157_v57  ;;  %2064 = vmatpush.bf16.msrb.mxu0 %v14167_v59  ;;  %v14196_v57 = vld [vmem:[%s18908_s4 + $0x470] sm:$0xff]  ;;  %v14234_v59 = vld [vmem:[%s18908_s4 + $0x5a0] sm:$0xff] }
 0x158   : > { %v14220_v7 = vld [vmem:[%s18908_s4 + $0x530] sm:$0xff] }
 0x159   : > { %1496 = vmatpush.bf16.msra.mxu1 %v14112_v20  ;;  %v14179_v20 = vld [vmem:[%s18908_s4 + $0x3e8] sm:$0xff] }
 0x15a   : > { %1658 = vmatpush.bf16.msra.mxu3 %v14128_v29  ;;  %v14195_v29 = vld [vmem:[%s18908_s4 + $0x468] sm:$0xff] }
 0x15b   : > { %1897 = vmatpush.bf16.msra.mxu2 %v14156_v44  ;;  %2065 = vmatpush.bf16.msrb.mxu0 %v14166_v60  ;;  %v14233_v44 = vld [vmem:[%s18908_s4 + $0x598] sm:$0xff]  ;;  %v14178_v60 = vld [vmem:[%s18908_s4 + $0x3e0] sm:$0xff] }
 0x15d   : > { %1497 = vmatpush.bf16.msra.mxu1 %v14111_v33  ;;  %v14183_v33 = vld [vmem:[%s18908_s4 + $0x408] sm:$0xff] }
 0x15e   : > { %1659 = vmatpush.bf16.msra.mxu3 %v14127_v62  ;;  %2066 = vmatmul.bf16.vlgmr.msrb.gmra.mxu0 %v1992_v52  ;;  %v14232_v62 = vld [vmem:[%s18908_s4 + $0x590] sm:$0xff]  ;;  %v14231_v52 = vld [vmem:[%s18908_s4 + $0x588] sm:$0xff] }
 0x15f   : > { %2382 = vmatpush.bf16.msra.mxu0 %v14205_v61  ;;  %1898 = vmatpush.bf16.msra.mxu2 %v14155_v1  ;;  %v14194_v61 = vld [vmem:[%s18908_s4 + $0x460] sm:$0xff]  ;;  %v14193_v1 = vld [vmem:[%s18908_s4 + $0x458] sm:$0xff] }
 0x161   : > { %1498 = vmatpush.bf16.msra.mxu1 %v14110_v54  ;;  %v14221_v54 = vld [vmem:[%s18908_s4 + $0x538] sm:$0xff] }
 0x162   : > { %1660 = vmatpush.bf16.msra.mxu3 %v14126_v4  ;;  %v14176_v4 = vld [vmem:[%s18908_s4 + $0x3d0] sm:$0xff] }
 0x163   : > { %2383 = vmatpush.bf16.msra.mxu0 %v14204_v42  ;;  %1899 = vmatpush.bf16.msra.mxu2 %v14154_v2  ;;  %v14182_v42 = vld [vmem:[%s18908_s4 + $0x400] sm:$0xff] }
 0x164   : > { %1499 = vmatmul.bf16.vlgmr.msra.gmra.mxu1 %v1425_v11  ;;  %v14230_v2 = vld [vmem:[%s18908_s4 + $0x580] sm:$0xff]  ;;  %v14191_v11 = vld [vmem:[%s18908_s4 + $0x448] sm:$0xff] }
 0x165   : > { %1815 = vmatpush.bf16.msrb.mxu1 %v14149_v5  ;;  %1661 = vmatmul.bf16.vlgmr.msra.gmra.mxu3 %v1587_v13  ;;  %v14192_v5 = vld [vmem:[%s18908_s4 + $0x450] sm:$0xff]  ;;  %v2639_v13 = vld [vmem:[#allocation2 + $0x1e] sm:$0xff] }
 0x166   : > { %1977 = vmatpush.bf16.msrb.mxu3 %v14165_v6  ;;  %v2153_v6 = vld [vmem:[#allocation2 + $0x16] sm:$0xff] }
 0x167   : > { %2384 = vmatpush.bf16.msra.mxu0 %v14203_v9  ;;  %1900 = vmatpush.bf16.msra.mxu2 %v14153_v3  ;;  %v2154_v55 = vpack.c.bf16 %v2153_v6, %v2153_v6  ;;  %v14175_v9 = vld [vmem:[%s18908_s4 + $0x3c8] sm:$0xff]  ;;  %v14174_v3 = vld [vmem:[%s18908_s4 + $0x3c0] sm:$0xff]  ;;  %v2886_v6 = vld [vmem:[%s15471_s22 + $0x18] sm:$0xff] }
 0x169   : > { %1816 = vmatpush.bf16.msrb.mxu1 %v14148_v14  ;;  %v14219_v14 = vld [vmem:[%s18908_s4 + $0x528] sm:$0xff] }
 0x16a   : > { %1978 = vmatpush.bf16.msrb.mxu3 %v14164_v15  ;;  %v2640_v15 = vpack.c.bf16 %v2639_v13, %v2639_v13  ;;  %v14247_v13 = vld [vmem:[%s18908_s4 + $0x608] sm:$0xff] }
 0x16b   : > { %2385 = vmatpush.bf16.msra.mxu0 %v14202_v16  ;;  %1901 = vmatpush.bf16.msra.mxu2 %v14152_v21  ;;  %v14190_v16 = vld [vmem:[%s18908_s4 + $0x440] sm:$0xff]  ;;  %v2072_v21 = vld [vmem:[#allocation2 + $0x15] sm:$0xff] }
 0x16d   : > { %1817 = vmatpush.bf16.msrb.mxu1 %v14147_v17  ;;  %v14213_v17 = vld [vmem:[%s18908_s4 + $0x4f8] sm:$0xff] }
 0x16e   : > { %1979 = vmatpush.bf16.msrb.mxu3 %v14163_v18  ;;  %v14229_v18 = vld [vmem:[%s18908_s4 + $0x578] sm:$0xff] }
 0x16f   : > { %2386 = vmatpush.bf16.msra.mxu0 %v14201_v22  ;;  %1902 = vmatpush.bf16.msra.mxu2 %v14151_v24  ;;  %v2234_v22 = vld [vmem:[#allocation2 + $0x17] sm:$0xff] }
 0x170   : > { %v2235_v24 = vpack.c.bf16 %v2234_v22, %v2234_v22 }
 0x171   : > { %1818 = vmatpush.bf16.msrb.mxu1 %v14146_v23  ;;  %v14218_v23 = vld [vmem:[%s18908_s4 + $0x520] sm:$0xff] }
 0x172   : > { %1980 = vmatpush.bf16.msrb.mxu3 %v14162_v48  ;;  %v2073_v48 = vpack.c.bf16 %v2072_v21, %v2072_v21 }
 0x173   : > { %2387 = vmatpush.bf16.msra.mxu0 %v14200_v27  ;;  %1903 = vmatpush.bf16.msra.mxu2 %v14150_v34  ;;  %v14212_v27 = vld [vmem:[%s18908_s4 + $0x4f0] sm:$0xff]  ;;  %v14211_v34 = vld [vmem:[%s18908_s4 + $0x4e8] sm:$0xff] }
 0x175   : > { %1819 = vmatpush.bf16.msrb.mxu1 %v14145_v0  ;;  %v14228_v0 = vld [vmem:[%s18908_s4 + $0x570] sm:$0xff] }
 0x176   : > { %1981 = vmatpush.bf16.msrb.mxu3 %v14161_v32  ;;  %1904 = vmatmul.bf16.vlgmr.msra.gmra.mxu2 %v1830_v38  ;;  %v14217_v32 = vld [vmem:[%s18908_s4 + $0x518] sm:$0xff]  ;;  %v14214_v38 = vld [vmem:[%s18908_s4 + $0x500] sm:$0xff] }
 0x177   : > { %2388 = vmatpush.bf16.msra.mxu0 %v14199_v36  ;;  %2220 = vmatpush.bf16.msrb.mxu2 %v14189_v10  ;;  %v14227_v36 = vld [vmem:[%s18908_s4 + $0x568] sm:$0xff]  ;;  %v14216_v10 = vld [vmem:[%s18908_s4 + $0x510] sm:$0xff] }
 0x179   : > { %1820 = vmatpush.bf16.msrb.mxu1 %v14144_v12  ;;  %v14210_v12 = vld [vmem:[%s18908_s4 + $0x4e0] sm:$0xff] }
 0x17a   : > { %1982 = vmatpush.bf16.msrb.mxu3 %v14160_v25  ;;  %v14226_v25 = vld [vmem:[%s18908_s4 + $0x560] sm:$0xff] }
 0x17b   : > { %2389 = vmatpush.bf16.msra.mxu0 %v14198_v37  ;;  %2221 = vmatpush.bf16.msrb.mxu2 %v14188_v30  ;;  %v14215_v37 = vld [vmem:[%s18908_s4 + $0x508] sm:$0xff]  ;;  %v14209_v30 = vld [vmem:[%s18908_s4 + $0x4d8] sm:$0xff] }
 0x17d   : > { %1821 = vmatpush.bf16.msrb.mxu1 %v14143_v40  ;;  %v14253_v40 = vld [vmem:[%s18908_s4 + $0x638] sm:$0xff] }
 0x17e   : > { %1983 = vmatpush.bf16.msrb.mxu3 %v14159_v45  ;;  %2390 = vmatmul.bf16.vlgmr.msra.gmra.mxu0 %v2316_v28  ;;  %v14208_v45 = vld [vmem:[%s18908_s4 + $0x4d0] sm:$0xff]  ;;  %v2925_v28 = vld [vmem:[%s18907_s3] sm:$0xf] }
 0x17f   : > { %2706 = vmatpush.bf16.msrb.mxu0 %v14237_v26  ;;  %2222 = vmatpush.bf16.msrb.mxu2 %v14187_v35  ;;  %v14225_v26 = vld [vmem:[%s18908_s4 + $0x558] sm:$0xff]  ;;  %v14224_v35 = vld [vmem:[%s18908_s4 + $0x550] sm:$0xff] }
 0x181   : > { %1822 = vmatpush.bf16.msrb.mxu1 %v14142_v46  ;;  %v14252_v46 = vld [vmem:[%s18908_s4 + $0x630] sm:$0xff] }
 0x182   : > { %1984 = vmatpush.bf16.msrb.mxu3 %v14158_v47  ;;  %v3137_v47 = vsel %vm426_vm0, %v2925_v28, 0 }
 0x183   : > { %2707 = vmatpush.bf16.msrb.mxu0 %v14236_v8  ;;  %2223 = vmatpush.bf16.msrb.mxu2 %v14186_v50  ;;  %v2477_v8 = vld [vmem:[#allocation2 + $0x1c] sm:$0xff]  ;;  %v2884_v50 = vld [vmem:[%s15471_s22 + $0x8] sm:$0xff] }
 0x184   : > { %1823 = vmatmul.bf16.vlgmr.msrb.gmra.mxu1 %v1749_v51  ;;  %v2911_v51 = vpack.c.bf16 %v2884_v50, %v2883_v19 }
 0x185   : > { %2139 = vmatpush.bf16.msra.mxu1 %v14181_v31  ;;  %1985 = vmatmul.bf16.vlgmr.msrb.gmra.mxu3 %v1911_v53  ;;  %v2478_v31 = vpack.c.bf16 %v2477_v8, %v2477_v8  ;;  %v12318_v53 = vld [vmem:[%s18907_s3 + $0x4] sm:$0xf] }
 0x186   : > { %2301 = vmatpush.bf16.msra.mxu3 %v14197_v49  ;;  %v14207_v49 = vld [vmem:[%s18908_s4 + $0x4c8] sm:$0xff]  ;;  %v2720_v8 = vld [vmem:[#allocation2 + $0x1f] sm:$0xff] }
 0x187   : > { %2708 = vmatpush.bf16.msrb.mxu0 %v14235_v41  ;;  %2224 = vmatpush.bf16.msrb.mxu2 %v14185_v58  ;;  %v14251_v41 = vld [vmem:[%s18908_s4 + $0x628] sm:$0xff]  ;;  %v14245_v58 = vld [vmem:[%s18908_s4 + $0x5f8] sm:$0xff] }
 0x189   : > { %2140 = vmatpush.bf16.msra.mxu1 %v14180_v56  ;;  %v14206_v56 = vld [vmem:[%s18908_s4 + $0x4c0] sm:$0xff] }
 0x18a   : > { %2302 = vmatpush.bf16.msra.mxu3 %v14196_v57  ;;  %v14222_v57 = vld [vmem:[%s18908_s4 + $0x540] sm:$0xff] }
 0x18b   : > { %2709 = vmatpush.bf16.msrb.mxu0 %v14234_v59  ;;  %2225 = vmatpush.bf16.msrb.mxu2 %v14184_v39  ;;  %v2396_v59 = vld [vmem:[#allocation2 + $0x19] sm:$0xff] }
 0x18c   : > { %v14250_v39 = vld [vmem:[%s18908_s4 + $0x620] sm:$0xff] }
 0x18d   : > { %2141 = vmatpush.bf16.msra.mxu1 %v14179_v20  ;;  %v2558_v20 = vld [vmem:[#allocation2 + $0x1d] sm:$0xff] }
 0x18e   : > { %2303 = vmatpush.bf16.msra.mxu3 %v14195_v29  ;;  %v3013_v29 = vsel %vm426_vm0, %v12318_v53, 0 }
 0x18f   : > { %2710 = vmatpush.bf16.msrb.mxu0 %v14233_v44  ;;  %2226 = vmatpush.bf16.msrb.mxu2 %v14183_v33  ;;  %v12377_v44 = vld [vmem:[%s18907_s3 + $0x10] sm:$0xf]  ;;  %v2559_v33 = vpack.c.bf16 %v2558_v20, %v2558_v20 }
 0x191   : > { %2142 = vmatpush.bf16.msra.mxu1 %v14178_v60 }
 0x192   : > { %2304 = vmatpush.bf16.msra.mxu3 %v14194_v61  ;;  %v2397_v61 = vpack.c.bf16 %v2396_v59, %v2396_v59  ;;  %v2890_v59 = vld [vmem:[%s15471_s22 + $0x38] sm:$0xff] }
 0x193   : > { %2711 = vmatpush.bf16.msrb.mxu0 %v14232_v62  ;;  %2227 = vmatpush.bf16.msrb.mxu2 %v14182_v42  ;;  %v14244_v62 = vld [vmem:[%s18908_s4 + $0x5f0] sm:$0xff]  ;;  %v14249_v42 = vld [vmem:[%s18908_s4 + $0x618] sm:$0xff] }
 0x195   : > { %2143 = vmatpush.bf16.msra.mxu1 %v14177_v63 }
 0x196   : > { %2305 = vmatpush.bf16.msra.mxu3 %v14193_v1  ;;  %2228 = vmatmul.bf16.vlgmr.msrb.gmra.mxu2 %v2154_v55  ;;  %v3697_v1 = vsel %vm426_vm0, %v12377_v44, 0 }
 0x197   : > { %2712 = vmatpush.bf16.msrb.mxu0 %v14231_v52  ;;  %2544 = vmatpush.bf16.msra.mxu2 %v14221_v54  ;;  %v14243_v52 = vld [vmem:[%s18908_s4 + $0x5e8] sm:$0xff]  ;;  %v14248_v54 = vld [vmem:[%s18908_s4 + $0x610] sm:$0xff] }
 0x199   : > { %2144 = vmatpush.bf16.msra.mxu1 %v14176_v4 }
 0x19a   : > { %2306 = vmatpush.bf16.msra.mxu3 %v14192_v5  ;;  %v2885_v5 = vld [vmem:[%s15471_s22 + $0x10] sm:$0xff] }
 0x19b   : > { %2713 = vmatpush.bf16.msrb.mxu0 %v14230_v2  ;;  %2545 = vmatpush.bf16.msra.mxu2 %v14220_v7  ;;  %v14242_v7 = vld [vmem:[%s18908_s4 + $0x5e0] sm:$0xff] }
 0x19d   : > { %2145 = vmatpush.bf16.msra.mxu1 %v14175_v9  ;;  %v2912_v9 = vpack.c.bf16 %v2886_v6, %v2885_v5 }
 0x19e   : > { %2307 = vmatpush.bf16.msra.mxu3 %v14191_v11  ;;  %2714 = vmatmul.bf16.vlgmr.msrb.gmra.mxu0 %v2640_v15  ;;  %v2927_v15 = vld [vmem:[%s15471_s22 + $0x9] sm:$0xff] }
 0x19f   : > { %2546 = vmatpush.bf16.msra.mxu2 %v14219_v14  ;;  %3146 = vmatpush.bf16.msra.mxu0 %v3137_v47  ;;  %v2926_v14 = vld [vmem:[%s15471_s22 + $0x1] sm:$0xff]  ;;  %v2928_v47 = vld [vmem:[%s15471_s22 + $0x11] sm:$0xff] }
 0x1a0   : > { %v2954_v21 = vpack.c.bf16 %v2927_v15, %v2926_v14  ;;  %v2932_v15 = vld [vmem:[%s15471_s22 + $0x31] sm:$0xff] }
 0x1a1   : > { %2146 = vmatpush.bf16.msra.mxu1 %v14174_v3  ;;  %v14241_v3 = vld [vmem:[%s18908_s4 + $0x5d8] sm:$0xff] }
 0x1a2   : > { %2308 = vmatpush.bf16.msra.mxu3 %v14190_v16  ;;  %v12362_v16 = vld [vmem:[%s18907_s3 + $0xc] sm:$0xf] }
 0x1a3   : > { %2547 = vmatpush.bf16.msra.mxu2 %v14218_v23  ;;  %v2801_v23 = vld [vmem:[#allocation2 + $0x20] sm:$0xff] }
 0x1a4   : > { %2147 = vmatmul.bf16.vlgmr.msra.gmra.mxu1 %v2073_v48  ;;  %v3501_v48 = vsel %vm426_vm0, %v12362_v16, 0 }
 0x1a5   : > { %2463 = vmatpush.bf16.msrb.mxu1 %v14213_v17  ;;  %2309 = vmatmul.bf16.vlgmr.msra.gmra.mxu3 %v2235_v24  ;;  %v14246_v17 = vld [vmem:[%s18908_s4 + $0x600] sm:$0xff] }
 0x1a6   : > { %2625 = vmatpush.bf16.msrb.mxu3 %v14229_v18 }
 0x1a7   : > { %2548 = vmatpush.bf16.msra.mxu2 %v14217_v32 }
 0x1a9   : > { %2464 = vmatpush.bf16.msrb.mxu1 %v14212_v27  ;;  %v14240_v27 = vld [vmem:[%s18908_s4 + $0x5d0] sm:$0xff] }
 0x1aa   : > { %2626 = vmatpush.bf16.msrb.mxu3 %v14228_v0 }
 0x1ab   : > { %2549 = vmatpush.bf16.msra.mxu2 %v14216_v10 }
 0x1ad   : > { %2465 = vmatpush.bf16.msrb.mxu1 %v14211_v34  ;;  %v2802_v34 = vpack.c.bf16 %v2801_v23, %v2801_v23 }
 0x1ae   : > { %2627 = vmatpush.bf16.msrb.mxu3 %v14227_v36  ;;  %12333 = vmatmul.msk.bf16.vlgmr.msra.gmra.mxu0 %vm416_vm1, %v2911_v51  ;;  %v14239_v36 = vld [vmem:[%s18908_s4 + $0x5c8] sm:$0xff] }
 0x1af   : > { %2550 = vmatpush.bf16.msra.mxu2 %v14215_v37  ;;  %v12347_v37 = vld [vmem:[%s18907_s3 + $0x8] sm:$0xf] }
 0x1b0   : > { %v3305_v28 = vsel %vm426_vm0, %v12347_v37, 0  ;;  %v2935_v37 = vld [vmem:[%s15471_s22 + $0x49] sm:$0xff] }
 0x1b1   : > { %2466 = vmatpush.bf16.msrb.mxu1 %v14210_v12  ;;  %v2887_v12 = vld [vmem:[%s15471_s22 + $0x20] sm:$0xff] }
 0x1b2   : > { %2628 = vmatpush.bf16.msrb.mxu3 %v14226_v25  ;;  %v2888_v25 = vld [vmem:[%s15471_s22 + $0x28] sm:$0xff] }
 0x1b3   : > { %2551 = vmatpush.bf16.msra.mxu2 %v14214_v38 }
 0x1b5   : > { %2467 = vmatpush.bf16.msrb.mxu1 %v14209_v30 }
 0x1b6   : > { %2629 = vmatpush.bf16.msrb.mxu3 %v14225_v26  ;;  %2552 = vmatmul.bf16.vlgmr.msra.gmra.mxu2 %v2478_v31  ;;  %v14238_v26 = vld [vmem:[%s18908_s4 + $0x5c0] sm:$0xff] }
 0x1b7   : > { %2868 = vmatpush.bf16.msrb.mxu2 %v14253_v40  ;;  %v1015_v60 = vpop.f32.mrf.mxu2  ;;  %v15555_v40 = vpack.c.bf16 %v2888_v25, %v2887_v12  ;;  %v2929_v31 = vld [vmem:[%s15471_s22 + $0x19] sm:$0xff]  ;;  %v2934_v25 = vld [vmem:[%s15471_s22 + $0x41] sm:$0xff] }
 0x1b8   : > { %v15562_v19 = vpack.c.bf16 %v2929_v31, %v2928_v47  ;;  %v3225_v47 = vld [vmem:[%s15471_s22 + $0x3a] sm:$0xff] }
 0x1b9   : > { %2468 = vmatpush.bf16.msrb.mxu1 %v14208_v45  ;;  %v15507_v63 = vpop.f32.mrf.mxu0 }
 0x1ba   : > { %2630 = vmatpush.bf16.msrb.mxu3 %v14224_v35 }
 0x1bb   : > { %2869 = vmatpush.bf16.msrb.mxu2 %v14252_v46 }
 0x1bd   : > { %2469 = vmatpush.bf16.msrb.mxu1 %v14207_v49  ;;  %v2721_v49 = vpack.c.bf16 %v2720_v8, %v2720_v8  ;;  %v2895_v8 = vld [vmem:[%s15471_s22 + $0x60] sm:$0xff] }
 0x1be   : > { %2631 = vmatpush.bf16.msrb.mxu3 %v14223_v43  ;;  %12334 = vmatmul.msk.bf16.gmra.mxu0 %vm416_vm1, %v2912_v9 }
 0x1bf   : > { %2870 = vmatpush.bf16.msrb.mxu2 %v14251_v41  ;;  %v1017_v4 = vpop.f32.mrf.mxu2 }
 0x1c1   : > { %2470 = vmatpush.bf16.msrb.mxu1 %v14206_v56  ;;  %v954_v2 = vpop.f32.mrf.mxu1  ;;  %v1421_v55 = vpop.f32.mrf.mxu0 }
 0x1c2   : > { %2632 = vmatpush.bf16.msrb.mxu3 %v14222_v57  ;;  %v1016_v11 = vadd.f32 %v1015_v60, %v954_v2  ;;  %v2891_v2 = vld [vmem:[%s15471_s22 + $0x40] sm:$0xff] }
 0x1c3   : > { %2871 = vmatpush.bf16.msrb.mxu2 %v14250_v39  ;;  %v3219_v39 = vld [vmem:[%s15471_s22 + $0xa] sm:$0xff] }
 0x1c4   : > { %2471 = vmatmul.bf16.vlgmr.msrb.gmra.mxu1 %v2397_v61 }
 0x1c5   : > { %2787 = vmatpush.bf16.msra.mxu1 %v14245_v58  ;;  %2633 = vmatmul.bf16.vlgmr.msrb.gmra.mxu3 %v2559_v33  ;;  %v2889_v58 = vld [vmem:[%s15471_s22 + $0x30] sm:$0xff] }
 0x1c6   : > { %3022 = vmatpush.bf16.msra.mxu3 %v3013_v29  ;;  %v3218_v29 = vld [vmem:[%s15471_s22 + $0x2] sm:$0xff]  ;;  %v15572_v44 = vpack.c.bf16 %v2890_v59, %v2889_v58 }
 0x1c7   : > { %2872 = vmatpush.bf16.msrb.mxu2 %v14249_v42  ;;  %v2931_v42 = vld [vmem:[%s15471_s22 + $0x29] sm:$0xff] }
 0x1c8   : > { %v1095_v18 = vpop.f32.mrf.mxu3 }
 0x1c9   : > { %2788 = vmatpush.bf16.msra.mxu1 %v14244_v62  ;;  %v1099_v22 = vadd.f32 %v1095_v18, %v1016_v11  ;;  %v956_v24 = vpop.f32.mrf.mxu1  ;;  %v1257_v0 = vpop.f32.mrf.mxu2  ;;  %v3221_v11 = vld [vmem:[%s15471_s22 + $0x1a] sm:$0xff] }
 0x1ca   : > { %3706 = vmatpush.bf16.msrb.mxu3 %v3697_v1  ;;  %v1743_v32 = vpop.f32.mrf.mxu0  ;;  %v2930_v1 = vld [vmem:[%s15471_s22 + $0x21] sm:$0xff] }
 0x1cb   : > { %2873 = vmatpush.bf16.msrb.mxu2 %v14248_v54  ;;  %v15578_v54 = vpack.c.bf16 %v2931_v42, %v2930_v1  ;;  %v3222_v24 = vld [vmem:[%s15471_s22 + $0x22] sm:$0xff] }
 0x1cd   : > { %2789 = vmatpush.bf16.msra.mxu1 %v14243_v52 }
 0x1ce   : > { %12335 = vmatmul.msk.bf16.gmra.mxu0 %vm416_vm1, %v15555_v40 }
 0x1cf   : > { %2874 = vmatpush.bf16.msrb.mxu2 %v14247_v13 }
 0x1d0   : > { %v1097_v10 = vpop.f32.mrf.mxu3 }
 0x1d1   : > { %2790 = vmatpush.bf16.msra.mxu1 %v14242_v7  ;;  %v1176_v30 = vpop.f32.mrf.mxu1  ;;  %v1259_v38 = vpop.f32.mrf.mxu2  ;;  %v2892_v7 = vld [vmem:[%s15471_s22 + $0x48] sm:$0xff] }
 0x1d2   : > { %v1180_v45 = vadd.f32 %v1176_v30, %v1099_v22  ;;  %v1745_v35 = vpop.f32.mrf.mxu0  ;;  %v15589_v13 = vpack.c.bf16 %v2892_v7, %v2891_v2  ;;  %v15617_v38 = vpack.c.bf16 %v2935_v37, %v2934_v25  ;;  %v2899_v7 = vld [vmem:[%s15471_s22 + $0x80] sm:$0xff]  ;;  %v2901_v25 = vld [vmem:[%s15471_s22 + $0x90] sm:$0xff]  ;;  %v2902_v37 = vld [vmem:[%s15471_s22 + $0x98] sm:$0xff] }
 0x1d3   : > { %2875 = vmatpush.bf16.msrb.mxu2 %v14246_v17 }
 0x1d4   : > { %v1261_v46 = vadd.f32 %v1257_v0, %v1180_v45 }
 0x1d5   : > { %2791 = vmatpush.bf16.msra.mxu1 %v14241_v3  ;;  %12319 = vmatmul.msk.bf16.vlgmr.msra.gmra.mxu3 %vm416_vm1, %v2954_v21  ;;  %v2933_v3 = vld [vmem:[%s15471_s22 + $0x39] sm:$0xff] }
 0x1d6   : > { %2876 = vmatmul.bf16.vlgmr.msrb.gmra.mxu2 %v2802_v34  ;;  %v15597_v16 = vpack.c.bf16 %v2933_v3, %v2932_v15  ;;  %v2894_v34 = vld [vmem:[%s15471_s22 + $0x58] sm:$0xff] }
 0x1d7   : > { %3510 = vmatpush.bf16.msra.mxu2 %v3501_v48 }
 0x1d8   : > { %v1338_v43 = vpop.f32.mrf.mxu3 }
 0x1d9   : > { %2792 = vmatpush.bf16.msra.mxu1 %v14240_v27  ;;  %v1342_v50 = vadd.f32 %v1338_v43, %v1261_v46  ;;  %v1178_v41 = vpop.f32.mrf.mxu1  ;;  %v1581_v51 = vpop.f32.mrf.mxu2  ;;  %v3223_v27 = vld [vmem:[%s15471_s22 + $0x2a] sm:$0xff]  ;;  %v3224_v46 = vld [vmem:[%s15471_s22 + $0x32] sm:$0xff] }
 0x1da   : > { %v15611_v12 = vpack.c.bf16 %v3223_v27, %v3222_v24  ;;  %v2936_v43 = vld [vmem:[%s15471_s22 + $0x51] sm:$0xff] }
 0x1db   : > { %v1423_v53 = vadd.f32 %v15507_v63, %v1342_v50  ;;  %v2067_v56 = vpop.f32.mrf.mxu0  ;;  %v3246_v63 = vpack.c.bf16 %v3219_v39, %v3218_v29  ;;  %v2937_v50 = vld [vmem:[%s15471_s22 + $0x59] sm:$0xff]  ;;  %v2897_v29 = vld [vmem:[%s15471_s22 + $0x70] sm:$0xff] }
 0x1dc   : > { %v2898_v39 = vld [vmem:[%s15471_s22 + $0x78] sm:$0xff] }
 0x1dd   : > { %2793 = vmatpush.bf16.msra.mxu1 %v14239_v36 }
 0x1de   : > { %12336 = vmatmul.msk.bf16.gmra.mxu0 %vm416_vm1, %v15572_v44 }
 0x1e0   : > { %v1340_v57 = vpop.f32.mrf.mxu3 }
 0x1e1   : > { %2794 = vmatpush.bf16.msra.mxu1 %v14238_v26  ;;  %v1500_v20 = vpop.f32.mrf.mxu1  ;;  %v1583_v61 = vpop.f32.mrf.mxu2 }
 0x1e2   : > { %v1504_v60 = vadd.f32 %v1500_v20, %v1423_v53  ;;  %v15637_v53 = vpack.c.bf16 %v2937_v50, %v2936_v43  ;;  %v3226_v61 = vld [vmem:[%s15471_s22 + $0x42] sm:$0xff] }
 0x1e3   : > { %v2069_v33 = vpop.f32.mrf.mxu0 }
 0x1e4   : > { %2795 = vmatmul.bf16.vlgmr.msra.gmra.mxu1 %v2721_v49  ;;  %v1585_v62 = vadd.f32 %v1581_v51, %v1504_v60  ;;  %v15631_v49 = vpack.c.bf16 %v3225_v47, %v3224_v46  ;;  %v3227_v33 = vld [vmem:[%s15471_s22 + $0x4a] sm:$0xff]  ;;  %v2942_v46 = vld [vmem:[%s15471_s22 + $0x81] sm:$0xff] }
 0x1e5   : > { %3314 = vmatpush.bf16.msrb.mxu1 %v3305_v28  ;;  %12320 = vmatmul.msk.bf16.gmra.mxu3 %vm416_vm1, %v15562_v19  ;;  %v2896_v28 = vld [vmem:[%s15471_s22 + $0x68] sm:$0xff]  ;;  %v15651_v42 = vpack.c.bf16 %v3227_v33, %v3226_v61 }
 0x1e6   : > { %12363 = vmatmul.msk.bf16.vlgmr.msra.gmra.mxu2 %vm416_vm1, %v2912_v9  ;;  %v3220_v9 = vld [vmem:[%s15471_s22 + $0x12] sm:$0xff]  ;;  %v15629_v31 = vpack.c.bf16 %v2896_v28, %v2895_v8  ;;  %v15689_v8 = vpack.c.bf16 %v2902_v37, %v2901_v25  ;;  %v2943_v47 = vld [vmem:[%s15471_s22 + $0x89] sm:$0xff] }
 0x1e7   : > { %v15591_v14 = vpack.c.bf16 %v3221_v11, %v3220_v9  ;;  %v3228_v9 = vld [vmem:[%s15471_s22 + $0x52] sm:$0xff]  ;;  %v3229_v11 = vld [vmem:[%s15471_s22 + $0x5a] sm:$0xff]  ;;  %v3235_v25 = vld [vmem:[%s15471_s22 + $0x8a] sm:$0xff] }
 0x1e8   : > { %v1662_v52 = vpop.f32.mrf.mxu3 }
 0x1e9   : > { %v1666_v4 = vadd.f32 %v1662_v52, %v1585_v62  ;;  %v1502_v5 = vpop.f32.mrf.mxu1  ;;  %v15649_v62 = vpack.c.bf16 %v2898_v39, %v2897_v29  ;;  %v2938_v52 = vld [vmem:[%s15471_s22 + $0x61] sm:$0xff]  ;;  %v12392_v29 = vld [vmem:[%s18907_s3 + $0x14] sm:$0xf] }
 0x1ea   : > { %v3232_v39 = vld [vmem:[%s15471_s22 + $0x72] sm:$0xff]  ;;  %v3893_v33 = vsel %vm426_vm0, %v12392_v29, 0 }
 0x1eb   : > { %v1747_v6 = vadd.f32 %v1743_v32, %v1666_v4  ;;  %v2893_v32 = vld [vmem:[%s15471_s22 + $0x50] sm:$0xff]  ;;  %3902 = vmatpush.bf16.msrb.mxu0 %v3893_v33 }
 0x1ec   : > { %v15609_v36 = vpack.c.bf16 %v2894_v34, %v2893_v32  ;;  %v2939_v4 = vld [vmem:[%s15471_s22 + $0x69] sm:$0xff] }
 0x1ee   : > { %12337 = vmatmul.msk.bf16.gmra.mxu0 %vm416_vm1, %v15589_v13 }
 0x1f0   : > { %v1664_v55 = vpop.f32.mrf.mxu3 }
 0x1f1   : > { %v2900_v55 = vld [vmem:[%s15471_s22 + $0x88] sm:$0xff] }
 0x1f2   : > { %v15669_v15 = vpack.c.bf16 %v2900_v55, %v2899_v7 }
 0x1f4   : > { %12348 = vmatmul.msk.bf16.vlgmr.msrb.gmra.mxu1 %vm416_vm1, %v3246_v63 }
 0x1f5   : > { %12321 = vmatmul.msk.bf16.gmra.mxu3 %vm416_vm1, %v15578_v54 }
 0x1f6   : > { %12364 = vmatmul.msk.bf16.gmra.mxu2 %vm416_vm1, %v15555_v40 }
 0x1f9   : > { %v1905_v18 = vpop.f32.mrf.mxu2 }
 0x1fb   : > { %v2391_v17 = vpop.f32.mrf.mxu0 }
 0x1fe   : > { %12338 = vmatmul.msk.bf16.gmra.mxu0 %vm416_vm1, %v15609_v36 }
 0x201   : > { %v1824_v21 = vpop.f32.mrf.mxu1  ;;  %v1907_v0 = vpop.f32.mrf.mxu2 }
 0x202   : > { %v1828_v22 = vadd.f32 %v1824_v21, %v1747_v6  ;;  %v15657_v6 = vpack.c.bf16 %v2939_v4, %v2938_v52  ;;  %v2940_v21 = vld [vmem:[%s15471_s22 + $0x71] sm:$0xff] }
 0x203   : > { %v2393_v23 = vpop.f32.mrf.mxu0  ;;  %v2944_v4 = vld [vmem:[%s15471_s22 + $0x91] sm:$0xff] }
 0x204   : > { %12349 = vmatmul.msk.bf16.gmra.mxu1 %vm416_vm1, %v15591_v14  ;;  %v1909_v48 = vadd.f32 %v1905_v18, %v1828_v22  ;;  %v15671_v18 = vpack.c.bf16 %v3229_v11, %v3228_v9  ;;  %v2941_v22 = vld [vmem:[%s15471_s22 + $0x79] sm:$0xff] }
 0x205   : > { %12322 = vmatmul.msk.bf16.gmra.mxu3 %vm416_vm1, %v15597_v16  ;;  %v15677_v23 = vpack.c.bf16 %v2941_v22, %v2940_v21 }
 0x206   : > { %12365 = vmatmul.msk.bf16.gmra.mxu2 %vm416_vm1, %v15572_v44 }
 0x208   : > { %v1986_v10 = vpop.f32.mrf.mxu3 }
 0x209   : > { %v1990_v30 = vadd.f32 %v1986_v10, %v1909_v48  ;;  %v1826_v26 = vpop.f32.mrf.mxu1 }
 0x20a   : > { %v3230_v26 = vld [vmem:[%s15471_s22 + $0x62] sm:$0xff] }
 0x20b   : > { %v2071_v45 = vadd.f32 %v2067_v56, %v1990_v30 }
 0x20e   : > { %12339 = vmatmul.msk.bf16.gmra.mxu0 %vm416_vm1, %v15629_v31 }
 0x210   : > { %v1988_v35 = vpop.f32.mrf.mxu3 }
 0x214   : > { %12350 = vmatmul.msk.bf16.gmra.mxu1 %vm416_vm1, %v15611_v12 }
 0x215   : > { %12323 = vmatmul.msk.bf16.gmra.mxu3 %vm416_vm1, %v15617_v38 }
 0x216   : > { %12366 = vmatmul.msk.bf16.gmra.mxu2 %vm416_vm1, %v15589_v13 }
 0x219   : > { %v2229_v51 = vpop.f32.mrf.mxu2 }
 0x21b   : > { %v2715_v41 = vpop.f32.mrf.mxu0 }
 0x21e   : > { %12340 = vmatmul.msk.bf16.gmra.mxu0 %vm416_vm1, %v15649_v62 }
 0x221   : > { %v2148_v56 = vpop.f32.mrf.mxu1  ;;  %v2231_v20 = vpop.f32.mrf.mxu2 }
 0x222   : > { %v2152_v57 = vadd.f32 %v2148_v56, %v2071_v45  ;;  %v3231_v45 = vld [vmem:[%s15471_s22 + $0x6a] sm:$0xff] }
 0x223   : > { %v2717_v58 = vpop.f32.mrf.mxu0  ;;  %v15691_v28 = vpack.c.bf16 %v3231_v45, %v3230_v26  ;;  %v2904_v20 = vld [vmem:[%s15471_s22 + $0xa8] sm:$0xff] }
 0x224   : > { %12351 = vmatmul.msk.bf16.gmra.mxu1 %vm416_vm1, %v15631_v49  ;;  %v2233_v59 = vadd.f32 %v2229_v51, %v2152_v57  ;;  %v15697_v51 = vpack.c.bf16 %v2943_v47, %v2942_v46  ;;  %v2946_v26 = vld [vmem:[%s15471_s22 + $0xa1] sm:$0xff]  ;;  %v2947_v45 = vld [vmem:[%s15471_s22 + $0xa9] sm:$0xff] }
 0x225   : > { %12324 = vmatmul.msk.bf16.gmra.mxu3 %vm416_vm1, %v15637_v53 }
 0x226   : > { %12367 = vmatmul.msk.bf16.gmra.mxu2 %vm416_vm1, %v15609_v36 }
 0x228   : > { %v2310_v60 = vpop.f32.mrf.mxu3 }
 0x229   : > { %v2314_v63 = vadd.f32 %v2310_v60, %v2233_v59  ;;  %v2150_v1 = vpop.f32.mrf.mxu1  ;;  %v2903_v59 = vld [vmem:[%s15471_s22 + $0xa0] sm:$0xff] }
 0x22a   : > { %v3233_v60 = vld [vmem:[%s15471_s22 + $0x7a] sm:$0xff]  ;;  %v15712_v61 = vpack.c.bf16 %v2904_v20, %v2903_v59 }
 0x22b   : > { %v2395_v5 = vadd.f32 %v2391_v17, %v2314_v63  ;;  %v3148_v3 = vpop.f32.mrf.mxu0  ;;  %v12407_v63 = vld [vmem:[%s18907_s3 + $0x18] sm:$0xf]  ;;  %v15719_v52 = vpack.c.bf16 %v3233_v60, %v3232_v39 }
 0x22c   : > { %v4089_v1 = vsel %vm426_vm0, %v12407_v63, 0  ;;  %v2907_v63 = vld [vmem:[%s15471_s22 + $0xc0] sm:$0xff] }
 0x22d   : > { %4098 = vmatpush.bf16.msra.mxu1 %v4089_v1  ;;  %v2908_v1 = vld [vmem:[%s15471_s22 + $0xc8] sm:$0xff] }
 0x22e   : > { %12341 = vmatmul.msk.bf16.gmra.mxu0 %vm416_vm1, %v15669_v15 }
 0x230   : > { %v2312_v2 = vpop.f32.mrf.mxu3 }
 0x233   : > { %v3150_v32 = vpop.f32.mrf.mxu0 }
 0x234   : > { %12352 = vmatmul.msk.bf16.gmra.mxu1 %vm416_vm1, %v15651_v42 }
 0x235   : > { %12325 = vmatmul.msk.bf16.gmra.mxu3 %vm416_vm1, %v15657_v6 }
 0x236   : > { %12368 = vmatmul.msk.bf16.gmra.mxu2 %vm416_vm1, %v15629_v31 }
 0x239   : > { %v2553_v17 = vpop.f32.mrf.mxu2 }
 0x23b   : > { %v3153_v43 = vpop.f32.mrf.mxu0 }
 0x23e   : > { %12342 = vmatmul.msk.bf16.gmra.mxu0 %vm416_vm1, %v15689_v8 }
 0x241   : > { %v2472_v48 = vpop.f32.mrf.mxu1  ;;  %v2555_v0 = vpop.f32.mrf.mxu2 }
 0x242   : > { %v2476_v24 = vadd.f32 %v2472_v48, %v2395_v5  ;;  %v2945_v5 = vld [vmem:[%s15471_s22 + $0x99] sm:$0xff] }
 0x244   : > { %12353 = vmatmul.msk.bf16.gmra.mxu1 %vm416_vm1, %v15671_v18  ;;  %v2557_v27 = vadd.f32 %v2553_v17, %v2476_v24 }
 0x245   : > { %12326 = vmatmul.msk.bf16.gmra.mxu3 %vm416_vm1, %v15677_v23 }
 0x246   : > { %12369 = vmatmul.msk.bf16.gmra.mxu2 %vm416_vm1, %v15649_v62 }
 0x248   : > { %v2634_v34 = vpop.f32.mrf.mxu3 }
 0x249   : > { %v2638_v10 = vadd.f32 %v2634_v34, %v2557_v27  ;;  %v2474_v30 = vpop.f32.mrf.mxu1  ;;  %v2906_v34 = vld [vmem:[%s15471_s22 + $0xb8] sm:$0xff] }
 0x24b   : > { %v2719_v35 = vadd.f32 %v2715_v41, %v2638_v10  ;;  %v3155_v41 = vpop.f32.mrf.mxu0  ;;  %v3234_v10 = vld [vmem:[%s15471_s22 + $0x82] sm:$0xff] }
 0x24c   : > { %v15741_v30 = vpack.c.bf16 %v3235_v25, %v3234_v10 }
 0x24e   : > { %12343 = vmatmul.msk.bf16.gmra.mxu0 %vm416_vm1, %v15712_v61 }
 0x250   : > { %v2636_v50 = vpop.f32.mrf.mxu3 }
 0x253   : > { %v3158_v2 = vpop.f32.mrf.mxu0 }
 0x254   : > { %12354 = vmatmul.msk.bf16.gmra.mxu1 %vm416_vm1, %v15691_v28 }
 0x255   : > { %12327 = vmatmul.msk.bf16.gmra.mxu3 %vm416_vm1, %v15697_v51 }
 0x256   : > { %12370 = vmatmul.msk.bf16.gmra.mxu2 %vm416_vm1, %v15669_v15 }
 0x258   : > { %v3024_v56 = vpop.f32.mrf.mxu3 }
 0x259   : > { %v3149_v57 = vadd.f32 %v3148_v3, %v3024_v56  ;;  %v2877_v58 = vpop.f32.mrf.mxu2  ;;  %v15725_v3 = vpack.c.bf16 %v2945_v5, %v2944_v4  ;;  %v15747_v56 = vpack.c.bf16 %v2947_v45, %v2946_v26  ;;  %v3236_v4 = vld [vmem:[%s15471_s22 + $0x92] sm:$0xff]  ;;  %v3237_v5 = vld [vmem:[%s15471_s22 + $0x9a] sm:$0xff] }
 0x25b   : > { %v3160_v22 = vpop.f32.mrf.mxu0 }
 0x260   : > { %v3026_v9 = vpop.f32.mrf.mxu3 }
 0x261   : > { %v2796_v7 = vpop.f32.mrf.mxu1  ;;  %v3151_v11 = vadd.f32 %v3150_v32, %v3026_v9  ;;  %v2879_v21 = vpop.f32.mrf.mxu2  ;;  %v2905_v32 = vld [vmem:[%s15471_s22 + $0xb0] sm:$0xff] }
 0x262   : > { %v2800_v55 = vadd.f32 %v2796_v7, %v2719_v35  ;;  %v15739_v37 = vpack.c.bf16 %v2906_v34, %v2905_v32  ;;  %v15763_v7 = vpack.c.bf16 %v2908_v1, %v2907_v63  ;;  %v2948_v9 = vld [vmem:[%s15471_s22 + $0xb1] sm:$0xff]  ;;  %v2949_v21 = vld [vmem:[%s15471_s22 + $0xb9] sm:$0xff]  ;;  %v2950_v63 = vld [vmem:[%s15471_s22 + $0xc1] sm:$0xff] }
 0x263   : > { %v3163_v35 = vpop.f32.mrf.mxu0  ;;  %v15771_v32 = vpack.c.bf16 %v2949_v21, %v2948_v9  ;;  %v2951_v1 = vld [vmem:[%s15471_s22 + $0xc9] sm:$0xff] }
 0x264   : > { %v15727_v17 = vadd.f32 %v2877_v58, %v2800_v55  ;;  %12355 = vmatmul.msk.bf16.gmra.mxu1 %vm416_vm1, %v15719_v52  ;;  %12344 = vmatmul.msk.bf16.gmra.mxu0 %vm416_vm1, %v15739_v37  ;;  %v15765_v55 = vpack.c.bf16 %v3237_v5, %v3236_v4  ;;  %v15795_v21 = vpack.c.bf16 %v2951_v1, %v2950_v63  ;;  %v3241_v63 = vld [vmem:[%s15471_s22 + $0xba] sm:$0xff] }
 0x265   : > { %12328 = vmatmul.msk.bf16.gmra.mxu3 %vm416_vm1, %v15725_v3 }
 0x266   : > { %18916 = vst [vmem:[#allocation5_spill] sm:$0xff] %v15727_v17  ;;  %12371 = vmatmul.msk.bf16.gmra.mxu2 %vm416_vm1, %v15689_v8  ;;  %v3440_v17 = vld [vmem:[%s15471_s22 + $0xe0] sm:$0xff] }
 0x268   : > { %v3029_v24 = vpop.f32.mrf.mxu3 }
 0x269   : > { %v2798_v48 = vpop.f32.mrf.mxu1  ;;  %v3154_v27 = vadd.f32 %v3153_v43, %v3029_v24  ;;  %v3512_v0 = vpop.f32.mrf.mxu2 }
 0x270   : > { %v3031_v50 = vpop.f32.mrf.mxu3 }
 0x271   : > { %v3316_v46 = vpop.f32.mrf.mxu1  ;;  %v3156_v43 = vadd.f32 %v3155_v41, %v3031_v50  ;;  %v3514_v59 = vpop.f32.mrf.mxu2  ;;  %v2909_v50 = vld [vmem:[%s15471_s22 + $0xd0] sm:$0xff] }
 0x272   : > { %v3386_v47 = vadd.f32 %v3316_v46, %v3149_v57  ;;  %v3165_v57 = vpop.f32.mrf.mxu0 }
 0x274   : > { %v15749_v58 = vadd.f32 %v3512_v0, %v3386_v47  ;;  %12356 = vmatmul.msk.bf16.gmra.mxu1 %vm416_vm1, %v15741_v30  ;;  %12345 = vmatmul.msk.bf16.gmra.mxu0 %vm416_vm1, %v15763_v7 }
 0x275   : > { %12329 = vmatmul.msk.bf16.gmra.mxu3 %vm416_vm1, %v15747_v56 }
 0x276   : > { %12372 = vmatmul.msk.bf16.gmra.mxu2 %vm416_vm1, %v15712_v61 }
 0x278   : > { %v3034_v29 = vpop.f32.mrf.mxu3 }
 0x279   : > { %v3318_v20 = vpop.f32.mrf.mxu1  ;;  %v3159_v39 = vadd.f32 %v3158_v2, %v3034_v29  ;;  %v3517_v33 = vpop.f32.mrf.mxu2 }
 0x27a   : > { %v3387_v41 = vadd.f32 %v3318_v20, %v3151_v11  ;;  %v3168_v48 = vpop.f32.mrf.mxu0  ;;  %v3238_v20 = vld [vmem:[%s15471_s22 + $0xa2] sm:$0xff] }
 0x27c   : > { %v15757_v60 = vadd.f32 %v3514_v59, %v3387_v41  ;;  %v2910_v59 = vld [vmem:[%s15471_s22 + $0xd8] sm:$0xff]  ;;  %v3239_v41 = vld [vmem:[%s15471_s22 + $0xaa] sm:$0xff] }
 0x27d   : > { %v15787_v29 = vpack.c.bf16 %v2910_v59, %v2909_v50 }
 0x27f   : > { %18917 = vst [vmem:[#allocation6_spill] sm:$0xff] %v15787_v29 }
 0x280   : > { %v3036_v2 = vpop.f32.mrf.mxu3 }
 0x281   : > { %v3321_v24 = vpop.f32.mrf.mxu1  ;;  %v3161_v0 = vadd.f32 %v3160_v22, %v3036_v2  ;;  %v3519_v10 = vpop.f32.mrf.mxu2  ;;  %v12422_v2 = vld [vmem:[%s18907_s3 + $0x1c] sm:$0xf] }
 0x282   : > { %v3388_v11 = vadd.f32 %v3321_v24, %v3154_v27  ;;  %v3170_v27 = vpop.f32.mrf.mxu0 }
 0x284   : > { %v15773_v34 = vadd.f32 %v3517_v33, %v3388_v11  ;;  %12357 = vmatmul.msk.bf16.gmra.mxu1 %vm416_vm1, %v15765_v55  ;;  %v15789_v33 = vpack.c.bf16 %v3239_v41, %v3238_v20  ;;  %12346 = vmatmul.msk.bf16.gmra.mxu0 %vm416_vm1, %v15787_v29  ;;  %v3240_v41 = vld [vmem:[%s15471_s22 + $0xb2] sm:$0xff] }
 0x285   : > { %12330 = vmatmul.msk.bf16.gmra.mxu3 %vm416_vm1, %v15771_v32  ;;  %v15817_v1 = vpack.c.bf16 %v3241_v63, %v3240_v41  ;;  %v3242_v41 = vld [vmem:[%s15471_s22 + $0xc2] sm:$0xff]  ;;  %v3243_v63 = vld [vmem:[%s15471_s22 + $0xca] sm:$0xff] }
 0x286   : > { %12373 = vmatmul.msk.bf16.gmra.mxu2 %vm416_vm1, %v15739_v37 }
 0x288   : > { %v3039_v26 = vpop.f32.mrf.mxu3 }
 0x289   : > { %v3323_v25 = vpop.f32.mrf.mxu1  ;;  %v3164_v45 = vadd.f32 %v3163_v35, %v3039_v26  ;;  %v3522_v47 = vpop.f32.mrf.mxu2 }
 0x28a   : > { %v3389_v22 = vadd.f32 %v3323_v25, %v3156_v43  ;;  %v3173_v4 = vpop.f32.mrf.mxu0 }
 0x28c   : > { %v15781_v46 = vadd.f32 %v3519_v10, %v3389_v22  ;;  %v4285_v10 = vsel %vm426_vm0, %v12422_v2, 0 }
 0x28d   : > { %4294 = vmatpush.bf16.msrb.mxu2 %v4285_v10 }
 0x290   : > { %v3041_v35 = vpop.f32.mrf.mxu3 }
 0x291   : > { %v3326_v5 = vpop.f32.mrf.mxu1  ;;  %v3166_v9 = vadd.f32 %v3165_v57, %v3041_v35  ;;  %v3524_v11 = vpop.f32.mrf.mxu2  ;;  %v12437_v57 = vld [vmem:[%s18907_s3 + $0x20] sm:$0xf] }
 0x292   : > { %v3390_v43 = vadd.f32 %v3326_v5, %v3159_v39  ;;  %v3175_v39 = vpop.f32.mrf.mxu0  ;;  %v4481_v25 = vsel %vm426_vm0, %v12437_v57, 0  ;;  %v2952_v5 = vld [vmem:[%s15471_s22 + $0xd1] sm:$0xff] }
 0x293   : > { %4490 = vmatpush.bf16.msra.mxu3 %v4481_v25 }
 0x294   : > { %v15797_v24 = vadd.f32 %v3522_v47, %v3390_v43  ;;  %12358 = vmatmul.msk.bf16.gmra.mxu1 %vm416_vm1, %v15789_v33  ;;  %v2953_v43 = vld [vmem:[%s15471_s22 + $0xd9] sm:$0xff]  ;;  %12393 = vmatmul.msk.bf16.vlgmr.msrb.gmra.mxu0 %vm416_vm1, %v15591_v14 }
 0x295   : > { %12331 = vmatmul.msk.bf16.gmra.mxu3 %vm416_vm1, %v15795_v21 }
 0x296   : > { %12374 = vmatmul.msk.bf16.gmra.mxu2 %vm416_vm1, %v15763_v7 }
 0x298   : > { %v3044_v47 = vpop.f32.mrf.mxu3 }
 0x299   : > { %v3328_v22 = vpop.f32.mrf.mxu1  ;;  %v3169_v50 = vadd.f32 %v3168_v48, %v3044_v47  ;;  %v3527_v20 = vpop.f32.mrf.mxu2  ;;  %v15823_v48 = vpack.c.bf16 %v2953_v43, %v2952_v5  ;;  %v15837_v5 = vpack.c.bf16 %v3243_v63, %v3242_v41  ;;  %v3244_v63 = vld [vmem:[%s15471_s22 + $0xd2] sm:$0xff] }
 0x29a   : > { %v3391_v26 = vadd.f32 %v3328_v22, %v3161_v0  ;;  %v3178_v35 = vpop.f32.mrf.mxu0 }
 0x29b   : > { %18918 = vst [vmem:[#allocation7_spill] sm:$0xff] %v15823_v48 }
 0x29c   : > { %v15813_v59 = vadd.f32 %v3524_v11, %v3391_v26 }
 0x2a0   : > { %v3046_v57 = vpop.f32.mrf.mxu3 }
 0x2a1   : > { %v3331_v2 = vpop.f32.mrf.mxu1  ;;  %v3171_v0 = vadd.f32 %v3170_v27, %v3046_v57  ;;  %v3529_v25 = vpop.f32.mrf.mxu2 }
 0x2a2   : > { %v3392_v10 = vadd.f32 %v3331_v2, %v3164_v45  ;;  %v3180_v22 = vpop.f32.mrf.mxu0 }
 0x2a4   : > { %v15825_v11 = vadd.f32 %v3527_v20, %v3392_v10  ;;  %12359 = vmatmul.msk.bf16.gmra.mxu1 %vm416_vm1, %v15817_v1  ;;  %12394 = vmatmul.msk.bf16.gmra.mxu0 %vm416_vm1, %v15611_v12 }
 0x2a5   : > { %12332 = vmatmul.msk.bf16.gmra.mxu3 %vm416_vm1, %v15823_v48 }
 0x2a6   : > { %12375 = vmatmul.msk.bf16.gmra.mxu2 %vm416_vm1, %v15787_v29  ;;  %v3441_v29 = vld [vmem:[%s15471_s22 + $0xe8] sm:$0xff] }
 0x2a8   : > { %v3049_v27 = vpop.f32.mrf.mxu3 }
 0x2a9   : > { %v3333_v26 = vpop.f32.mrf.mxu1  ;;  %v3174_v45 = vadd.f32 %v3173_v4, %v3049_v27  ;;  %v3532_v20 = vpop.f32.mrf.mxu2 }
 0x2aa   : > { %v3393_v14 = vadd.f32 %v3333_v26, %v3166_v9  ;;  %v3183_v43 = vpop.f32.mrf.mxu0  ;;  %v15847_v26 = vpack.c.bf16 %v3441_v29, %v3440_v17 }
 0x2ac   : > { %v15833_v47 = vadd.f32 %v3529_v25, %v3393_v14 }
 0x2b0   : > { %v3051_v57 = vpop.f32.mrf.mxu3 }
 0x2b1   : > { %v3336_v2 = vpop.f32.mrf.mxu1  ;;  %v3176_v9 = vadd.f32 %v3175_v39, %v3051_v57  ;;  %v3534_v25 = vpop.f32.mrf.mxu2 }
 0x2b2   : > { %v3394_v10 = vadd.f32 %v3336_v2, %v3169_v50  ;;  %v3185_v14 = vpop.f32.mrf.mxu0  ;;  %v3245_v2 = vld [vmem:[%s15471_s22 + $0xda] sm:$0xff] }
 0x2b4   : > { %v15843_v4 = vadd.f32 %v3532_v20, %v3394_v10  ;;  %12360 = vmatmul.msk.bf16.gmra.mxu1 %vm416_vm1, %v15837_v5  ;;  %v15857_v10 = vpack.c.bf16 %v3245_v2, %v3244_v63  ;;  %12395 = vmatmul.msk.bf16.gmra.mxu0 %vm416_vm1, %v15631_v49 }
 0x2b5   : > { %12378 = vmatmul.msk.bf16.vlgmr.msrb.gmra.mxu3 %vm416_vm1, %v15562_v19 }
 0x2b6   : > { %18919 = vst [vmem:[#allocation8_spill] sm:$0xff] %v15843_v4  ;;  %12376 = vmatmul.msk.bf16.gmra.mxu2 %vm416_vm1, %v15847_v26 }
 0x2b8   : > { %v3054_v27 = vpop.f32.mrf.mxu3 }
 0x2b9   : > { %v3338_v12 = vpop.f32.mrf.mxu1  ;;  %v3179_v41 = vadd.f32 %v3178_v35, %v3054_v27  ;;  %v3537_v20 = vpop.f32.mrf.mxu2 }
 0x2ba   : > { %v3395_v50 = vadd.f32 %v3338_v12, %v3171_v0  ;;  %v3188_v17 = vpop.f32.mrf.mxu0 }
 0x2bc   : > { %v15853_v39 = vadd.f32 %v3534_v25, %v3395_v50 }
 0x2c0   : > { %v3056_v57 = vpop.f32.mrf.mxu3 }
 0x2c1   : > { %v3341_v29 = vpop.f32.mrf.mxu1  ;;  %v3181_v4 = vadd.f32 %v3180_v22, %v3056_v57  ;;  %v3539_v35 = vpop.f32.mrf.mxu2 }
 0x2c2   : > { %v3396_v19 = vadd.f32 %v3341_v29, %v3174_v45  ;;  %v3190_v0 = vpop.f32.mrf.mxu0 }
 0x2c4   : > { %v15861_v48 = vadd.f32 %v3537_v20, %v3396_v19  ;;  %12361 = vmatmul.msk.bf16.gmra.mxu1 %vm416_vm1, %v15857_v10  ;;  %12396 = vmatmul.msk.bf16.gmra.mxu0 %vm416_vm1, %v15651_v42 }
 0x2c5   : > { %12379 = vmatmul.msk.bf16.gmra.mxu3 %vm416_vm1, %v15578_v54 }
 0x2c6   : > { %12423 = vmatmul.msk.bf16.vlgmr.msrb.gmra.mxu2 %vm416_vm1, %v15578_v54 }
 0x2c8   : > { %v3059_v50 = vpop.f32.mrf.mxu3 }
 0x2c9   : > { %v3343_v25 = vpop.f32.mrf.mxu1  ;;  %v3184_v49 = vadd.f32 %v3183_v43, %v3059_v50  ;;  %v3542_v22 = vpop.f32.mrf.mxu2 }
 0x2ca   : > { %v3397_v12 = vadd.f32 %v3343_v25, %v3176_v9  ;;  %v3193_v2 = vpop.f32.mrf.mxu0 }
 0x2cc   : > { %v15869_v45 = vadd.f32 %v3539_v35, %v3397_v12 }
 0x2d0   : > { %v3061_v63 = vpop.f32.mrf.mxu3 }
 0x2d1   : > { %v3346_v27 = vpop.f32.mrf.mxu1  ;;  %v3186_v29 = vadd.f32 %v3185_v14, %v3061_v63  ;;  %v3544_v54 = vpop.f32.mrf.mxu2 }
 0x2d2   : > { %v3398_v20 = vadd.f32 %v3346_v27, %v3179_v41  ;;  %v3195_v14 = vpop.f32.mrf.mxu0 }
 0x2d4   : > { %v15873_v19 = vadd.f32 %v3542_v22, %v3398_v20  ;;  %12408 = vmatmul.msk.bf16.vlgmr.msra.gmra.mxu1 %vm416_vm1, %v15555_v40  ;;  %12397 = vmatmul.msk.bf16.gmra.mxu0 %vm416_vm1, %v15671_v18 }
 0x2d5   : > { %12380 = vmatmul.msk.bf16.gmra.mxu3 %vm416_vm1, %v15597_v16 }
 0x2d6   : > { %12424 = vmatmul.msk.bf16.gmra.mxu2 %vm416_vm1, %v15597_v16 }
 0x2d8   : > { %v3064_v57 = vpop.f32.mrf.mxu3 }
 0x2d9   : > { %v3348_v43 = vpop.f32.mrf.mxu1  ;;  %v3189_v42 = vadd.f32 %v3188_v17, %v3064_v57  ;;  %v3547_v35 = vpop.f32.mrf.mxu2 }
 0x2da   : > { %v3399_v9 = vadd.f32 %v3348_v43, %v3181_v4  ;;  %v3198_v4 = vpop.f32.mrf.mxu0 }
 0x2dc   : > { %v15881_v41 = vadd.f32 %v3544_v54, %v3399_v9 }
 0x2e0   : > { %v3066_v12 = vpop.f32.mrf.mxu3 }
 0x2e1   : > { %v3351_v25 = vpop.f32.mrf.mxu1  ;;  %v3191_v50 = vadd.f32 %v3190_v0, %v3066_v12  ;;  %v3549_v16 = vpop.f32.mrf.mxu2 }
 0x2e2   : > { %v3400_v40 = vadd.f32 %v3351_v25, %v3184_v49  ;;  %v3200_v63 = vpop.f32.mrf.mxu0 }
 0x2e4   : > { %v15885_v22 = vadd.f32 %v3547_v35, %v3400_v40  ;;  %12409 = vmatmul.msk.bf16.gmra.mxu1 %vm416_vm1, %v15572_v44  ;;  %12398 = vmatmul.msk.bf16.gmra.mxu0 %vm416_vm1, %v15691_v28 }
 0x2e5   : > { %12381 = vmatmul.msk.bf16.gmra.mxu3 %vm416_vm1, %v15617_v38 }
 0x2e6   : > { %12425 = vmatmul.msk.bf16.gmra.mxu2 %vm416_vm1, %v15617_v38 }
 0x2e8   : > { %v3069_v20 = vpop.f32.mrf.mxu3 }
 0x2e9   : > { %v3353_v17 = vpop.f32.mrf.mxu1  ;;  %v3194_v18 = vadd.f32 %v3193_v2, %v3069_v20  ;;  %v3552_v0 = vpop.f32.mrf.mxu2 }
 0x2ea   : > { %v3401_v27 = vadd.f32 %v3353_v17, %v3186_v29  ;;  %v3203_v25 = vpop.f32.mrf.mxu0 }
 0x2ec   : > { %v15893_v49 = vadd.f32 %v3549_v16, %v3401_v27 }
 0x2f0   : > { %v3071_v43 = vpop.f32.mrf.mxu3 }
 0x2f1   : > { %v3356_v54 = vpop.f32.mrf.mxu1  ;;  %v3196_v9 = vadd.f32 %v3195_v14, %v3071_v43  ;;  %v3554_v38 = vpop.f32.mrf.mxu2 }
 0x2f2   : > { %v3402_v44 = vadd.f32 %v3356_v54, %v3189_v42 }
 0x2f4   : > { %v15897_v57 = vadd.f32 %v3552_v0, %v3402_v44  ;;  %12410 = vmatmul.msk.bf16.gmra.mxu1 %vm416_vm1, %v15589_v13  ;;  %12399 = vmatmul.msk.bf16.gmra.mxu0 %vm416_vm1, %v15719_v52 }
 0x2f5   : > { %12382 = vmatmul.msk.bf16.gmra.mxu3 %vm416_vm1, %v15637_v53 }
 0x2f6   : > { %12426 = vmatmul.msk.bf16.gmra.mxu2 %vm416_vm1, %v15637_v53 }
 0x2f8   : > { %v3074_v35 = vpop.f32.mrf.mxu3 }
 0x2f9   : > { %v3358_v2 = vpop.f32.mrf.mxu1  ;;  %v3199_v28 = vadd.f32 %v3198_v4, %v3074_v35  ;;  %v3557_v14 = vpop.f32.mrf.mxu2 }
 0x2fa   : > { %v3403_v29 = vadd.f32 %v3358_v2, %v3191_v50  ;;  %v3205_v50 = vpop.f32.mrf.mxu0 }
 0x2fc   : > { %v15905_v42 = vadd.f32 %v3554_v38, %v3403_v29 }
 0x300   : > { %v3076_v12 = vpop.f32.mrf.mxu3 }
 0x301   : > { %v3361_v40 = vpop.f32.mrf.mxu1  ;;  %v3201_v16 = vadd.f32 %v3200_v63, %v3076_v12  ;;  %v3559_v53 = vpop.f32.mrf.mxu2 }
 0x302   : > { %v3404_v13 = vadd.f32 %v3361_v40, %v3194_v18  ;;  %v3208_v63 = vpop.f32.mrf.mxu0 }
 0x304   : > { %v15909_v17 = vadd.f32 %v3557_v14, %v3404_v13  ;;  %12411 = vmatmul.msk.bf16.gmra.mxu1 %vm416_vm1, %v15609_v36  ;;  %12400 = vmatmul.msk.bf16.gmra.mxu0 %vm416_vm1, %v15741_v30 }
 0x305   : > { %12383 = vmatmul.msk.bf16.gmra.mxu3 %vm416_vm1, %v15657_v6 }
 0x306   : > { %12427 = vmatmul.msk.bf16.gmra.mxu2 %vm416_vm1, %v15657_v6 }
 0x308   : > { %v3079_v20 = vpop.f32.mrf.mxu3 }
 0x309   : > { %v3363_v4 = vpop.f32.mrf.mxu1  ;;  %v3204_v52 = vadd.f32 %v3203_v25, %v3079_v20  ;;  %v3562_v0 = vpop.f32.mrf.mxu2 }
 0x30a   : > { %v3405_v27 = vadd.f32 %v3363_v4, %v3196_v9  ;;  %v3210_v9 = vpop.f32.mrf.mxu0 }
 0x30c   : > { %v15917_v18 = vadd.f32 %v3559_v53, %v3405_v27 }
 0x310   : > { %v3081_v44 = vpop.f32.mrf.mxu3 }
 0x311   : > { %v3366_v54 = vpop.f32.mrf.mxu1  ;;  %v3206_v43 = vadd.f32 %v3205_v50, %v3081_v44  ;;  %v3564_v6 = vpop.f32.mrf.mxu2 }
 0x312   : > { %v3406_v36 = vadd.f32 %v3366_v54, %v3199_v28  ;;  %v3213_v13 = vpop.f32.mrf.mxu0 }
 0x314   : > { %v15921_v38 = vadd.f32 %v3562_v0, %v3406_v36  ;;  %12412 = vmatmul.msk.bf16.gmra.mxu1 %vm416_vm1, %v15629_v31  ;;  %12401 = vmatmul.msk.bf16.gmra.mxu0 %vm416_vm1, %v15765_v55 }
 0x315   : > { %12384 = vmatmul.msk.bf16.gmra.mxu3 %vm416_vm1, %v15677_v23 }
 0x316   : > { %12428 = vmatmul.msk.bf16.gmra.mxu2 %vm416_vm1, %v15677_v23 }
 0x318   : > { %v3084_v35 = vpop.f32.mrf.mxu3 }
 0x319   : > { %v3368_v2 = vpop.f32.mrf.mxu1  ;;  %v3209_v30 = vadd.f32 %v3208_v63, %v3084_v35  ;;  %v3567_v28 = vpop.f32.mrf.mxu2 }
 0x31a   : > { %v3407_v29 = vadd.f32 %v3368_v2, %v3201_v16  ;;  %v3215_v20 = vpop.f32.mrf.mxu0 }
 0x31c   : > { %v15929_v25 = vadd.f32 %v3564_v6, %v3407_v29 }
 0x320   : > { %v3086_v40 = vpop.f32.mrf.mxu3 }
 0x321   : > { %v3371_v14 = vpop.f32.mrf.mxu1  ;;  %v3211_v12 = vadd.f32 %v3210_v9, %v3086_v40  ;;  %v3569_v23 = vpop.f32.mrf.mxu2 }
 0x322   : > { %v3408_v31 = vadd.f32 %v3371_v14, %v3204_v52  ;;  %v3904_v44 = vpop.f32.mrf.mxu0 }
 0x324   : > { %v15933_v53 = vadd.f32 %v3567_v28, %v3408_v31  ;;  %12413 = vmatmul.msk.bf16.gmra.mxu1 %vm416_vm1, %v15649_v62  ;;  %12402 = vmatmul.msk.bf16.gmra.mxu0 %vm416_vm1, %v15789_v33 }
 0x325   : > { %12385 = vmatmul.msk.bf16.gmra.mxu3 %vm416_vm1, %v15697_v51 }
 0x326   : > { %12429 = vmatmul.msk.bf16.gmra.mxu2 %vm416_vm1, %v15697_v51 }
 0x328   : > { %v3089_v4 = vpop.f32.mrf.mxu3 }
 0x329   : > { %v3373_v16 = vpop.f32.mrf.mxu1  ;;  %v3214_v55 = vadd.f32 %v3213_v13, %v3089_v4  ;;  %v3572_v52 = vpop.f32.mrf.mxu2 }
 0x32a   : > { %v3409_v50 = vadd.f32 %v3373_v16, %v3206_v43  ;;  %v3906_v28 = vpop.f32.mrf.mxu0 }
 0x32c   : > { %v15941_v27 = vadd.f32 %v3569_v23, %v3409_v50 }
 0x330   : > { %v3091_v63 = vpop.f32.mrf.mxu3 }
 0x331   : > { %v3376_v0 = vpop.f32.mrf.mxu1  ;;  %v3216_v54 = vadd.f32 %v3215_v20, %v3091_v63  ;;  %v3574_v51 = vpop.f32.mrf.mxu2 }
 0x332   : > { %v3410_v62 = vadd.f32 %v3376_v0, %v3209_v30  ;;  %v14261_v30 = vld [vmem:[%s18909_s5 + $0x38] sm:$0xff]  ;;  %v3909_v23 = vpop.f32.mrf.mxu0 }
 0x333   : > { %4952 = vmatpush.bf16.msrb.mxu1 %v14261_v30 }
 0x334   : > { %v15945_v36 = vadd.f32 %v3572_v52, %v3410_v62  ;;  %12414 = vmatmul.msk.bf16.gmra.mxu1 %vm416_vm1, %v15669_v15  ;;  %v14269_v15 = vld [vmem:[%s18909_s5 + $0x78] sm:$0xff]  ;;  %12403 = vmatmul.msk.bf16.gmra.mxu0 %vm416_vm1, %v15817_v1 }
 0x335   : > { %12386 = vmatmul.msk.bf16.gmra.mxu3 %vm416_vm1, %v15725_v3  ;;  %4845 = vmatpush.bf16.msra.mxu0 %v14269_v15 }
 0x336   : > { %12430 = vmatmul.msk.bf16.gmra.mxu2 %vm416_vm1, %v15725_v3 }
 0x338   : > { %v3708_v9 = vpop.f32.mrf.mxu3 }
 0x339   : > { %v3378_v43 = vpop.f32.mrf.mxu1  ;;  %v3778_v33 = vadd.f32 %v3708_v9, %v15749_v58  ;;  %v3577_v29 = vpop.f32.mrf.mxu2 }
 0x33a   : > { %v3411_v6 = vadd.f32 %v3378_v43, %v3211_v12  ;;  %v3911_v62 = vpop.f32.mrf.mxu0 }
 0x33b   : > { %v3974_v35 = vadd.f32 %v3904_v44, %v3778_v33 }
 0x33c   : > { %v15954_v2 = vadd.f32 %v3574_v51, %v3411_v6 }
 0x340   : > { %v3710_v14 = vpop.f32.mrf.mxu3 }
 0x341   : > { %v3381_v3 = vpop.f32.mrf.mxu1  ;;  %v3779_v31 = vadd.f32 %v3710_v14, %v15757_v60  ;;  %v3579_v13 = vpop.f32.mrf.mxu2  ;;  %v3833_v14 = vld [vmem:[%s15471_s22 + $0xea] sm:$0xff] }
 0x342   : > { %v3412_v58 = vadd.f32 %v3381_v3, %v3214_v55 }
 0x343   : > { %v3975_v12 = vadd.f32 %v3906_v28, %v3779_v31 }
 0x344   : > { %v15965_v40 = vadd.f32 %v3577_v29, %v3412_v58  ;;  %12415 = vmatmul.msk.bf16.gmra.mxu1 %vm416_vm1, %v15689_v8  ;;  %12404 = vmatmul.msk.bf16.gmra.mxu0 %vm416_vm1, %v15837_v5  ;;  %v3832_v58 = vld [vmem:[%s15471_s22 + $0xe2] sm:$0xff] }
 0x345   : > { %12387 = vmatmul.msk.bf16.gmra.mxu3 %vm416_vm1, %v15747_v56 }
 0x346   : > { %12431 = vmatmul.msk.bf16.gmra.mxu2 %vm416_vm1, %v15747_v56 }
 0x348   : > { %v3713_v50 = vpop.f32.mrf.mxu3 }
 0x349   : > { %v3383_v16 = vpop.f32.mrf.mxu1  ;;  %v3780_v4 = vadd.f32 %v3713_v50, %v15773_v34  ;;  %v4296_v55 = vpop.f32.mrf.mxu2 }
 0x34a   : > { %v3413_v1 = vadd.f32 %v3383_v16, %v3216_v54  ;;  %v3636_v16 = vld [vmem:[%s15471_s22 + $0xe1] sm:$0xff] }
 0x34b   : > { %v3976_v20 = vadd.f32 %v3909_v23, %v3780_v4 }
 0x34c   : > { %v15974_v60 = vadd.f32 %v3579_v13, %v3413_v1  ;;  %v3637_v1 = vld [vmem:[%s15471_s22 + $0xe9] sm:$0xff] }
 0x350   : > { %v3715_v0 = vpop.f32.mrf.mxu3 }
 0x351   : > { %v4100_v52 = vpop.f32.mrf.mxu1  ;;  %v3781_v63 = vadd.f32 %v3715_v0, %v15781_v46  ;;  %v4298_v34 = vpop.f32.mrf.mxu2  ;;  %v14268_v46 = vld [vmem:[%s18909_s5 + $0x70] sm:$0xff]  ;;  %v4394_v0 = vld [vmem:[%s15471_s22 + $0x22] sm:$0xff] }
 0x352   : > { %v4170_v8 = vadd.f32 %v4100_v52, %v3974_v35  ;;  %4846 = vmatpush.bf16.msra.mxu0 %v14268_v46 }
 0x353   : > { %v3977_v56 = vadd.f32 %v3911_v62, %v3781_v63  ;;  %v4395_v62 = vld [vmem:[%s15471_s22 + $0x2a] sm:$0xff] }
 0x354   : > { %v15979_v51 = vadd.f32 %v4296_v55, %v4170_v8  ;;  %12416 = vmatmul.msk.bf16.gmra.mxu1 %vm416_vm1, %v15712_v61  ;;  %v14260_v61 = vld [vmem:[%s18909_s5 + $0x30] sm:$0xff]  ;;  %12405 = vmatmul.msk.bf16.gmra.mxu0 %vm416_vm1, %v15857_v10  ;;  %v3651_v55 = vpack.c.bf16 %v3637_v1, %v3636_v16  ;;  %v4401_v16 = vld [vmem:[%s15471_s22 + $0x5a] sm:$0xff] }
 0x355   : > { %12388 = vmatmul.msk.bf16.gmra.mxu3 %vm416_vm1, %v15771_v32  ;;  %4953 = vmatpush.bf16.msrb.mxu1 %v14260_v61 }
 0x356   : > { %12432 = vmatmul.msk.bf16.gmra.mxu2 %vm416_vm1, %v15771_v32 }
 0x358   : > { %v3718_v44 = vpop.f32.mrf.mxu3 }
 0x359   : > { %v4102_v54 = vpop.f32.mrf.mxu1  ;;  %v15991_v43 = vadd.f32 %v3718_v44, %v15797_v24  ;;  %v4301_v9 = vpop.f32.mrf.mxu2 }
 0x35a   : > { %v4171_v5 = vadd.f32 %v4102_v54, %v3975_v12  ;;  %v14259_v12 = vld [vmem:[%s18909_s5 + $0x28] sm:$0xff] }
 0x35b   : > { %4954 = vmatpush.bf16.msrb.mxu1 %v14259_v12 }
 0x35c   : > { %v15993_v6 = vadd.f32 %v4298_v34, %v4171_v5  ;;  %v14266_v34 = vld [vmem:[%s18909_s5 + $0x60] sm:$0xff]  ;;  %v4422_v5 = vpack.c.bf16 %v4395_v62, %v4394_v0  ;;  %v14256_v62 = vld [vmem:[%s18909_s5 + $0x10] sm:$0xff] }
 0x360   : > { %v3720_v29 = vpop.f32.mrf.mxu3 }
 0x361   : > { %v4105_v32 = vpop.f32.mrf.mxu1  ;;  %v16001_v24 = vadd.f32 %v3720_v29, %v15813_v59  ;;  %v4303_v30 = vpop.f32.mrf.mxu2 }
 0x362   : > { %v4172_v33 = vadd.f32 %v4105_v32, %v3976_v20  ;;  %v18922_v20 = vld [vmem:[#allocation6_spill] sm:$0xff] }
 0x363   : > { %v4396_v32 = vld [vmem:[%s15471_s22 + $0x32] sm:$0xff] }
 0x364   : > { %v16003_v35 = vadd.f32 %v4301_v9, %v4172_v33  ;;  %12417 = vmatmul.msk.bf16.gmra.mxu1 %vm416_vm1, %v15739_v37  ;;  %v16018_v37 = vpack.c.bf16 %v3833_v14, %v3832_v58  ;;  %v4029_v9 = vld [vmem:[%s15471_s22 + $0xf8] sm:$0xff]  ;;  %v4398_v58 = vld [vmem:[%s15471_s22 + $0x42] sm:$0xff]  ;;  %v4399_v14 = vld [vmem:[%s15471_s22 + $0x4a] sm:$0xff] }
 0x365   : > { %12389 = vmatmul.msk.bf16.gmra.mxu3 %vm416_vm1, %v15795_v21  ;;  %v4397_v33 = vld [vmem:[%s15471_s22 + $0x3a] sm:$0xff] }
 0x366   : > { %12433 = vmatmul.msk.bf16.gmra.mxu2 %vm416_vm1, %v15795_v21  ;;  %12406 = vmatmul.msk.bf16.gmra.mxu0 %vm416_vm1, %v16018_v37  ;;  %v14267_v21 = vld [vmem:[%s18909_s5 + $0x68] sm:$0xff] }
 0x367   : > { %4847 = vmatpush.bf16.msra.mxu0 %v14267_v21 }
 0x368   : > { %v3723_v10 = vpop.f32.mrf.mxu3 }
 0x369   : > { %v4107_v15 = vpop.f32.mrf.mxu1  ;;  %v16012_v3 = vadd.f32 %v3723_v10, %v15825_v11  ;;  %v18920_v11 = vld [vmem:[#allocation7_spill] sm:$0xff] }
 0x36a   : > { %v4173_v28 = vadd.f32 %v4107_v15, %v3977_v56  ;;  %v4224_v56 = vld [vmem:[%s15471_s22 + $0xf1] sm:$0xff] }
 0x36b   : > { %4848 = vmatpush.bf16.msra.mxu0 %v14266_v34  ;;  %v14265_v10 = vld [vmem:[%s18909_s5 + $0x58] sm:$0xff]  ;;  %v16127_v34 = vpop.f32.mrf.mxu2 }
 0x36c   : > { %v16014_v59 = vadd.f32 %v4303_v30, %v4173_v28  ;;  %v4423_v30 = vpack.c.bf16 %v4397_v33, %v4396_v32  ;;  %v4404_v33 = vld [vmem:[%s15471_s22 + $0x72] sm:$0xff] }
 0x36f   : > { %4849 = vmatpush.bf16.msra.mxu0 %v14265_v10 }
 0x370   : > { %v3725_v31 = vpop.f32.mrf.mxu3 }
 0x371   : > { %v16023_v13 = vadd.f32 %v3725_v31, %v15833_v47  ;;  %v18921_v47 = vld [vmem:[#allocation8_spill] sm:$0xff] }
 0x374   : > { %12418 = vmatmul.msk.bf16.gmra.mxu1 %vm416_vm1, %v15763_v7 }
 0x375   : > { %12390 = vmatmul.msk.bf16.gmra.mxu3 %vm416_vm1, %v18920_v11 }
 0x376   : > { %12434 = vmatmul.msk.bf16.gmra.mxu2 %vm416_vm1, %v18920_v11  ;;  %v4424_v11 = vpack.c.bf16 %v4399_v14, %v4398_v58 }
 0x378   : > { %v3728_v7 = vpop.f32.mrf.mxu3 }
 0x379   : > { %v16038_v23 = vadd.f32 %v3728_v7, %v18921_v47  ;;  %v16099_v7 = vpop.f32.mrf.mxu1  ;;  %v4400_v47 = vld [vmem:[%s15471_s22 + $0x52] sm:$0xff] }
 0x380   : > { %v3730_v50 = vpop.f32.mrf.mxu3 }
 0x381   : > { %v16043_v4 = vadd.f32 %v3730_v50, %v15853_v39  ;;  %v4225_v39 = vld [vmem:[%s15471_s22 + $0xf9] sm:$0xff] }
 0x382   : > { %v4239_v44 = vpack.c.bf16 %v4225_v39, %v4224_v56  ;;  %v4402_v56 = vld [vmem:[%s15471_s22 + $0x62] sm:$0xff]  ;;  %v4403_v39 = vld [vmem:[%s15471_s22 + $0x6a] sm:$0xff] }
 0x384   : > { %12419 = vmatmul.msk.bf16.gmra.mxu1 %vm416_vm1, %v18922_v20 }
 0x385   : > { %12391 = vmatmul.msk.bf16.gmra.mxu3 %vm416_vm1, %v3651_v55 }
 0x386   : > { %12435 = vmatmul.msk.bf16.gmra.mxu2 %vm416_vm1, %v3651_v55  ;;  %v4425_v55 = vpack.c.bf16 %v4401_v16, %v4400_v47  ;;  %v4406_v16 = vld [vmem:[%s15471_s22 + $0x82] sm:$0xff] }
 0x388   : > { %v3733_v52 = vpop.f32.mrf.mxu3 }
 0x389   : > { %v16050_v8 = vadd.f32 %v3733_v52, %v15861_v48  ;;  %v14258_v48 = vld [vmem:[%s18909_s5 + $0x20] sm:$0xff]  ;;  %v16112_v52 = vpop.f32.mrf.mxu0 }
 0x38a   : > { %4955 = vmatpush.bf16.msrb.mxu1 %v14258_v48  ;;  %v4426_v48 = vpack.c.bf16 %v4403_v39, %v4402_v56 }
 0x390   : > { %v3735_v63 = vpop.f32.mrf.mxu3 }
 0x391   : > { %v16060_v54 = vadd.f32 %v3735_v63, %v15869_v45  ;;  %v4028_v45 = vld [vmem:[%s15471_s22 + $0xf0] sm:$0xff] }
 0x394   : > { %12420 = vmatmul.msk.bf16.gmra.mxu1 %vm416_vm1, %v15847_v26  ;;  %v4043_v26 = vpack.c.bf16 %v4029_v9, %v4028_v45 }
 0x395   : > { %12438 = vmatmul.msk.bf16.vlgmr.msra.gmra.mxu3 %vm416_vm1, %v4422_v5 }
 0x396   : > { %12436 = vmatmul.msk.bf16.gmra.mxu2 %vm416_vm1, %v4239_v44  ;;  %v16132_v44 = vpop.f32.mrf.mxu0 }
 0x398   : > { %v3738_v46 = vpop.f32.mrf.mxu3 }
 0x399   : > { %v16070_v61 = vadd.f32 %v3738_v46, %v15873_v19 }
 0x39e   : > { %v16142_v32 = vpop.f32.mrf.mxu0 }
 0x3a0   : > { %v3740_v29 = vpop.f32.mrf.mxu3 }
 0x3a1   : > { %v16077_v15 = vadd.f32 %v3740_v29, %v15881_v41  ;;  %v14257_v41 = vld [vmem:[%s18909_s5 + $0x18] sm:$0xff] }
 0x3a2   : > { %4956 = vmatpush.bf16.msrb.mxu1 %v14257_v41  ;;  %v4405_v29 = vld [vmem:[%s15471_s22 + $0x7a] sm:$0xff]  ;;  %v14276_v41 = vld [vmem:[%s18909_s5 + $0xb0] sm:$0xff] }
 0x3a4   : > { %12421 = vmatmul.msk.bf16.gmra.mxu1 %vm416_vm1, %v4043_v26  ;;  %v16140_v26 = vpop.f32.mrf.mxu2 }
 0x3a5   : > { %12439 = vmatmul.msk.bf16.gmra.mxu3 %vm416_vm1, %v4423_v30 }
 0x3a6   : > { %4957 = vmatpush.bf16.msrb.mxu1 %v14256_v62  ;;  %v16163_v14 = vpop.f32.mrf.mxu0 }
 0x3a8   : > { %v3743_v28 = vpop.f32.mrf.mxu3 }
 0x3a9   : > { %v16082_v19 = vadd.f32 %v3743_v28, %v15885_v22  ;;  %v4427_v28 = vpack.c.bf16 %v4405_v29, %v4404_v33 }
 0x3ac   : > { %v16157_v58 = vpop.f32.mrf.mxu2 }
 0x3b0   : > { %v3745_v31 = vpop.f32.mrf.mxu3 }
 0x3b1   : > { %v16093_v21 = vadd.f32 %v3745_v31, %v15893_v49  ;;  %v16106_v49 = vpop.f32.mrf.mxu1 }
 0x3b4   : > { %v16170_v47 = vpop.f32.mrf.mxu2 }
 0x3b5   : > { %12440 = vmatmul.msk.bf16.gmra.mxu3 %vm416_vm1, %v4424_v11 }
 0x3b8   : > { %v3748_v22 = vpop.f32.mrf.mxu3 }
 0x3b9   : > { %v16097_v12 = vadd.f32 %v3748_v22, %v15897_v57  ;;  %v14264_v57 = vld [vmem:[%s18909_s5 + $0x50] sm:$0xff]  ;;  %v16123_v63 = vpop.f32.mrf.mxu1 }
 0x3ba   : > { %4850 = vmatpush.bf16.msra.mxu0 %v14264_v57 }
 0x3c0   : > { %v3750_v1 = vpop.f32.mrf.mxu3 }
 0x3c1   : > { %v16104_v50 = vadd.f32 %v3750_v1, %v15905_v42  ;;  %v14277_v42 = vld [vmem:[%s18909_s5 + $0xb8] sm:$0xff]  ;;  %v16135_v46 = vpop.f32.mrf.mxu1  ;;  %v4407_v1 = vld [vmem:[%s15471_s22 + $0x8a] sm:$0xff] }
 0x3c2   : > { %5106 = vmatpush.bf16.msra.mxu2 %v14277_v42  ;;  %v4428_v42 = vpack.c.bf16 %v4407_v1, %v4406_v16 }
 0x3c3   : > { %18923 = vst [vmem:[#allocation7_spill] sm:$0xff] %v16104_v50 }
 0x3c5   : > { %12441 = vmatmul.msk.bf16.gmra.mxu3 %vm416_vm1, %v4425_v55 }
 0x3c6   : > { %5107 = vmatpush.bf16.msra.mxu2 %v14276_v41 }
 0x3c8   : > { %v3753_v20 = vpop.f32.mrf.mxu3 }
 0x3c9   : > { %v16115_v0 = vadd.f32 %v3753_v20, %v15909_v17  ;;  %v16149_v10 = vpop.f32.mrf.mxu1  ;;  %v16174_v20 = vpop.f32.mrf.mxu0 }
 0x3cb   : > { %18924 = vst [vmem:[#allocation8_spill] sm:$0xff] %v16115_v0  ;;  %v3978_v0 = vadd.f32 %v16112_v52, %v15991_v43 }
 0x3d0   : > { %v3755_v17 = vpop.f32.mrf.mxu3 }
 0x3d1   : > { %v16130_v5 = vadd.f32 %v3755_v17, %v15917_v18  ;;  %v16168_v22 = vpop.f32.mrf.mxu1  ;;  %v16187_v17 = vpop.f32.mrf.mxu0 }
 0x3d3   : > { %18925 = vst [vmem:[#allocation6_spill] sm:$0xff] %v16130_v5  ;;  %v4415_v5 = vld [vmem:[%s15471_s22 + $0xca] sm:$0xff] }
 0x3d5   : > { %12442 = vmatmul.msk.bf16.gmra.mxu3 %vm416_vm1, %v4426_v48  ;;  %v4408_v48 = vld [vmem:[%s15471_s22 + $0x92] sm:$0xff] }
 0x3d8   : > { %v3758_v45 = vpop.f32.mrf.mxu3 }
 0x3d9   : > { %v16138_v9 = vadd.f32 %v3758_v45, %v15921_v38  ;;  %v14263_v38 = vld [vmem:[%s18909_s5 + $0x48] sm:$0xff]  ;;  %v16180_v62 = vpop.f32.mrf.mxu1  ;;  %v4409_v45 = vld [vmem:[%s15471_s22 + $0x9a] sm:$0xff] }
 0x3da   : > { %4851 = vmatpush.bf16.msra.mxu0 %v14263_v38 }
 0x3db   : > { %18926 = vst [vmem:[#allocation9_spill] sm:$0xff] %v16138_v9 }
 0x3e0   : > { %v3760_v30 = vpop.f32.mrf.mxu3 }
 0x3e1   : > { %v16147_v18 = vadd.f32 %v3760_v30, %v15929_v25  ;;  %v14255_v25 = vld [vmem:[%s18909_s5 + $0x8] sm:$0xff]  ;;  %v16191_v33 = vpop.f32.mrf.mxu1  ;;  %v4429_v30 = vpack.c.bf16 %v4409_v45, %v4408_v48  ;;  %v14273_v45 = vld [vmem:[%s18909_s5 + $0x98] sm:$0xff] }
 0x3e2   : > { %4958 = vmatpush.bf16.msrb.mxu1 %v14255_v25 }
 0x3e3   : > { %18927 = vst [vmem:[#allocation10_spill] sm:$0xff] %v16147_v18 }
 0x3e5   : > { %12443 = vmatmul.msk.bf16.gmra.mxu3 %vm416_vm1, %v4427_v28  ;;  %v14262_v28 = vld [vmem:[%s18909_s5 + $0x40] sm:$0xff] }
 0x3e6   : > { %4852 = vmatpush.bf16.msra.mxu0 %v14262_v28 }
 0x3e8   : > { %v3763_v31 = vpop.f32.mrf.mxu3 }
 0x3e9   : > { %v16166_v11 = vadd.f32 %v3763_v31, %v15933_v53  ;;  %v16182_v53 = vpop.f32.mrf.mxu2  ;;  %v14254_v31 = vld [vmem:[%s18909_s5] sm:$0xff]  ;;  %v16213_v16 = vpop.f32.mrf.mxu1 }
 0x3ea   : > { %4959 = vmatpush.bf16.msrb.mxu1 %v14254_v31 }
 0x3eb   : > { %18928 = vst [vmem:[#allocation11_spill] sm:$0xff] %v16166_v11 }
 0x3f0   : > { %v3765_v55 = vpop.f32.mrf.mxu3 }
 0x3f1   : > { %v16177_v57 = vadd.f32 %v3765_v55, %v15941_v27  ;;  %v16199_v38 = vpop.f32.mrf.mxu2  ;;  %v14274_v55 = vld [vmem:[%s18909_s5 + $0xa0] sm:$0xff]  ;;  %v16230_v28 = vpop.f32.mrf.mxu1 }
 0x3f3   : > { %18929 = vst [vmem:[#allocation12_spill] sm:$0xff] %v16177_v57 }
 0x3f5   : > { %12444 = vmatmul.msk.bf16.gmra.mxu3 %vm416_vm1, %v4428_v42  ;;  %v4410_v42 = vld [vmem:[%s15471_s22 + $0xa2] sm:$0xff] }
 0x3f8   : > { %v3768_v56 = vpop.f32.mrf.mxu3 }
 0x3f9   : > { %v16185_v39 = vadd.f32 %v3768_v56, %v15945_v36  ;;  %v16201_v36 = vpop.f32.mrf.mxu0  ;;  %v16215_v1 = vpop.f32.mrf.mxu2  ;;  %v4411_v56 = vld [vmem:[%s15471_s22 + $0xaa] sm:$0xff] }
 0x3fb   : > { %18930 = vst [vmem:[#allocation13_spill] sm:$0xff] %v16185_v39 }
 0x400   : > { %v3770_v29 = vpop.f32.mrf.mxu3 }
 0x401   : > { %v16194_v27 = vadd.f32 %v3770_v29, %v15954_v2  ;;  %v14275_v2 = vld [vmem:[%s18909_s5 + $0xa8] sm:$0xff]  ;;  %v16222_v48 = vpop.f32.mrf.mxu0 }
 0x402   : > { %5108 = vmatpush.bf16.msra.mxu2 %v14275_v2  ;;  %v16236_v2 = vpop.f32.mrf.mxu2 }
 0x403   : > { %18931 = vst [vmem:[#allocation14_spill] sm:$0xff] %v16194_v27  ;;  %v4413_v27 = vld [vmem:[%s15471_s22 + $0xba] sm:$0xff] }
 0x405   : > { %12445 = vmatmul.msk.bf16.gmra.mxu3 %vm416_vm1, %v4429_v30  ;;  %v4430_v30 = vpack.c.bf16 %v4411_v56, %v4410_v42 }
 0x406   : > { %5109 = vmatpush.bf16.msra.mxu2 %v14274_v55  ;;  %v14271_v55 = vld [vmem:[%s18909_s5 + $0x88] sm:$0xff] }
 0x408   : > { %v3773_v41 = vpop.f32.mrf.mxu3 }
 0x409   : > { %v16208_v25 = vadd.f32 %v3773_v41, %v15965_v40  ;;  %v14272_v41 = vld [vmem:[%s18909_s5 + $0x90] sm:$0xff]  ;;  %v16246_v42 = vpop.f32.mrf.mxu0 }
 0x40a   : > { %5110 = vmatpush.bf16.msra.mxu2 %v14273_v45 }
 0x40b   : > { %18932 = vst [vmem:[#allocation15_spill] sm:$0xff] %v16208_v25  ;;  %v4412_v25 = vld [vmem:[%s15471_s22 + $0xb2] sm:$0xff] }
 0x40c   : > { %v4431_v57 = vpack.c.bf16 %v4413_v27, %v4412_v25 }
 0x40e   : > { %5111 = vmatpush.bf16.msra.mxu2 %v14272_v41 }
 0x410   : > { %v3775_v40 = vpop.f32.mrf.mxu3 }
 0x411   : > { %v16228_v29 = vadd.f32 %v3775_v40, %v15974_v60  ;;  %v16241_v60 = vld [vmem:[%s18911_s7 + $0x2] ss:$0 sm:$0xff]  ;;  %v16252_v40 = vld [vmem:[%s18911_s7 + $0x3] ss:$0 sm:$0xff]  ;;  %v16272_v11 = vpop.f32.mrf.mxu0 }
 0x412   : > { %5112 = vmatpush.bf16.msra.mxu2 %v14271_v55 }
 0x413   : > { %18933 = vst [vmem:[#allocation16_spill] sm:$0xff] %v16228_v29  ;;  %v16259_v29 = vpop.f32.mrf.mxu1 }
 0x415   : > { %12446 = vmatmul.msk.bf16.gmra.mxu3 %vm416_vm1, %v4430_v30  ;;  %v14270_v30 = vld [vmem:[%s18909_s5 + $0x80] sm:$0xff] }
 0x416   : > { %5113 = vmatpush.bf16.msra.mxu2 %v14270_v30 }
 0x418   : > { %v4492_v31 = vpop.f32.mrf.mxu3 }
 0x419   : > { %v4562_v56 = vadd.f32 %v4492_v31, %v15979_v51  ;;  %v16263_v31 = vpop.f32.mrf.mxu2 }
 0x41b   : > { %v4591_v45 = vmul.f32 %v16241_v60, %v4562_v56  ;;  %v14285_v56 = vld [vmem:[%s18909_s5 + $0xf8] sm:$0xff] }
 0x41c   : > { %5280 = vmatpush.bf16.msrb.mxu0 %v14285_v56  ;;  %v16283_v56 = vpop.f32.mrf.mxu0 }
 0x41d   : > { %v4620_v41 = vadd.f32 %v16252_v40, %v4591_v45  ;;  %v14293_v45 = vld [vmem:[%s18909_s5 + $0x138] sm:$0xff] }
 0x41e   : > { %5454 = vmatpush.bf16.msra.mxu1 %v14293_v45 }
 0x41f   : > { %v4648_v51 = vmax.f32 %v4620_v41, 0.0 }
 0x420   : > { %v4494_v39 = vpop.f32.mrf.mxu3 }
 0x421   : > { %4676 = vst [vmem:[#allocation3] sm:$0xff] %v4648_v51  ;;  %v4563_v55 = vadd.f32 %v4494_v39, %v15993_v6  ;;  %v16277_v39 = vpop.f32.mrf.mxu1  ;;  %v16280_v9 = vpop.f32.mrf.mxu2 }
 0x423   : > { %v4592_v30 = vmul.f32 %v16241_v60, %v4563_v55 }
 0x425   : > { %v4621_v41 = vadd.f32 %v16252_v40, %v4592_v30  ;;  %12447 = vmatmul.msk.bf16.gmra.mxu3 %vm416_vm1, %v4431_v57  ;;  %v4414_v30 = vld [vmem:[%s15471_s22 + $0xc2] sm:$0xff] }
 0x427   : > { %v4649_v6 = vmax.f32 %v4621_v41, 0.0 }
 0x428   : > { %v4497_v27 = vpop.f32.mrf.mxu3 }
 0x429   : > { %4677 = vst [vmem:[#allocation3 + $0x8] sm:$0xff] %v4649_v6  ;;  %v4564_v25 = vadd.f32 %v4497_v27, %v16003_v35  ;;  %v4724_v18 = vpack.c.bf16 %v4649_v6, %v4648_v51  ;;  %v4432_v51 = vpack.c.bf16 %v4415_v5, %v4414_v30  ;;  %v14284_v6 = vld [vmem:[%s18909_s5 + $0xf0] sm:$0xff]  ;;  %v4174_v27 = vadd.f32 %v16099_v7, %v3978_v0 }
 0x42a   : > { %5281 = vmatpush.bf16.msrb.mxu0 %v14284_v6  ;;  %v3979_v30 = vadd.f32 %v16132_v44, %v16001_v24  ;;  %v14309_v24 = vld [vmem:[%s18909_s5 + $0x1b8] sm:$0xff] }
 0x42b   : > { %v4593_v55 = vmul.f32 %v16241_v60, %v4564_v25  ;;  %4960 = vmatmul.bf16.vlgmr.msrb.gmra.mxu1 %v4724_v18  ;;  %v16294_v18 = vpop.f32.mrf.mxu1  ;;  %v4370_v43 = vadd.f32 %v16127_v34, %v4174_v27  ;;  %v14292_v34 = vld [vmem:[%s18909_s5 + $0x130] sm:$0xff]  ;;  %5802 = vmatpush.bf16.msrb.mxu3 %v14309_v24 }
 0x42c   : > { %v4175_v44 = vadd.f32 %v16106_v49, %v3979_v30  ;;  %5455 = vmatpush.bf16.msra.mxu1 %v14292_v34  ;;  %v14308_v49 = vld [vmem:[%s18909_s5 + $0x1b0] sm:$0xff] }
 0x42d   : > { %v4622_v45 = vadd.f32 %v16252_v40, %v4593_v55  ;;  %v16298_v55 = vpop.f32.mrf.mxu2 }
 0x42e   : > { %v4371_v30 = vadd.f32 %v16140_v26, %v4175_v44 }
 0x42f   : > { %v4650_v57 = vmax.f32 %v4622_v45, 0.0  ;;  %5803 = vmatpush.bf16.msrb.mxu3 %v14308_v49 }
 0x430   : > { %v4499_v41 = vpop.f32.mrf.mxu3  ;;  %v4750_v5 = vld [vmem:[#allocation3 + $0x1] sm:$0xff] }
 0x431   : > { %4678 = vst [vmem:[#allocation3 + $0x10] sm:$0xff] %v4650_v57  ;;  %v4565_v35 = vadd.f32 %v4499_v41, %v16014_v59  ;;  %v16303_v59 = vpop.f32.mrf.mxu0  ;;  %v5011_v0 = vld [vmem:[#allocation3 + $0x2] sm:$0xff] }
 0x433   : > { %v4594_v25 = vmul.f32 %v16241_v60, %v4565_v35 }
 0x435   : > { %v4623_v45 = vadd.f32 %v16252_v40, %v4594_v25  ;;  %12448 = vmatmul.msk.bf16.gmra.mxu3 %vm416_vm1, %v4432_v51 }
 0x437   : > { %v4651_v52 = vmax.f32 %v4623_v45, 0.0  ;;  %v16317_v45 = vpop.f32.mrf.mxu1 }
 0x438   : > { %v4502_v41 = vpop.f32.mrf.mxu3  ;;  %v4751_v7 = vld [vmem:[#allocation3 + $0x9] sm:$0xff] }
 0x439   : > { %v5012_v35 = vld [vmem:[#allocation3 + $0xa] sm:$0xff]  ;;  %4679 = vst [vmem:[#allocation3 + $0x18] sm:$0xff] %v4651_v52  ;;  %v4566_v6 = vadd.f32 %v4502_v41, %v4370_v43  ;;  %v4770_v50 = vpack.c.bf16 %v4751_v7, %v4750_v5  ;;  %v16307_v51 = vpack.c.bf16 %v4651_v52, %v4650_v57  ;;  %v16321_v43 = vpop.f32.mrf.mxu2  ;;  %v4417_v5 = vld [vmem:[%s15471_s22 + $0xda] sm:$0xff]  ;;  %v3980_v7 = vadd.f32 %v16142_v32, %v16012_v3 }
 0x43a   : > { %v5031_v25 = vpack.c.bf16 %v5012_v35, %v5011_v0  ;;  %v4416_v52 = vld [vmem:[%s15471_s22 + $0xd2] sm:$0xff]  ;;  %v16331_v0 = vpop.f32.mrf.mxu0  ;;  %v14306_v3 = vld [vmem:[%s18909_s5 + $0x1a0] sm:$0xff] }
 0x43b   : > { %v4595_v27 = vmul.f32 %v16241_v60, %v4566_v6  ;;  %4853 = vmatmul.bf16.vlgmr.msra.gmra.mxu0 %v4770_v50  ;;  %4965 = vmatmul.bf16.gmra.mxu1 %v16307_v51  ;;  %v4433_v6 = vpack.c.bf16 %v4417_v5, %v4416_v52  ;;  %v4176_v34 = vadd.f32 %v16123_v63, %v3980_v7 }
 0x43c   : > { %5114 = vmatmul.bf16.vlgmr.msra.gmra.mxu2 %v5031_v25  ;;  %v14307_v25 = vld [vmem:[%s18909_s5 + $0x1a8] sm:$0xff]  ;;  %v3981_v63 = vadd.f32 %v16163_v14, %v16023_v13  ;;  %v14305_v14 = vld [vmem:[%s18909_s5 + $0x198] sm:$0xff] }
 0x43d   : > { %v4624_v57 = vadd.f32 %v16252_v40, %v4595_v27  ;;  %5804 = vmatpush.bf16.msrb.mxu3 %v14307_v25  ;;  %v4372_v32 = vadd.f32 %v16157_v58, %v4176_v34  ;;  %v14283_v58 = vld [vmem:[%s18909_s5 + $0xe8] sm:$0xff] }
 0x43e   : > { %v14291_v13 = vld [vmem:[%s18909_s5 + $0x128] sm:$0xff]  ;;  %v4177_v34 = vadd.f32 %v16135_v46, %v3981_v63  ;;  %5282 = vmatpush.bf16.msrb.mxu0 %v14283_v58  ;;  %v3982_v63 = vadd.f32 %v16174_v20, %v16038_v23  ;;  %v14302_v23 = vld [vmem:[%s18909_s5 + $0x180] sm:$0xff] }
 0x43f   : > { %v4652_v50 = vmax.f32 %v4624_v57, 0.0  ;;  %v16340_v44 = vpop.f32.mrf.mxu1  ;;  %5456 = vmatpush.bf16.msra.mxu1 %v14291_v13 }
 0x440   : > { %v4504_v41 = vpop.f32.mrf.mxu3  ;;  %v4752_v57 = vld [vmem:[#allocation3 + $0x11] sm:$0xff]  ;;  %v4373_v46 = vadd.f32 %v16170_v47, %v4177_v34 }
 0x441   : > { %4680 = vst [vmem:[#allocation3 + $0x20] sm:$0xff] %v4652_v50  ;;  %v4567_v35 = vadd.f32 %v4504_v41, %v4371_v30  ;;  %v16348_v52 = vpop.f32.mrf.mxu2  ;;  %v5013_v30 = vld [vmem:[#allocation3 + $0x12] sm:$0xff]  ;;  %5805 = vmatpush.bf16.msrb.mxu3 %v14306_v3  ;;  %v14304_v3 = vld [vmem:[%s18909_s5 + $0x190] sm:$0xff] }
 0x443   : > { %v4596_v24 = vmul.f32 %v16241_v60, %v4567_v35 }
 0x445   : > { %v4625_v26 = vadd.f32 %v16252_v40, %v4596_v24  ;;  %12449 = vmatmul.msk.bf16.gmra.mxu3 %vm416_vm1, %v4433_v6  ;;  %v16364_v24 = vpop.f32.mrf.mxu0 }
 0x446   : > { %5806 = vmatpush.bf16.msrb.mxu3 %v14305_v14 }
 0x447   : > { %v4653_v27 = vmax.f32 %v4625_v26, 0.0 }
 0x448   : > { %v4507_v5 = vpop.f32.mrf.mxu3  ;;  %v4753_v49 = vld [vmem:[#allocation3 + $0x19] sm:$0xff] }
 0x449   : > { %v5014_v41 = vld [vmem:[#allocation3 + $0x1a] sm:$0xff]  ;;  %4681 = vst [vmem:[#allocation3 + $0x28] sm:$0xff] %v4653_v27  ;;  %v4568_v7 = vadd.f32 %v4507_v5, %v4372_v32  ;;  %v16350_v35 = vpack.c.bf16 %v4753_v49, %v4752_v57  ;;  %v16352_v25 = vpack.c.bf16 %v4653_v27, %v4652_v50  ;;  %v16374_v27 = vpop.f32.mrf.mxu1  ;;  %v16378_v49 = vpop.f32.mrf.mxu2 }
 0x44a   : > { %v5032_v6 = vpack.c.bf16 %v5014_v41, %v5013_v30  ;;  %5807 = vmatpush.bf16.msrb.mxu3 %v14304_v3  ;;  %v14303_v30 = vld [vmem:[%s18909_s5 + $0x188] sm:$0xff]  ;;  %v4178_v41 = vadd.f32 %v16149_v10, %v3982_v63  ;;  %v3983_v10 = vadd.f32 %v16187_v17, %v16043_v4 }
 0x44b   : > { %v4597_v26 = vmul.f32 %v16241_v60, %v4568_v7  ;;  %4858 = vmatmul.bf16.gmra.mxu0 %v16350_v35  ;;  %4970 = vmatmul.bf16.gmra.mxu1 %v16352_v25 }
 0x44c   : > { %5119 = vmatmul.bf16.gmra.mxu2 %v5032_v6  ;;  %v4374_v20 = vadd.f32 %v16182_v53, %v4178_v41  ;;  %v14282_v53 = vld [vmem:[%s18909_s5 + $0xe0] sm:$0xff]  ;;  %v4179_v4 = vadd.f32 %v16168_v22, %v3983_v10 }
 0x44d   : > { %v4626_v50 = vadd.f32 %v16252_v40, %v4597_v26  ;;  %v16385_v7 = vpop.f32.mrf.mxu0  ;;  %5283 = vmatpush.bf16.msrb.mxu0 %v14282_v53  ;;  %v4421_v41 = vld [vmem:[%s15471_s22 + $0xfa] sm:$0xff] }
 0x44e   : > { %5808 = vmatpush.bf16.msrb.mxu3 %v14303_v30  ;;  %v4420_v30 = vld [vmem:[%s15471_s22 + $0xf2] sm:$0xff]  ;;  %v14290_v10 = vld [vmem:[%s18909_s5 + $0x120] sm:$0xff] }
 0x44f   : > { %v4654_v32 = vmax.f32 %v4626_v50, 0.0  ;;  %5457 = vmatpush.bf16.msra.mxu1 %v14290_v10 }
 0x450   : > { %v4509_v57 = vpop.f32.mrf.mxu3  ;;  %v4754_v13 = vld [vmem:[#allocation3 + $0x21] sm:$0xff] }
 0x451   : > { %4682 = vst [vmem:[#allocation3 + $0x30] sm:$0xff] %v4654_v32  ;;  %v4569_v5 = vadd.f32 %v4509_v57, %v4373_v46  ;;  %v5015_v26 = vld [vmem:[#allocation3 + $0x22] sm:$0xff]  ;;  %v16403_v63 = vpop.f32.mrf.mxu1 }
 0x452   : > { %5809 = vmatpush.bf16.msrb.mxu3 %v14302_v23 }
 0x453   : > { %v4598_v47 = vmul.f32 %v16241_v60, %v4569_v5  ;;  %v16408_v5 = vpop.f32.mrf.mxu2 }
 0x455   : > { %v4627_v6 = vadd.f32 %v16252_v40, %v4598_v47  ;;  %12450 = vmatmul.msk.bf16.gmra.mxu3 %vm416_vm1, %v16018_v37  ;;  %v4375_v47 = vadd.f32 %v16199_v38, %v4179_v4 }
 0x457   : > { %v4655_v58 = vmax.f32 %v4627_v6, 0.0  ;;  %v16415_v6 = vpop.f32.mrf.mxu0 }
 0x458   : > { %v4512_v14 = vpop.f32.mrf.mxu3  ;;  %v4755_v34 = vld [vmem:[#allocation3 + $0x29] sm:$0xff] }
 0x459   : > { %v5016_v50 = vld [vmem:[#allocation3 + $0x2a] sm:$0xff]  ;;  %4683 = vst [vmem:[#allocation3 + $0x38] sm:$0xff] %v4655_v58  ;;  %v4570_v3 = vadd.f32 %v4512_v14, %v4374_v20  ;;  %v16396_v37 = vpack.c.bf16 %v4755_v34, %v4754_v13  ;;  %v16398_v57 = vpack.c.bf16 %v4655_v58, %v4654_v32  ;;  %v3984_v20 = vadd.f32 %v16201_v36, %v16050_v8  ;;  %v16424_v38 = vpop.f32.mrf.mxu1 }
 0x45a   : > { %v5033_v46 = vpack.c.bf16 %v5016_v50, %v5015_v26  ;;  %v4435_v13 = vpack.c.bf16 %v4421_v41, %v4420_v30 }
 0x45b   : > { %v4599_v17 = vmul.f32 %v16241_v60, %v4570_v3  ;;  %4863 = vmatmul.bf16.gmra.mxu0 %v16396_v37  ;;  %4975 = vmatmul.bf16.gmra.mxu1 %v16398_v57  ;;  %v4180_v14 = vadd.f32 %v16180_v62, %v3984_v20  ;;  %v16428_v50 = vpop.f32.mrf.mxu2 }
 0x45c   : > { %5124 = vmatmul.bf16.gmra.mxu2 %v5033_v46  ;;  %v3985_v46 = vadd.f32 %v16222_v48, %v16060_v54 }
 0x45d   : > { %v4628_v32 = vadd.f32 %v16252_v40, %v4599_v17  ;;  %v4376_v8 = vadd.f32 %v16215_v1, %v4180_v14 }
 0x45e   : > { %v4181_v1 = vadd.f32 %v16191_v33, %v3985_v46  ;;  %v3986_v33 = vadd.f32 %v16246_v42, %v16070_v61 }
 0x45f   : > { %v4656_v23 = vmax.f32 %v4628_v32, 0.0  ;;  %v16433_v32 = vpop.f32.mrf.mxu0 }
 0x460   : > { %v4514_v22 = vpop.f32.mrf.mxu3  ;;  %v4756_v3 = vld [vmem:[#allocation3 + $0x31] sm:$0xff] }
 0x461   : > { %4684 = vst [vmem:[#allocation3 + $0x40] sm:$0xff] %v4656_v23  ;;  %v4571_v58 = vadd.f32 %v4514_v22, %v4375_v47  ;;  %v5017_v4 = vld [vmem:[#allocation3 + $0x32] sm:$0xff]  ;;  %v16444_v48 = vpop.f32.mrf.mxu1 }
 0x463   : > { %v4600_v34 = vmul.f32 %v16241_v60, %v4571_v58  ;;  %v4377_v58 = vadd.f32 %v16236_v2, %v4181_v1  ;;  %v16447_v10 = vpop.f32.mrf.mxu2 }
 0x465   : > { %v4629_v26 = vadd.f32 %v16252_v40, %v4600_v34  ;;  %12451 = vmatmul.msk.bf16.gmra.mxu3 %vm416_vm1, %v4435_v13  ;;  %v14281_v34 = vld [vmem:[%s18909_s5 + $0xd8] sm:$0xff] }
 0x466   : > { %5284 = vmatpush.bf16.msrb.mxu0 %v14281_v34  ;;  %v14280_v34 = vld [vmem:[%s18909_s5 + $0xd0] sm:$0xff] }
 0x467   : > { %v4657_v36 = vmax.f32 %v4629_v26, 0.0  ;;  %v14289_v26 = vld [vmem:[%s18909_s5 + $0x118] sm:$0xff]  ;;  %v16458_v2 = vpop.f32.mrf.mxu0 }
 0x468   : > { %v4517_v53 = vpop.f32.mrf.mxu3  ;;  %v4757_v62 = vld [vmem:[#allocation3 + $0x39] sm:$0xff]  ;;  %5458 = vmatpush.bf16.msra.mxu1 %v14289_v26 }
 0x469   : > { %v5018_v17 = vld [vmem:[#allocation3 + $0x3a] sm:$0xff]  ;;  %4685 = vst [vmem:[#allocation3 + $0x48] sm:$0xff] %v4657_v36  ;;  %v4572_v30 = vadd.f32 %v4517_v53, %v4376_v8  ;;  %v16435_v41 = vpack.c.bf16 %v4757_v62, %v4756_v3  ;;  %v16437_v22 = vpack.c.bf16 %v4657_v36, %v4656_v23  ;;  %v4182_v8 = vadd.f32 %v16213_v16, %v3986_v33  ;;  %v16466_v62 = vpop.f32.mrf.mxu1 }
 0x46a   : > { %v5034_v47 = vpack.c.bf16 %v5018_v17, %v5017_v4  ;;  %v3987_v53 = vadd.f32 %v16272_v11, %v16077_v15  ;;  %5285 = vmatpush.bf16.msrb.mxu0 %v14280_v34 }
 0x46b   : > { %v4601_v20 = vmul.f32 %v16241_v60, %v4572_v30  ;;  %4868 = vmatmul.bf16.gmra.mxu0 %v16435_v41  ;;  %4980 = vmatmul.bf16.gmra.mxu1 %v16437_v22  ;;  %v4378_v42 = vadd.f32 %v16263_v31, %v4182_v8 }
 0x46c   : > { %5129 = vmatmul.bf16.gmra.mxu2 %v5034_v47  ;;  %v4183_v31 = vadd.f32 %v16230_v28, %v3987_v53 }
 0x46d   : > { %v4630_v54 = vadd.f32 %v16252_v40, %v4601_v20 }
 0x46f   : > { %v4658_v13 = vmax.f32 %v4630_v54, 0.0  ;;  %v16478_v15 = vpop.f32.mrf.mxu0 }
 0x470   : > { %v4519_v23 = vpop.f32.mrf.mxu3  ;;  %v4758_v46 = vld [vmem:[#allocation3 + $0x41] sm:$0xff] }
 0x471   : > { %4686 = vst [vmem:[#allocation3 + $0x50] sm:$0xff] %v4658_v13  ;;  %v4573_v14 = vadd.f32 %v4519_v23, %v4377_v58  ;;  %v5019_v17 = vld [vmem:[#allocation3 + $0x42] sm:$0xff]  ;;  %v4379_v23 = vadd.f32 %v16280_v9, %v4183_v31  ;;  %v16487_v26 = vpop.f32.mrf.mxu1 }
 0x473   : > { %v4602_v36 = vmul.f32 %v16241_v60, %v4573_v14  ;;  %v3988_v14 = vadd.f32 %v16283_v56, %v16082_v19 }
 0x475   : > { %v4631_v61 = vadd.f32 %v16252_v40, %v4602_v36  ;;  %5810 = vmatmul.bf16.vlgmr.msrb.gmra.mxu3 %v16350_v35  ;;  %v16472_v35 = vpop.f32.mrf.mxu2  ;;  %v4184_v8 = vadd.f32 %v16259_v29, %v3988_v14 }
 0x477   : > { %v4659_v3 = vmax.f32 %v4631_v61, 0.0  ;;  %v4380_v19 = vadd.f32 %v16298_v55, %v4184_v8  ;;  %v16496_v56 = vpop.f32.mrf.mxu0  ;;  %v14288_v55 = vld [vmem:[%s18909_s5 + $0x110] sm:$0xff] }
 0x478   : > { %v4522_v16 = vpop.f32.mrf.mxu3  ;;  %v4759_v4 = vld [vmem:[#allocation3 + $0x49] sm:$0xff]  ;;  %5459 = vmatpush.bf16.msra.mxu1 %v14288_v55 }
 0x479   : > { %v5020_v30 = vld [vmem:[#allocation3 + $0x4a] sm:$0xff]  ;;  %4687 = vst [vmem:[#allocation3 + $0x58] sm:$0xff] %v4659_v3  ;;  %v4574_v47 = vadd.f32 %v4522_v16, %v4378_v42  ;;  %v16468_v1 = vpack.c.bf16 %v4759_v4, %v4758_v46  ;;  %v16470_v54 = vpack.c.bf16 %v4659_v3, %v4658_v13  ;;  %v3989_v46 = vadd.f32 %v16303_v59, %v16093_v21  ;;  %v16510_v21 = vpop.f32.mrf.mxu1 }
 0x47a   : > { %v5035_v20 = vpack.c.bf16 %v5020_v30, %v5019_v17 }
 0x47b   : > { %v4603_v58 = vmul.f32 %v16241_v60, %v4574_v47  ;;  %4873 = vmatmul.bf16.gmra.mxu0 %v16468_v1  ;;  %4985 = vmatmul.bf16.gmra.mxu1 %v16470_v54 }
 0x47c   : > { %5134 = vmatmul.bf16.gmra.mxu2 %v5035_v20 }
 0x47d   : > { %v4632_v11 = vadd.f32 %v16252_v40, %v4603_v58  ;;  %v16491_v61 = vpop.f32.mrf.mxu2 }
 0x47f   : > { %v4660_v33 = vmax.f32 %v4632_v11, 0.0 }
 0x480   : > { %v4524_v13 = vpop.f32.mrf.mxu3  ;;  %v4760_v3 = vld [vmem:[#allocation3 + $0x51] sm:$0xff] }
 0x481   : > { %4688 = vst [vmem:[#allocation3 + $0x60] sm:$0xff] %v4660_v33  ;;  %v4575_v28 = vadd.f32 %v4524_v13, %v4379_v23  ;;  %v5021_v16 = vld [vmem:[#allocation3 + $0x52] sm:$0xff]  ;;  %v16519_v13 = vpop.f32.mrf.mxu0 }
 0x483   : > { %v4604_v36 = vmul.f32 %v16241_v60, %v4575_v28 }
 0x485   : > { %v4633_v9 = vadd.f32 %v16252_v40, %v4604_v36  ;;  %5815 = vmatmul.bf16.gmra.mxu3 %v16396_v37  ;;  %v4185_v37 = vadd.f32 %v16277_v39, %v3989_v46  ;;  %v16514_v58 = vpop.f32.mrf.mxu2  ;;  %v3990_v39 = vadd.f32 %v16331_v0, %v16097_v12  ;;  %v16525_v36 = vpop.f32.mrf.mxu1 }
 0x487   : > { %v4661_v42 = vmax.f32 %v4633_v9, 0.0  ;;  %v4381_v11 = vadd.f32 %v16321_v43, %v4185_v37  ;;  %v4186_v28 = vadd.f32 %v16294_v18, %v3990_v39 }
 0x488   : > { %v4527_v53 = vpop.f32.mrf.mxu3  ;;  %v4761_v29 = vld [vmem:[#allocation3 + $0x59] sm:$0xff] }
 0x489   : > { %v5022_v4 = vld [vmem:[#allocation3 + $0x5a] sm:$0xff]  ;;  %4689 = vst [vmem:[#allocation3 + $0x68] sm:$0xff] %v4661_v42  ;;  %v4576_v17 = vadd.f32 %v4527_v53, %v4380_v19  ;;  %v16500_v30 = vpack.c.bf16 %v4761_v29, %v4760_v3  ;;  %v16502_v20 = vpack.c.bf16 %v4661_v42, %v4660_v33  ;;  %v4382_v43 = vadd.f32 %v16348_v52, %v4186_v28  ;;  %v18934_v42 = vld [vmem:[#allocation7_spill] sm:$0xff] }
 0x48a   : > { %v5036_v47 = vpack.c.bf16 %v5022_v4, %v5021_v16  ;;  %v3991_v12 = vadd.f32 %v16364_v24, %v18934_v42  ;;  %v14279_v52 = vld [vmem:[%s18909_s5 + $0xc8] sm:$0xff] }
 0x48b   : > { %v4605_v31 = vmul.f32 %v16241_v60, %v4576_v17  ;;  %4878 = vmatmul.bf16.gmra.mxu0 %v16500_v30  ;;  %4990 = vmatmul.bf16.gmra.mxu1 %v16502_v20  ;;  %v14287_v24 = vld [vmem:[%s18909_s5 + $0x108] sm:$0xff] }
 0x48c   : > { %5139 = vmatmul.bf16.gmra.mxu2 %v5036_v47  ;;  %v4187_v17 = vadd.f32 %v16317_v45, %v3991_v12  ;;  %v16543_v47 = vpop.f32.mrf.mxu0  ;;  %5286 = vmatpush.bf16.msrb.mxu0 %v14279_v52  ;;  %v14301_v45 = vld [vmem:[%s18909_s5 + $0x178] sm:$0xff] }
 0x48d   : > { %v4634_v59 = vadd.f32 %v16252_v40, %v4605_v31  ;;  %v16530_v0 = vpop.f32.mrf.mxu2  ;;  %5460 = vmatpush.bf16.msra.mxu1 %v14287_v24  ;;  %5628 = vmatpush.bf16.msrb.mxu2 %v14301_v45 }
 0x48e   : > { %v4383_v31 = vadd.f32 %v16378_v49, %v4187_v17  ;;  %v14278_v17 = vld [vmem:[%s18909_s5 + $0xc0] sm:$0xff] }
 0x48f   : > { %v4662_v23 = vmax.f32 %v4634_v59, 0.0 }
 0x490   : > { %v4529_v33 = vpop.f32.mrf.mxu3  ;;  %v4762_v19 = vld [vmem:[#allocation3 + $0x61] sm:$0xff]  ;;  %5287 = vmatpush.bf16.msrb.mxu0 %v14278_v17 }
 0x491   : > { %4690 = vst [vmem:[#allocation3 + $0x70] sm:$0xff] %v4662_v23  ;;  %v4577_v14 = vadd.f32 %v4529_v33, %v4381_v11  ;;  %v5023_v18 = vld [vmem:[#allocation3 + $0x62] sm:$0xff]  ;;  %v16550_v11 = vpop.f32.mrf.mxu1  ;;  %v18935_v33 = vld [vmem:[#allocation8_spill] sm:$0xff] }
 0x492   : > { %v3992_v39 = vadd.f32 %v16385_v7, %v18935_v33  ;;  %v14295_v17 = vld [vmem:[%s18909_s5 + $0x148] sm:$0xff] }
 0x493   : > { %v4606_v34 = vmul.f32 %v16241_v60, %v4577_v14 }
 0x495   : > { %v4635_v8 = vadd.f32 %v16252_v40, %v4606_v34  ;;  %5820 = vmatmul.bf16.gmra.mxu3 %v16435_v41  ;;  %v16557_v28 = vpop.f32.mrf.mxu2  ;;  %v4188_v34 = vadd.f32 %v16340_v44, %v3992_v39 }
 0x497   : > { %v4663_v9 = vmax.f32 %v4635_v8, 0.0  ;;  %v14300_v8 = vld [vmem:[%s18909_s5 + $0x170] sm:$0xff]  ;;  %v4384_v7 = vadd.f32 %v16408_v5, %v4188_v34  ;;  %v14297_v34 = vld [vmem:[%s18909_s5 + $0x158] sm:$0xff] }
 0x498   : > { %v4532_v3 = vpop.f32.mrf.mxu3  ;;  %v4763_v46 = vld [vmem:[#allocation3 + $0x69] sm:$0xff]  ;;  %5629 = vmatpush.bf16.msrb.mxu2 %v14300_v8 }
 0x499   : > { %v5024_v53 = vld [vmem:[#allocation3 + $0x6a] sm:$0xff]  ;;  %4691 = vst [vmem:[#allocation3 + $0x78] sm:$0xff] %v4663_v9  ;;  %v4578_v29 = vadd.f32 %v4532_v3, %v4382_v43  ;;  %v16532_v16 = vpack.c.bf16 %v4763_v46, %v4762_v19  ;;  %v16534_v4 = vpack.c.bf16 %v4663_v9, %v4662_v23  ;;  %v16564_v43 = vpop.f32.mrf.mxu0 }
 0x49a   : > { %v5037_v41 = vpack.c.bf16 %v5024_v53, %v5023_v18  ;;  %v18936_v3 = vld [vmem:[#allocation6_spill] sm:$0xff] }
 0x49b   : > { %v4607_v55 = vmul.f32 %v16241_v60, %v4578_v29  ;;  %4883 = vmatmul.bf16.gmra.mxu0 %v16532_v16  ;;  %4995 = vmatmul.bf16.gmra.mxu1 %v16534_v4  ;;  %v3993_v44 = vadd.f32 %v16415_v6, %v18936_v3 }
 0x49c   : > { %5144 = vmatmul.bf16.gmra.mxu2 %v5037_v41  ;;  %v14299_v41 = vld [vmem:[%s18909_s5 + $0x168] sm:$0xff] }
 0x49d   : > { %v4636_v37 = vadd.f32 %v16252_v40, %v4607_v55  ;;  %5630 = vmatpush.bf16.msrb.mxu2 %v14299_v41  ;;  %v4189_v6 = vadd.f32 %v16374_v27, %v3993_v44 }
 0x49f   : > { %v4664_v59 = vmax.f32 %v4636_v37, 0.0  ;;  %v16584_v37 = vpop.f32.mrf.mxu2 }
 0x4a0   : > { %v4534_v23 = vpop.f32.mrf.mxu3  ;;  %v4764_v42 = vld [vmem:[#allocation3 + $0x71] sm:$0xff] }
 0x4a1   : > { %4692 = vst [vmem:[#allocation3 + $0x80] sm:$0xff] %v4664_v59  ;;  %v4579_v14 = vadd.f32 %v4534_v23, %v4383_v31  ;;  %v5025_v12 = vld [vmem:[#allocation3 + $0x72] sm:$0xff]  ;;  %v4385_v23 = vadd.f32 %v16428_v50, %v4189_v6  ;;  %v16595_v45 = vpop.f32.mrf.mxu0  ;;  %v14296_v50 = vld [vmem:[%s18909_s5 + $0x150] sm:$0xff] }
 0x4a2   : > { %v14298_v31 = vld [vmem:[%s18909_s5 + $0x160] sm:$0xff] }
 0x4a3   : > { %v4608_v49 = vmul.f32 %v16241_v60, %v4579_v14  ;;  %5631 = vmatpush.bf16.msrb.mxu2 %v14298_v31 }
 0x4a5   : > { %v4637_v9 = vadd.f32 %v16252_v40, %v4608_v49  ;;  %5825 = vmatmul.bf16.gmra.mxu3 %v16468_v1  ;;  %v18937_v49 = vld [vmem:[#allocation9_spill] sm:$0xff] }
 0x4a6   : > { %v3994_v8 = vadd.f32 %v16433_v32, %v18937_v49 }
 0x4a7   : > { %v4665_v19 = vmax.f32 %v4637_v9, 0.0  ;;  %5632 = vmatpush.bf16.msrb.mxu2 %v14297_v34 }
 0x4a8   : > { %v4537_v46 = vpop.f32.mrf.mxu3  ;;  %v4765_v18 = vld [vmem:[#allocation3 + $0x79] sm:$0xff]  ;;  %v4961_v29 = vpop.f32.mrf.mxu1 }
 0x4a9   : > { %v5026_v53 = vld [vmem:[#allocation3 + $0x7a] sm:$0xff]  ;;  %4693 = vst [vmem:[#allocation3 + $0x88] sm:$0xff] %v4665_v19  ;;  %v4580_v52 = vadd.f32 %v4537_v46, %v4384_v7  ;;  %v16574_v1 = vpack.c.bf16 %v4765_v18, %v4764_v42  ;;  %v16576_v5 = vpack.c.bf16 %v4665_v19, %v4664_v59  ;;  %v4190_v7 = vadd.f32 %v16403_v63, %v3994_v8  ;;  %v18938_v18 = vld [vmem:[#allocation10_spill] sm:$0xff] }
 0x4aa   : > { %v5038_v24 = vpack.c.bf16 %v5026_v53, %v5025_v12  ;;  %v14286_v59 = vld [vmem:[%s18909_s5 + $0x100] sm:$0xff]  ;;  %v16609_v12 = vpop.f32.mrf.mxu2  ;;  %v3995_v63 = vadd.f32 %v16458_v2, %v18938_v18 }
 0x4ab   : > { %v4609_v55 = vmul.f32 %v16241_v60, %v4580_v52  ;;  %4888 = vmatmul.bf16.gmra.mxu0 %v16574_v1  ;;  %5000 = vmatmul.bf16.gmra.mxu1 %v16576_v5  ;;  %v4386_v32 = vadd.f32 %v16447_v10, %v4190_v7 }
 0x4ac   : > { %5149 = vmatmul.bf16.gmra.mxu2 %v5038_v24  ;;  %5461 = vmatpush.bf16.msra.mxu1 %v14286_v59  ;;  %v4191_v2 = vadd.f32 %v16424_v38, %v3995_v63 }
 0x4ad   : > { %v4638_v27 = vadd.f32 %v16252_v40, %v4609_v55  ;;  %5633 = vmatpush.bf16.msrb.mxu2 %v14296_v50 }
 0x4af   : > { %v4666_v33 = vmax.f32 %v4638_v27, 0.0 }
 0x4b0   : > { %v4539_v39 = vpop.f32.mrf.mxu3  ;;  %v4963_v14 = vpop.f32.mrf.mxu1  ;;  %v4766_v44 = vld [vmem:[#allocation3 + $0x81] sm:$0xff] }
 0x4b1   : > { %4694 = vst [vmem:[#allocation3 + $0x90] sm:$0xff] %v4666_v33  ;;  %v4581_v9 = vadd.f32 %v4539_v39, %v4385_v23  ;;  %v5027_v46 = vld [vmem:[#allocation3 + $0x82] sm:$0xff]  ;;  %5634 = vmatpush.bf16.msrb.mxu2 %v14295_v17 }
 0x4b3   : > { %v4610_v19 = vmul.f32 %v16241_v60, %v4581_v9  ;;  %v18939_v9 = vld [vmem:[#allocation11_spill] sm:$0xff] }
 0x4b4   : > { %v3996_v7 = vadd.f32 %v16478_v15, %v18939_v9 }
 0x4b5   : > { %v4639_v42 = vadd.f32 %v16252_v40, %v4610_v19  ;;  %5830 = vmatmul.bf16.gmra.mxu3 %v16500_v30 }
 0x4b7   : > { %v4667_v3 = vmax.f32 %v4639_v42, 0.0 }
 0x4b8   : > { %v4542_v53 = vpop.f32.mrf.mxu3  ;;  %v4854_v41 = vpop.f32.mrf.mxu0  ;;  %v4767_v52 = vld [vmem:[#allocation3 + $0x89] sm:$0xff] }
 0x4b9   : > { %v5028_v24 = vld [vmem:[#allocation3 + $0x8a] sm:$0xff]  ;;  %4695 = vst [vmem:[#allocation3 + $0x98] sm:$0xff] %v4667_v3  ;;  %v4582_v30 = vadd.f32 %v4542_v53, %v4386_v32  ;;  %v4962_v6 = vadd.f32 %v4961_v29, %v4854_v41  ;;  %v16617_v55 = vpack.c.bf16 %v4767_v52, %v4766_v44  ;;  %v4966_v31 = vpop.f32.mrf.mxu1  ;;  %v16619_v59 = vpack.c.bf16 %v4667_v3, %v4666_v33  ;;  %v14294_v29 = vld [vmem:[%s18909_s5 + $0x140] sm:$0xff] }
 0x4ba   : > { %v5039_v10 = vpack.c.bf16 %v5028_v24, %v5027_v46  ;;  %5635 = vmatpush.bf16.msrb.mxu2 %v14294_v29  ;;  %v4387_v33 = vadd.f32 %v16472_v35, %v4191_v2  ;;  %v14317_v32 = vld [vmem:[%s18909_s5 + $0x1f8] sm:$0xff]  ;;  %v4192_v3 = vadd.f32 %v16444_v48, %v3996_v7  ;;  %v18940_v52 = vld [vmem:[#allocation12_spill] sm:$0xff] }
 0x4bb   : > { %v4611_v27 = vmul.f32 %v16241_v60, %v4582_v30  ;;  %4893 = vmatmul.bf16.gmra.mxu0 %v16617_v55  ;;  %5005 = vmatmul.bf16.gmra.mxu1 %v16619_v59  ;;  %v14325_v35 = vld [vmem:[%s18909_s5 + $0x238] sm:$0xff]  ;;  %v3997_v24 = vadd.f32 %v16496_v56, %v18940_v52  ;;  %v5362_v52 = vld [vmem:[#allocation3 + $0x1c] sm:$0xff] }
 0x4bc   : > { %5154 = vmatmul.bf16.gmra.mxu2 %v5039_v10  ;;  %5976 = vmatpush.bf16.msra.mxu0 %v14317_v32  ;;  %v4388_v46 = vadd.f32 %v16491_v61, %v4192_v3  ;;  %v5360_v41 = vld [vmem:[#allocation3 + $0xc] sm:$0xff] }
 0x4bd   : > { %v4640_v23 = vadd.f32 %v16252_v40, %v4611_v27  ;;  %6150 = vmatpush.bf16.msrb.mxu1 %v14325_v35 }
 0x4bf   : > { %v5115_v39 = vpop.f32.mrf.mxu2  ;;  %v4668_v34 = vmax.f32 %v4640_v23, 0.0  ;;  %v5359_v23 = vld [vmem:[#allocation3 + $0x4] sm:$0xff] }
 0x4c0   : > { %v16630_v49 = vadd.f32 %v5115_v39, %v4962_v6  ;;  %v4544_v38 = vpop.f32.mrf.mxu3  ;;  %v4856_v8 = vpop.f32.mrf.mxu0  ;;  %v4768_v53 = vld [vmem:[#allocation3 + $0x91] sm:$0xff]  ;;  %v5379_v39 = vpack.c.bf16 %v5360_v41, %v5359_v23 }
 0x4c1   : > { %4696 = vst [vmem:[#allocation3 + $0xa0] sm:$0xff] %v4668_v34  ;;  %v4583_v19 = vadd.f32 %v4544_v38, %v4387_v33  ;;  %v4964_v50 = vadd.f32 %v4963_v14, %v4856_v8  ;;  %v4968_v42 = vpop.f32.mrf.mxu1  ;;  %v5029_v6 = vld [vmem:[#allocation3 + $0x92] sm:$0xff]  ;;  %v4193_v38 = vadd.f32 %v16466_v62, %v3997_v24 }
 0x4c3   : > { %v4612_v44 = vmul.f32 %v16241_v60, %v4583_v19 }
 0x4c5   : > { %v4641_v15 = vadd.f32 %v16252_v40, %v4612_v44  ;;  %5835 = vmatmul.bf16.gmra.mxu3 %v16532_v16 }
 0x4c7   : > { %v5117_v14 = vpop.f32.mrf.mxu2  ;;  %v4669_v18 = vmax.f32 %v4641_v15, 0.0  ;;  %v14316_v15 = vld [vmem:[%s18909_s5 + $0x1f0] sm:$0xff] }
 0x4c8   : > { %v16645_v63 = vadd.f32 %v5117_v14, %v4964_v50  ;;  %v4547_v48 = vpop.f32.mrf.mxu3  ;;  %v4859_v17 = vpop.f32.mrf.mxu0  ;;  %v4769_v30 = vld [vmem:[#allocation3 + $0x99] sm:$0xff]  ;;  %5977 = vmatpush.bf16.msra.mxu0 %v14316_v15 }
 0x4c9   : > { %v5030_v10 = vld [vmem:[#allocation3 + $0x9a] sm:$0xff]  ;;  %4697 = vst [vmem:[#allocation3 + $0xa8] sm:$0xff] %v4669_v18  ;;  %v4584_v2 = vadd.f32 %v4547_v48, %v4388_v46  ;;  %v4967_v27 = vadd.f32 %v4966_v31, %v4859_v17  ;;  %v16649_v16 = vpack.c.bf16 %v4769_v30, %v4768_v53  ;;  %v4971_v61 = vpop.f32.mrf.mxu1  ;;  %v16651_v33 = vpack.c.bf16 %v4669_v18, %v4668_v34  ;;  %v5186_v53 = vld [vmem:[#allocation3 + $0xb] sm:$0xff]  ;;  %v5185_v17 = vld [vmem:[#allocation3 + $0x3] sm:$0xff] }
 0x4ca   : > { %v5040_v29 = vpack.c.bf16 %v5030_v10, %v5029_v6  ;;  %v4389_v31 = vadd.f32 %v16514_v58, %v4193_v38  ;;  %v18941_v34 = vld [vmem:[#allocation13_spill] sm:$0xff]  ;;  %v18942_v30 = vld [vmem:[#allocation14_spill] sm:$0xff] }
 0x4cb   : > { %v4613_v56 = vmul.f32 %v16241_v60, %v4584_v2  ;;  %4898 = vmatmul.bf16.gmra.mxu0 %v16649_v16  ;;  %5462 = vmatmul.bf16.vlgmr.msra.gmra.mxu1 %v5379_v39  ;;  %v3998_v35 = vadd.f32 %v16519_v13, %v18941_v34  ;;  %v5205_v2 = vpack.c.bf16 %v5186_v53, %v5185_v17 }
 0x4cc   : > { %5159 = vmatmul.bf16.gmra.mxu2 %v5040_v29  ;;  %v14341_v29 = vld [vmem:[%s18909_s5 + $0x2b8] sm:$0xff] }
 0x4cd   : > { %v4642_v8 = vadd.f32 %v16252_v40, %v4613_v56  ;;  %v4194_v14 = vadd.f32 %v16487_v26, %v3998_v35  ;;  %v3999_v26 = vadd.f32 %v16543_v47, %v18942_v30  ;;  %6498 = vmatpush.bf16.msra.mxu3 %v14341_v29 }
 0x4cf   : > { %v5120_v9 = vpop.f32.mrf.mxu2  ;;  %v4670_v7 = vmax.f32 %v4642_v8, 0.0  ;;  %v4390_v13 = vadd.f32 %v16530_v0, %v4194_v14  ;;  %v14324_v0 = vld [vmem:[%s18909_s5 + $0x230] sm:$0xff]  ;;  %v4195_v39 = vadd.f32 %v16510_v21, %v3999_v26 }
 0x4d0   : > { %v16658_v19 = vadd.f32 %v5120_v9, %v4967_v27  ;;  %v4549_v50 = vpop.f32.mrf.mxu3  ;;  %v4861_v32 = vpop.f32.mrf.mxu0  ;;  %6151 = vmatpush.bf16.msrb.mxu1 %v14324_v0 }
 0x4d1   : > { %4698 = vst [vmem:[#allocation3 + $0xb0] sm:$0xff] %v4670_v7  ;;  %v4585_v62 = vadd.f32 %v4549_v50, %v4389_v31  ;;  %v4969_v3 = vadd.f32 %v4968_v42, %v4861_v32  ;;  %v4973_v44 = vpop.f32.mrf.mxu1  ;;  %v4391_v8 = vadd.f32 %v16557_v28, %v4195_v39  ;;  %v18943_v7 = vld [vmem:[#allocation15_spill] sm:$0xff]  ;;  %v14315_v28 = vld [vmem:[%s18909_s5 + $0x1e8] sm:$0xff] }
 0x4d2   : > { %v4000_v50 = vadd.f32 %v16564_v43, %v18943_v7  ;;  %5978 = vmatpush.bf16.msra.mxu0 %v14315_v28  ;;  %v14338_v43 = vld [vmem:[%s18909_s5 + $0x2a0] sm:$0xff]  ;;  %v5190_v7 = vld [vmem:[#allocation3 + $0x2b] sm:$0xff] }
 0x4d3   : > { %v4614_v58 = vmul.f32 %v16241_v60, %v4585_v62  ;;  %v14547_v62 = vld [vmem:[%s18911_s7 + $0x2] ss:$0 sm:$0xff] }
 0x4d4   : > { %v4196_v35 = vadd.f32 %v16525_v36, %v4000_v50  ;;  %v14323_v36 = vld [vmem:[%s18909_s5 + $0x228] sm:$0xff] }
 0x4d5   : > { %v4643_v46 = vadd.f32 %v16252_v40, %v4614_v58  ;;  %5840 = vmatmul.bf16.gmra.mxu3 %v16574_v1  ;;  %v5361_v1 = vld [vmem:[#allocation3 + $0x14] sm:$0xff]  ;;  %6152 = vmatpush.bf16.msrb.mxu1 %v14323_v36 }
 0x4d6   : > { %v16680_v23 = vpack.c.bf16 %v5362_v52, %v5361_v1  ;;  %v5188_v58 = vld [vmem:[#allocation3 + $0x1b] sm:$0xff] }
 0x4d7   : > { %v5122_v18 = vpop.f32.mrf.mxu2  ;;  %v4671_v41 = vmax.f32 %v4643_v46, 0.0  ;;  %v4392_v46 = vadd.f32 %v16584_v37, %v4196_v35 }
 0x4d8   : > { %v16670_v42 = vadd.f32 %v5122_v18, %v4969_v3  ;;  %v4552_v24 = vpop.f32.mrf.mxu3  ;;  %v4864_v48 = vpop.f32.mrf.mxu0 }
 0x4d9   : > { %4699 = vst [vmem:[#allocation3 + $0xb8] sm:$0xff] %v4671_v41  ;;  %v4586_v6 = vadd.f32 %v4552_v24, %v4390_v13  ;;  %v4972_v10 = vadd.f32 %v4971_v61, %v4864_v48  ;;  %v4976_v27 = vpop.f32.mrf.mxu1  ;;  %v14340_v61 = vld [vmem:[%s18909_s5 + $0x2b0] sm:$0xff]  ;;  %v5187_v24 = vld [vmem:[#allocation3 + $0x13] sm:$0xff] }
 0x4da   : > { %6499 = vmatpush.bf16.msra.mxu3 %v14340_v61  ;;  %v5364_v13 = vld [vmem:[#allocation3 + $0x2c] sm:$0xff]  ;;  %v18944_v48 = vld [vmem:[#allocation16_spill] sm:$0xff]  ;;  %v16723_v37 = vpack.c.bf16 %v5188_v58, %v5187_v24  ;;  %v5725_v24 = vld [vmem:[#allocation3 + $0xa1] sm:$0xff] }
 0x4db   : > { %v4615_v47 = vmul.f32 %v16241_v60, %v4586_v6  ;;  %5288 = vmatmul.bf16.vlgmr.msrb.gmra.mxu0 %v5205_v2  ;;  %5467 = vmatmul.bf16.gmra.mxu1 %v16680_v23  ;;  %v4001_v17 = vadd.f32 %v16595_v45, %v18944_v48  ;;  %v14336_v45 = vld [vmem:[%s18909_s5 + $0x290] sm:$0xff] }
 0x4dc   : > { %5636 = vmatmul.bf16.vlgmr.msrb.gmra.mxu2 %v16307_v51  ;;  %v14339_v51 = vld [vmem:[%s18909_s5 + $0x2a8] sm:$0xff] }
 0x4dd   : > { %v4644_v38 = vadd.f32 %v16252_v40, %v4615_v47  ;;  %v4197_v1 = vadd.f32 %v16550_v11, %v4001_v17  ;;  %v5192_v17 = vld [vmem:[#allocation3 + $0x3b] sm:$0xff] }
 0x4de   : > { %6500 = vmatpush.bf16.msra.mxu3 %v14339_v51 }
 0x4df   : > { %v5125_v56 = vpop.f32.mrf.mxu2  ;;  %v4672_v9 = vmax.f32 %v4644_v38, 0.0  ;;  %v4393_v39 = vadd.f32 %v16609_v12, %v4197_v1  ;;  %v14334_v12 = vld [vmem:[%s18909_s5 + $0x280] sm:$0xff] }
 0x4e0   : > { %v16691_v21 = vadd.f32 %v5125_v56, %v4972_v10  ;;  %v4554_v60 = vpop.f32.mrf.mxu3  ;;  %v4866_v31 = vpop.f32.mrf.mxu0  ;;  %v5363_v10 = vld [vmem:[#allocation3 + $0x24] sm:$0xff] }
 0x4e1   : > { %4700 = vst [vmem:[#allocation3 + $0xc0] sm:$0xff] %v4672_v9  ;;  %v4587_v32 = vadd.f32 %v4554_v60, %v4391_v8  ;;  %v4974_v40 = vadd.f32 %v4973_v44, %v4866_v31  ;;  %v4978_v34 = vpop.f32.mrf.mxu1  ;;  %v14548_v44 = vld [vmem:[%s18911_s7 + $0x3] ss:$0 sm:$0xff]  ;;  %v16725_v2 = vpack.c.bf16 %v5364_v13, %v5363_v10  ;;  %v5726_v13 = vld [vmem:[#allocation3 + $0xa9] sm:$0xff]  ;;  %v5191_v10 = vld [vmem:[#allocation3 + $0x33] sm:$0xff] }
 0x4e2   : > { %6501 = vmatpush.bf16.msra.mxu3 %v14338_v43 }
 0x4e3   : > { %v4616_v3 = vmul.f32 %v14547_v62, %v4587_v32 }
 0x4e5   : > { %v4645_v15 = vadd.f32 %v14548_v44, %v4616_v3  ;;  %5845 = vmatmul.bf16.gmra.mxu3 %v16617_v55  ;;  %v14337_v55 = vld [vmem:[%s18909_s5 + $0x298] sm:$0xff] }
 0x4e6   : > { %6502 = vmatpush.bf16.msra.mxu3 %v14337_v55  ;;  %v5736_v55 = vpack.c.bf16 %v5726_v13, %v5725_v24  ;;  %v14312_v13 = vld [vmem:[%s18909_s5 + $0x1d0] sm:$0xff]  ;;  %v6406_v24 = vld [vmem:[#allocation3 + $0x38] sm:$0xff] }
 0x4e7   : > { %v5127_v14 = vpop.f32.mrf.mxu2  ;;  %v4673_v18 = vmax.f32 %v4645_v15, 0.0  ;;  %v14322_v15 = vld [vmem:[%s18909_s5 + $0x220] sm:$0xff] }
 0x4e8   : > { %v16716_v53 = vadd.f32 %v5127_v14, %v4974_v40  ;;  %v4557_v41 = vpop.f32.mrf.mxu3  ;;  %v4869_v52 = vpop.f32.mrf.mxu0  ;;  %v5366_v40 = vld [vmem:[#allocation3 + $0x3c] sm:$0xff]  ;;  %6153 = vmatpush.bf16.msrb.mxu1 %v14322_v15 }
 0x4e9   : > { %4701 = vst [vmem:[#allocation3 + $0xc8] sm:$0xff] %v4673_v18  ;;  %v4588_v30 = vadd.f32 %v4557_v41, %v4392_v46  ;;  %v4977_v26 = vadd.f32 %v4976_v27, %v4869_v52  ;;  %v4981_v6 = vpop.f32.mrf.mxu1 }
 0x4ea   : > { %6503 = vmatpush.bf16.msra.mxu3 %v14336_v45 }
 0x4eb   : > { %v4617_v0 = vmul.f32 %v14547_v62, %v4588_v30  ;;  %5293 = vmatmul.bf16.gmra.mxu0 %v16723_v37  ;;  %5472 = vmatmul.bf16.gmra.mxu1 %v16725_v2 }
 0x4ec   : > { %5641 = vmatmul.bf16.gmra.mxu2 %v16352_v25  ;;  %v14335_v25 = vld [vmem:[%s18909_s5 + $0x288] sm:$0xff] }
 0x4ed   : > { %v4646_v27 = vadd.f32 %v14548_v44, %v4617_v0  ;;  %v16769_v0 = vpack.c.bf16 %v5192_v17, %v5191_v10  ;;  %v6405_v17 = vld [vmem:[#allocation3 + $0x30] sm:$0xff]  ;;  %v5196_v10 = vld [vmem:[#allocation3 + $0x5b] sm:$0xff] }
 0x4ee   : > { %6504 = vmatpush.bf16.msra.mxu3 %v14335_v25 }
 0x4ef   : > { %v5130_v29 = vpop.f32.mrf.mxu2  ;;  %v4674_v47 = vmax.f32 %v4646_v27, 0.0  ;;  %v5367_v27 = vld [vmem:[#allocation3 + $0x44] sm:$0xff] }
 0x4f0   : > { %v16735_v61 = vadd.f32 %v5130_v29, %v4977_v26  ;;  %v4559_v11 = vpop.f32.mrf.mxu3  ;;  %v4871_v38 = vpop.f32.mrf.mxu0 }
 0x4f1   : > { %4702 = vst [vmem:[#allocation3 + $0xd0] sm:$0xff] %v4674_v47  ;;  %v4589_v56 = vadd.f32 %v4559_v11, %v4393_v39  ;;  %v4979_v8 = vadd.f32 %v4978_v34, %v4871_v38  ;;  %v4983_v9 = vpop.f32.mrf.mxu1  ;;  %v14314_v34 = vld [vmem:[%s18909_s5 + $0x1e0] sm:$0xff]  ;;  %v14313_v39 = vld [vmem:[%s18909_s5 + $0x1d8] sm:$0xff] }
 0x4f2   : > { %6505 = vmatpush.bf16.msra.mxu3 %v14334_v12  ;;  %5979 = vmatpush.bf16.msra.mxu0 %v14314_v34  ;;  %v14321_v47 = vld [vmem:[%s18909_s5 + $0x218] sm:$0xff] }
 0x4f3   : > { %v4618_v60 = vmul.f32 %v14547_v62, %v4589_v56  ;;  %v5189_v62 = vld [vmem:[#allocation3 + $0x23] sm:$0xff]  ;;  %6154 = vmatpush.bf16.msrb.mxu1 %v14321_v47  ;;  %v5195_v47 = vld [vmem:[#allocation3 + $0x53] sm:$0xff] }
 0x4f4   : > { %v16751_v43 = vpack.c.bf16 %v5190_v7, %v5189_v62 }
 0x4f5   : > { %v4647_v31 = vadd.f32 %v14548_v44, %v4618_v60  ;;  %5850 = vmatmul.bf16.gmra.mxu3 %v16649_v16  ;;  %v5365_v44 = vld [vmem:[#allocation3 + $0x34] sm:$0xff]  ;;  %v6403_v60 = vld [vmem:[#allocation3 + $0x20] sm:$0xff] }
 0x4f6   : > { %v16756_v36 = vpack.c.bf16 %v5366_v40, %v5365_v44  ;;  %5980 = vmatpush.bf16.msra.mxu0 %v14313_v39  ;;  %v5369_v44 = vld [vmem:[#allocation3 + $0x54] sm:$0xff] }
 0x4f7   : > { %v5132_v51 = vpop.f32.mrf.mxu2  ;;  %v4675_v50 = vmax.f32 %v4647_v31, 0.0 }
 0x4f8   : > { %v16744_v32 = vadd.f32 %v5132_v51, %v4979_v8  ;;  %v4874_v28 = vpop.f32.mrf.mxu0  ;;  %v16749_v35 = vpop.f32.mrf.mxu3  ;;  %v6404_v8 = vld [vmem:[#allocation3 + $0x28] sm:$0xff] }
 0x4f9   : > { %4703 = vst [vmem:[#allocation3 + $0xd8] sm:$0xff] %v4675_v50  ;;  %v4982_v3 = vadd.f32 %v4981_v6, %v4874_v28  ;;  %v4986_v16 = vpop.f32.mrf.mxu1  ;;  %v6423_v12 = vpack.c.bf16 %v6404_v8, %v6403_v60  ;;  %v5194_v51 = vld [vmem:[#allocation3 + $0x4b] sm:$0xff]  ;;  %v5370_v50 = vld [vmem:[#allocation3 + $0x5c] sm:$0xff] }
 0x4fa   : > { %v5193_v28 = vld [vmem:[#allocation3 + $0x43] sm:$0xff]  ;;  %v16792_v15 = vpack.c.bf16 %v5370_v50, %v5369_v44  ;;  %5981 = vmatpush.bf16.msra.mxu0 %v14312_v13  ;;  %v5198_v13 = vld [vmem:[#allocation3 + $0x6b] sm:$0xff] }
 0x4fb   : > { %5298 = vmatmul.bf16.gmra.mxu0 %v16751_v43  ;;  %5477 = vmatmul.bf16.gmra.mxu1 %v16756_v36  ;;  %v6408_v50 = vld [vmem:[#allocation3 + $0x48] sm:$0xff] }
 0x4fc   : > { %5646 = vmatmul.bf16.gmra.mxu2 %v16398_v57  ;;  %v5368_v57 = vld [vmem:[#allocation3 + $0x4c] sm:$0xff] }
 0x4fd   : > { %v16771_v29 = vpack.c.bf16 %v5368_v57, %v5367_v27  ;;  %v6424_v57 = vpack.c.bf16 %v6406_v24, %v6405_v17  ;;  %v5374_v24 = vld [vmem:[#allocation3 + $0x7c] sm:$0xff] }
 0x4ff   : > { %v5135_v14 = vpop.f32.mrf.mxu2 }
 0x500   : > { %v16761_v58 = vadd.f32 %v5135_v14, %v4982_v3  ;;  %v4876_v46 = vpop.f32.mrf.mxu0  ;;  %v16763_v18 = vpop.f32.mrf.mxu3  ;;  %v16790_v3 = vpack.c.bf16 %v5194_v51, %v5193_v28 }
 0x501   : > { %v4984_v41 = vadd.f32 %v4983_v9, %v4876_v46  ;;  %v4988_v52 = vpop.f32.mrf.mxu1 }
 0x505   : > { %5855 = vmatmul.bf16.gmra.mxu3 %v5736_v55 }
 0x507   : > { %v5137_v48 = vpop.f32.mrf.mxu2 }
 0x508   : > { %v16765_v30 = vadd.f32 %v5137_v48, %v4984_v41  ;;  %v4879_v26 = vpop.f32.mrf.mxu0  ;;  %v16767_v6 = vpop.f32.mrf.mxu3 }
 0x509   : > { %v4987_v1 = vadd.f32 %v4986_v16, %v4879_v26  ;;  %v4991_v45 = vpop.f32.mrf.mxu1 }
 0x50b   : > { %5303 = vmatmul.bf16.gmra.mxu0 %v16769_v0  ;;  %5482 = vmatmul.bf16.gmra.mxu1 %v16771_v29 }
 0x50c   : > { %5651 = vmatmul.bf16.gmra.mxu2 %v16437_v22 }
 0x50f   : > { %v5140_v11 = vpop.f32.mrf.mxu2 }
 0x510   : > { %v16782_v38 = vadd.f32 %v5140_v11, %v4987_v1  ;;  %v4881_v25 = vpop.f32.mrf.mxu0  ;;  %v16784_v56 = vpop.f32.mrf.mxu3 }
 0x511   : > { %v4989_v22 = vadd.f32 %v4988_v52, %v4881_v25  ;;  %v4993_v9 = vpop.f32.mrf.mxu1  ;;  %v16811_v25 = vpack.c.bf16 %v5196_v10, %v5195_v47  ;;  %v5373_v10 = vld [vmem:[#allocation3 + $0x74] sm:$0xff] }
 0x515   : > { %6506 = vmatmul.bf16.vlgmr.msra.gmra.mxu3 %v6423_v12 }
 0x517   : > { %v5142_v31 = vpop.f32.mrf.mxu2 }
 0x518   : > { %v16786_v7 = vadd.f32 %v5142_v31, %v4989_v22  ;;  %v4884_v40 = vpop.f32.mrf.mxu0  ;;  %v16788_v34 = vpop.f32.mrf.mxu3  ;;  %v5371_v22 = vld [vmem:[#allocation3 + $0x64] sm:$0xff] }
 0x519   : > { %v4992_v62 = vadd.f32 %v4991_v45, %v4884_v40  ;;  %v4996_v16 = vpop.f32.mrf.mxu1  ;;  %v5372_v45 = vld [vmem:[#allocation3 + $0x6c] sm:$0xff] }
 0x51b   : > { %5308 = vmatmul.bf16.gmra.mxu0 %v16790_v3  ;;  %5487 = vmatmul.bf16.gmra.mxu1 %v16792_v15 }
 0x51c   : > { %5656 = vmatmul.bf16.gmra.mxu2 %v16470_v54  ;;  %v14320_v54 = vld [vmem:[%s18909_s5 + $0x210] sm:$0xff] }
 0x51d   : > { %6155 = vmatpush.bf16.msrb.mxu1 %v14320_v54  ;;  %v5197_v54 = vld [vmem:[#allocation3 + $0x63] sm:$0xff] }
 0x51f   : > { %v5145_v14 = vpop.f32.mrf.mxu2 }
 0x520   : > { %v16797_v46 = vadd.f32 %v5145_v14, %v4992_v62  ;;  %v4886_v41 = vpop.f32.mrf.mxu0  ;;  %v16802_v52 = vpop.f32.mrf.mxu3  ;;  %v14311_v62 = vld [vmem:[%s18909_s5 + $0x1c8] sm:$0xff] }
 0x521   : > { %v4994_v55 = vadd.f32 %v4993_v9, %v4886_v41  ;;  %v4998_v48 = vpop.f32.mrf.mxu1  ;;  %v16813_v9 = vpack.c.bf16 %v5372_v45, %v5371_v22  ;;  %5982 = vmatpush.bf16.msra.mxu0 %v14311_v62  ;;  %v16834_v45 = vpack.c.bf16 %v5374_v24, %v5373_v10 }
 0x525   : > { %6511 = vmatmul.bf16.gmra.mxu3 %v6424_v57  ;;  %v16832_v57 = vpack.c.bf16 %v5198_v13, %v5197_v54  ;;  %v5376_v13 = vld [vmem:[#allocation3 + $0x8c] sm:$0xff] }
 0x526   : > { %v5199_v54 = vld [vmem:[#allocation3 + $0x73] sm:$0xff] }
 0x527   : > { %v5147_v26 = vpop.f32.mrf.mxu2 }
 0x528   : > { %v16807_v1 = vadd.f32 %v5147_v26, %v4994_v55  ;;  %v4889_v27 = vpop.f32.mrf.mxu0  ;;  %v16809_v39 = vpop.f32.mrf.mxu3 }
 0x529   : > { %v4997_v11 = vadd.f32 %v4996_v16, %v4889_v27  ;;  %v5001_v8 = vpop.f32.mrf.mxu1  ;;  %v14319_v16 = vld [vmem:[%s18909_s5 + $0x208] sm:$0xff]  ;;  %v14333_v27 = vld [vmem:[%s18909_s5 + $0x278] sm:$0xff] }
 0x52a   : > { %6156 = vmatpush.bf16.msrb.mxu1 %v14319_v16  ;;  %6324 = vmatpush.bf16.msra.mxu2 %v14333_v27  ;;  %v14331_v16 = vld [vmem:[%s18909_s5 + $0x268] sm:$0xff] }
 0x52b   : > { %5313 = vmatmul.bf16.gmra.mxu0 %v16811_v25  ;;  %5492 = vmatmul.bf16.gmra.mxu1 %v16813_v9 }
 0x52c   : > { %5661 = vmatmul.bf16.gmra.mxu2 %v16502_v20  ;;  %v6407_v20 = vld [vmem:[#allocation3 + $0x40] sm:$0xff] }
 0x52d   : > { %v6425_v44 = vpack.c.bf16 %v6408_v50, %v6407_v20 }
 0x52f   : > { %v5150_v60 = vpop.f32.mrf.mxu2 }
 0x530   : > { %v16818_v12 = vadd.f32 %v5150_v60, %v4997_v11  ;;  %v4891_v31 = vpop.f32.mrf.mxu0  ;;  %v16820_v51 = vpop.f32.mrf.mxu3  ;;  %v6410_v60 = vld [vmem:[#allocation3 + $0x58] sm:$0xff] }
 0x531   : > { %v4999_v40 = vadd.f32 %v4998_v48, %v4891_v31  ;;  %v5003_v28 = vpop.f32.mrf.mxu1 }
 0x535   : > { %6516 = vmatmul.bf16.gmra.mxu3 %v6425_v44  ;;  %v5200_v44 = vld [vmem:[#allocation3 + $0x7b] sm:$0xff] }
 0x536   : > { %v16859_v10 = vpack.c.bf16 %v5200_v44, %v5199_v54  ;;  %v14327_v54 = vld [vmem:[%s18909_s5 + $0x248] sm:$0xff] }
 0x537   : > { %v5152_v14 = vpop.f32.mrf.mxu2 }
 0x538   : > { %v16828_v41 = vadd.f32 %v5152_v14, %v4999_v40  ;;  %v4894_v55 = vpop.f32.mrf.mxu0  ;;  %v16830_v48 = vpop.f32.mrf.mxu3  ;;  %v6409_v40 = vld [vmem:[#allocation3 + $0x50] sm:$0xff] }
 0x539   : > { %18945 = vst [vmem:[#allocation7_spill] sm:$0xff] %v16830_v48  ;;  %v5002_v17 = vadd.f32 %v5001_v8, %v4894_v55  ;;  %v5006_v26 = vpop.f32.mrf.mxu1  ;;  %v6426_v62 = vpack.c.bf16 %v6410_v60, %v6409_v40  ;;  %v14318_v60 = vld [vmem:[%s18909_s5 + $0x200] sm:$0xff] }
 0x53a   : > { %6157 = vmatpush.bf16.msrb.mxu1 %v14318_v60  ;;  %v5378_v60 = vld [vmem:[#allocation3 + $0x9c] sm:$0xff] }
 0x53b   : > { %5318 = vmatmul.bf16.gmra.mxu0 %v16832_v57  ;;  %5497 = vmatmul.bf16.gmra.mxu1 %v16834_v45 }
 0x53c   : > { %5666 = vmatmul.bf16.gmra.mxu2 %v16534_v4  ;;  %v14332_v4 = vld [vmem:[%s18909_s5 + $0x270] sm:$0xff] }
 0x53d   : > { %6325 = vmatpush.bf16.msra.mxu2 %v14332_v4 }
 0x53f   : > { %v5155_v47 = vpop.f32.mrf.mxu2 }
 0x540   : > { %v16842_v11 = vadd.f32 %v5155_v47, %v5002_v17  ;;  %v4896_v8 = vpop.f32.mrf.mxu0  ;;  %v16844_v22 = vpop.f32.mrf.mxu3  ;;  %v5375_v47 = vld [vmem:[#allocation3 + $0x84] sm:$0xff] }
 0x541   : > { %18946 = vst [vmem:[#allocation8_spill] sm:$0xff] %v16844_v22  ;;  %v5004_v31 = vadd.f32 %v5003_v28, %v4896_v8  ;;  %v5008_v50 = vpop.f32.mrf.mxu1  ;;  %6326 = vmatpush.bf16.msra.mxu2 %v14331_v16  ;;  %v14310_v28 = vld [vmem:[%s18909_s5 + $0x1c0] sm:$0xff] }
 0x542   : > { %5983 = vmatpush.bf16.msra.mxu0 %v14310_v28  ;;  %v14330_v8 = vld [vmem:[%s18909_s5 + $0x260] sm:$0xff]  ;;  %v6411_v28 = vld [vmem:[#allocation3 + $0x60] sm:$0xff] }
 0x543   : > { %v5204_v22 = vld [vmem:[#allocation3 + $0x9b] sm:$0xff] }
 0x545   : > { %6521 = vmatmul.bf16.gmra.mxu3 %v6426_v62  ;;  %6327 = vmatpush.bf16.msra.mxu2 %v14330_v8 }
 0x547   : > { %v5157_v20 = vpop.f32.mrf.mxu2 }
 0x548   : > { %v16852_v14 = vadd.f32 %v5157_v20, %v5004_v31  ;;  %v4899_v24 = vpop.f32.mrf.mxu0  ;;  %v16857_v55 = vpop.f32.mrf.mxu3  ;;  %v16867_v31 = vpack.c.bf16 %v5376_v13, %v5375_v47  ;;  %v6412_v20 = vld [vmem:[#allocation3 + $0x68] sm:$0xff] }
 0x549   : > { %18947 = vst [vmem:[#allocation6_spill] sm:$0xff] %v16857_v55  ;;  %v5007_v17 = vadd.f32 %v5006_v26, %v4899_v24  ;;  %v5463_v27 = vpop.f32.mrf.mxu1  ;;  %v14329_v26 = vld [vmem:[%s18909_s5 + $0x258] sm:$0xff]  ;;  %v6427_v24 = vpack.c.bf16 %v6412_v20, %v6411_v28  ;;  %v14326_v28 = vld [vmem:[%s18909_s5 + $0x240] sm:$0xff] }
 0x54a   : > { %6328 = vmatpush.bf16.msra.mxu2 %v14329_v26  ;;  %v5202_v47 = vld [vmem:[#allocation3 + $0x8b] sm:$0xff] }
 0x54b   : > { %5323 = vmatmul.bf16.gmra.mxu0 %v16859_v10  ;;  %5502 = vmatmul.bf16.gmra.mxu1 %v16867_v31 }
 0x54c   : > { %5671 = vmatmul.bf16.gmra.mxu2 %v16576_v5  ;;  %v14328_v5 = vld [vmem:[%s18909_s5 + $0x250] sm:$0xff] }
 0x54e   : > { %6329 = vmatpush.bf16.msra.mxu2 %v14328_v5  ;;  %v5377_v5 = vld [vmem:[#allocation3 + $0x94] sm:$0xff] }
 0x54f   : > { %v5160_v4 = vpop.f32.mrf.mxu2 }
 0x550   : > { %v16875_v40 = vadd.f32 %v5160_v4, %v5007_v17  ;;  %v4901_v62 = vpop.f32.mrf.mxu0  ;;  %v16877_v16 = vpop.f32.mrf.mxu3  ;;  %v5201_v4 = vld [vmem:[#allocation3 + $0x83] sm:$0xff] }
 0x551   : > { %18948 = vst [vmem:[#allocation9_spill] sm:$0xff] %v16877_v16  ;;  %v5009_v44 = vadd.f32 %v5008_v50, %v4901_v62  ;;  %v5465_v13 = vpop.f32.mrf.mxu1  ;;  %v16890_v16 = vpack.c.bf16 %v5202_v47, %v5201_v4 }
 0x552   : > { %6330 = vmatpush.bf16.msra.mxu2 %v14327_v54  ;;  %v14349_v54 = vld [vmem:[%s18909_s5 + $0x2f8] sm:$0xff] }
 0x553   : > { %6672 = vmatpush.bf16.msrb.mxu0 %v14349_v54 }
 0x555   : > { %6526 = vmatmul.bf16.gmra.mxu3 %v6427_v24  ;;  %v16895_v24 = vpack.c.bf16 %v5378_v60, %v5377_v5 }
 0x556   : > { %6331 = vmatpush.bf16.msra.mxu2 %v14326_v28 }
 0x557   : > { %v5162_v17 = vpop.f32.mrf.mxu2 }
 0x558   : > { %v16885_v8 = vadd.f32 %v5162_v17, %v5009_v44  ;;  %v5289_v26 = vpop.f32.mrf.mxu0  ;;  %v16887_v50 = vpop.f32.mrf.mxu3 }
 0x559   : > { %18949 = vst [vmem:[#allocation10_spill] sm:$0xff] %v16887_v50  ;;  %v5339_v62 = vadd.f32 %v5289_v26, %v16630_v49  ;;  %v5468_v20 = vpop.f32.mrf.mxu1  ;;  %v14357_v49 = vld [vmem:[%s18909_s5 + $0x338] sm:$0xff] }
 0x55a   : > { %6846 = vmatpush.bf16.msra.mxu1 %v14357_v49 }
 0x55b   : > { %5328 = vmatmul.bf16.gmra.mxu0 %v16890_v16  ;;  %v5513_v44 = vadd.f32 %v5463_v27, %v5339_v62  ;;  %5507 = vmatmul.bf16.gmra.mxu1 %v16895_v24  ;;  %v6413_v62 = vld [vmem:[#allocation3 + $0x70] sm:$0xff] }
 0x55c   : > { %5676 = vmatmul.bf16.gmra.mxu2 %v16619_v59  ;;  %v6414_v59 = vld [vmem:[#allocation3 + $0x78] sm:$0xff] }
 0x55d   : > { %v6428_v5 = vpack.c.bf16 %v6414_v59, %v6413_v62 }
 0x55f   : > { %v5637_v17 = vpop.f32.mrf.mxu2 }
 0x560   : > { %v16906_v47 = vadd.f32 %v5637_v17, %v5513_v44  ;;  %v5291_v60 = vpop.f32.mrf.mxu0  ;;  %v16908_v26 = vpop.f32.mrf.mxu3  ;;  %v5203_v44 = vld [vmem:[#allocation3 + $0x93] sm:$0xff] }
 0x561   : > { %18950 = vst [vmem:[#allocation11_spill] sm:$0xff] %v16908_v26  ;;  %v5340_v27 = vadd.f32 %v5291_v60, %v16645_v63  ;;  %v5470_v4 = vpop.f32.mrf.mxu1  ;;  %v16916_v17 = vpack.c.bf16 %v5204_v22, %v5203_v44 }
 0x563   : > { %v5514_v50 = vadd.f32 %v5465_v13, %v5340_v27 }
 0x565   : > { %6531 = vmatmul.bf16.gmra.mxu3 %v6428_v5 }
 0x567   : > { %v5639_v55 = vpop.f32.mrf.mxu2 }
 0x568   : > { %v16911_v48 = vadd.f32 %v5639_v55, %v5514_v50  ;;  %v5294_v28 = vpop.f32.mrf.mxu0  ;;  %v16913_v54 = vpop.f32.mrf.mxu3  ;;  %v14348_v55 = vld [vmem:[%s18909_s5 + $0x2f0] sm:$0xff] }
 0x569   : > { %v5341_v49 = vadd.f32 %v5294_v28, %v16658_v19  ;;  %v5473_v26 = vpop.f32.mrf.mxu1  ;;  %v6416_v19 = vld [vmem:[#allocation3 + $0x88] sm:$0xff]  ;;  %6673 = vmatpush.bf16.msrb.mxu0 %v14348_v55  ;;  %v5882_v28 = vld [vmem:[#allocation3 + $0x1a] sm:$0xff] }
 0x56b   : > { %5333 = vmatmul.bf16.gmra.mxu0 %v16916_v17  ;;  %v5515_v63 = vadd.f32 %v5468_v20, %v5341_v49  ;;  %6158 = vmatmul.bf16.vlgmr.msrb.gmra.mxu1 %v16723_v37  ;;  %v6415_v37 = vld [vmem:[#allocation3 + $0x80] sm:$0xff]  ;;  %v14373_v49 = vld [vmem:[%s18909_s5 + $0x3b8] sm:$0xff] }
 0x56c   : > { %5681 = vmatmul.bf16.gmra.mxu2 %v16651_v33  ;;  %v14356_v33 = vld [vmem:[%s18909_s5 + $0x330] sm:$0xff]  ;;  %v6429_v20 = vpack.c.bf16 %v6416_v19, %v6415_v37  ;;  %7194 = vmatpush.bf16.msrb.mxu3 %v14373_v49 }
 0x56d   : > { %6847 = vmatpush.bf16.msra.mxu1 %v14356_v33 }
 0x56f   : > { %v5642_v13 = vpop.f32.mrf.mxu2 }
 0x570   : > { %v16921_v60 = vadd.f32 %v5642_v13, %v5515_v63  ;;  %v5296_v50 = vpop.f32.mrf.mxu0  ;;  %v16926_v59 = vpop.f32.mrf.mxu3  ;;  %v5881_v13 = vld [vmem:[#allocation3 + $0x12] sm:$0xff] }
 0x571   : > { %18951 = vst [vmem:[#allocation12_spill] sm:$0xff] %v16926_v59  ;;  %v5342_v22 = vadd.f32 %v5296_v50, %v16670_v42  ;;  %v5475_v27 = vpop.f32.mrf.mxu1  ;;  %v5901_v50 = vpack.c.bf16 %v5882_v28, %v5881_v13  ;;  %v14355_v13 = vld [vmem:[%s18909_s5 + $0x328] sm:$0xff] }
 0x572   : > { %6848 = vmatpush.bf16.msra.mxu1 %v14355_v13  ;;  %v6420_v13 = vld [vmem:[#allocation3 + $0xa8] sm:$0xff] }
 0x573   : > { %v5516_v62 = vadd.f32 %v5470_v4, %v5342_v22  ;;  %v14372_v4 = vld [vmem:[%s18909_s5 + $0x3b0] sm:$0xff] }
 0x574   : > { %7195 = vmatpush.bf16.msrb.mxu3 %v14372_v4  ;;  %v14369_v4 = vld [vmem:[%s18909_s5 + $0x398] sm:$0xff] }
 0x575   : > { %6536 = vmatmul.bf16.gmra.mxu3 %v6429_v20 }
 0x577   : > { %v5644_v5 = vpop.f32.mrf.mxu2 }
 0x578   : > { %v16932_v44 = vadd.f32 %v5644_v5, %v5516_v62  ;;  %v5299_v42 = vpop.f32.mrf.mxu0  ;;  %v16937_v63 = vpop.f32.mrf.mxu3  ;;  %v6418_v62 = vld [vmem:[#allocation3 + $0x98] sm:$0xff] }
 0x579   : > { %v5343_v55 = vadd.f32 %v5299_v42, %v16691_v21  ;;  %v5478_v59 = vpop.f32.mrf.mxu1  ;;  %v14371_v21 = vld [vmem:[%s18909_s5 + $0x3a8] sm:$0xff] }
 0x57a   : > { %7196 = vmatpush.bf16.msrb.mxu3 %v14371_v21 }
 0x57b   : > { %5984 = vmatmul.bf16.vlgmr.msra.gmra.mxu0 %v5901_v50  ;;  %v5517_v19 = vadd.f32 %v5473_v26, %v5343_v55  ;;  %6163 = vmatmul.bf16.gmra.mxu1 %v16751_v43  ;;  %v6417_v43 = vld [vmem:[#allocation3 + $0x90] sm:$0xff]  ;;  %v14370_v26 = vld [vmem:[%s18909_s5 + $0x3a0] sm:$0xff] }
 0x57c   : > { %6332 = vmatmul.bf16.vlgmr.msra.gmra.mxu2 %v16680_v23  ;;  %v14347_v23 = vld [vmem:[%s18909_s5 + $0x2e8] sm:$0xff]  ;;  %v6430_v49 = vpack.c.bf16 %v6418_v62, %v6417_v43  ;;  %v5884_v55 = vld [vmem:[#allocation3 + $0x2a] sm:$0xff] }
 0x57d   : > { %6674 = vmatpush.bf16.msrb.mxu0 %v14347_v23 }
 0x57e   : > { %7197 = vmatpush.bf16.msrb.mxu3 %v14370_v26 }
 0x57f   : > { %v5647_v22 = vpop.f32.mrf.mxu2 }
 0x580   : > { %v16945_v33 = vadd.f32 %v5647_v22, %v5517_v19  ;;  %v5301_v37 = vpop.f32.mrf.mxu0  ;;  %v16950_v20 = vpop.f32.mrf.mxu3 }
 0x581   : > { %v5344_v5 = vadd.f32 %v5301_v37, %v16716_v53  ;;  %v5480_v28 = vpop.f32.mrf.mxu1 }
 0x582   : > { %7198 = vmatpush.bf16.msrb.mxu3 %v14369_v4  ;;  %v6419_v4 = vld [vmem:[#allocation3 + $0xa0] sm:$0xff] }
 0x583   : > { %v5518_v42 = vadd.f32 %v5475_v27, %v5344_v5  ;;  %v5883_v27 = vld [vmem:[#allocation3 + $0x22] sm:$0xff] }
 0x584   : > { %v16970_v37 = vpack.c.bf16 %v5884_v55, %v5883_v27  ;;  %v14368_v5 = vld [vmem:[%s18909_s5 + $0x390] sm:$0xff]  ;;  %v5886_v27 = vld [vmem:[#allocation3 + $0x3a] sm:$0xff] }
 0x585   : > { %6541 = vmatmul.bf16.gmra.mxu3 %v6430_v49 }
 0x586   : > { %7199 = vmatpush.bf16.msrb.mxu3 %v14368_v5  ;;  %v14346_v5 = vld [vmem:[%s18909_s5 + $0x2e0] sm:$0xff] }
 0x587   : > { %v5649_v53 = vpop.f32.mrf.mxu2  ;;  %6675 = vmatpush.bf16.msrb.mxu0 %v14346_v5  ;;  %v6421_v5 = vld [vmem:[#allocation3 + $0xb0] sm:$0xff] }
 0x588   : > { %v16962_v50 = vadd.f32 %v5649_v53, %v5518_v42  ;;  %v5304_v19 = vpop.f32.mrf.mxu0  ;;  %v16967_v22 = vpop.f32.mrf.mxu3 }
 0x589   : > { %v5345_v21 = vadd.f32 %v5304_v19, %v16735_v61  ;;  %v5483_v62 = vpop.f32.mrf.mxu1  ;;  %v14367_v61 = vld [vmem:[%s18909_s5 + $0x388] sm:$0xff] }
 0x58a   : > { %7200 = vmatpush.bf16.msrb.mxu3 %v14367_v61 }
 0x58b   : > { %5989 = vmatmul.bf16.gmra.mxu0 %v16970_v37  ;;  %v5519_v23 = vadd.f32 %v5478_v59, %v5345_v21  ;;  %6168 = vmatmul.bf16.gmra.mxu1 %v16769_v0  ;;  %v6431_v0 = vpack.c.bf16 %v6420_v13, %v6419_v4 }
 0x58c   : > { %6337 = vmatmul.bf16.gmra.mxu2 %v16725_v2  ;;  %v14366_v2 = vld [vmem:[%s18909_s5 + $0x380] sm:$0xff] }
 0x58e   : > { %7201 = vmatpush.bf16.msrb.mxu3 %v14366_v2 }
 0x58f   : > { %v5652_v43 = vpop.f32.mrf.mxu2 }
 0x590   : > { %v16978_v26 = vadd.f32 %v5652_v43, %v5519_v23  ;;  %v5306_v49 = vpop.f32.mrf.mxu0  ;;  %v16983_v42 = vpop.f32.mrf.mxu3  ;;  %v5885_v43 = vld [vmem:[#allocation3 + $0x32] sm:$0xff] }
 0x591   : > { %v5346_v53 = vadd.f32 %v5306_v49, %v16744_v32  ;;  %v5485_v55 = vpop.f32.mrf.mxu1  ;;  %v16997_v49 = vpack.c.bf16 %v5886_v27, %v5885_v43 }
 0x593   : > { %v5520_v59 = vadd.f32 %v5480_v28, %v5346_v53  ;;  %v14354_v28 = vld [vmem:[%s18909_s5 + $0x320] sm:$0xff] }
 0x594   : > { %6849 = vmatpush.bf16.msra.mxu1 %v14354_v28  ;;  %v5887_v28 = vld [vmem:[#allocation3 + $0x42] sm:$0xff] }
 0x595   : > { %6546 = vmatmul.bf16.gmra.mxu3 %v6431_v0 }
 0x597   : > { %v5654_v19 = vpop.f32.mrf.mxu2 }
 0x598   : > { %v16989_v21 = vadd.f32 %v5654_v19, %v5520_v59  ;;  %v5309_v32 = vpop.f32.mrf.mxu0  ;;  %v16994_v23 = vpop.f32.mrf.mxu3  ;;  %v6422_v59 = vld [vmem:[#allocation3 + $0xb8] sm:$0xff] }
 0x599   : > { %18952 = vst [vmem:[#allocation13_spill] sm:$0xff] %v16994_v23  ;;  %v5347_v61 = vadd.f32 %v5309_v32, %v16761_v58  ;;  %v5488_v13 = vpop.f32.mrf.mxu1  ;;  %v6432_v32 = vpack.c.bf16 %v6422_v59, %v6421_v5  ;;  %v7100_v5 = vld [vmem:[#allocation3 + $0x2c] sm:$0xff] }
 0x59b   : > { %5994 = vmatmul.bf16.gmra.mxu0 %v16997_v49  ;;  %v5521_v53 = vadd.f32 %v5483_v62, %v5347_v61  ;;  %6173 = vmatmul.bf16.gmra.mxu1 %v16790_v3 }
 0x59c   : > { %6342 = vmatmul.bf16.gmra.mxu2 %v16756_v36  ;;  %v5888_v36 = vld [vmem:[#allocation3 + $0x4a] sm:$0xff] }
 0x59f   : > { %v5657_v4 = vpop.f32.mrf.mxu2 }
 0x5a0   : > { %v17005_v2 = vadd.f32 %v5657_v4, %v5521_v53  ;;  %v5311_v58 = vpop.f32.mrf.mxu0  ;;  %v17007_v0 = vpop.f32.mrf.mxu3  ;;  %v17015_v4 = vpack.c.bf16 %v5888_v36, %v5887_v28 }
 0x5a1   : > { %18953 = vst [vmem:[#allocation14_spill] sm:$0xff] %v17007_v0  ;;  %v5348_v19 = vadd.f32 %v5311_v58, %v16765_v30  ;;  %v5490_v27 = vpop.f32.mrf.mxu1 }
 0x5a3   : > { %v5522_v43 = vadd.f32 %v5485_v55, %v5348_v19  ;;  %v14345_v55 = vld [vmem:[%s18909_s5 + $0x2d8] sm:$0xff] }
 0x5a4   : > { %6676 = vmatpush.bf16.msrb.mxu0 %v14345_v55 }
 0x5a5   : > { %6551 = vmatmul.bf16.gmra.mxu3 %v6432_v32 }
 0x5a7   : > { %v5659_v23 = vpop.f32.mrf.mxu2 }
 0x5a8   : > { %v17010_v62 = vadd.f32 %v5659_v23, %v5522_v43  ;;  %v5314_v3 = vpop.f32.mrf.mxu0  ;;  %v17012_v61 = vpop.f32.mrf.mxu3  ;;  %v14353_v23 = vld [vmem:[%s18909_s5 + $0x318] sm:$0xff]  ;;  %v7099_v43 = vld [vmem:[#allocation3 + $0x24] sm:$0xff] }
 0x5a9   : > { %18954 = vst [vmem:[#allocation15_spill] sm:$0xff] %v17012_v61  ;;  %v5349_v53 = vadd.f32 %v5314_v3, %v16782_v38  ;;  %v5493_v0 = vpop.f32.mrf.mxu1  ;;  %6850 = vmatpush.bf16.msra.mxu1 %v14353_v23  ;;  %v7119_v36 = vpack.c.bf16 %v7100_v5, %v7099_v43  ;;  %v14344_v5 = vld [vmem:[%s18909_s5 + $0x2d0] sm:$0xff] }
 0x5aa   : > { %6677 = vmatpush.bf16.msrb.mxu0 %v14344_v5 }
 0x5ab   : > { %5999 = vmatmul.bf16.gmra.mxu0 %v17015_v4  ;;  %v5523_v30 = vadd.f32 %v5488_v13, %v5349_v53  ;;  %6178 = vmatmul.bf16.gmra.mxu1 %v16811_v25  ;;  %v5890_v53 = vld [vmem:[#allocation3 + $0x5a] sm:$0xff] }
 0x5ac   : > { %6347 = vmatmul.bf16.gmra.mxu2 %v16771_v29 }
 0x5af   : > { %v5662_v38 = vpop.f32.mrf.mxu2 }
 0x5b0   : > { %v17026_v58 = vadd.f32 %v5662_v38, %v5523_v30  ;;  %v5316_v59 = vpop.f32.mrf.mxu0  ;;  %v17028_v19 = vpop.f32.mrf.mxu3  ;;  %v5889_v30 = vld [vmem:[#allocation3 + $0x52] sm:$0xff] }
 0x5b1   : > { %18955 = vst [vmem:[#allocation16_spill] sm:$0xff] %v17028_v19  ;;  %v5350_v13 = vadd.f32 %v5316_v59, %v16786_v7  ;;  %v5495_v32 = vpop.f32.mrf.mxu1  ;;  %v17036_v38 = vpack.c.bf16 %v5890_v53, %v5889_v30  ;;  %v5892_v30 = vld [vmem:[#allocation3 + $0x6a] sm:$0xff] }
 0x5b3   : > { %v5524_v3 = vadd.f32 %v5490_v27, %v5350_v13 }
 0x5b5   : > { %7202 = vmatmul.bf16.vlgmr.msrb.gmra.mxu3 %v7119_v36 }
 0x5b7   : > { %v5664_v28 = vpop.f32.mrf.mxu2 }
 0x5b8   : > { %v17031_v61 = vadd.f32 %v5664_v28, %v5524_v3  ;;  %v5319_v25 = vpop.f32.mrf.mxu0  ;;  %v17033_v55 = vpop.f32.mrf.mxu3 }
 0x5b9   : > { %v5351_v23 = vadd.f32 %v5319_v25, %v16797_v46  ;;  %v5498_v19 = vpop.f32.mrf.mxu1  ;;  %v7102_v46 = vld [vmem:[#allocation3 + $0x3c] sm:$0xff] }
 0x5bb   : > { %6004 = vmatmul.bf16.gmra.mxu0 %v17036_v38  ;;  %v5525_v7 = vadd.f32 %v5493_v0, %v5351_v23  ;;  %6183 = vmatmul.bf16.gmra.mxu1 %v16832_v57  ;;  %v14352_v0 = vld [vmem:[%s18909_s5 + $0x310] sm:$0xff]  ;;  %v7101_v57 = vld [vmem:[#allocation3 + $0x34] sm:$0xff] }
 0x5bc   : > { %6352 = vmatmul.bf16.gmra.mxu2 %v16792_v15  ;;  %v7120_v28 = vpack.c.bf16 %v7102_v46, %v7101_v57  ;;  %6851 = vmatpush.bf16.msra.mxu1 %v14352_v0 }
 0x5bf   : > { %v5667_v27 = vpop.f32.mrf.mxu2 }
 0x5c0   : > { %v17041_v59 = vadd.f32 %v5667_v27, %v5525_v7  ;;  %v5321_v13 = vpop.f32.mrf.mxu0  ;;  %v17046_v43 = vpop.f32.mrf.mxu3 }
 0x5c1   : > { %18956 = vst [vmem:[#allocation17_spill] sm:$0xff] %v17046_v43  ;;  %v5352_v36 = vadd.f32 %v5321_v13, %v16807_v1  ;;  %v5500_v3 = vpop.f32.mrf.mxu1  ;;  %v5891_v43 = vld [vmem:[#allocation3 + $0x62] sm:$0xff] }
 0x5c2   : > { %v17057_v5 = vpack.c.bf16 %v5892_v30, %v5891_v43  ;;  %v14351_v43 = vld [vmem:[%s18909_s5 + $0x308] sm:$0xff] }
 0x5c3   : > { %v5526_v53 = vadd.f32 %v5495_v32, %v5352_v36  ;;  %6852 = vmatpush.bf16.msra.mxu1 %v14351_v43 }
 0x5c5   : > { %7207 = vmatmul.bf16.gmra.mxu3 %v7120_v28 }
 0x5c7   : > { %v5669_v25 = vpop.f32.mrf.mxu2 }
 0x5c8   : > { %v17052_v23 = vadd.f32 %v5669_v25, %v5526_v53  ;;  %v5324_v7 = vpop.f32.mrf.mxu0  ;;  %v17054_v27 = vpop.f32.mrf.mxu3  ;;  %v5894_v25 = vld [vmem:[#allocation3 + $0x7a] sm:$0xff] }
 0x5c9   : > { %v5353_v1 = vadd.f32 %v5324_v7, %v16818_v12  ;;  %v5503_v13 = vpop.f32.mrf.mxu1  ;;  %v14343_v12 = vld [vmem:[%s18909_s5 + $0x2c8] sm:$0xff] }
 0x5ca   : > { %6678 = vmatpush.bf16.msrb.mxu0 %v14343_v12 }
 0x5cb   : > { %6009 = vmatmul.bf16.gmra.mxu0 %v17057_v5  ;;  %v5527_v32 = vadd.f32 %v5498_v19, %v5353_v1  ;;  %6188 = vmatmul.bf16.gmra.mxu1 %v16859_v10  ;;  %v5893_v1 = vld [vmem:[#allocation3 + $0x72] sm:$0xff] }
 0x5cc   : > { %6357 = vmatmul.bf16.gmra.mxu2 %v16813_v9 }
 0x5cf   : > { %v5672_v46 = vpop.f32.mrf.mxu2 }
 0x5d0   : > { %v17062_v36 = vadd.f32 %v5672_v46, %v5527_v32  ;;  %v5326_v0 = vpop.f32.mrf.mxu0  ;;  %v17064_v57 = vpop.f32.mrf.mxu3  ;;  %v17079_v46 = vpack.c.bf16 %v5894_v25, %v5893_v1  ;;  %v5896_v1 = vld [vmem:[#allocation3 + $0x8a] sm:$0xff] }
 0x5d1   : > { %v5354_v28 = vadd.f32 %v5326_v0, %v16828_v41  ;;  %v5505_v53 = vpop.f32.mrf.mxu1 }
 0x5d3   : > { %v5528_v19 = vadd.f32 %v5500_v3, %v5354_v28 }
 0x5d5   : > { %7212 = vmatmul.bf16.gmra.mxu3 %v16771_v29  ;;  %v14365_v29 = vld [vmem:[%s18909_s5 + $0x378] sm:$0xff] }
 0x5d6   : > { %7020 = vmatpush.bf16.msrb.mxu2 %v14365_v29 }
 0x5d7   : > { %v5674_v10 = vpop.f32.mrf.mxu2 }
 0x5d8   : > { %v17074_v30 = vadd.f32 %v5674_v10, %v5528_v19  ;;  %v5329_v7 = vpop.f32.mrf.mxu0  ;;  %v17076_v41 = vpop.f32.mrf.mxu3 }
 0x5d9   : > { %v5355_v32 = vadd.f32 %v5329_v7, %v16842_v11  ;;  %v5508_v0 = vpop.f32.mrf.mxu1 }
 0x5db   : > { %6014 = vmatmul.bf16.gmra.mxu0 %v17079_v46  ;;  %v5529_v3 = vadd.f32 %v5503_v13, %v5355_v32  ;;  %6193 = vmatmul.bf16.gmra.mxu1 %v16890_v16  ;;  %v14364_v13 = vld [vmem:[%s18909_s5 + $0x370] sm:$0xff]  ;;  %v14363_v16 = vld [vmem:[%s18909_s5 + $0x368] sm:$0xff] }
 0x5dc   : > { %6362 = vmatmul.bf16.gmra.mxu2 %v16834_v45 }
 0x5dd   : > { %7021 = vmatpush.bf16.msrb.mxu2 %v14364_v13  ;;  %v14350_v13 = vld [vmem:[%s18909_s5 + $0x300] sm:$0xff] }
 0x5de   : > { %6853 = vmatpush.bf16.msra.mxu1 %v14350_v13 }
 0x5df   : > { %v5677_v28 = vpop.f32.mrf.mxu2 }
 0x5e0   : > { %v17087_v12 = vadd.f32 %v5677_v28, %v5529_v3  ;;  %v5331_v43 = vpop.f32.mrf.mxu0  ;;  %v17089_v11 = vpop.f32.mrf.mxu3 }
 0x5e1   : > { %v5356_v19 = vadd.f32 %v5331_v43, %v16852_v14  ;;  %v5510_v10 = vpop.f32.mrf.mxu1  ;;  %7022 = vmatpush.bf16.msrb.mxu2 %v14363_v16  ;;  %v14342_v14 = vld [vmem:[%s18909_s5 + $0x2c0] sm:$0xff] }
 0x5e2   : > { %6679 = vmatpush.bf16.msrb.mxu0 %v14342_v14 }
 0x5e3   : > { %v5530_v25 = vadd.f32 %v5505_v53, %v5356_v19  ;;  %v5895_v53 = vld [vmem:[#allocation3 + $0x82] sm:$0xff] }
 0x5e4   : > { %v17107_v43 = vpack.c.bf16 %v5896_v1, %v5895_v53 }
 0x5e5   : > { %7217 = vmatmul.bf16.gmra.mxu3 %v16792_v15  ;;  %v14362_v15 = vld [vmem:[%s18909_s5 + $0x360] sm:$0xff] }
 0x5e6   : > { %7023 = vmatpush.bf16.msrb.mxu2 %v14362_v15  ;;  %v5898_v15 = vld [vmem:[#allocation3 + $0x9a] sm:$0xff] }
 0x5e7   : > { %v5679_v7 = vpop.f32.mrf.mxu2 }
 0x5e8   : > { %v17099_v32 = vadd.f32 %v5679_v7, %v5530_v25  ;;  %v5334_v3 = vpop.f32.mrf.mxu0  ;;  %v17104_v29 = vpop.f32.mrf.mxu3 }
 0x5e9   : > { %v5357_v28 = vadd.f32 %v5334_v3, %v16875_v40  ;;  %v6159_v19 = vpop.f32.mrf.mxu1  ;;  %v14361_v40 = vld [vmem:[%s18909_s5 + $0x358] sm:$0xff] }
 0x5ea   : > { %7024 = vmatpush.bf16.msrb.mxu2 %v14361_v40 }
 0x5eb   : > { %6019 = vmatmul.bf16.gmra.mxu0 %v17107_v43  ;;  %v5531_v25 = vadd.f32 %v5508_v0, %v5357_v28  ;;  %6198 = vmatmul.bf16.gmra.mxu1 %v16916_v17  ;;  %v14359_v0 = vld [vmem:[%s18909_s5 + $0x348] sm:$0xff] }
 0x5ec   : > { %6367 = vmatmul.bf16.gmra.mxu2 %v16867_v31  ;;  %v14360_v31 = vld [vmem:[%s18909_s5 + $0x350] sm:$0xff] }
 0x5ee   : > { %7025 = vmatpush.bf16.msrb.mxu2 %v14360_v31 }
 0x5ef   : > { %v5682_v16 = vpop.f32.mrf.mxu2 }
 0x5f0   : > { %v17121_v7 = vadd.f32 %v5682_v16, %v5531_v25  ;;  %v5336_v1 = vpop.f32.mrf.mxu0  ;;  %v17123_v14 = vpop.f32.mrf.mxu3  ;;  %v6074_v25 = vld [vmem:[#allocation3 + $0xab] sm:$0xff] }
 0x5f1   : > { %18957 = vst [vmem:[#allocation18_spill] sm:$0xff] %v17123_v14  ;;  %v5358_v3 = vadd.f32 %v5336_v1, %v16885_v8  ;;  %v6161_v53 = vpop.f32.mrf.mxu1  ;;  %v5861_v8 = vadd.f32 %v16749_v35, %v16906_v47  ;;  %v5897_v1 = vld [vmem:[#allocation3 + $0x92] sm:$0xff]  ;;  %v6073_v14 = vld [vmem:[#allocation3 + $0xa3] sm:$0xff] }
 0x5f2   : > { %7026 = vmatpush.bf16.msrb.mxu2 %v14359_v0  ;;  %v14381_v47 = vld [vmem:[%s18909_s5 + $0x3f8] sm:$0xff] }
 0x5f3   : > { %v5532_v17 = vadd.f32 %v5510_v10, %v5358_v3  ;;  %v17139_v3 = vpack.c.bf16 %v5898_v15, %v5897_v1  ;;  %v14389_v0 = vld [vmem:[%s18909_s5 + $0x438] sm:$0xff]  ;;  %7368 = vmatpush.bf16.msra.mxu0 %v14381_v47 }
 0x5f4   : > { %7542 = vmatpush.bf16.msrb.mxu1 %v14389_v0 }
 0x5f5   : > { %7222 = vmatmul.bf16.gmra.mxu3 %v16813_v9  ;;  %v14358_v9 = vld [vmem:[%s18909_s5 + $0x340] sm:$0xff] }
 0x5f6   : > { %7027 = vmatpush.bf16.msrb.mxu2 %v14358_v9 }
 0x5f7   : > { %v5684_v28 = vpop.f32.mrf.mxu2 }
 0x5f8   : > { %v17133_v13 = vadd.f32 %v5684_v28, %v5532_v17  ;;  %v5985_v40 = vpop.f32.mrf.mxu0  ;;  %v17137_v16 = vpop.f32.mrf.mxu3  ;;  %v17144_v17 = vpack.c.bf16 %v6074_v25, %v6073_v14 }
 0x5f9   : > { %18958 = vst [vmem:[#allocation19_spill] sm:$0xff] %v17137_v16  ;;  %v6035_v10 = vadd.f32 %v5985_v40, %v5861_v8  ;;  %v6164_v31 = vpop.f32.mrf.mxu1  ;;  %v6248_v16 = vld [vmem:[#allocation3 + $0xac] sm:$0xff] }
 0x5fb   : > { %6024 = vmatmul.bf16.gmra.mxu0 %v17139_v3  ;;  %v6209_v35 = vadd.f32 %v6159_v19, %v6035_v10  ;;  %6203 = vmatmul.bf16.gmra.mxu1 %v17144_v17  ;;  %v5900_v10 = vld [vmem:[#allocation3 + $0xaa] sm:$0xff] }
 0x5fc   : > { %6372 = vmatmul.bf16.gmra.mxu2 %v16895_v24  ;;  %v5862_v24 = vadd.f32 %v16763_v18, %v16911_v48  ;;  %v5899_v18 = vld [vmem:[#allocation3 + $0xa2] sm:$0xff] }
 0x5fd   : > { %v6247_v48 = vld [vmem:[#allocation3 + $0xa4] sm:$0xff] }
 0x5ff   : > { %v6333_v14 = vpop.f32.mrf.mxu2 }
 0x600   : > { %v17155_v28 = vadd.f32 %v6333_v14, %v6209_v35  ;;  %v5987_v19 = vpop.f32.mrf.mxu0  ;;  %v17159_v15 = vpop.f32.mrf.mxu3  ;;  %v5863_v35 = vadd.f32 %v16767_v6, %v16921_v60  ;;  %v5864_v60 = vadd.f32 %v16784_v56, %v16932_v44  ;;  %v6578_v44 = vld [vmem:[#allocation3 + $0x29] sm:$0xff] }
 0x601   : > { %18959 = vst [vmem:[#allocation20_spill] sm:$0xff] %v17159_v15  ;;  %v6036_v8 = vadd.f32 %v5987_v19, %v5862_v24  ;;  %v6166_v25 = vpop.f32.mrf.mxu1  ;;  %v17168_v15 = vpack.c.bf16 %v5900_v10, %v5899_v18  ;;  %v17170_v24 = vpack.c.bf16 %v6248_v16, %v6247_v48  ;;  %v6926_v48 = vld [vmem:[#allocation3 + $0x2b] sm:$0xff] }
 0x603   : > { %v6210_v40 = vadd.f32 %v6161_v53, %v6036_v8  ;;  %v14380_v8 = vld [vmem:[%s18909_s5 + $0x3f0] sm:$0xff] }
 0x604   : > { %7369 = vmatpush.bf16.msra.mxu0 %v14380_v8 }
 0x605   : > { %7227 = vmatmul.bf16.gmra.mxu3 %v16834_v45 }
 0x607   : > { %v6335_v1 = vpop.f32.mrf.mxu2 }
 0x608   : > { %v17162_v9 = vadd.f32 %v6335_v1, %v6210_v40  ;;  %v5990_v47 = vpop.f32.mrf.mxu0  ;;  %v17166_v0 = vpop.f32.mrf.mxu3  ;;  %v7112_v1 = vld [vmem:[#allocation3 + $0x8c] sm:$0xff] }
 0x609   : > { %v6037_v14 = vadd.f32 %v5990_v47, %v5863_v35  ;;  %v6169_v53 = vpop.f32.mrf.mxu1 }
 0x60b   : > { %6029 = vmatmul.bf16.gmra.mxu0 %v17168_v15  ;;  %v6211_v45 = vadd.f32 %v6164_v31, %v6037_v14  ;;  %6854 = vmatmul.bf16.vlgmr.msra.gmra.mxu1 %v16970_v37  ;;  %v14388_v37 = vld [vmem:[%s18909_s5 + $0x430] sm:$0xff] }
 0x60c   : > { %6377 = vmatmul.bf16.gmra.mxu2 %v17170_v24  ;;  %v7111_v31 = vld [vmem:[#allocation3 + $0x84] sm:$0xff]  ;;  %7543 = vmatpush.bf16.msrb.mxu1 %v14388_v37 }
 0x60d   : > { %v7125_v47 = vpack.c.bf16 %v7112_v1, %v7111_v31  ;;  %v6925_v1 = vld [vmem:[#allocation3 + $0x23] sm:$0xff] }
 0x60e   : > { %v6945_v37 = vpack.c.bf16 %v6926_v48, %v6925_v1 }
 0x60f   : > { %v6338_v19 = vpop.f32.mrf.mxu2 }
 0x610   : > { %v17175_v6 = vadd.f32 %v6338_v19, %v6211_v45  ;;  %v5992_v16 = vpop.f32.mrf.mxu0  ;;  %v17182_v40 = vpop.f32.mrf.mxu3  ;;  %v5865_v45 = vadd.f32 %v16788_v34, %v16945_v33  ;;  %v14405_v19 = vld [vmem:[%s18909_s5 + $0x4b8] sm:$0xff] }
 0x611   : > { %v6038_v10 = vadd.f32 %v5992_v16, %v5864_v60  ;;  %v6171_v35 = vpop.f32.mrf.mxu1  ;;  %v6577_v16 = vld [vmem:[#allocation3 + $0x21] sm:$0xff]  ;;  %7890 = vmatpush.bf16.msra.mxu3 %v14405_v19 }
 0x612   : > { %v7114_v19 = vld [vmem:[#allocation3 + $0x9c] sm:$0xff] }
 0x613   : > { %v6212_v18 = vadd.f32 %v6166_v25, %v6038_v10  ;;  %v6597_v10 = vpack.c.bf16 %v6578_v44, %v6577_v16  ;;  %v14403_v44 = vld [vmem:[%s18909_s5 + $0x4a8] sm:$0xff] }
 0x615   : > { %7232 = vmatmul.bf16.gmra.mxu3 %v7125_v47  ;;  %v14404_v47 = vld [vmem:[%s18909_s5 + $0x4b0] sm:$0xff] }
 0x616   : > { %7891 = vmatpush.bf16.msra.mxu3 %v14404_v47  ;;  %v6928_v47 = vld [vmem:[#allocation3 + $0x3b] sm:$0xff] }
 0x617   : > { %v6340_v56 = vpop.f32.mrf.mxu2 }
 0x618   : > { %v17187_v14 = vadd.f32 %v6340_v56, %v6212_v18  ;;  %v5995_v60 = vpop.f32.mrf.mxu0  ;;  %v17194_v8 = vpop.f32.mrf.mxu3  ;;  %v5866_v56 = vadd.f32 %v16802_v52, %v16962_v50  ;;  %v14402_v52 = vld [vmem:[%s18909_s5 + $0x4a0] sm:$0xff] }
 0x619   : > { %v6039_v25 = vadd.f32 %v5995_v60, %v5865_v45  ;;  %v6174_v31 = vpop.f32.mrf.mxu1 }
 0x61a   : > { %7892 = vmatpush.bf16.msra.mxu3 %v14403_v44 }
 0x61b   : > { %6680 = vmatmul.bf16.vlgmr.msrb.gmra.mxu0 %v6597_v10  ;;  %v6213_v34 = vadd.f32 %v6169_v53, %v6039_v25  ;;  %6859 = vmatmul.bf16.gmra.mxu1 %v16997_v49  ;;  %v14379_v49 = vld [vmem:[%s18909_s5 + $0x3e8] sm:$0xff]  ;;  %v7113_v53 = vld [vmem:[#allocation3 + $0x94] sm:$0xff] }
 0x61c   : > { %7028 = vmatmul.bf16.vlgmr.msrb.gmra.mxu2 %v6945_v37  ;;  %v7126_v50 = vpack.c.bf16 %v7114_v19, %v7113_v53  ;;  %7370 = vmatpush.bf16.msra.mxu0 %v14379_v49  ;;  %v14387_v25 = vld [vmem:[%s18909_s5 + $0x428] sm:$0xff]  ;;  %v6927_v19 = vld [vmem:[#allocation3 + $0x33] sm:$0xff] }
 0x61d   : > { %v6580_v37 = vld [vmem:[#allocation3 + $0x39] sm:$0xff]  ;;  %7544 = vmatpush.bf16.msrb.mxu1 %v14387_v25  ;;  %v17229_v53 = vpack.c.bf16 %v6928_v47, %v6927_v19  ;;  %v5868_v25 = vadd.f32 %v16820_v51, %v16989_v21  ;;  %v6930_v51 = vld [vmem:[#allocation3 + $0x4b] sm:$0xff] }
 0x61e   : > { %7893 = vmatpush.bf16.msra.mxu3 %v14402_v52  ;;  %v18963_v19 = vld [vmem:[#allocation7_spill] sm:$0xff] }
 0x61f   : > { %v6343_v33 = vpop.f32.mrf.mxu2 }
 0x620   : > { %v17200_v18 = vadd.f32 %v6343_v33, %v6213_v34  ;;  %v5997_v48 = vpop.f32.mrf.mxu0  ;;  %v17207_v45 = vpop.f32.mrf.mxu3  ;;  %v5867_v33 = vadd.f32 %v16809_v39, %v16978_v26  ;;  %v14400_v39 = vld [vmem:[%s18909_s5 + $0x490] sm:$0xff] }
 0x621   : > { %18960 = vst [vmem:[#allocation21_spill] sm:$0xff] %v17207_v45  ;;  %v6040_v60 = vadd.f32 %v5997_v48, %v5866_v56  ;;  %v6176_v16 = vpop.f32.mrf.mxu1  ;;  %v6579_v48 = vld [vmem:[#allocation3 + $0x31] sm:$0xff] }
 0x622   : > { %v17227_v49 = vpack.c.bf16 %v6580_v37, %v6579_v48  ;;  %v6582_v48 = vld [vmem:[#allocation3 + $0x49] sm:$0xff] }
 0x623   : > { %v6214_v1 = vadd.f32 %v6171_v35, %v6040_v60  ;;  %v14401_v35 = vld [vmem:[%s18909_s5 + $0x498] sm:$0xff] }
 0x624   : > { %7894 = vmatpush.bf16.msra.mxu3 %v14401_v35 }
 0x625   : > { %7237 = vmatmul.bf16.gmra.mxu3 %v7126_v50 }
 0x627   : > { %v6345_v10 = vpop.f32.mrf.mxu2 }
 0x628   : > { %v17218_v34 = vadd.f32 %v6345_v10, %v6214_v1  ;;  %v6000_v56 = vpop.f32.mrf.mxu0  ;;  %v17225_v44 = vpop.f32.mrf.mxu3  ;;  %7895 = vmatpush.bf16.msra.mxu3 %v14400_v39  ;;  %v14399_v10 = vld [vmem:[%s18909_s5 + $0x488] sm:$0xff]  ;;  %v14378_v39 = vld [vmem:[%s18909_s5 + $0x3e0] sm:$0xff] }
 0x629   : > { %18961 = vst [vmem:[#allocation22_spill] sm:$0xff] %v17225_v44  ;;  %v6041_v60 = vadd.f32 %v6000_v56, %v5867_v33  ;;  %v6179_v52 = vpop.f32.mrf.mxu1  ;;  %7371 = vmatpush.bf16.msra.mxu0 %v14378_v39  ;;  %v7118_v39 = vld [vmem:[#allocation3 + $0xbc] sm:$0xff] }
 0x62b   : > { %6685 = vmatmul.bf16.gmra.mxu0 %v17227_v49  ;;  %v6215_v26 = vadd.f32 %v6174_v31, %v6041_v60  ;;  %6864 = vmatmul.bf16.gmra.mxu1 %v17015_v4  ;;  %v14398_v4 = vld [vmem:[%s18909_s5 + $0x480] sm:$0xff]  ;;  %v5869_v60 = vadd.f32 %v18963_v19, %v17005_v2 }
 0x62c   : > { %7033 = vmatmul.bf16.gmra.mxu2 %v17229_v53  ;;  %7896 = vmatpush.bf16.msra.mxu3 %v14399_v10  ;;  %v14386_v2 = vld [vmem:[%s18909_s5 + $0x420] sm:$0xff] }
 0x62d   : > { %7545 = vmatpush.bf16.msrb.mxu1 %v14386_v2 }
 0x62f   : > { %v6348_v50 = vpop.f32.mrf.mxu2 }
 0x630   : > { %v17237_v1 = vadd.f32 %v6348_v50, %v6215_v26  ;;  %v6002_v37 = vpop.f32.mrf.mxu0  ;;  %v17244_v47 = vpop.f32.mrf.mxu3  ;;  %7897 = vmatpush.bf16.msra.mxu3 %v14398_v4 }
 0x631   : > { %18962 = vst [vmem:[#allocation23_spill] sm:$0xff] %v17244_v47  ;;  %v6042_v33 = vadd.f32 %v6002_v37, %v5868_v25  ;;  %v6181_v35 = vpop.f32.mrf.mxu1  ;;  %v6581_v25 = vld [vmem:[#allocation3 + $0x41] sm:$0xff] }
 0x633   : > { %v6216_v31 = vadd.f32 %v6176_v16, %v6042_v33  ;;  %v6929_v16 = vld [vmem:[#allocation3 + $0x43] sm:$0xff] }
 0x634   : > { %v17261_v37 = vpack.c.bf16 %v6930_v51, %v6929_v16  ;;  %v7117_v16 = vld [vmem:[#allocation3 + $0xb4] sm:$0xff] }
 0x635   : > { %7242 = vmatmul.bf16.gmra.mxu3 %v17170_v24  ;;  %v17259_v24 = vpack.c.bf16 %v6582_v48, %v6581_v25  ;;  %v18965_v48 = vld [vmem:[#allocation8_spill] sm:$0xff] }
 0x636   : > { %v5870_v51 = vadd.f32 %v18965_v48, %v17010_v62  ;;  %v6583_v48 = vld [vmem:[#allocation3 + $0x51] sm:$0xff] }
 0x637   : > { %v6350_v56 = vpop.f32.mrf.mxu2 }
 0x638   : > { %v17250_v21 = vadd.f32 %v6350_v56, %v6216_v31  ;;  %v6005_v26 = vpop.f32.mrf.mxu0  ;;  %v17257_v50 = vpop.f32.mrf.mxu3 }
 0x639   : > { %18964 = vst [vmem:[#allocation7_spill] sm:$0xff] %v17257_v50  ;;  %v6043_v10 = vadd.f32 %v6005_v26, %v5869_v60  ;;  %v6184_v33 = vpop.f32.mrf.mxu1  ;;  %v7128_v50 = vpack.c.bf16 %v7118_v39, %v7117_v16  ;;  %v18968_v39 = vld [vmem:[#allocation9_spill] sm:$0xff] }
 0x63b   : > { %6690 = vmatmul.bf16.gmra.mxu0 %v17259_v24  ;;  %v6217_v4 = vadd.f32 %v6179_v52, %v6043_v10  ;;  %6869 = vmatmul.bf16.gmra.mxu1 %v17036_v38  ;;  %v6584_v10 = vld [vmem:[#allocation3 + $0x59] sm:$0xff] }
 0x63c   : > { %7038 = vmatmul.bf16.gmra.mxu2 %v17261_v37  ;;  %v6932_v38 = vld [vmem:[#allocation3 + $0x5b] sm:$0xff] }
 0x63f   : > { %v6353_v31 = vpop.f32.mrf.mxu2 }
 0x640   : > { %v17269_v56 = vadd.f32 %v6353_v31, %v6217_v4  ;;  %v6007_v19 = vpop.f32.mrf.mxu0  ;;  %v17273_v60 = vpop.f32.mrf.mxu3  ;;  %v18967_v4 = vld [vmem:[#allocation6_spill] sm:$0xff] }
 0x641   : > { %18966 = vst [vmem:[#allocation8_spill] sm:$0xff] %v17273_v60  ;;  %v6044_v26 = vadd.f32 %v6007_v19, %v5870_v51  ;;  %v6186_v25 = vpop.f32.mrf.mxu1  ;;  %v5871_v31 = vadd.f32 %v18967_v4, %v17026_v58  ;;  %v6931_v60 = vld [vmem:[#allocation3 + $0x53] sm:$0xff]  ;;  %v17281_v51 = vpack.c.bf16 %v6584_v10, %v6583_v48  ;;  %v6586_v4 = vld [vmem:[#allocation3 + $0x69] sm:$0xff] }
 0x642   : > { %v17283_v19 = vpack.c.bf16 %v6932_v38, %v6931_v60  ;;  %v14377_v58 = vld [vmem:[%s18909_s5 + $0x3d8] sm:$0xff]  ;;  %v18970_v48 = vld [vmem:[#allocation10_spill] sm:$0xff] }
 0x643   : > { %v6218_v47 = vadd.f32 %v6181_v35, %v6044_v26  ;;  %7372 = vmatpush.bf16.msra.mxu0 %v14377_v58  ;;  %v5872_v26 = vadd.f32 %v18968_v39, %v17031_v61  ;;  %v6585_v61 = vld [vmem:[#allocation3 + $0x61] sm:$0xff] }
 0x645   : > { %7247 = vmatmul.bf16.gmra.mxu3 %v7128_v50  ;;  %v14385_v50 = vld [vmem:[%s18909_s5 + $0x418] sm:$0xff] }
 0x646   : > { %7546 = vmatpush.bf16.msrb.mxu1 %v14385_v50 }
 0x647   : > { %v6355_v52 = vpop.f32.mrf.mxu2 }
 0x648   : > { %v17275_v2 = vadd.f32 %v6355_v52, %v6218_v47  ;;  %v6010_v44 = vpop.f32.mrf.mxu0  ;;  %v17279_v62 = vpop.f32.mrf.mxu3 }
 0x649   : > { %v6045_v45 = vadd.f32 %v6010_v44, %v5871_v31  ;;  %v6189_v35 = vpop.f32.mrf.mxu1  ;;  %v6934_v31 = vld [vmem:[#allocation3 + $0x6b] sm:$0xff] }
 0x64b   : > { %6695 = vmatmul.bf16.gmra.mxu0 %v17281_v51  ;;  %v6219_v47 = vadd.f32 %v6184_v33, %v6045_v45  ;;  %6874 = vmatmul.bf16.gmra.mxu1 %v17057_v5 }
 0x64c   : > { %7043 = vmatmul.bf16.gmra.mxu2 %v17283_v19 }
 0x64f   : > { %v6358_v44 = vpop.f32.mrf.mxu2 }
 0x650   : > { %v17294_v60 = vadd.f32 %v6358_v44, %v6219_v47  ;;  %v6012_v16 = vpop.f32.mrf.mxu0  ;;  %v17298_v45 = vpop.f32.mrf.mxu3  ;;  %v5873_v47 = vadd.f32 %v18970_v48, %v17041_v59  ;;  %v6933_v44 = vld [vmem:[#allocation3 + $0x63] sm:$0xff] }
 0x651   : > { %18969 = vst [vmem:[#allocation6_spill] sm:$0xff] %v17298_v45  ;;  %v6046_v33 = vadd.f32 %v6012_v16, %v5872_v26  ;;  %v6191_v52 = vpop.f32.mrf.mxu1  ;;  %v17307_v45 = vpack.c.bf16 %v6586_v4, %v6585_v61  ;;  %v17309_v26 = vpack.c.bf16 %v6934_v31, %v6933_v44  ;;  %v6936_v61 = vld [vmem:[#allocation3 + $0x7b] sm:$0xff] }
 0x653   : > { %v6220_v10 = vadd.f32 %v6186_v25, %v6046_v33  ;;  %v18971_v33 = vld [vmem:[#allocation11_spill] sm:$0xff] }
 0x655   : > { %7898 = vmatmul.bf16.vlgmr.msra.gmra.mxu3 %v17229_v53 }
 0x657   : > { %v6360_v38 = vpop.f32.mrf.mxu2 }
 0x658   : > { %v17301_v5 = vadd.f32 %v6360_v38, %v6220_v10  ;;  %v6015_v58 = vpop.f32.mrf.mxu0  ;;  %v17305_v50 = vpop.f32.mrf.mxu3  ;;  %v5874_v10 = vadd.f32 %v18971_v33, %v17052_v23  ;;  %v14376_v38 = vld [vmem:[%s18909_s5 + $0x3d0] sm:$0xff]  ;;  %v6588_v23 = vld [vmem:[#allocation3 + $0x79] sm:$0xff]  ;;  %v6587_v33 = vld [vmem:[#allocation3 + $0x71] sm:$0xff] }
 0x659   : > { %v6047_v39 = vadd.f32 %v6015_v58, %v5873_v47  ;;  %v6194_v25 = vpop.f32.mrf.mxu1  ;;  %7373 = vmatpush.bf16.msra.mxu0 %v14376_v38 }
 0x65b   : > { %6700 = vmatmul.bf16.gmra.mxu0 %v17307_v45  ;;  %v6221_v53 = vadd.f32 %v6189_v35, %v6047_v39  ;;  %6879 = vmatmul.bf16.gmra.mxu1 %v17079_v46  ;;  %v14384_v46 = vld [vmem:[%s18909_s5 + $0x410] sm:$0xff]  ;;  %v5875_v39 = vadd.f32 %v16913_v54, %v17062_v36  ;;  %v18973_v36 = vld [vmem:[#allocation12_spill] sm:$0xff] }
 0x65c   : > { %7048 = vmatmul.bf16.gmra.mxu2 %v17309_v26  ;;  %7547 = vmatpush.bf16.msrb.mxu1 %v14384_v46 }
 0x65f   : > { %v6363_v16 = vpop.f32.mrf.mxu2 }
 0x660   : > { %v17314_v59 = vadd.f32 %v6363_v16, %v6221_v53  ;;  %v6017_v4 = vpop.f32.mrf.mxu0  ;;  %v17321_v31 = vpop.f32.mrf.mxu3 }
 0x661   : > { %v6048_v48 = vadd.f32 %v6017_v4, %v5874_v10  ;;  %v6196_v47 = vpop.f32.mrf.mxu1  ;;  %v6935_v10 = vld [vmem:[#allocation3 + $0x73] sm:$0xff]  ;;  %v17333_v4 = vpack.c.bf16 %v6588_v23, %v6587_v33 }
 0x663   : > { %v6222_v35 = vadd.f32 %v6191_v52, %v6048_v48  ;;  %v17335_v52 = vpack.c.bf16 %v6936_v61, %v6935_v10  ;;  %v6938_v10 = vld [vmem:[#allocation3 + $0x8b] sm:$0xff] }
 0x665   : > { %7903 = vmatmul.bf16.gmra.mxu3 %v17261_v37 }
 0x667   : > { %v6365_v58 = vpop.f32.mrf.mxu2 }
 0x668   : > { %v17327_v44 = vadd.f32 %v6365_v58, %v6222_v35  ;;  %v6020_v53 = vpop.f32.mrf.mxu0  ;;  %v17331_v16 = vpop.f32.mrf.mxu3  ;;  %v5876_v35 = vadd.f32 %v18973_v36, %v17074_v30  ;;  %v6590_v30 = vld [vmem:[#allocation3 + $0x89] sm:$0xff] }
 0x669   : > { %18972 = vst [vmem:[#allocation9_spill] sm:$0xff] %v17331_v16  ;;  %v6049_v38 = vadd.f32 %v6020_v53, %v5875_v39  ;;  %v6199_v48 = vpop.f32.mrf.mxu1  ;;  %v14375_v53 = vld [vmem:[%s18909_s5 + $0x3c8] sm:$0xff] }
 0x66a   : > { %7374 = vmatpush.bf16.msra.mxu0 %v14375_v53 }
 0x66b   : > { %6705 = vmatmul.bf16.gmra.mxu0 %v17333_v4  ;;  %v6223_v37 = vadd.f32 %v6194_v25, %v6049_v38  ;;  %6884 = vmatmul.bf16.gmra.mxu1 %v17107_v43  ;;  %v14383_v25 = vld [vmem:[%s18909_s5 + $0x408] sm:$0xff] }
 0x66c   : > { %7053 = vmatmul.bf16.gmra.mxu2 %v17335_v52  ;;  %7548 = vmatpush.bf16.msrb.mxu1 %v14383_v25  ;;  %v5878_v25 = vadd.f32 %v16950_v20, %v17099_v32  ;;  %v6940_v20 = vld [vmem:[#allocation3 + $0x9b] sm:$0xff] }
 0x66f   : > { %v6368_v46 = vpop.f32.mrf.mxu2 }
 0x670   : > { %v17340_v54 = vadd.f32 %v6368_v46, %v6223_v37  ;;  %v6022_v58 = vpop.f32.mrf.mxu0  ;;  %v17344_v39 = vpop.f32.mrf.mxu3  ;;  %v5877_v37 = vadd.f32 %v16937_v63, %v17087_v12  ;;  %v14397_v63 = vld [vmem:[%s18909_s5 + $0x478] sm:$0xff] }
 0x671   : > { %18974 = vst [vmem:[#allocation10_spill] sm:$0xff] %v17344_v39  ;;  %v6050_v23 = vadd.f32 %v6022_v58, %v5876_v35  ;;  %v6201_v61 = vpop.f32.mrf.mxu1  ;;  %v6589_v35 = vld [vmem:[#allocation3 + $0x81] sm:$0xff]  ;;  %7716 = vmatpush.bf16.msra.mxu2 %v14397_v63  ;;  %v6939_v63 = vld [vmem:[#allocation3 + $0x93] sm:$0xff] }
 0x672   : > { %v6937_v58 = vld [vmem:[#allocation3 + $0x83] sm:$0xff]  ;;  %v17359_v16 = vpack.c.bf16 %v6590_v30, %v6589_v35  ;;  %v5879_v35 = vadd.f32 %v16967_v22, %v17121_v7  ;;  %v14382_v22 = vld [vmem:[%s18909_s5 + $0x400] sm:$0xff] }
 0x673   : > { %v6224_v43 = vadd.f32 %v6196_v47, %v6050_v23  ;;  %v17361_v47 = vpack.c.bf16 %v6938_v10, %v6937_v58  ;;  %7549 = vmatpush.bf16.msrb.mxu1 %v14382_v22  ;;  %v6770_v22 = vld [vmem:[#allocation3 + $0xba] sm:$0xff] }
 0x675   : > { %7908 = vmatmul.bf16.gmra.mxu3 %v17283_v19 }
 0x677   : > { %v6370_v33 = vpop.f32.mrf.mxu2 }
 0x678   : > { %v17353_v38 = vadd.f32 %v6370_v33, %v6224_v43  ;;  %v6025_v46 = vpop.f32.mrf.mxu0  ;;  %v17357_v36 = vpop.f32.mrf.mxu3 }
 0x679   : > { %v6051_v39 = vadd.f32 %v6025_v46, %v5877_v37  ;;  %v6204_v23 = vpop.f32.mrf.mxu1  ;;  %v6592_v46 = vld [vmem:[#allocation3 + $0x99] sm:$0xff] }
 0x67b   : > { %6710 = vmatmul.bf16.gmra.mxu0 %v17359_v16  ;;  %v6225_v19 = vadd.f32 %v6199_v48, %v6051_v39  ;;  %6889 = vmatmul.bf16.gmra.mxu1 %v17139_v3  ;;  %v14396_v48 = vld [vmem:[%s18909_s5 + $0x470] sm:$0xff]  ;;  %v14395_v3 = vld [vmem:[%s18909_s5 + $0x468] sm:$0xff] }
 0x67c   : > { %7058 = vmatmul.bf16.gmra.mxu2 %v17361_v47 }
 0x67d   : > { %7717 = vmatpush.bf16.msra.mxu2 %v14396_v48 }
 0x67f   : > { %v6373_v12 = vpop.f32.mrf.mxu2 }
 0x680   : > { %v17369_v53 = vadd.f32 %v6373_v12, %v6225_v19  ;;  %v6027_v43 = vpop.f32.mrf.mxu0  ;;  %v17373_v30 = vpop.f32.mrf.mxu3  ;;  %v6591_v19 = vld [vmem:[#allocation3 + $0x91] sm:$0xff] }
 0x681   : > { %v6052_v33 = vadd.f32 %v6027_v43, %v5878_v25  ;;  %v6206_v10 = vpop.f32.mrf.mxu1  ;;  %7718 = vmatpush.bf16.msra.mxu2 %v14395_v3  ;;  %v17389_v25 = vpack.c.bf16 %v6592_v46, %v6591_v19  ;;  %v5880_v46 = vadd.f32 %v16983_v42, %v17133_v13  ;;  %v6594_v42 = vld [vmem:[#allocation3 + $0xa9] sm:$0xff] }
 0x683   : > { %v6226_v39 = vadd.f32 %v6201_v61, %v6052_v33  ;;  %v14374_v61 = vld [vmem:[%s18909_s5 + $0x3c0] sm:$0xff] }
 0x684   : > { %7375 = vmatpush.bf16.msra.mxu0 %v14374_v61  ;;  %v14394_v33 = vld [vmem:[%s18909_s5 + $0x460] sm:$0xff] }
 0x685   : > { %7913 = vmatmul.bf16.gmra.mxu3 %v17309_v26  ;;  %v17391_v26 = vpack.c.bf16 %v6940_v20, %v6939_v63  ;;  %7719 = vmatpush.bf16.msra.mxu2 %v14394_v33 }
 0x687   : > { %v6375_v37 = vpop.f32.mrf.mxu2 }
 0x688   : > { %v17382_v32 = vadd.f32 %v6375_v37, %v6226_v39  ;;  %v6030_v58 = vpop.f32.mrf.mxu0  ;;  %v17399_v7 = vpop.f32.mrf.mxu3  ;;  %v14393_v39 = vld [vmem:[%s18909_s5 + $0x458] sm:$0xff] }
 0x689   : > { %v6053_v12 = vadd.f32 %v6030_v58, %v5879_v35  ;;  %v6855_v43 = vpop.f32.mrf.mxu1  ;;  %7720 = vmatpush.bf16.msra.mxu2 %v14393_v39  ;;  %v14391_v58 = vld [vmem:[%s18909_s5 + $0x448] sm:$0xff] }
 0x68a   : > { %v6593_v39 = vld [vmem:[#allocation3 + $0xa1] sm:$0xff] }
 0x68b   : > { %6715 = vmatmul.bf16.gmra.mxu0 %v17389_v25  ;;  %v6227_v48 = vadd.f32 %v6204_v23, %v6053_v12  ;;  %6894 = vmatmul.bf16.gmra.mxu1 %v17168_v15  ;;  %v14392_v15 = vld [vmem:[%s18909_s5 + $0x450] sm:$0xff]  ;;  %v18976_v12 = vld [vmem:[#allocation13_spill] sm:$0xff] }
 0x68c   : > { %7063 = vmatmul.bf16.gmra.mxu2 %v17391_v26  ;;  %v6557_v33 = vadd.f32 %v18976_v12, %v17155_v28 }
 0x68d   : > { %7721 = vmatpush.bf16.msra.mxu2 %v14392_v15  ;;  %v14413_v15 = vld [vmem:[%s18909_s5 + $0x4f8] sm:$0xff] }
 0x68e   : > { %8064 = vmatpush.bf16.msrb.mxu0 %v14413_v15  ;;  %v18979_v15 = vld [vmem:[#allocation15_spill] sm:$0xff] }
 0x68f   : > { %v6378_v3 = vpop.f32.mrf.mxu2 }
 0x690   : > { %v17407_v37 = vadd.f32 %v6378_v3, %v6227_v48  ;;  %v6032_v20 = vpop.f32.mrf.mxu0  ;;  %v17417_v19 = vpop.f32.mrf.mxu3  ;;  %v17424_v3 = vpack.c.bf16 %v6594_v42, %v6593_v39 }
 0x691   : > { %v6054_v35 = vadd.f32 %v6032_v20, %v5880_v46  ;;  %v6857_v61 = vpop.f32.mrf.mxu1  ;;  %18975 = vst [vmem:[#allocation11_spill] sm:$0xff] %v17417_v19  ;;  %7722 = vmatpush.bf16.msra.mxu2 %v14391_v58  ;;  %v6769_v20 = vld [vmem:[#allocation3 + $0xb2] sm:$0xff] }
 0x693   : > { %v6228_v23 = vadd.f32 %v6206_v10, %v6054_v35  ;;  %v17429_v35 = vpack.c.bf16 %v6770_v22, %v6769_v20  ;;  %v6944_v20 = vld [vmem:[#allocation3 + $0xbb] sm:$0xff] }
 0x695   : > { %7918 = vmatmul.bf16.gmra.mxu3 %v17335_v52  ;;  %v14390_v52 = vld [vmem:[%s18909_s5 + $0x440] sm:$0xff] }
 0x696   : > { %7723 = vmatpush.bf16.msra.mxu2 %v14390_v52 }
 0x697   : > { %v6380_v63 = vpop.f32.mrf.mxu2 }
 0x698   : > { %v17420_v13 = vadd.f32 %v6380_v63, %v6228_v23  ;;  %v6681_v48 = vpop.f32.mrf.mxu0  ;;  %v14421_v23 = vld [vmem:[%s18909_s5 + $0x538] sm:$0xff]  ;;  %v17440_v63 = vpop.f32.mrf.mxu3 }
 0x699   : > { %v6731_v10 = vadd.f32 %v6681_v48, %v6557_v33  ;;  %v6860_v46 = vpop.f32.mrf.mxu1  ;;  %8238 = vmatpush.bf16.msra.mxu1 %v14421_v23  ;;  %18977 = vst [vmem:[#allocation12_spill] sm:$0xff] %v17440_v63  ;;  %v6559_v23 = vadd.f32 %v18979_v15, %v17175_v6 }
 0x69b   : > { %6720 = vmatmul.bf16.gmra.mxu0 %v17424_v3  ;;  %v6905_v28 = vadd.f32 %v6855_v43, %v6731_v10  ;;  %6899 = vmatmul.bf16.gmra.mxu1 %v17429_v35  ;;  %v6596_v10 = vld [vmem:[#allocation3 + $0xb9] sm:$0xff] }
 0x69c   : > { %7068 = vmatmul.bf16.gmra.mxu2 %v17144_v17  ;;  %v18978_v17 = vld [vmem:[#allocation14_spill] sm:$0xff] }
 0x69d   : > { %v6558_v43 = vadd.f32 %v18978_v17, %v17162_v9 }
 0x69f   : > { %v7029_v58 = vpop.f32.mrf.mxu2 }
 0x6a0   : > { %v17442_v42 = vadd.f32 %v7029_v58, %v6905_v28  ;;  %v6683_v12 = vpop.f32.mrf.mxu0  ;;  %v6595_v28 = vld [vmem:[#allocation3 + $0xb1] sm:$0xff]  ;;  %v17451_v19 = vpop.f32.mrf.mxu3 }
 0x6a1   : > { %v6732_v33 = vadd.f32 %v6683_v12, %v6558_v43  ;;  %v6862_v22 = vpop.f32.mrf.mxu1  ;;  %v6943_v58 = vld [vmem:[#allocation3 + $0xb3] sm:$0xff]  ;;  %v17453_v17 = vpack.c.bf16 %v6596_v10, %v6595_v28 }
 0x6a2   : > { %v17455_v43 = vpack.c.bf16 %v6944_v20, %v6943_v58  ;;  %v7622_v28 = vld [vmem:[#allocation3 + $0x3a] sm:$0xff] }
 0x6a3   : > { %v6906_v48 = vadd.f32 %v6857_v61, %v6732_v33  ;;  %v18980_v33 = vld [vmem:[#allocation16_spill] sm:$0xff] }
 0x6a5   : > { %7923 = vmatmul.bf16.gmra.mxu3 %v17361_v47 }
 0x6a7   : > { %v7031_v39 = vpop.f32.mrf.mxu2 }
 0x6a8   : > { %v17447_v52 = vadd.f32 %v7031_v39, %v6906_v48  ;;  %v6686_v63 = vpop.f32.mrf.mxu0  ;;  %v6560_v48 = vadd.f32 %v18980_v33, %v17187_v14  ;;  %v17470_v15 = vpop.f32.mrf.mxu3  ;;  %v7274_v14 = vld [vmem:[#allocation3 + $0x38] sm:$0xff]  ;;  %v7273_v33 = vld [vmem:[#allocation3 + $0x30] sm:$0xff] }
 0x6a9   : > { %v6733_v9 = vadd.f32 %v6686_v63, %v6559_v23  ;;  %v6865_v61 = vpop.f32.mrf.mxu1  ;;  %v14412_v63 = vld [vmem:[%s18909_s5 + $0x4f0] sm:$0xff] }
 0x6aa   : > { %8065 = vmatpush.bf16.msrb.mxu0 %v14412_v63 }
 0x6ab   : > { %6725 = vmatmul.bf16.gmra.mxu0 %v17453_v17  ;;  %v6907_v47 = vadd.f32 %v6860_v46, %v6733_v9  ;;  %7550 = vmatmul.bf16.vlgmr.msrb.gmra.mxu1 %v17227_v49  ;;  %v14420_v46 = vld [vmem:[%s18909_s5 + $0x530] sm:$0xff]  ;;  %v6561_v9 = vadd.f32 %v17033_v55, %v17200_v18 }
 0x6ac   : > { %7073 = vmatmul.bf16.gmra.mxu2 %v17455_v43  ;;  %8239 = vmatpush.bf16.msra.mxu1 %v14420_v46 }
 0x6af   : > { %v7034_v12 = vpop.f32.mrf.mxu2 }
 0x6b0   : > { %v17460_v6 = vadd.f32 %v7034_v12, %v6907_v47  ;;  %v6688_v39 = vpop.f32.mrf.mxu0  ;;  %v14437_v47 = vld [vmem:[%s18909_s5 + $0x5b8] sm:$0xff]  ;;  %v17484_v55 = vpop.f32.mrf.mxu3 }
 0x6b1   : > { %v6734_v10 = vadd.f32 %v6688_v39, %v6560_v48  ;;  %v6867_v20 = vpop.f32.mrf.mxu1  ;;  %v7621_v48 = vld [vmem:[#allocation3 + $0x32] sm:$0xff]  ;;  %8586 = vmatpush.bf16.msrb.mxu3 %v14437_v47 }
 0x6b2   : > { %v7641_v39 = vpack.c.bf16 %v7622_v28, %v7621_v48  ;;  %v14435_v28 = vld [vmem:[%s18909_s5 + $0x5a8] sm:$0xff]  ;;  %v7810_v47 = vld [vmem:[#allocation3 + $0xab] sm:$0xff]  ;;  %v14434_v48 = vld [vmem:[%s18909_s5 + $0x5a0] sm:$0xff] }
 0x6b3   : > { %v6908_v49 = vadd.f32 %v6862_v22, %v6734_v10  ;;  %v7293_v22 = vpack.c.bf16 %v7274_v14, %v7273_v33 }
 0x6b5   : > { %7928 = vmatmul.bf16.gmra.mxu3 %v17391_v26  ;;  %v14436_v26 = vld [vmem:[%s18909_s5 + $0x5b0] sm:$0xff] }
 0x6b6   : > { %8587 = vmatpush.bf16.msrb.mxu3 %v14436_v26  ;;  %v7276_v26 = vld [vmem:[#allocation3 + $0x48] sm:$0xff] }
 0x6b7   : > { %v7036_v23 = vpop.f32.mrf.mxu2 }
 0x6b8   : > { %v17473_v58 = vadd.f32 %v7036_v23, %v6908_v49  ;;  %v6691_v12 = vpop.f32.mrf.mxu0  ;;  %v18981_v23 = vld [vmem:[#allocation17_spill] sm:$0xff] }
 0x6b9   : > { %v6735_v63 = vadd.f32 %v6691_v12, %v6561_v9  ;;  %v6870_v10 = vpop.f32.mrf.mxu1  ;;  %v6562_v14 = vadd.f32 %v18981_v23, %v17218_v34 }
 0x6ba   : > { %8588 = vmatpush.bf16.msrb.mxu3 %v14435_v28 }
 0x6bb   : > { %7376 = vmatmul.bf16.vlgmr.msra.gmra.mxu0 %v7293_v22  ;;  %v6909_v46 = vadd.f32 %v6865_v61, %v6735_v63  ;;  %7555 = vmatmul.bf16.gmra.mxu1 %v17259_v24  ;;  %v14411_v24 = vld [vmem:[%s18909_s5 + $0x4e8] sm:$0xff] }
 0x6bc   : > { %7724 = vmatmul.bf16.vlgmr.msra.gmra.mxu2 %v7641_v39  ;;  %v7809_v61 = vld [vmem:[#allocation3 + $0xa3] sm:$0xff]  ;;  %8066 = vmatpush.bf16.msrb.mxu0 %v14411_v24 }
 0x6bd   : > { %v7822_v63 = vpack.c.bf16 %v7810_v47, %v7809_v61  ;;  %v14419_v22 = vld [vmem:[%s18909_s5 + $0x528] sm:$0xff] }
 0x6be   : > { %8589 = vmatpush.bf16.msrb.mxu3 %v14434_v48  ;;  %8240 = vmatpush.bf16.msra.mxu1 %v14419_v22  ;;  %v7623_v47 = vld [vmem:[#allocation3 + $0x42] sm:$0xff]  ;;  %v6564_v22 = vadd.f32 %v17064_v57, %v17250_v21  ;;  %v7626_v57 = vld [vmem:[#allocation3 + $0x5a] sm:$0xff] }
 0x6bf   : > { %v7039_v18 = vpop.f32.mrf.mxu2 }
 0x6c0   : > { %v17486_v49 = vadd.f32 %v7039_v18, %v6909_v46  ;;  %v6693_v9 = vpop.f32.mrf.mxu0  ;;  %v7624_v46 = vld [vmem:[#allocation3 + $0x4a] sm:$0xff]  ;;  %v17502_v18 = vpop.f32.mrf.mxu3 }
 0x6c1   : > { %v6736_v12 = vadd.f32 %v6693_v9, %v6562_v14  ;;  %v6872_v33 = vpop.f32.mrf.mxu1  ;;  %v6563_v14 = vadd.f32 %v17054_v27, %v17237_v1  ;;  %v7275_v9 = vld [vmem:[#allocation3 + $0x40] sm:$0xff]  ;;  %v17513_v61 = vpack.c.bf16 %v7624_v46, %v7623_v47  ;;  %v6565_v47 = vadd.f32 %v17076_v41, %v17269_v56 }
 0x6c2   : > { %v17511_v24 = vpack.c.bf16 %v7276_v26, %v7275_v9  ;;  %v7278_v9 = vld [vmem:[#allocation3 + $0x58] sm:$0xff] }
 0x6c3   : > { %v6910_v34 = vadd.f32 %v6867_v20, %v6736_v12  ;;  %v14433_v20 = vld [vmem:[%s18909_s5 + $0x598] sm:$0xff] }
 0x6c4   : > { %8590 = vmatpush.bf16.msrb.mxu3 %v14433_v20 }
 0x6c5   : > { %7933 = vmatmul.bf16.gmra.mxu3 %v7822_v63  ;;  %v14432_v63 = vld [vmem:[%s18909_s5 + $0x590] sm:$0xff] }
 0x6c7   : > { %v7041_v39 = vpop.f32.mrf.mxu2 }
 0x6c8   : > { %v17504_v23 = vadd.f32 %v7041_v39, %v6910_v34  ;;  %v6696_v28 = vpop.f32.mrf.mxu0  ;;  %8591 = vmatpush.bf16.msrb.mxu3 %v14432_v63  ;;  %v14431_v39 = vld [vmem:[%s18909_s5 + $0x588] sm:$0xff]  ;;  %v17528_v46 = vpop.f32.mrf.mxu3 }
 0x6c9   : > { %v6737_v12 = vadd.f32 %v6696_v28, %v6563_v14  ;;  %v6875_v48 = vpop.f32.mrf.mxu1 }
 0x6cb   : > { %7381 = vmatmul.bf16.gmra.mxu0 %v17511_v24  ;;  %v6911_v27 = vadd.f32 %v6870_v10, %v6737_v12  ;;  %7560 = vmatmul.bf16.gmra.mxu1 %v17281_v51  ;;  %v14430_v51 = vld [vmem:[%s18909_s5 + $0x580] sm:$0xff] }
 0x6cc   : > { %7729 = vmatmul.bf16.gmra.mxu2 %v17513_v61  ;;  %8592 = vmatpush.bf16.msrb.mxu3 %v14431_v39  ;;  %v14410_v12 = vld [vmem:[%s18909_s5 + $0x4e0] sm:$0xff] }
 0x6cd   : > { %8067 = vmatpush.bf16.msrb.mxu0 %v14410_v12  ;;  %v7813_v12 = vld [vmem:[#allocation3 + $0xc3] sm:$0xff] }
 0x6cf   : > { %v7044_v1 = vpop.f32.mrf.mxu2 }
 0x6d0   : > { %v17521_v34 = vadd.f32 %v7044_v1, %v6911_v27  ;;  %v6698_v26 = vpop.f32.mrf.mxu0  ;;  %8593 = vmatpush.bf16.msrb.mxu3 %v14430_v51  ;;  %v7277_v27 = vld [vmem:[#allocation3 + $0x50] sm:$0xff] }
 0x6d1   : > { %v6738_v14 = vadd.f32 %v6698_v26, %v6564_v22  ;;  %v6877_v20 = vpop.f32.mrf.mxu1  ;;  %v7625_v1 = vld [vmem:[#allocation3 + $0x52] sm:$0xff] }
 0x6d2   : > { %v14418_v26 = vld [vmem:[%s18909_s5 + $0x520] sm:$0xff] }
 0x6d3   : > { %v6912_v10 = vadd.f32 %v6872_v33, %v6738_v14  ;;  %v17541_v33 = vpack.c.bf16 %v7278_v9, %v7277_v27  ;;  %v17548_v14 = vpop.f32.mrf.mxu3  ;;  %8241 = vmatpush.bf16.msra.mxu1 %v14418_v26  ;;  %v7814_v9 = vld [vmem:[#allocation3 + $0xcb] sm:$0xff] }
 0x6d4   : > { %18982 = vst [vmem:[#allocation13_spill] sm:$0xff] %v17548_v14 }
 0x6d5   : > { %7938 = vmatmul.bf16.gmra.mxu3 %v17455_v43  ;;  %v17543_v43 = vpack.c.bf16 %v7626_v57, %v7625_v1 }
 0x6d7   : > { %v7046_v28 = vpop.f32.mrf.mxu2 }
 0x6d8   : > { %v17534_v21 = vadd.f32 %v7046_v28, %v6912_v10  ;;  %v6701_v63 = vpop.f32.mrf.mxu0  ;;  %v6566_v10 = vadd.f32 %v17089_v11, %v17275_v2  ;;  %v7279_v11 = vld [vmem:[#allocation3 + $0x60] sm:$0xff] }
 0x6d9   : > { %v6739_v22 = vadd.f32 %v6701_v63, %v6565_v47  ;;  %v6880_v39 = vpop.f32.mrf.mxu1  ;;  %v7824_v63 = vpack.c.bf16 %v7814_v9, %v7813_v12  ;;  %v7627_v2 = vld [vmem:[#allocation3 + $0x62] sm:$0xff] }
 0x6db   : > { %7386 = vmatmul.bf16.gmra.mxu0 %v17541_v33  ;;  %v6913_v41 = vadd.f32 %v6875_v48, %v6739_v22  ;;  %7565 = vmatmul.bf16.gmra.mxu1 %v17307_v45  ;;  %v17557_v1 = vpop.f32.mrf.mxu3  ;;  %v7280_v22 = vld [vmem:[#allocation3 + $0x68] sm:$0xff] }
 0x6dc   : > { %7734 = vmatmul.bf16.gmra.mxu2 %v17543_v43  ;;  %v7628_v45 = vld [vmem:[#allocation3 + $0x6a] sm:$0xff] }
 0x6df   : > { %v7049_v56 = vpop.f32.mrf.mxu2 }
 0x6e0   : > { %v17553_v51 = vadd.f32 %v7049_v56, %v6913_v41  ;;  %v6703_v28 = vpop.f32.mrf.mxu0  ;;  %v6567_v41 = vadd.f32 %v17104_v29, %v17294_v60  ;;  %v14417_v29 = vld [vmem:[%s18909_s5 + $0x518] sm:$0xff] }
 0x6e1   : > { %v6740_v57 = vadd.f32 %v6703_v28, %v6566_v10  ;;  %v6882_v47 = vpop.f32.mrf.mxu1  ;;  %v17563_v10 = vpack.c.bf16 %v7280_v22, %v7279_v11  ;;  %v17565_v28 = vpack.c.bf16 %v7628_v45, %v7627_v2  ;;  %8242 = vmatpush.bf16.msra.mxu1 %v14417_v29  ;;  %v7630_v11 = vld [vmem:[#allocation3 + $0x7a] sm:$0xff]  ;;  %v18985_v2 = vld [vmem:[#allocation19_spill] sm:$0xff] }
 0x6e3   : > { %v6914_v27 = vadd.f32 %v6877_v20, %v6740_v57  ;;  %v14409_v57 = vld [vmem:[%s18909_s5 + $0x4d8] sm:$0xff]  ;;  %v17576_v12 = vpop.f32.mrf.mxu3 }
 0x6e4   : > { %8068 = vmatpush.bf16.msrb.mxu0 %v14409_v57  ;;  %18983 = vst [vmem:[#allocation14_spill] sm:$0xff] %v17576_v12  ;;  %v6569_v57 = vadd.f32 %v18985_v2, %v17314_v59 }
 0x6e5   : > { %7943 = vmatmul.bf16.gmra.mxu3 %v7824_v63 }
 0x6e7   : > { %v7051_v48 = vpop.f32.mrf.mxu2 }
 0x6e8   : > { %v17559_v26 = vadd.f32 %v7051_v48, %v6914_v27  ;;  %v6706_v56 = vpop.f32.mrf.mxu0  ;;  %v18984_v27 = vld [vmem:[#allocation18_spill] sm:$0xff] }
 0x6e9   : > { %v6741_v14 = vadd.f32 %v6706_v56, %v6567_v41  ;;  %v6885_v20 = vpop.f32.mrf.mxu1  ;;  %v7282_v56 = vld [vmem:[#allocation3 + $0x78] sm:$0xff] }
 0x6eb   : > { %7391 = vmatmul.bf16.gmra.mxu0 %v17563_v10  ;;  %v6915_v9 = vadd.f32 %v6880_v39, %v6741_v14  ;;  %7570 = vmatmul.bf16.gmra.mxu1 %v17333_v4  ;;  %v6568_v39 = vadd.f32 %v18984_v27, %v17301_v5  ;;  %v17587_v12 = vpop.f32.mrf.mxu3 }
 0x6ec   : > { %7739 = vmatmul.bf16.gmra.mxu2 %v17565_v28 }
 0x6ef   : > { %v7054_v60 = vpop.f32.mrf.mxu2 }
 0x6f0   : > { %v17578_v63 = vadd.f32 %v7054_v60, %v6915_v9  ;;  %v6708_v14 = vpop.f32.mrf.mxu0  ;;  %v7281_v9 = vld [vmem:[#allocation3 + $0x70] sm:$0xff] }
 0x6f1   : > { %v6742_v48 = vadd.f32 %v6708_v14, %v6568_v39  ;;  %v6887_v22 = vpop.f32.mrf.mxu1  ;;  %v7629_v60 = vld [vmem:[#allocation3 + $0x72] sm:$0xff]  ;;  %v17589_v27 = vpack.c.bf16 %v7282_v56, %v7281_v9  ;;  %v7632_v9 = vld [vmem:[#allocation3 + $0x8a] sm:$0xff] }
 0x6f2   : > { %v17591_v39 = vpack.c.bf16 %v7630_v11, %v7629_v60 }
 0x6f3   : > { %v6916_v45 = vadd.f32 %v6882_v47, %v6742_v48  ;;  %v18986_v48 = vld [vmem:[#allocation20_spill] sm:$0xff] }
 0x6f5   : > { %8594 = vmatmul.bf16.vlgmr.msrb.gmra.mxu3 %v17513_v61 }
 0x6f7   : > { %v7056_v41 = vpop.f32.mrf.mxu2 }
 0x6f8   : > { %v17583_v4 = vadd.f32 %v7056_v41, %v6916_v45  ;;  %v6711_v29 = vpop.f32.mrf.mxu0  ;;  %v6570_v45 = vadd.f32 %v18986_v48, %v17327_v44  ;;  %v14408_v41 = vld [vmem:[%s18909_s5 + $0x4d0] sm:$0xff] }
 0x6f9   : > { %v6743_v5 = vadd.f32 %v6711_v29, %v6569_v57  ;;  %v6890_v47 = vpop.f32.mrf.mxu1  ;;  %8069 = vmatpush.bf16.msrb.mxu0 %v14408_v41  ;;  %v17606_v57 = vpop.f32.mrf.mxu3  ;;  %v7284_v44 = vld [vmem:[#allocation3 + $0x88] sm:$0xff] }
 0x6fa   : > { %v7631_v48 = vld [vmem:[#allocation3 + $0x82] sm:$0xff] }
 0x6fb   : > { %7396 = vmatmul.bf16.gmra.mxu0 %v17589_v27  ;;  %v6917_v61 = vadd.f32 %v6885_v20, %v6743_v5  ;;  %7575 = vmatmul.bf16.gmra.mxu1 %v17359_v16  ;;  %v14416_v20 = vld [vmem:[%s18909_s5 + $0x510] sm:$0xff]  ;;  %v6571_v5 = vadd.f32 %v17166_v0, %v17340_v54  ;;  %v6572_v54 = vadd.f32 %v17182_v40, %v17353_v38 }
 0x6fc   : > { %7744 = vmatmul.bf16.gmra.mxu2 %v17591_v39  ;;  %8243 = vmatpush.bf16.msra.mxu1 %v14416_v20 }
 0x6ff   : > { %v7059_v14 = vpop.f32.mrf.mxu2 }
 0x700   : > { %v17596_v59 = vadd.f32 %v7059_v14, %v6917_v61  ;;  %v6713_v56 = vpop.f32.mrf.mxu0  ;;  %v7283_v14 = vld [vmem:[#allocation3 + $0x80] sm:$0xff] }
 0x701   : > { %v6744_v11 = vadd.f32 %v6713_v56, %v6570_v45  ;;  %v6892_v2 = vpop.f32.mrf.mxu1  ;;  %v17613_v41 = vpack.c.bf16 %v7284_v44, %v7283_v14  ;;  %v17615_v56 = vpack.c.bf16 %v7632_v9, %v7631_v48  ;;  %v14407_v9 = vld [vmem:[%s18909_s5 + $0x4c8] sm:$0xff]  ;;  %v6573_v48 = vadd.f32 %v17194_v8, %v17369_v53 }
 0x702   : > { %8070 = vmatpush.bf16.msrb.mxu0 %v14407_v9  ;;  %v7634_v14 = vld [vmem:[#allocation3 + $0x9a] sm:$0xff]  ;;  %v14429_v9 = vld [vmem:[%s18909_s5 + $0x578] sm:$0xff] }
 0x703   : > { %v6918_v16 = vadd.f32 %v6887_v22, %v6744_v11  ;;  %v17620_v11 = vpop.f32.mrf.mxu3  ;;  %8412 = vmatpush.bf16.msrb.mxu2 %v14429_v9 }
 0x705   : > { %8599 = vmatmul.bf16.gmra.mxu3 %v17543_v43 }
 0x707   : > { %v7061_v29 = vpop.f32.mrf.mxu2 }
 0x708   : > { %v17609_v60 = vadd.f32 %v7061_v29, %v6918_v16  ;;  %v6716_v61 = vpop.f32.mrf.mxu0 }
 0x709   : > { %v6745_v45 = vadd.f32 %v6716_v61, %v6571_v5  ;;  %v6895_v22 = vpop.f32.mrf.mxu1  ;;  %v7286_v61 = vld [vmem:[#allocation3 + $0x98] sm:$0xff] }
 0x70b   : > { %7401 = vmatmul.bf16.gmra.mxu0 %v17613_v41  ;;  %v6919_v43 = vadd.f32 %v6890_v47, %v6745_v45  ;;  %7580 = vmatmul.bf16.gmra.mxu1 %v17389_v25  ;;  %v14415_v47 = vld [vmem:[%s18909_s5 + $0x508] sm:$0xff]  ;;  %v17633_v40 = vpop.f32.mrf.mxu3 }
 0x70c   : > { %7749 = vmatmul.bf16.gmra.mxu2 %v17615_v56  ;;  %8244 = vmatpush.bf16.msra.mxu1 %v14415_v47  ;;  %v18987_v47 = vld [vmem:[#allocation21_spill] sm:$0xff] }
 0x70f   : > { %v7064_v20 = vpop.f32.mrf.mxu2 }
 0x710   : > { %v17622_v0 = vadd.f32 %v7064_v20, %v6919_v43  ;;  %v6718_v16 = vpop.f32.mrf.mxu0  ;;  %v7285_v43 = vld [vmem:[#allocation3 + $0x90] sm:$0xff] }
 0x711   : > { %v6746_v29 = vadd.f32 %v6718_v16, %v6572_v54  ;;  %v6897_v44 = vpop.f32.mrf.mxu1  ;;  %v7633_v20 = vld [vmem:[#allocation3 + $0x92] sm:$0xff]  ;;  %v17639_v16 = vpack.c.bf16 %v7286_v61, %v7285_v43 }
 0x713   : > { %v6920_v25 = vadd.f32 %v6892_v2, %v6746_v29  ;;  %v17641_v2 = vpack.c.bf16 %v7634_v14, %v7633_v20  ;;  %v17653_v61 = vpop.f32.mrf.mxu3  ;;  %v7288_v20 = vld [vmem:[#allocation3 + $0xa8] sm:$0xff] }
 0x714   : > { %18988 = vst [vmem:[#allocation15_spill] sm:$0xff] %v17653_v61  ;;  %v7640_v61 = vld [vmem:[#allocation3 + $0xca] sm:$0xff] }
 0x715   : > { %8604 = vmatmul.bf16.gmra.mxu3 %v17565_v28 }
 0x717   : > { %v7066_v5 = vpop.f32.mrf.mxu2 }
 0x718   : > { %v17635_v38 = vadd.f32 %v7066_v5, %v6920_v25  ;;  %v6721_v45 = vpop.f32.mrf.mxu0  ;;  %v6574_v25 = vadd.f32 %v18987_v47, %v17382_v32  ;;  %v7636_v32 = vld [vmem:[#allocation3 + $0xaa] sm:$0xff]  ;;  %v7287_v47 = vld [vmem:[#allocation3 + $0xa0] sm:$0xff] }
 0x719   : > { %v6747_v54 = vadd.f32 %v6721_v45, %v6573_v48  ;;  %v6900_v29 = vpop.f32.mrf.mxu1 }
 0x71b   : > { %7406 = vmatmul.bf16.gmra.mxu0 %v17639_v16  ;;  %v6921_v28 = vadd.f32 %v6895_v22, %v6747_v54  ;;  %7585 = vmatmul.bf16.gmra.mxu1 %v17424_v3  ;;  %v14428_v22 = vld [vmem:[%s18909_s5 + $0x570] sm:$0xff]  ;;  %v14427_v3 = vld [vmem:[%s18909_s5 + $0x568] sm:$0xff] }
 0x71c   : > { %7754 = vmatmul.bf16.gmra.mxu2 %v17641_v2 }
 0x71d   : > { %8413 = vmatpush.bf16.msrb.mxu2 %v14428_v22 }
 0x71f   : > { %v7069_v8 = vpop.f32.mrf.mxu2 }
 0x720   : > { %v17649_v53 = vadd.f32 %v7069_v8, %v6921_v28  ;;  %v6723_v5 = vpop.f32.mrf.mxu0  ;;  %v18989_v28 = vld [vmem:[#allocation22_spill] sm:$0xff] }
 0x721   : > { %v6748_v14 = vadd.f32 %v6723_v5, %v6574_v25  ;;  %v6902_v48 = vpop.f32.mrf.mxu1  ;;  %v6575_v9 = vadd.f32 %v18989_v28, %v17407_v37  ;;  %8414 = vmatpush.bf16.msrb.mxu2 %v14427_v3  ;;  %v7635_v25 = vld [vmem:[#allocation3 + $0xa2] sm:$0xff]  ;;  %v14414_v37 = vld [vmem:[%s18909_s5 + $0x500] sm:$0xff]  ;;  %v17679_v3 = vpop.f32.mrf.mxu3 }
 0x722   : > { %18990 = vst [vmem:[#allocation16_spill] sm:$0xff] %v17679_v3  ;;  %8245 = vmatpush.bf16.msra.mxu1 %v14414_v37  ;;  %v7465_v3 = vld [vmem:[#allocation3 + $0xc1] sm:$0xff] }
 0x723   : > { %v6922_v45 = vadd.f32 %v6897_v44, %v6748_v14  ;;  %v14406_v44 = vld [vmem:[%s18909_s5 + $0x4c0] sm:$0xff]  ;;  %v17669_v14 = vpack.c.bf16 %v7288_v20, %v7287_v47  ;;  %v14425_v20 = vld [vmem:[%s18909_s5 + $0x558] sm:$0xff] }
 0x724   : > { %8071 = vmatpush.bf16.msrb.mxu0 %v14406_v44 }
 0x725   : > { %8609 = vmatmul.bf16.gmra.mxu3 %v17591_v39  ;;  %v17671_v39 = vpack.c.bf16 %v7636_v32, %v7635_v25 }
 0x727   : > { %v7071_v43 = vpop.f32.mrf.mxu2 }
 0x728   : > { %v17662_v54 = vadd.f32 %v7071_v43, %v6922_v45  ;;  %v6726_v8 = vpop.f32.mrf.mxu0  ;;  %v14426_v45 = vld [vmem:[%s18909_s5 + $0x560] sm:$0xff] }
 0x729   : > { %v6749_v5 = vadd.f32 %v6726_v8, %v6575_v9  ;;  %v7551_v22 = vpop.f32.mrf.mxu1  ;;  %8415 = vmatpush.bf16.msrb.mxu2 %v14426_v45  ;;  %v18991_v9 = vld [vmem:[#allocation23_spill] sm:$0xff]  ;;  %v17697_v45 = vpop.f32.mrf.mxu3 }
 0x72a   : > { %v6576_v44 = vadd.f32 %v18991_v9, %v17420_v13  ;;  %18992 = vst [vmem:[#allocation17_spill] sm:$0xff] %v17697_v45  ;;  %v7290_v13 = vld [vmem:[#allocation3 + $0xb8] sm:$0xff]  ;;  %v7466_v9 = vld [vmem:[#allocation3 + $0xc9] sm:$0xff] }
 0x72b   : > { %7411 = vmatmul.bf16.gmra.mxu0 %v17669_v14  ;;  %v6923_v43 = vadd.f32 %v6900_v29, %v6749_v5  ;;  %7590 = vmatmul.bf16.gmra.mxu1 %v17453_v17  ;;  %v14424_v17 = vld [vmem:[%s18909_s5 + $0x550] sm:$0xff]  ;;  %v14423_v5 = vld [vmem:[%s18909_s5 + $0x548] sm:$0xff]  ;;  %v17709_v45 = vpack.c.bf16 %v7466_v9, %v7465_v3 }
 0x72c   : > { %7759 = vmatmul.bf16.gmra.mxu2 %v17671_v39 }
 0x72d   : > { %8416 = vmatpush.bf16.msrb.mxu2 %v14425_v20  ;;  %v18993_v20 = vld [vmem:[#allocation7_spill] sm:$0xff] }
 0x72f   : > { %v7074_v32 = vpop.f32.mrf.mxu2 }
 0x730   : > { %v17687_v28 = vadd.f32 %v7074_v32, %v6923_v43  ;;  %v6728_v8 = vpop.f32.mrf.mxu0  ;;  %v7253_v32 = vadd.f32 %v18993_v20, %v17442_v42 }
 0x731   : > { %v6750_v47 = vadd.f32 %v6728_v8, %v6576_v44  ;;  %v7553_v25 = vpop.f32.mrf.mxu1  ;;  %8417 = vmatpush.bf16.msrb.mxu2 %v14424_v17  ;;  %v7289_v8 = vld [vmem:[#allocation3 + $0xb0] sm:$0xff] }
 0x733   : > { %v6924_v29 = vadd.f32 %v6902_v48, %v6750_v47  ;;  %v17704_v47 = vpack.c.bf16 %v7290_v13, %v7289_v8 }
 0x735   : > { %8614 = vmatmul.bf16.gmra.mxu3 %v17615_v56  ;;  %8418 = vmatpush.bf16.msrb.mxu2 %v14423_v5  ;;  %v14422_v56 = vld [vmem:[%s18909_s5 + $0x540] sm:$0xff]  ;;  %v14453_v5 = vld [vmem:[%s18909_s5 + $0x638] sm:$0xff] }
 0x736   : > { %8934 = vmatpush.bf16.msrb.mxu1 %v14453_v5 }
 0x737   : > { %v7076_v37 = vpop.f32.mrf.mxu2 }
 0x738   : > { %v17700_v43 = vadd.f32 %v7076_v37, %v6924_v29  ;;  %v7377_v44 = vpop.f32.mrf.mxu0  ;;  %v14445_v29 = vld [vmem:[%s18909_s5 + $0x5f8] sm:$0xff]  ;;  %v17720_v37 = vpop.f32.mrf.mxu3 }
 0x739   : > { %v7427_v48 = vadd.f32 %v7377_v44, %v7253_v32  ;;  %v7556_v17 = vpop.f32.mrf.mxu1  ;;  %8419 = vmatpush.bf16.msrb.mxu2 %v14422_v56  ;;  %8760 = vmatpush.bf16.msra.mxu0 %v14445_v29  ;;  %18994 = vst [vmem:[#allocation18_spill] sm:$0xff] %v17720_v37  ;;  %v7255_v29 = vadd.f32 %v17279_v62, %v17460_v6  ;;  %v18997_v6 = vld [vmem:[#allocation6_spill] sm:$0xff] }
 0x73b   : > { %7416 = vmatmul.bf16.gmra.mxu0 %v17704_v47  ;;  %v7601_v42 = vadd.f32 %v7551_v22, %v7427_v48  ;;  %7595 = vmatmul.bf16.gmra.mxu1 %v17709_v45  ;;  %v7292_v48 = vld [vmem:[#allocation3 + $0xc8] sm:$0xff] }
 0x73c   : > { %7764 = vmatmul.bf16.gmra.mxu2 %v17429_v35  ;;  %v18995_v35 = vld [vmem:[#allocation8_spill] sm:$0xff] }
 0x73d   : > { %v7254_v22 = vadd.f32 %v18995_v35, %v17447_v52 }
 0x73f   : > { %v7725_v3 = vpop.f32.mrf.mxu2 }
 0x740   : > { %v17722_v13 = vadd.f32 %v7725_v3, %v7601_v42  ;;  %v7379_v20 = vpop.f32.mrf.mxu0  ;;  %v7291_v42 = vld [vmem:[#allocation3 + $0xc0] sm:$0xff]  ;;  %v17731_v37 = vpop.f32.mrf.mxu3 }
 0x741   : > { %v7428_v32 = vadd.f32 %v7379_v20, %v7254_v22  ;;  %v7558_v9 = vpop.f32.mrf.mxu1  ;;  %v7639_v3 = vld [vmem:[#allocation3 + $0xc2] sm:$0xff]  ;;  %18996 = vst [vmem:[#allocation19_spill] sm:$0xff] %v17731_v37  ;;  %v17733_v35 = vpack.c.bf16 %v7292_v48, %v7291_v42 }
 0x742   : > { %v17735_v22 = vpack.c.bf16 %v7640_v61, %v7639_v3  ;;  %v8318_v42 = vld [vmem:[#allocation3 + $0x49] sm:$0xff] }
 0x743   : > { %v7602_v44 = vadd.f32 %v7553_v25, %v7428_v32  ;;  %v7256_v32 = vadd.f32 %v18997_v6, %v17473_v58  ;;  %v7970_v58 = vld [vmem:[#allocation3 + $0x3c] sm:$0xff] }
 0x744   : > { %v8317_v6 = vld [vmem:[#allocation3 + $0x41] sm:$0xff] }
 0x745   : > { %8619 = vmatmul.bf16.gmra.mxu3 %v17641_v2 }
 0x747   : > { %v7727_v8 = vpop.f32.mrf.mxu2 }
 0x748   : > { %v17727_v56 = vadd.f32 %v7727_v8, %v7602_v44  ;;  %v7382_v5 = vpop.f32.mrf.mxu0  ;;  %v14444_v44 = vld [vmem:[%s18909_s5 + $0x5f0] sm:$0xff] }
 0x749   : > { %v7429_v52 = vadd.f32 %v7382_v5, %v7255_v29  ;;  %v7561_v25 = vpop.f32.mrf.mxu1  ;;  %8761 = vmatpush.bf16.msra.mxu0 %v14444_v44  ;;  %v17750_v29 = vpop.f32.mrf.mxu3 }
 0x74b   : > { %7421 = vmatmul.bf16.gmra.mxu0 %v17733_v35  ;;  %v7603_v2 = vadd.f32 %v7556_v17, %v7429_v52  ;;  %8246 = vmatmul.bf16.vlgmr.msra.gmra.mxu1 %v17511_v24  ;;  %v14452_v17 = vld [vmem:[%s18909_s5 + $0x630] sm:$0xff]  ;;  %v7257_v52 = vadd.f32 %v17305_v50, %v17486_v49  ;;  %v7258_v50 = vadd.f32 %v17321_v31, %v17504_v23  ;;  %v8320_v31 = vld [vmem:[#allocation3 + $0x59] sm:$0xff] }
 0x74c   : > { %7769 = vmatmul.bf16.gmra.mxu2 %v17735_v22  ;;  %8935 = vmatpush.bf16.msrb.mxu1 %v14452_v17 }
 0x74f   : > { %v7730_v20 = vpop.f32.mrf.mxu2 }
 0x750   : > { %v17740_v62 = vadd.f32 %v7730_v20, %v7603_v2  ;;  %v7384_v61 = vpop.f32.mrf.mxu0  ;;  %v7969_v20 = vld [vmem:[#allocation3 + $0x34] sm:$0xff] }
 0x751   : > { %v7430_v8 = vadd.f32 %v7384_v61, %v7256_v32  ;;  %v7563_v48 = vpop.f32.mrf.mxu1  ;;  %v7989_v44 = vpack.c.bf16 %v7970_v58, %v7969_v20  ;;  %v8337_v61 = vpack.c.bf16 %v8318_v42, %v8317_v6  ;;  %v14443_v58 = vld [vmem:[%s18909_s5 + $0x5e8] sm:$0xff]  ;;  %v8505_v42 = vld [vmem:[#allocation3 + $0xb2] sm:$0xff] }
 0x752   : > { %8762 = vmatpush.bf16.msra.mxu0 %v14443_v58  ;;  %v7972_v6 = vld [vmem:[#allocation3 + $0x4c] sm:$0xff] }
 0x753   : > { %v7604_v24 = vadd.f32 %v7558_v9, %v7430_v8 }
 0x755   : > { %8624 = vmatmul.bf16.gmra.mxu3 %v17671_v39  ;;  %v17758_v39 = vpop.f32.mrf.mxu3 }
 0x757   : > { %v7732_v5 = vpop.f32.mrf.mxu2 }
 0x758   : > { %v17753_v3 = vadd.f32 %v7732_v5, %v7604_v24  ;;  %v7387_v2 = vpop.f32.mrf.mxu0  ;;  %v8506_v24 = vld [vmem:[#allocation3 + $0xba] sm:$0xff] }
 0x759   : > { %v7431_v32 = vadd.f32 %v7387_v2, %v7257_v52  ;;  %v7566_v37 = vpop.f32.mrf.mxu1 }
 0x75b   : > { %8072 = vmatmul.bf16.vlgmr.msrb.gmra.mxu0 %v7989_v44  ;;  %v7605_v9 = vadd.f32 %v7561_v25, %v7431_v32  ;;  %8251 = vmatmul.bf16.gmra.mxu1 %v17541_v33  ;;  %v8518_v25 = vpack.c.bf16 %v8506_v24, %v8505_v42  ;;  %v14451_v33 = vld [vmem:[%s18909_s5 + $0x628] sm:$0xff] }
 0x75c   : > { %8420 = vmatmul.bf16.vlgmr.msrb.gmra.mxu2 %v8337_v61  ;;  %v18998_v44 = vld [vmem:[#allocation9_spill] sm:$0xff]  ;;  %8936 = vmatpush.bf16.msrb.mxu1 %v14451_v33 }
 0x75d   : > { %v17770_v23 = vpop.f32.mrf.mxu3  ;;  %v7259_v61 = vadd.f32 %v18998_v44, %v17521_v34  ;;  %v18999_v34 = vld [vmem:[#allocation10_spill] sm:$0xff] }
 0x75f   : > { %v7735_v8 = vpop.f32.mrf.mxu2 }
 0x760   : > { %v17760_v17 = vadd.f32 %v7735_v8, %v7605_v9  ;;  %v7389_v49 = vpop.f32.mrf.mxu0  ;;  %v7971_v8 = vld [vmem:[#allocation3 + $0x44] sm:$0xff] }
 0x761   : > { %v7432_v5 = vadd.f32 %v7389_v49, %v7258_v50  ;;  %v7568_v52 = vpop.f32.mrf.mxu1  ;;  %v17776_v49 = vpack.c.bf16 %v7972_v6, %v7971_v8  ;;  %v8322_v8 = vld [vmem:[#allocation3 + $0x69] sm:$0xff] }
 0x763   : > { %v7606_v2 = vadd.f32 %v7563_v48, %v7432_v5  ;;  %v8319_v48 = vld [vmem:[#allocation3 + $0x51] sm:$0xff] }
 0x764   : > { %v8338_v24 = vpack.c.bf16 %v8320_v31, %v8319_v48 }
 0x765   : > { %8629 = vmatmul.bf16.gmra.mxu3 %v8518_v25 }
 0x767   : > { %v7737_v20 = vpop.f32.mrf.mxu2 }
 0x768   : > { %v17772_v32 = vadd.f32 %v7737_v20, %v7606_v2  ;;  %v7392_v9 = vpop.f32.mrf.mxu0  ;;  %v7260_v2 = vadd.f32 %v18999_v34, %v17534_v21  ;;  %v17784_v20 = vpop.f32.mrf.mxu3  ;;  %v14442_v21 = vld [vmem:[%s18909_s5 + $0x5e0] sm:$0xff] }
 0x769   : > { %v7433_v50 = vadd.f32 %v7392_v9, %v7259_v61  ;;  %v7571_v5 = vpop.f32.mrf.mxu1  ;;  %v7974_v9 = vld [vmem:[#allocation3 + $0x5c] sm:$0xff]  ;;  %8763 = vmatpush.bf16.msra.mxu0 %v14442_v21 }
 0x76a   : > { %v14450_v34 = vld [vmem:[%s18909_s5 + $0x620] sm:$0xff] }
 0x76b   : > { %8077 = vmatmul.bf16.gmra.mxu0 %v17776_v49  ;;  %v7607_v58 = vadd.f32 %v7566_v37, %v7433_v50  ;;  %8256 = vmatmul.bf16.gmra.mxu1 %v17563_v10  ;;  %v7261_v10 = vadd.f32 %v17357_v36, %v17553_v51  ;;  %v7973_v50 = vld [vmem:[#allocation3 + $0x54] sm:$0xff] }
 0x76c   : > { %8425 = vmatmul.bf16.gmra.mxu2 %v8338_v24  ;;  %v8321_v24 = vld [vmem:[#allocation3 + $0x61] sm:$0xff]  ;;  %8937 = vmatpush.bf16.msrb.mxu1 %v14450_v34 }
 0x76f   : > { %v7740_v42 = vpop.f32.mrf.mxu2 }
 0x770   : > { %v17780_v25 = vadd.f32 %v7740_v42, %v7607_v58  ;;  %v7394_v33 = vpop.f32.mrf.mxu0  ;;  %v17794_v42 = vpack.c.bf16 %v7974_v9, %v7973_v50  ;;  %v8510_v9 = vld [vmem:[#allocation3 + $0xda] sm:$0xff] }
 0x771   : > { %v7434_v44 = vadd.f32 %v7394_v33, %v7260_v2  ;;  %v7573_v6 = vpop.f32.mrf.mxu1  ;;  %v17799_v2 = vpop.f32.mrf.mxu3 }
 0x773   : > { %v7608_v61 = vadd.f32 %v7568_v52, %v7434_v44  ;;  %v8339_v52 = vpack.c.bf16 %v8322_v8, %v8321_v24  ;;  %v7262_v44 = vadd.f32 %v17373_v30, %v17559_v26  ;;  %v7976_v24 = vld [vmem:[#allocation3 + $0x6c] sm:$0xff]  ;;  %v7975_v30 = vld [vmem:[#allocation3 + $0x64] sm:$0xff] }
 0x774   : > { %v8323_v26 = vld [vmem:[#allocation3 + $0x71] sm:$0xff] }
 0x775   : > { %8634 = vmatmul.bf16.gmra.mxu3 %v17735_v22 }
 0x777   : > { %v7742_v31 = vpop.f32.mrf.mxu2 }
 0x778   : > { %v17787_v37 = vadd.f32 %v7742_v31, %v7608_v61  ;;  %v7397_v48 = vpop.f32.mrf.mxu0  ;;  %v8509_v31 = vld [vmem:[#allocation3 + $0xd2] sm:$0xff] }
 0x779   : > { %v7435_v58 = vadd.f32 %v7397_v48, %v7261_v10  ;;  %v7576_v22 = vpop.f32.mrf.mxu1  ;;  %v8520_v21 = vpack.c.bf16 %v8510_v9, %v8509_v31  ;;  %v17807_v50 = vpop.f32.mrf.mxu3  ;;  %v14441_v31 = vld [vmem:[%s18909_s5 + $0x5d8] sm:$0xff] }
 0x77a   : > { %8764 = vmatpush.bf16.msra.mxu0 %v14441_v31  ;;  %v8325_v31 = vld [vmem:[#allocation3 + $0x81] sm:$0xff] }
 0x77b   : > { %8082 = vmatmul.bf16.gmra.mxu0 %v17794_v42  ;;  %v7609_v36 = vadd.f32 %v7571_v5, %v7435_v58  ;;  %8261 = vmatmul.bf16.gmra.mxu1 %v17589_v27  ;;  %v8324_v27 = vld [vmem:[#allocation3 + $0x79] sm:$0xff] }
 0x77c   : > { %8430 = vmatmul.bf16.gmra.mxu2 %v8339_v52  ;;  %v7263_v52 = vadd.f32 %v17399_v7, %v17578_v63  ;;  %v14449_v7 = vld [vmem:[%s18909_s5 + $0x618] sm:$0xff] }
 0x77d   : > { %8938 = vmatpush.bf16.msrb.mxu1 %v14449_v7 }
 0x77f   : > { %v7745_v51 = vpop.f32.mrf.mxu2 }
 0x780   : > { %v17803_v33 = vadd.f32 %v7745_v51, %v7609_v36  ;;  %v7399_v61 = vpop.f32.mrf.mxu0  ;;  %v17813_v51 = vpack.c.bf16 %v7976_v24, %v7975_v30 }
 0x781   : > { %v7436_v8 = vadd.f32 %v7399_v61, %v7262_v44  ;;  %v7578_v10 = vpop.f32.mrf.mxu1  ;;  %v8340_v44 = vpack.c.bf16 %v8324_v27, %v8323_v26  ;;  %v19001_v26 = vld [vmem:[#allocation12_spill] sm:$0xff] }
 0x783   : > { %v7610_v48 = vadd.f32 %v7573_v6, %v7436_v8  ;;  %v19000_v8 = vld [vmem:[#allocation11_spill] sm:$0xff] }
 0x785   : > { %8639 = vmatmul.bf16.gmra.mxu3 %v8520_v21  ;;  %v7264_v21 = vadd.f32 %v19000_v8, %v17583_v4 }
 0x787   : > { %v7747_v5 = vpop.f32.mrf.mxu2 }
 0x788   : > { %v17809_v58 = vadd.f32 %v7747_v5, %v7610_v48  ;;  %v7402_v34 = vpop.f32.mrf.mxu0 }
 0x789   : > { %v7437_v36 = vadd.f32 %v7402_v34, %v7263_v52  ;;  %v7581_v61 = vpop.f32.mrf.mxu1  ;;  %v7978_v52 = vld [vmem:[#allocation3 + $0x7c] sm:$0xff]  ;;  %v8326_v34 = vld [vmem:[#allocation3 + $0x89] sm:$0xff] }
 0x78b   : > { %8087 = vmatmul.bf16.gmra.mxu0 %v17813_v51  ;;  %v7611_v6 = vadd.f32 %v7576_v22, %v7437_v36  ;;  %8266 = vmatmul.bf16.gmra.mxu1 %v17613_v41  ;;  %v7265_v41 = vadd.f32 %v19001_v26, %v17596_v59  ;;  %v7266_v59 = vadd.f32 %v17451_v19, %v17609_v60  ;;  %v8328_v26 = vld [vmem:[#allocation3 + $0x99] sm:$0xff] }
 0x78c   : > { %8435 = vmatmul.bf16.gmra.mxu2 %v8340_v44  ;;  %v7977_v44 = vld [vmem:[#allocation3 + $0x74] sm:$0xff]  ;;  %v7267_v19 = vadd.f32 %v17470_v15, %v17622_v0  ;;  %v7268_v15 = vadd.f32 %v17484_v55, %v17635_v38  ;;  %v7269_v55 = vadd.f32 %v17502_v18, %v17649_v53  ;;  %v7270_v18 = vadd.f32 %v17528_v46, %v17662_v54 }
 0x78d   : > { %v17831_v7 = vpack.c.bf16 %v7978_v52, %v7977_v44  ;;  %v8327_v44 = vld [vmem:[#allocation3 + $0x91] sm:$0xff] }
 0x78f   : > { %v7750_v63 = vpop.f32.mrf.mxu2 }
 0x790   : > { %v17823_v9 = vadd.f32 %v7750_v63, %v7611_v6  ;;  %v7404_v48 = vpop.f32.mrf.mxu0  ;;  %v8341_v63 = vpack.c.bf16 %v8326_v34, %v8325_v31  ;;  %v7980_v34 = vld [vmem:[#allocation3 + $0x8c] sm:$0xff] }
 0x791   : > { %v7438_v22 = vadd.f32 %v7404_v48, %v7264_v21  ;;  %v7583_v5 = vpop.f32.mrf.mxu1  ;;  %v14440_v48 = vld [vmem:[%s18909_s5 + $0x5d0] sm:$0xff] }
 0x792   : > { %8765 = vmatpush.bf16.msra.mxu0 %v14440_v48 }
 0x793   : > { %v7612_v24 = vadd.f32 %v7578_v10, %v7438_v22 }
 0x797   : > { %v7752_v27 = vpop.f32.mrf.mxu2 }
 0x798   : > { %v17827_v30 = vadd.f32 %v7752_v27, %v7612_v24  ;;  %v7407_v36 = vpop.f32.mrf.mxu0 }
 0x799   : > { %v7439_v6 = vadd.f32 %v7407_v36, %v7265_v41  ;;  %v7586_v4 = vpop.f32.mrf.mxu1  ;;  %v7979_v36 = vld [vmem:[#allocation3 + $0x84] sm:$0xff] }
 0x79b   : > { %8092 = vmatmul.bf16.gmra.mxu0 %v17831_v7  ;;  %v7613_v10 = vadd.f32 %v7581_v61, %v7439_v6  ;;  %8271 = vmatmul.bf16.gmra.mxu1 %v17639_v16  ;;  %v14448_v61 = vld [vmem:[%s18909_s5 + $0x610] sm:$0xff]  ;;  %v17849_v6 = vpack.c.bf16 %v7980_v34, %v7979_v36 }
 0x79c   : > { %8440 = vmatmul.bf16.gmra.mxu2 %v8341_v63  ;;  %8939 = vmatpush.bf16.msrb.mxu1 %v14448_v61  ;;  %v8342_v63 = vpack.c.bf16 %v8328_v26, %v8327_v44  ;;  %v14447_v61 = vld [vmem:[%s18909_s5 + $0x608] sm:$0xff]  ;;  %v7981_v26 = vld [vmem:[#allocation3 + $0x94] sm:$0xff] }
 0x79f   : > { %v7755_v8 = vpop.f32.mrf.mxu2 }
 0x7a0   : > { %v17835_v21 = vadd.f32 %v7755_v8, %v7613_v10  ;;  %v7409_v22 = vpop.f32.mrf.mxu0  ;;  %8940 = vmatpush.bf16.msrb.mxu1 %v14447_v61  ;;  %v8332_v61 = vld [vmem:[#allocation3 + $0xb9] sm:$0xff] }
 0x7a1   : > { %v7440_v24 = vadd.f32 %v7409_v22, %v7266_v59  ;;  %v7588_v27 = vpop.f32.mrf.mxu1 }
 0x7a3   : > { %v7614_v52 = vadd.f32 %v7583_v5, %v7440_v24  ;;  %v14439_v24 = vld [vmem:[%s18909_s5 + $0x5c8] sm:$0xff] }
 0x7a4   : > { %8766 = vmatpush.bf16.msra.mxu0 %v14439_v24  ;;  %v7984_v24 = vld [vmem:[#allocation3 + $0xac] sm:$0xff] }
 0x7a7   : > { %v7757_v16 = vpop.f32.mrf.mxu2 }
 0x7a8   : > { %v17845_v41 = vadd.f32 %v7757_v16, %v7614_v52  ;;  %v7412_v60 = vpop.f32.mrf.mxu0  ;;  %v7982_v52 = vld [vmem:[#allocation3 + $0x9c] sm:$0xff]  ;;  %v8330_v16 = vld [vmem:[#allocation3 + $0xa9] sm:$0xff] }
 0x7a9   : > { %v7441_v31 = vadd.f32 %v7412_v60, %v7267_v19  ;;  %v7591_v10 = vpop.f32.mrf.mxu1  ;;  %v8329_v19 = vld [vmem:[#allocation3 + $0xa1] sm:$0xff]  ;;  %v17867_v36 = vpack.c.bf16 %v7982_v52, %v7981_v26 }
 0x7aa   : > { %v8343_v44 = vpack.c.bf16 %v8330_v16, %v8329_v19  ;;  %v7983_v52 = vld [vmem:[#allocation3 + $0xa4] sm:$0xff]  ;;  %v8331_v16 = vld [vmem:[#allocation3 + $0xb1] sm:$0xff] }
 0x7ab   : > { %8097 = vmatmul.bf16.gmra.mxu0 %v17849_v6  ;;  %v7615_v5 = vadd.f32 %v7586_v4, %v7441_v31  ;;  %8276 = vmatmul.bf16.gmra.mxu1 %v17669_v14  ;;  %v17884_v54 = vpack.c.bf16 %v7984_v24, %v7983_v52  ;;  %v19003_v24 = vld [vmem:[#allocation14_spill] sm:$0xff]  ;;  %v8161_v52 = vld [vmem:[#allocation3 + $0xd0] sm:$0xff] }
 0x7ac   : > { %8445 = vmatmul.bf16.gmra.mxu2 %v8342_v63 }
 0x7af   : > { %v7760_v8 = vpop.f32.mrf.mxu2 }
 0x7b0   : > { %v17853_v59 = vadd.f32 %v7760_v8, %v7615_v5  ;;  %v7414_v0 = vpop.f32.mrf.mxu0 }
 0x7b1   : > { %v7442_v48 = vadd.f32 %v7414_v0, %v7268_v15  ;;  %v7593_v22 = vpop.f32.mrf.mxu1 }
 0x7b3   : > { %v7616_v4 = vadd.f32 %v7588_v27, %v7442_v48 }
 0x7b7   : > { %v7762_v14 = vpop.f32.mrf.mxu2 }
 0x7b8   : > { %v17863_v34 = vadd.f32 %v7762_v14, %v7616_v4  ;;  %v7417_v38 = vpop.f32.mrf.mxu0  ;;  %v19002_v4 = vld [vmem:[#allocation13_spill] sm:$0xff] }
 0x7b9   : > { %v7443_v60 = vadd.f32 %v7417_v38, %v7269_v55  ;;  %v7596_v31 = vpop.f32.mrf.mxu1  ;;  %v8344_v55 = vpack.c.bf16 %v8332_v61, %v8331_v16  ;;  %v14469_v38 = vld [vmem:[%s18910_s6 + $0x78] sm:$0xff]  ;;  %v7949_v61 = vadd.f32 %v19003_v24, %v17722_v13  ;;  %v7950_v13 = vadd.f32 %v17587_v12, %v17727_v56 }
 0x7ba   : > { %9558 = vmatpush.bf16.msra.mxu2 %v14469_v38  ;;  %v7952_v56 = vadd.f32 %v17620_v11, %v17753_v3  ;;  %v17932_v11 = vpop.f32.mrf.mxu3 }
 0x7bb   : > { %8102 = vmatmul.bf16.gmra.mxu0 %v17867_v36  ;;  %v7617_v27 = vadd.f32 %v7591_v10, %v7443_v60  ;;  %8281 = vmatmul.bf16.gmra.mxu1 %v17704_v47  ;;  %v7271_v10 = vadd.f32 %v19002_v4, %v17687_v28  ;;  %v14438_v47 = vld [vmem:[%s18909_s5 + $0x5c0] sm:$0xff] }
 0x7bc   : > { %8450 = vmatmul.bf16.gmra.mxu2 %v8343_v44  ;;  %8767 = vmatpush.bf16.msra.mxu0 %v14438_v47  ;;  %v14446_v28 = vld [vmem:[%s18909_s5 + $0x600] sm:$0xff]  ;;  %v7272_v44 = vadd.f32 %v17557_v1, %v17700_v43  ;;  %v14468_v43 = vld [vmem:[%s18910_s6 + $0x70] sm:$0xff] }
 0x7bd   : > { %8941 = vmatpush.bf16.msrb.mxu1 %v14446_v28  ;;  %v7988_v28 = vld [vmem:[#allocation3 + $0xcc] sm:$0xff] }
 0x7be   : > { %9559 = vmatpush.bf16.msra.mxu2 %v14468_v43  ;;  %v19004_v43 = vld [vmem:[#allocation15_spill] sm:$0xff] }
 0x7bf   : > { %v7765_v63 = vpop.f32.mrf.mxu2 }
 0x7c0   : > { %v17871_v5 = vadd.f32 %v7765_v63, %v7617_v27  ;;  %v7419_v53 = vpop.f32.mrf.mxu0 }
 0x7c1   : > { %v7444_v8 = vadd.f32 %v7419_v53, %v7270_v18  ;;  %v7598_v15 = vpop.f32.mrf.mxu1 }
 0x7c3   : > { %v17875_v0 = vadd.f32 %v7593_v22, %v7444_v8  ;;  %v7986_v8 = vld [vmem:[#allocation3 + $0xbc] sm:$0xff] }
 0x7c7   : > { %v17877_v48 = vpop.f32.mrf.mxu2 }
 0x7c8   : > { %v7422_v14 = vpop.f32.mrf.mxu0 }
 0x7c9   : > { %v7445_v46 = vadd.f32 %v7422_v14, %v7271_v10  ;;  %v8247_v22 = vpop.f32.mrf.mxu1 }
 0x7cb   : > { %8107 = vmatmul.bf16.gmra.mxu0 %v17884_v54  ;;  %v7619_v26 = vadd.f32 %v7596_v31, %v7445_v46  ;;  %8286 = vmatmul.bf16.gmra.mxu1 %v17733_v35  ;;  %v8162_v31 = vld [vmem:[#allocation3 + $0xd8] sm:$0xff] }
 0x7cc   : > { %8455 = vmatmul.bf16.gmra.mxu2 %v8344_v55  ;;  %v7985_v35 = vld [vmem:[#allocation3 + $0xb4] sm:$0xff]  ;;  %v8172_v16 = vpack.c.bf16 %v8162_v31, %v8161_v52 }
 0x7cd   : > { %v17902_v47 = vpack.c.bf16 %v7986_v8, %v7985_v35  ;;  %v7953_v35 = vadd.f32 %v17633_v40, %v17760_v17  ;;  %v14466_v40 = vld [vmem:[%s18910_s6 + $0x60] sm:$0xff] }
 0x7cf   : > { %v7770_v19 = vpop.f32.mrf.mxu2 }
 0x7d0   : > { %v17894_v60 = vadd.f32 %v7770_v19, %v7619_v26  ;;  %v7424_v27 = vpop.f32.mrf.mxu0  ;;  %v8335_v26 = vld [vmem:[#allocation3 + $0xd1] sm:$0xff]  ;;  %v8336_v19 = vld [vmem:[#allocation3 + $0xd9] sm:$0xff] }
 0x7d1   : > { %v7446_v63 = vadd.f32 %v7424_v27, %v7272_v44  ;;  %v8249_v18 = vpop.f32.mrf.mxu1  ;;  %v7987_v44 = vld [vmem:[#allocation3 + $0xc4] sm:$0xff]  ;;  %v8346_v8 = vpack.c.bf16 %v8336_v19, %v8335_v26  ;;  %v8668_v26 = vld [vmem:[#allocation3 + $0x5b] sm:$0xff] }
 0x7d2   : > { %v19005_v19 = vld [vmem:[#allocation16_spill] sm:$0xff] }
 0x7d3   : > { %v17898_v53 = vadd.f32 %v7598_v15, %v7446_v63  ;;  %v17917_v63 = vpack.c.bf16 %v7988_v28, %v7987_v44  ;;  %v17944_v28 = vpop.f32.mrf.mxu3 }
 0x7d8   : > { %v8073_v4 = vpop.f32.mrf.mxu0 }
 0x7d9   : > { %v8123_v10 = vadd.f32 %v8073_v4, %v7949_v61  ;;  %v8252_v14 = vpop.f32.mrf.mxu1  ;;  %v8666_v4 = vld [vmem:[#allocation3 + $0x4b] sm:$0xff] }
 0x7db   : > { %8112 = vmatmul.bf16.gmra.mxu0 %v17902_v47  ;;  %v17906_v1 = vadd.f32 %v8247_v22, %v8123_v10  ;;  %8291 = vmatmul.bf16.gmra.mxu1 %v8172_v16 }
 0x7dc   : > { %8460 = vmatmul.bf16.gmra.mxu2 %v17709_v45  ;;  %v7951_v45 = vadd.f32 %v17606_v57, %v17740_v62  ;;  %v14467_v62 = vld [vmem:[%s18910_s6 + $0x68] sm:$0xff] }
 0x7dd   : > { %9560 = vmatpush.bf16.msra.mxu2 %v14467_v62 }
 0x7e0   : > { %v8075_v15 = vpop.f32.mrf.mxu0 }
 0x7e1   : > { %v8124_v46 = vadd.f32 %v8075_v15, %v7950_v13  ;;  %v8254_v55 = vpop.f32.mrf.mxu1  ;;  %v7954_v13 = vadd.f32 %v19004_v43, %v17772_v32  ;;  %9561 = vmatpush.bf16.msra.mxu2 %v14466_v40 }
 0x7e3   : > { %v17913_v38 = vadd.f32 %v8249_v18, %v8124_v46 }
 0x7e8   : > { %v8078_v22 = vpop.f32.mrf.mxu0 }
 0x7e9   : > { %v8125_v27 = vadd.f32 %v8078_v22, %v7951_v45  ;;  %v8257_v24 = vpop.f32.mrf.mxu1  ;;  %v7955_v45 = vadd.f32 %v19005_v19, %v17780_v25  ;;  %v8667_v22 = vld [vmem:[#allocation3 + $0x53] sm:$0xff]  ;;  %v8670_v25 = vld [vmem:[#allocation3 + $0x6b] sm:$0xff] }
 0x7ea   : > { %v8686_v32 = vpack.c.bf16 %v8668_v26, %v8667_v22  ;;  %v8672_v22 = vld [vmem:[#allocation3 + $0x7b] sm:$0xff] }
 0x7eb   : > { %8117 = vmatmul.bf16.gmra.mxu0 %v17917_v63  ;;  %v17920_v12 = vadd.f32 %v8252_v14, %v8125_v27  ;;  %8942 = vmatmul.bf16.vlgmr.msrb.gmra.mxu1 %v17776_v49  ;;  %v8665_v14 = vld [vmem:[#allocation3 + $0x43] sm:$0xff] }
 0x7ec   : > { %8465 = vmatmul.bf16.gmra.mxu2 %v8346_v8  ;;  %v8685_v52 = vpack.c.bf16 %v8666_v4, %v8665_v14 }
 0x7f0   : > { %v8080_v18 = vpop.f32.mrf.mxu0 }
 0x7f1   : > { %v8126_v61 = vadd.f32 %v8080_v18, %v7952_v56  ;;  %v8259_v57 = vpop.f32.mrf.mxu1  ;;  %v19006_v56 = vld [vmem:[#allocation17_spill] sm:$0xff] }
 0x7f2   : > { %v7956_v18 = vadd.f32 %v19006_v56, %v17787_v37  ;;  %v14465_v37 = vld [vmem:[%s18910_s6 + $0x58] sm:$0xff] }
 0x7f3   : > { %v17928_v31 = vadd.f32 %v8254_v55, %v8126_v61  ;;  %9562 = vmatpush.bf16.msra.mxu2 %v14465_v37 }
 0x7f8   : > { %v8083_v10 = vpop.f32.mrf.mxu0 }
 0x7f9   : > { %v8127_v49 = vadd.f32 %v8083_v10, %v7953_v35  ;;  %v8262_v16 = vpop.f32.mrf.mxu1  ;;  %v19007_v35 = vld [vmem:[#allocation18_spill] sm:$0xff] }
 0x7fa   : > { %v7957_v10 = vadd.f32 %v19007_v35, %v17803_v33  ;;  %v19008_v33 = vld [vmem:[#allocation19_spill] sm:$0xff] }
 0x7fb   : > { %8768 = vmatmul.bf16.vlgmr.msra.gmra.mxu0 %v8685_v52  ;;  %v17934_v3 = vadd.f32 %v8257_v24, %v8127_v49  ;;  %8947 = vmatmul.bf16.gmra.mxu1 %v17794_v42  ;;  %v17951_v24 = vpop.f32.mrf.mxu3  ;;  %v8669_v52 = vld [vmem:[#allocation3 + $0x63] sm:$0xff] }
 0x7fc   : > { %v8687_v43 = vpack.c.bf16 %v8670_v25, %v8669_v52  ;;  %v8674_v52 = vld [vmem:[#allocation3 + $0x8b] sm:$0xff] }
 0x800   : > { %v8085_v15 = vpop.f32.mrf.mxu0 }
 0x801   : > { %v8128_v46 = vadd.f32 %v8085_v15, %v7954_v13  ;;  %v8264_v55 = vpop.f32.mrf.mxu1 }
 0x803   : > { %v17942_v17 = vadd.f32 %v8259_v57, %v8128_v46  ;;  %v17959_v14 = vpop.f32.mrf.mxu3  ;;  %v7958_v46 = vadd.f32 %v19008_v33, %v17809_v58 }
 0x808   : > { %v8088_v42 = vpop.f32.mrf.mxu0 }
 0x809   : > { %v8129_v44 = vadd.f32 %v8088_v42, %v7955_v45  ;;  %v8267_v27 = vpop.f32.mrf.mxu1 }
 0x80b   : > { %8773 = vmatmul.bf16.gmra.mxu0 %v8686_v32  ;;  %v17948_v8 = vadd.f32 %v8262_v16, %v8129_v44  ;;  %8952 = vmatmul.bf16.gmra.mxu1 %v17813_v51  ;;  %v17961_v16 = vpop.f32.mrf.mxu2  ;;  %v17971_v19 = vpop.f32.mrf.mxu3  ;;  %v7959_v44 = vadd.f32 %v17750_v29, %v17823_v9  ;;  %v7960_v29 = vadd.f32 %v17758_v39, %v17827_v30  ;;  %v14461_v30 = vld [vmem:[%s18910_s6 + $0x38] sm:$0xff] }
 0x80c   : > { %9665 = vmatpush.bf16.msra.mxu3 %v14461_v30 }
 0x810   : > { %v8090_v61 = vpop.f32.mrf.mxu0 }
 0x811   : > { %v8130_v57 = vadd.f32 %v8090_v61, %v7956_v18  ;;  %v8269_v62 = vpop.f32.mrf.mxu1  ;;  %v14464_v61 = vld [vmem:[%s18910_s6 + $0x50] sm:$0xff] }
 0x812   : > { %9563 = vmatpush.bf16.msra.mxu2 %v14464_v61 }
 0x813   : > { %v17955_v4 = vadd.f32 %v8264_v55, %v8130_v57  ;;  %v17973_v45 = vpop.f32.mrf.mxu2  ;;  %v17984_v57 = vpop.f32.mrf.mxu3 }
 0x818   : > { %v8093_v49 = vpop.f32.mrf.mxu0 }
 0x819   : > { %v8131_v51 = vadd.f32 %v8093_v49, %v7957_v10  ;;  %v8272_v13 = vpop.f32.mrf.mxu1 }
 0x81b   : > { %8778 = vmatmul.bf16.gmra.mxu0 %v8687_v43  ;;  %v17966_v15 = vadd.f32 %v8267_v27, %v8131_v51  ;;  %8957 = vmatmul.bf16.gmra.mxu1 %v17831_v7  ;;  %v8671_v27 = vld [vmem:[#allocation3 + $0x73] sm:$0xff]  ;;  %v17993_v49 = vpop.f32.mrf.mxu3  ;;  %v7961_v43 = vadd.f32 %v17770_v23, %v17835_v21 }
 0x81c   : > { %v8688_v7 = vpack.c.bf16 %v8672_v22, %v8671_v27  ;;  %v7963_v27 = vadd.f32 %v17799_v2, %v17853_v59  ;;  %v14457_v2 = vld [vmem:[%s18910_s6 + $0x18] sm:$0xff]  ;;  %v7964_v59 = vadd.f32 %v17807_v50, %v17863_v34  ;;  %v14455_v50 = vld [vmem:[%s18910_s6 + $0x8] sm:$0xff] }
 0x81d   : > { %v8678_v34 = vld [vmem:[#allocation3 + $0xab] sm:$0xff] }
 0x820   : > { %v8095_v55 = vpop.f32.mrf.mxu0 }
 0x821   : > { %v8132_v40 = vadd.f32 %v8095_v55, %v7958_v46  ;;  %v8274_v26 = vpop.f32.mrf.mxu1  ;;  %v7962_v55 = vadd.f32 %v17784_v20, %v17845_v41  ;;  %v14459_v20 = vld [vmem:[%s18910_s6 + $0x28] sm:$0xff] }
 0x822   : > { %v8676_v41 = vld [vmem:[#allocation3 + $0x9b] sm:$0xff] }
 0x823   : > { %v17975_v42 = vadd.f32 %v8269_v62, %v8132_v40  ;;  %v17987_v62 = vpop.f32.mrf.mxu2  ;;  %v18007_v40 = vpop.f32.mrf.mxu3 }
 0x828   : > { %v8098_v32 = vpop.f32.mrf.mxu0 }
 0x829   : > { %v8133_v56 = vadd.f32 %v8098_v32, %v7959_v44  ;;  %v8277_v18 = vpop.f32.mrf.mxu1  ;;  %v14463_v44 = vld [vmem:[%s18910_s6 + $0x48] sm:$0xff] }
 0x82a   : > { %9564 = vmatpush.bf16.msra.mxu2 %v14463_v44 }
 0x82b   : > { %8783 = vmatmul.bf16.gmra.mxu0 %v8688_v7  ;;  %v17979_v58 = vadd.f32 %v8272_v13, %v8133_v56  ;;  %8962 = vmatmul.bf16.gmra.mxu1 %v17849_v6  ;;  %v17995_v51 = vpop.f32.mrf.mxu2  ;;  %v8673_v13 = vld [vmem:[#allocation3 + $0x83] sm:$0xff]  ;;  %v8675_v7 = vld [vmem:[#allocation3 + $0x93] sm:$0xff] }
 0x82c   : > { %v8689_v33 = vpack.c.bf16 %v8674_v52, %v8673_v13  ;;  %v8690_v61 = vpack.c.bf16 %v8676_v41, %v8675_v7  ;;  %v7792_v41 = vadd.f32 %v17877_v48, %v17875_v0  ;;  %v9418_v7 = vld [vmem:[#allocation4 + $0x17] sm:$0xff] }
 0x82e   : > { %v7966_v48 = vadd.f32 %v17944_v28, %v7792_v41  ;;  %v14476_v28 = vld [vmem:[%s18910_s6 + $0xb0] sm:$0xff]  ;;  %v14482_v41 = vld [vmem:[%s18910_s6 + $0xe0] sm:$0xff] }
 0x830   : > { %v8100_v9 = vpop.f32.mrf.mxu0 }
 0x831   : > { %v8134_v25 = vadd.f32 %v8100_v9, %v7960_v29  ;;  %v8279_v35 = vpop.f32.mrf.mxu1  ;;  %v14458_v9 = vld [vmem:[%s18910_s6 + $0x20] sm:$0xff] }
 0x833   : > { %v17991_v10 = vadd.f32 %v8274_v26, %v8134_v25  ;;  %v18009_v21 = vpop.f32.mrf.mxu2  ;;  %v18027_v25 = vpop.f32.mrf.mxu3 }
 0x838   : > { %v8103_v6 = vpop.f32.mrf.mxu0 }
 0x839   : > { %v8135_v37 = vadd.f32 %v8103_v6, %v7961_v43  ;;  %v8282_v46 = vpop.f32.mrf.mxu1 }
 0x83b   : > { %8788 = vmatmul.bf16.gmra.mxu0 %v8689_v33  ;;  %v17999_v39 = vadd.f32 %v8277_v18, %v8135_v37  ;;  %8967 = vmatmul.bf16.gmra.mxu1 %v17867_v36  ;;  %v14460_v36 = vld [vmem:[%s18910_s6 + $0x30] sm:$0xff]  ;;  %v14462_v37 = vld [vmem:[%s18910_s6 + $0x40] sm:$0xff] }
 0x83c   : > { %9666 = vmatpush.bf16.msra.mxu3 %v14460_v36  ;;  %v14456_v33 = vld [vmem:[%s18910_s6 + $0x10] sm:$0xff]  ;;  %9565 = vmatpush.bf16.msra.mxu2 %v14462_v37  ;;  %v14483_v37 = vld [vmem:[%s18910_s6 + $0xe8] sm:$0xff] }
 0x840   : > { %v8105_v23 = vpop.f32.mrf.mxu0  ;;  %9667 = vmatpush.bf16.msra.mxu3 %v14459_v20  ;;  %v14454_v20 = vld [vmem:[%s18910_s6] sm:$0xff] }
 0x841   : > { %v8136_v26 = vadd.f32 %v8105_v23, %v7962_v55  ;;  %v8284_v22 = vpop.f32.mrf.mxu1  ;;  %v7965_v55 = vadd.f32 %v17932_v11, %v17871_v5  ;;  %v14549_v5 = vld [vmem:[#allocation3 + $0xe0] sm:$0xff] }
 0x842   : > { %v9483_v11 = vpack.c.bf16 %v14549_v5, %v14549_v5 }
 0x843   : > { %v18017_v32 = vadd.f32 %v8279_v35, %v8136_v26  ;;  %v18029_v35 = vpop.f32.mrf.mxu2  ;;  %v8677_v26 = vld [vmem:[#allocation3 + $0xa3] sm:$0xff] }
 0x844   : > { %9668 = vmatpush.bf16.msra.mxu3 %v14458_v9  ;;  %9566 = vmatmul.bf16.vlgmr.msra.gmra.mxu2 %v9483_v11 }
 0x848   : > { %v8108_v56 = vpop.f32.mrf.mxu0  ;;  %9669 = vmatpush.bf16.msra.mxu3 %v14457_v2 }
 0x849   : > { %v8137_v18 = vadd.f32 %v8108_v56, %v7963_v27  ;;  %v8287_v29 = vpop.f32.mrf.mxu1  ;;  %v9417_v56 = vld [vmem:[#allocation4 + $0xf] sm:$0xff] }
 0x84b   : > { %8793 = vmatmul.bf16.gmra.mxu0 %v8690_v61  ;;  %v18031_v52 = vadd.f32 %v8282_v46, %v8137_v18  ;;  %8972 = vmatmul.bf16.gmra.mxu1 %v17884_v54  ;;  %v18047_v46 = vpop.f32.mrf.mxu3  ;;  %v18049_v30 = vpop.f32.mrf.mxu2  ;;  %v9437_v18 = vpack.c.bf16 %v9418_v7, %v9417_v56  ;;  %v14485_v61 = vld [vmem:[%s18910_s6 + $0xf8] sm:$0xff]  ;;  %v14474_v56 = vld [vmem:[%s18910_s6 + $0xa0] sm:$0xff] }
 0x84c   : > { %9670 = vmatpush.bf16.msra.mxu3 %v14456_v33  ;;  %9993 = vmatpush.bf16.msra.mxu1 %v14485_v61  ;;  %v8680_v33 = vld [vmem:[#allocation3 + $0xbb] sm:$0xff]  ;;  %v14481_v7 = vld [vmem:[%s18910_s6 + $0xd8] sm:$0xff]  ;;  %v8471_v61 = vadd.f32 %v17973_v45, %v17906_v1 }
 0x84d   : > { %v14479_v1 = vld [vmem:[%s18910_s6 + $0xc8] sm:$0xff]  ;;  %v8682_v45 = vld [vmem:[#allocation3 + $0xcb] sm:$0xff] }
 0x850   : > { %v8110_v43 = vpop.f32.mrf.mxu0  ;;  %9671 = vmatpush.bf16.msra.mxu3 %v14455_v50  ;;  %v7967_v50 = vadd.f32 %v17951_v24, %v17894_v60  ;;  %v7794_v60 = vadd.f32 %v17961_v16, %v17898_v53  ;;  %v14473_v53 = vld [vmem:[%s18910_s6 + $0x98] sm:$0xff] }
 0x851   : > { %v8138_v6 = vadd.f32 %v8110_v43, %v7964_v59  ;;  %v8289_v13 = vpop.f32.mrf.mxu1  ;;  %v14484_v43 = vld [vmem:[%s18910_s6 + $0xf0] sm:$0xff] }
 0x852   : > { %9994 = vmatpush.bf16.msra.mxu1 %v14484_v43  ;;  %v7968_v5 = vadd.f32 %v17959_v14, %v7794_v60  ;;  %v9096_v60 = vlaneseq }
 0x853   : > { %v18045_v54 = vadd.f32 %v8284_v22, %v8138_v6  ;;  %v8691_v22 = vpack.c.bf16 %v8678_v34, %v8677_v26  ;;  %v18067_v9 = vpop.f32.mrf.mxu3  ;;  %v18069_v0 = vpop.f32.mrf.mxu2 }
 0x854   : > { %9672 = vmatpush.bf16.msra.mxu3 %v14454_v20 }
 0x856   : > { %9995 = vmatpush.bf16.msra.mxu1 %v14483_v37  ;;  %v8857_v37 = vld [vmem:[#allocation3 + $0xd4] sm:$0xff] }
 0x857   : > { %9673 = vmatmul.bf16.vlgmr.msra.gmra.mxu3 %v9437_v18 }
 0x858   : > { %v8113_v23 = vpop.f32.mrf.mxu0 }
 0x859   : > { %v8139_v44 = vadd.f32 %v8113_v23, %v7965_v55  ;;  %v8292_v36 = vpop.f32.mrf.mxu1  ;;  %v14475_v23 = vld [vmem:[%s18910_s6 + $0xa8] sm:$0xff] }
 0x85a   : > { %9996 = vmatpush.bf16.msra.mxu1 %v14482_v41  ;;  %v14478_v41 = vld [vmem:[%s18910_s6 + $0xc0] sm:$0xff] }
 0x85b   : > { %8798 = vmatmul.bf16.gmra.mxu0 %v8691_v22  ;;  %v18061_v27 = vadd.f32 %v8287_v29, %v8139_v44  ;;  %8977 = vmatmul.bf16.gmra.mxu1 %v17902_v47  ;;  %v14477_v47 = vld [vmem:[%s18910_s6 + $0xb8] sm:$0xff]  ;;  %v18088_v34 = vpop.f32.mrf.mxu3  ;;  %v18093_v26 = vpop.f32.mrf.mxu2 }
 0x85c   : > { %9819 = vmatpush.bf16.msrb.mxu0 %v14477_v47  ;;  %v14472_v47 = vld [vmem:[%s18910_s6 + $0x90] sm:$0xff] }
 0x85e   : > { %9997 = vmatpush.bf16.msra.mxu1 %v14481_v7  ;;  %v8472_v7 = vadd.f32 %v17987_v62, %v17913_v38  ;;  %v18164_v38 = vld [vmem:[%s18911_s7 + $0x6] ss:$0 sm:$0xff]  ;;  %v18166_v62 = vshrl.u32 %v9096_v60, 7 }
 0x860   : > { %v8115_v29 = vpop.f32.mrf.mxu0  ;;  %9820 = vmatpush.bf16.msrb.mxu0 %v14476_v28  ;;  %v8645_v28 = vadd.f32 %v17971_v19, %v8471_v61 }
 0x861   : > { %v8140_v2 = vadd.f32 %v8115_v29, %v7966_v48  ;;  %v8294_v59 = vpop.f32.mrf.mxu1  ;;  %v392_v29 = vld [vmem:[%s18911_s7 + $0x4] sm:$0x1] }
 0x863   : > { %v18078_v6 = vadd.f32 %v8289_v13, %v8140_v2  ;;  %v8679_v13 = vld [vmem:[#allocation3 + $0xb3] sm:$0xff]  ;;  %v18116_v18 = vpop.f32.mrf.mxu3  ;;  %v18120_v48 = vpop.f32.mrf.mxu2 }
 0x864   : > { %v8692_v22 = vpack.c.bf16 %v8680_v33, %v8679_v13  ;;  %9821 = vmatpush.bf16.msrb.mxu0 %v14475_v23  ;;  %v14493_v2 = vld [vmem:[%s18910_s6 + $0x138] sm:$0xff]  ;;  %v8858_v33 = vld [vmem:[#allocation3 + $0xdc] sm:$0xff] }
 0x865   : > { %10167 = vmatpush.bf16.msrb.mxu2 %v14493_v2  ;;  %v14471_v13 = vld [vmem:[%s18910_s6 + $0x88] sm:$0xff] }
 0x868   : > { %v8118_v55 = vpop.f32.mrf.mxu0  ;;  %9822 = vmatpush.bf16.msrb.mxu0 %v14474_v56  ;;  %v8868_v56 = vpack.c.bf16 %v8858_v33, %v8857_v37 }
 0x869   : > { %v8141_v44 = vadd.f32 %v8118_v55, %v7967_v50  ;;  %v8943_v20 = vpop.f32.mrf.mxu1  ;;  %v8681_v55 = vld [vmem:[#allocation3 + $0xc3] sm:$0xff] }
 0x86b   : > { %8803 = vmatmul.bf16.gmra.mxu0 %v8692_v22  ;;  %v18100_v24 = vadd.f32 %v8292_v36, %v8141_v44  ;;  %8982 = vmatmul.bf16.gmra.mxu1 %v17917_v63  ;;  %v14480_v63 = vld [vmem:[%s18910_s6 + $0xd0] sm:$0xff]  ;;  %v8693_v44 = vpack.c.bf16 %v8682_v45, %v8681_v55 }
 0x86c   : > { %9823 = vmatpush.bf16.msrb.mxu0 %v14473_v53  ;;  %9998 = vmatpush.bf16.msra.mxu1 %v14480_v63  ;;  %v18153_v53 = vpop.f32.mrf.mxu3  ;;  %v18158_v63 = vpop.f32.mrf.mxu2 }
 0x870   : > { %v8120_v11 = vpop.f32.mrf.mxu0  ;;  %9824 = vmatpush.bf16.msrb.mxu0 %v14472_v47  ;;  %9999 = vmatpush.bf16.msra.mxu1 %v14479_v1 }
 0x871   : > { %v8142_v16 = vadd.f32 %v8120_v11, %v7968_v5  ;;  %v8945_v36 = vpop.f32.mrf.mxu1  ;;  %v18151_v11 = vld [vmem:[%s18911_s7 + $0x5] ss:$0 sm:$0xff] }
 0x873   : > { %v18122_v14 = vadd.f32 %v8294_v59, %v8142_v16  ;;  %v19009_v59 = vld [vmem:[#allocation5_spill] sm:$0xff]  ;;  %v14470_v16 = vld [vmem:[%s18910_s6 + $0x80] sm:$0xff] }
 0x874   : > { %v2882_v43 = vadd.f32 %v19009_v59, %v392_v29  ;;  %9825 = vmatpush.bf16.msrb.mxu0 %v14471_v13  ;;  %10000 = vmatpush.bf16.msra.mxu1 %v14478_v41  ;;  %v8646_v29 = vadd.f32 %v17984_v57, %v8472_v7  ;;  %v9098_v59 = vadd.s32 8, %v18166_v62  ;;  %v18178_v57 = vpop.f32.mrf.mxu3  ;;  %v8683_v13 = vld [vmem:[#allocation3 + $0xd3] sm:$0xff] }
 0x876   : > { %v18144_v19 = vperm.slane %v2882_v43, 0  ;;  %v8473_v43 = vadd.f32 %v17995_v51, %v17920_v12  ;;  %v9128_v55 = vand.u32 15, %v9098_v59 }
 0x878   : > { %v8769_v50 = vpop.f32.mrf.mxu0  ;;  %9826 = vmatpush.bf16.msrb.mxu0 %v14470_v16  ;;  %v8647_v12 = vadd.f32 %v17993_v49, %v8473_v43  ;;  %vm9358_vm2 = vcmp.lt.s32.totalorder %v9128_v55, 10 }
 0x879   : > { %v8819_v23 = vadd.f32 %v8769_v50, %v8645_v28  ;;  %v8948_v22 = vpop.f32.mrf.mxu1  ;;  %v14492_v50 = vld [vmem:[%s18910_s6 + $0x130] sm:$0xff]  ;;  %vm14551_vm4 = vmpackc.low %vm9358_vm2, %vm14635_vm3 }
 0x87a   : > { %10168 = vmatpush.bf16.msrb.mxu2 %v14492_v50 }
 0x87b   : > { %v8993_v5 = vadd.f32 %v8943_v20, %v8819_v23  ;;  %8808 = vmatmul.bf16.gmra.mxu0 %v8693_v44  ;;  %8987 = vmatmul.bf16.gmra.mxu1 %v8868_v56  ;;  %v8684_v23 = vld [vmem:[#allocation3 + $0xdb] sm:$0xff]  ;;  %v18180_v44 = vpop.f32.mrf.mxu2 }
 0x87c   : > { %v8694_v56 = vpack.c.bf16 %v8684_v23, %v8683_v13 }
 0x87d   : > { %v9014_v61 = vadd.f32 %v18144_v19, %v8993_v5  ;;  %v8474_v5 = vadd.f32 %v18009_v21, %v17928_v31 }
 0x87f   : > { %v9035_v20 = vmul.f32 %v18151_v11, %v9014_v61 }
 0x880   : > { %v8771_v47 = vpop.f32.mrf.mxu0 }
 0x881   : > { %v9056_v2 = vadd.f32 %v18164_v38, %v9035_v20  ;;  %v8820_v1 = vadd.f32 %v8771_v47, %v8646_v29  ;;  %v8950_v45 = vpop.f32.mrf.mxu1  ;;  %v8648_v47 = vadd.f32 %v18007_v40, %v8474_v5 }
 0x883   : > { %v9076_v28 = vmax.f32 %v9056_v2, 0.0  ;;  %v8994_v37 = vadd.f32 %v8945_v36, %v8820_v1  ;;  %v18190_v2 = vpop.f32.mrf.mxu3  ;;  %v18193_v31 = vpop.f32.mrf.mxu2 }
 0x885   : > { %9397 = vst [vmem:[#allocation4 + $0x20] sm:$0xff] %v9076_v28  ;;  %v9015_v33 = vadd.f32 %v18144_v19, %v8994_v37  ;;  %v9100_v37 = vadd.s32 24, %v18166_v62 }
 0x887   : > { %v9036_v41 = vmul.f32 %v18151_v11, %v9015_v33  ;;  %v8475_v33 = vadd.f32 %v18029_v35, %v17934_v3 }
 0x888   : > { %v8774_v51 = vpop.f32.mrf.mxu0 }
 0x889   : > { %v9057_v36 = vadd.f32 %v18164_v38, %v9036_v41  ;;  %v8821_v60 = vadd.f32 %v8774_v51, %v8647_v12  ;;  %v8953_v7 = vpop.f32.mrf.mxu1  ;;  %v9724_v12 = vld [vmem:[#allocation4 + $0x11] sm:$0xff] }
 0x88b   : > { %v9077_v16 = vmax.f32 %v9057_v36, 0.0  ;;  %v8995_v61 = vadd.f32 %v8948_v22, %v8821_v60  ;;  %8813 = vmatmul.bf16.gmra.mxu0 %v8694_v56  ;;  %v8649_v60 = vadd.f32 %v18027_v25, %v8475_v33  ;;  %v9102_v33 = vadd.s32 40, %v18166_v62 }
 0x88c   : > { %v9419_v13 = vld [vmem:[#allocation4 + $0x1f] sm:$0xff] }
 0x88d   : > { %v9378_v20 = vsel %vm9358_vm2, %v9077_v16, 0.0  ;;  %v9016_v29 = vadd.f32 %v18144_v19, %v8995_v61  ;;  %v14552_v59 = vpack.c.bf16 %v9077_v16, %v9076_v28  ;;  %v9142_v28 = vand.u32 15, %v9100_v37  ;;  %v9725_v51 = vld [vmem:[#allocation4 + $0x19] sm:$0xff]  ;;  %v18203_v16 = vpop.f32.mrf.mxu3 }
 0x88e   : > { %9398 = vst [vmem:[#allocation4 + $0x28] sm:$0xff] %v9378_v20  ;;  %v8476_v61 = vadd.f32 %v18049_v30, %v17942_v17  ;;  %v18207_v20 = vpop.f32.mrf.mxu2 }
 0x88f   : > { %v9037_v49 = vmul.f32 %v18151_v11, %v9016_v29  ;;  %14553 = vmatmul.msk.bf16.gmra.mxu2 %vm14551_vm4, %v14552_v59  ;;  %vm9360_vm5 = vcmp.lt.s32.totalorder %v9142_v28, 10 }
 0x890   : > { %v8776_v1 = vpop.f32.mrf.mxu0  ;;  %vm14554_vm6 = vmpackc.low %vm9360_vm5, %vm14635_vm3 }
 0x891   : > { %v9058_v21 = vadd.f32 %v18164_v38, %v9037_v49  ;;  %v8822_v22 = vadd.f32 %v8776_v1, %v8648_v47  ;;  %v8955_v43 = vpop.f32.mrf.mxu1  ;;  %v14491_v1 = vld [vmem:[%s18910_s6 + $0x128] sm:$0xff] }
 0x892   : > { %10169 = vmatpush.bf16.msrb.mxu2 %v14491_v1  ;;  %v14490_v1 = vld [vmem:[%s18910_s6 + $0x120] sm:$0xff] }
 0x893   : > { %v9078_v40 = vmax.f32 %v9058_v21, 0.0  ;;  %v8996_v50 = vadd.f32 %v8950_v45, %v8822_v22  ;;  %v9744_v45 = vpack.c.bf16 %v9725_v51, %v9724_v12  ;;  %v8650_v21 = vadd.f32 %v18047_v46, %v8476_v61 }
 0x894   : > { %v9156_v12 = vand.u32 15, %v9102_v33  ;;  %v8478_v61 = vadd.f32 %v18093_v26, %v17955_v4  ;;  %v9104_v33 = vadd.s32 56, %v18166_v62 }
 0x895   : > { %9399 = vst [vmem:[#allocation4 + $0x30] sm:$0xff] %v9078_v40  ;;  %v9017_v55 = vadd.f32 %v18144_v19, %v8996_v50  ;;  %v9420_v23 = vld [vmem:[#allocation4 + $0x27] sm:$0xff]  ;;  %v8477_v50 = vadd.f32 %v18069_v0, %v17948_v8 }
 0x896   : > { %v9438_v41 = vpack.c.bf16 %v9420_v23, %v9419_v13  ;;  %v18220_v23 = vpop.f32.mrf.mxu3  ;;  %v18222_v46 = vpop.f32.mrf.mxu2  ;;  %v9726_v0 = vld [vmem:[#allocation4 + $0x21] sm:$0xff]  ;;  %vm9362_vm7 = vcmp.lt.s32.totalorder %v9156_v12, 10  ;;  %v8652_v26 = vadd.f32 %v18088_v34, %v8478_v61  ;;  %10170 = vmatpush.bf16.msrb.mxu2 %v14490_v1  ;;  %v8479_v34 = vadd.f32 %v18120_v48, %v17966_v15 }
 0x897   : > { %v9038_v36 = vmul.f32 %v18151_v11, %v9017_v55  ;;  %vm18251_vm8 = vmpackc.low %vm9362_vm7, %vm14635_vm3 }
 0x898   : > { %v8779_v56 = vpop.f32.mrf.mxu0  ;;  %9678 = vmatmul.bf16.gmra.mxu3 %v9438_v41  ;;  %10001 = vmatmul.bf16.vlgmr.msra.gmra.mxu1 %v9438_v41 }
 0x899   : > { %v9059_v3 = vadd.f32 %v18164_v38, %v9038_v36  ;;  %v8823_v35 = vadd.f32 %v8779_v56, %v8649_v60  ;;  %v8958_v5 = vpop.f32.mrf.mxu1  ;;  %v8651_v56 = vadd.f32 %v18067_v9, %v8477_v50 }
 0x89b   : > { %v9079_v29 = vmax.f32 %v9059_v3, 0.0  ;;  %v8997_v49 = vadd.f32 %v8953_v7, %v8823_v35  ;;  %9827 = vmatmul.bf16.vlgmr.msrb.gmra.mxu0 %v9744_v45 }
 0x89c   : > { %v9421_v28 = vld [vmem:[#allocation4 + $0x2f] sm:$0xff] }
 0x89d   : > { %v9380_v25 = vsel %vm9360_vm5, %v9079_v29, 0.0  ;;  %v9018_v47 = vadd.f32 %v18144_v19, %v8997_v49  ;;  %v14555_v17 = vpack.c.bf16 %v9079_v29, %v9078_v40  ;;  %v9727_v36 = vld [vmem:[#allocation4 + $0x29] sm:$0xff] }
 0x89e   : > { %9400 = vst [vmem:[#allocation4 + $0x38] sm:$0xff] %v9380_v25  ;;  %v18232_v35 = vpack.c.bf16 %v9727_v36, %v9726_v0 }
 0x89f   : > { %v9039_v59 = vmul.f32 %v18151_v11, %v9018_v47  ;;  %14556 = vmatmul.msk.bf16.gmra.mxu2 %vm14554_vm6, %v14555_v17  ;;  %v18241_v47 = vpop.f32.mrf.mxu3 }
 0x8a0   : > { %v8781_v22 = vpop.f32.mrf.mxu0 }
 0x8a1   : > { %v9060_v30 = vadd.f32 %v18164_v38, %v9039_v59  ;;  %v8824_v7 = vadd.f32 %v8781_v22, %v8650_v21  ;;  %v8960_v37 = vpop.f32.mrf.mxu1  ;;  %v18246_v59 = vpop.f32.mrf.mxu2 }
 0x8a3   : > { %v9080_v55 = vmax.f32 %v9060_v30, 0.0  ;;  %v8998_v13 = vadd.f32 %v8955_v43, %v8824_v7 }
 0x8a5   : > { %9401 = vst [vmem:[#allocation4 + $0x40] sm:$0xff] %v9080_v55  ;;  %v9019_v40 = vadd.f32 %v18144_v19, %v8998_v13  ;;  %v9422_v41 = vld [vmem:[#allocation4 + $0x37] sm:$0xff] }
 0x8a6   : > { %v18225_v51 = vpack.c.bf16 %v9422_v41, %v9421_v28  ;;  %v9170_v41 = vand.u32 15, %v9104_v33  ;;  %v9728_v15 = vld [vmem:[#allocation4 + $0x31] sm:$0xff] }
 0x8a7   : > { %v9040_v60 = vmul.f32 %v18151_v11, %v9019_v40 }
 0x8a8   : > { %v8784_v8 = vpop.f32.mrf.mxu0  ;;  %9683 = vmatmul.bf16.gmra.mxu3 %v18225_v51  ;;  %10006 = vmatmul.bf16.gmra.mxu1 %v18225_v51  ;;  %vm9364_vm9 = vcmp.lt.s32.totalorder %v9170_v41, 10  ;;  %v14489_v41 = vld [vmem:[%s18910_s6 + $0x118] sm:$0xff] }
 0x8a9   : > { %v9061_v43 = vadd.f32 %v18164_v38, %v9040_v60  ;;  %v8825_v3 = vadd.f32 %v8784_v8, %v8651_v56  ;;  %v8963_v45 = vpop.f32.mrf.mxu1  ;;  %v8653_v56 = vadd.f32 %v18116_v18, %v8479_v34  ;;  %v18267_v8 = vpop.f32.mrf.mxu3  ;;  %v8480_v18 = vadd.f32 %v18158_v63, %v17975_v42  ;;  %vm18286_vm10 = vmpackc.low %vm9364_vm9, %vm14635_vm3  ;;  %10171 = vmatpush.bf16.msrb.mxu2 %v14489_v41 }
 0x8aa   : > { %v18271_v48 = vpop.f32.mrf.mxu2 }
 0x8ab   : > { %v18236_v29 = vmax.f32 %v9061_v43, 0.0  ;;  %v8999_v49 = vadd.f32 %v8958_v5, %v8825_v3  ;;  %9832 = vmatmul.bf16.gmra.mxu0 %v18232_v35 }
 0x8ac   : > { %v9423_v28 = vld [vmem:[#allocation4 + $0x3f] sm:$0xff] }
 0x8ad   : > { %v9382_v9 = vsel %vm9362_vm7, %v18236_v29, 0.0  ;;  %v9020_v25 = vadd.f32 %v18144_v19, %v8999_v49  ;;  %v14558_v22 = vpack.c.bf16 %v18236_v29, %v9080_v55  ;;  %v9729_v36 = vld [vmem:[#allocation4 + $0x39] sm:$0xff] }
 0x8ae   : > { %9402 = vst [vmem:[#allocation4 + $0x48] sm:$0xff] %v9382_v9  ;;  %v18274_v3 = vpack.c.bf16 %v9729_v36, %v9728_v15 }
 0x8af   : > { %v9041_v4 = vmul.f32 %v18151_v11, %v9020_v25  ;;  %14559 = vmatmul.msk.bf16.gmra.mxu2 %vm18251_vm8, %v14558_v22 }
 0x8b0   : > { %v8786_v5 = vpop.f32.mrf.mxu0 }
 0x8b1   : > { %v9062_v17 = vadd.f32 %v18164_v38, %v9041_v4  ;;  %v8826_v30 = vadd.f32 %v8786_v5, %v8652_v26  ;;  %v8965_v7 = vpop.f32.mrf.mxu1  ;;  %v8654_v26 = vadd.f32 %v18153_v53, %v8480_v18  ;;  %v18295_v33 = vpop.f32.mrf.mxu3  ;;  %v8481_v53 = vadd.f32 %v18180_v44, %v17979_v58 }
 0x8b2   : > { %v18299_v34 = vpop.f32.mrf.mxu2 }
 0x8b3   : > { %v9082_v50 = vmax.f32 %v9062_v17, 0.0  ;;  %v9000_v13 = vadd.f32 %v8960_v37, %v8826_v30  ;;  %v9106_v30 = vadd.s32 72, %v18166_v62  ;;  %v8655_v58 = vadd.f32 %v18178_v57, %v8481_v53 }
 0x8b5   : > { %9403 = vst [vmem:[#allocation4 + $0x50] sm:$0xff] %v9082_v50  ;;  %v9021_v40 = vadd.f32 %v18144_v19, %v9000_v13  ;;  %v9424_v55 = vld [vmem:[#allocation4 + $0x47] sm:$0xff]  ;;  %v9184_v36 = vand.u32 15, %v9106_v30 }
 0x8b6   : > { %v18263_v12 = vpack.c.bf16 %v9424_v55, %v9423_v28 }
 0x8b7   : > { %v9042_v60 = vmul.f32 %v18151_v11, %v9021_v40  ;;  %vm9366_vm11 = vcmp.lt.s32.totalorder %v9184_v36, 10  ;;  %v14488_v36 = vld [vmem:[%s18910_s6 + $0x110] sm:$0xff] }
 0x8b8   : > { %v8789_v0 = vpop.f32.mrf.mxu0  ;;  %9688 = vmatmul.bf16.gmra.mxu3 %v18263_v12  ;;  %10011 = vmatmul.bf16.gmra.mxu1 %v18263_v12  ;;  %vm18328_vm12 = vmpackc.low %vm9366_vm11, %vm14635_vm3 }
 0x8b9   : > { %v9063_v37 = vadd.f32 %v18164_v38, %v9042_v60  ;;  %v8827_v43 = vadd.f32 %v8789_v0, %v8653_v56  ;;  %v8968_v61 = vpop.f32.mrf.mxu1  ;;  %10172 = vmatpush.bf16.msrb.mxu2 %v14488_v36 }
 0x8bb   : > { %v18278_v49 = vmax.f32 %v9063_v37, 0.0  ;;  %v9001_v9 = vadd.f32 %v8963_v45, %v8827_v43  ;;  %9837 = vmatmul.bf16.gmra.mxu0 %v18274_v3 }
 0x8bc   : > { %v9425_v28 = vld [vmem:[#allocation4 + $0x4f] sm:$0xff] }
 0x8bd   : > { %v9384_v25 = vsel %vm9364_vm9, %v18278_v49, 0.0  ;;  %v9022_v1 = vadd.f32 %v18144_v19, %v9001_v9  ;;  %v14561_v42 = vpack.c.bf16 %v18278_v49, %v9082_v50  ;;  %v9731_v56 = vld [vmem:[#allocation4 + $0x49] sm:$0xff]  ;;  %v8482_v9 = vadd.f32 %v18193_v31, %v17991_v10 }
 0x8be   : > { %9404 = vst [vmem:[#allocation4 + $0x58] sm:$0xff] %v9384_v25 }
 0x8bf   : > { %v9043_v4 = vmul.f32 %v18151_v11, %v9022_v1  ;;  %14562 = vmatmul.msk.bf16.gmra.mxu2 %vm18286_vm10, %v14561_v42  ;;  %v18319_v1 = vpop.f32.mrf.mxu3 }
 0x8c0   : > { %v8791_v5 = vpop.f32.mrf.mxu0 }
 0x8c1   : > { %v9064_v63 = vadd.f32 %v18164_v38, %v9043_v4  ;;  %v8828_v45 = vadd.f32 %v8791_v5, %v8654_v26  ;;  %v8970_v17 = vpop.f32.mrf.mxu1  ;;  %v18321_v4 = vpop.f32.mrf.mxu2 }
 0x8c3   : > { %v9084_v13 = vmax.f32 %v9064_v63, 0.0  ;;  %v9002_v40 = vadd.f32 %v8965_v7, %v8828_v45  ;;  %v9730_v7 = vld [vmem:[#allocation4 + $0x41] sm:$0xff]  ;;  %v8656_v63 = vadd.f32 %v18190_v2, %v8482_v9  ;;  %v8483_v2 = vadd.f32 %v18207_v20, %v17999_v39 }
 0x8c4   : > { %v18312_v43 = vpack.c.bf16 %v9731_v56, %v9730_v7 }
 0x8c5   : > { %9405 = vst [vmem:[#allocation4 + $0x60] sm:$0xff] %v9084_v13  ;;  %v9023_v50 = vadd.f32 %v18144_v19, %v9002_v40  ;;  %v9426_v55 = vld [vmem:[#allocation4 + $0x57] sm:$0xff]  ;;  %v9108_v40 = vadd.s32 88, %v18166_v62  ;;  %v8657_v20 = vadd.f32 %v18203_v16, %v8483_v2 }
 0x8c6   : > { %v18305_v60 = vpack.c.bf16 %v9426_v55, %v9425_v28  ;;  %v14519_v2 = vld [vmem:[%s18910_s6 + $0x208] sm:$0xff] }
 0x8c7   : > { %v9044_v0 = vmul.f32 %v18151_v11, %v9023_v50  ;;  %v9198_v56 = vand.u32 15, %v9108_v40 }
 0x8c8   : > { %v8794_v44 = vpop.f32.mrf.mxu0  ;;  %9693 = vmatmul.bf16.gmra.mxu3 %v18305_v60  ;;  %10016 = vmatmul.bf16.gmra.mxu1 %v18305_v60 }
 0x8c9   : > { %v9065_v15 = vadd.f32 %v18164_v38, %v9044_v0  ;;  %v8829_v37 = vadd.f32 %v8794_v44, %v8655_v58  ;;  %v8973_v18 = vpop.f32.mrf.mxu1  ;;  %v18348_v44 = vpop.f32.mrf.mxu3  ;;  %vm9368_vm13 = vcmp.lt.s32.totalorder %v9198_v56, 10 }
 0x8ca   : > { %v18350_v7 = vpop.f32.mrf.mxu2  ;;  %vm18366_vm14 = vmpackc.low %vm9368_vm13, %vm14635_vm3 }
 0x8cb   : > { %v18316_v25 = vmax.f32 %v9065_v15, 0.0  ;;  %v9003_v57 = vadd.f32 %v8968_v61, %v8829_v37  ;;  %9842 = vmatmul.bf16.gmra.mxu0 %v18312_v43  ;;  %v9732_v15 = vld [vmem:[#allocation4 + $0x51] sm:$0xff] }
 0x8cc   : > { %v9733_v58 = vld [vmem:[#allocation4 + $0x59] sm:$0xff] }
 0x8cd   : > { %v9386_v26 = vsel %vm9366_vm11, %v18316_v25, 0.0  ;;  %v9024_v5 = vadd.f32 %v18144_v19, %v9003_v57  ;;  %v18333_v31 = vpack.c.bf16 %v18316_v25, %v9084_v13  ;;  %v9427_v13 = vld [vmem:[#allocation4 + $0x5f] sm:$0xff]  ;;  %v18357_v57 = vpack.c.bf16 %v9733_v58, %v9732_v15 }
 0x8ce   : > { %9406 = vst [vmem:[#allocation4 + $0x68] sm:$0xff] %v9386_v26  ;;  %v8484_v26 = vadd.f32 %v18222_v46, %v18017_v32 }
 0x8cf   : > { %v9045_v42 = vmul.f32 %v18151_v11, %v9024_v5  ;;  %14565 = vmatmul.msk.bf16.gmra.mxu2 %vm18328_vm12, %v18333_v31 }
 0x8d0   : > { %v8796_v45 = vpop.f32.mrf.mxu0 }
 0x8d1   : > { %v9066_v61 = vadd.f32 %v18164_v38, %v9045_v42  ;;  %v8830_v30 = vadd.f32 %v8796_v45, %v8656_v63  ;;  %v8975_v53 = vpop.f32.mrf.mxu1  ;;  %v18375_v46 = vpop.f32.mrf.mxu3 }
 0x8d3   : > { %v9086_v50 = vmax.f32 %v9066_v61, 0.0  ;;  %v9004_v28 = vadd.f32 %v8970_v17, %v8830_v30  ;;  %v8658_v30 = vadd.f32 %v18220_v23, %v8484_v26  ;;  %v9110_v23 = vadd.s32 104, %v18166_v62 }
 0x8d5   : > { %9407 = vst [vmem:[#allocation4 + $0x70] sm:$0xff] %v9086_v50  ;;  %v9025_v55 = vadd.f32 %v18144_v19, %v9004_v28  ;;  %v9428_v41 = vld [vmem:[#allocation4 + $0x67] sm:$0xff] }
 0x8d6   : > { %v18346_v0 = vpack.c.bf16 %v9428_v41, %v9427_v13  ;;  %v8485_v13 = vadd.f32 %v18246_v59, %v18031_v52  ;;  %v9734_v52 = vld [vmem:[#allocation4 + $0x61] sm:$0xff] }
 0x8d7   : > { %v9046_v39 = vmul.f32 %v18151_v11, %v9025_v55 }
 0x8d8   : > { %v8799_v17 = vpop.f32.mrf.mxu0  ;;  %9698 = vmatmul.bf16.gmra.mxu3 %v18346_v0  ;;  %10021 = vmatmul.bf16.gmra.mxu1 %v18346_v0 }
 0x8d9   : > { %v9067_v37 = vadd.f32 %v18164_v38, %v9046_v39  ;;  %v8831_v9 = vadd.f32 %v8799_v17, %v8657_v20  ;;  %v8978_v16 = vpop.f32.mrf.mxu1  ;;  %v9212_v20 = vand.u32 15, %v9110_v23  ;;  %v14501_v23 = vld [vmem:[%s18910_s6 + $0x178] sm:$0xff] }
 0x8da   : > { %10341 = vmatpush.bf16.msrb.mxu3 %v14501_v23  ;;  %v14498_v23 = vld [vmem:[%s18910_s6 + $0x160] sm:$0xff] }
 0x8db   : > { %v9087_v5 = vmax.f32 %v9067_v37, 0.0  ;;  %v9005_v42 = vadd.f32 %v8973_v18, %v8831_v9  ;;  %9847 = vmatmul.bf16.gmra.mxu0 %v18357_v57  ;;  %v18377_v18 = vpop.f32.mrf.mxu2  ;;  %v8659_v9 = vadd.f32 %v18241_v47, %v8485_v13  ;;  %vm18393_vm15 = vcmp.lt.s32.totalorder %v9212_v20, 10  ;;  %v14487_v13 = vld [vmem:[%s18910_s6 + $0x108] sm:$0xff] }
 0x8dc   : > { %v9429_v58 = vld [vmem:[#allocation4 + $0x6f] sm:$0xff]  ;;  %v8486_v47 = vadd.f32 %v18271_v48, %v18045_v54  ;;  %vm18416_vm0 = vmpackc.low %vm18393_vm15, %vm14635_vm3  ;;  %10173 = vmatpush.bf16.msrb.mxu2 %v14487_v13 }
 0x8dd   : > { %v9388_v63 = vsel %vm9368_vm13, %v9087_v5, 0.0  ;;  %v9026_v45 = vadd.f32 %v18144_v19, %v9005_v42  ;;  %v18370_v32 = vpack.c.bf16 %v9087_v5, %v9086_v50  ;;  %v9735_v15 = vld [vmem:[#allocation4 + $0x69] sm:$0xff] }
 0x8de   : > { %9408 = vst [vmem:[#allocation4 + $0x78] sm:$0xff] %v9388_v63  ;;  %v18391_v5 = vpack.c.bf16 %v9735_v15, %v9734_v52  ;;  %v9674_v63 = vpop.f32.mrf.mxu3  ;;  %v8660_v48 = vadd.f32 %v18267_v8, %v8486_v47  ;;  %v14500_v8 = vld [vmem:[%s18910_s6 + $0x170] sm:$0xff]  ;;  %v9112_v15 = vadd.s32 120, %v18166_v62 }
 0x8df   : > { %v9047_v61 = vmul.f32 %v18151_v11, %v9026_v45  ;;  %14568 = vmatmul.msk.bf16.gmra.mxu2 %vm18366_vm14, %v18370_v32  ;;  %10342 = vmatpush.bf16.msrb.mxu3 %v14500_v8  ;;  %v14517_v8 = vld [vmem:[%s18910_s6 + $0x1f8] sm:$0xff] }
 0x8e0   : > { %v8801_v40 = vpop.f32.mrf.mxu0  ;;  %10689 = vmatpush.bf16.msrb.mxu1 %v14517_v8  ;;  %v14514_v8 = vld [vmem:[%s18910_s6 + $0x1e0] sm:$0xff] }
 0x8e1   : > { %v9068_v28 = vadd.f32 %v18164_v38, %v9047_v61  ;;  %v8832_v55 = vadd.f32 %v8801_v40, %v8658_v30  ;;  %v8980_v56 = vpop.f32.mrf.mxu1 }
 0x8e3   : > { %v9088_v41 = vmax.f32 %v9068_v28, 0.0  ;;  %v9006_v36 = vadd.f32 %v8975_v53, %v8832_v55  ;;  %v9567_v42 = vpop.f32.mrf.mxu2 }
 0x8e4   : > { %v18397_v61 = vadd.f32 %v9674_v63, %v9567_v42  ;;  %v9226_v42 = vand.u32 15, %v9112_v15 }
 0x8e5   : > { %9409 = vst [vmem:[#allocation4 + $0x80] sm:$0xff] %v9088_v41  ;;  %v9027_v50 = vadd.f32 %v18144_v19, %v9006_v36  ;;  %v9430_v39 = vld [vmem:[#allocation4 + $0x77] sm:$0xff] }
 0x8e6   : > { %v18384_v17 = vpack.c.bf16 %v9430_v39, %v9429_v58  ;;  %vm18448_vm1 = vcmp.lt.s32.totalorder %v9226_v42, 10  ;;  %v14508_v42 = vld [vmem:[%s18910_s6 + $0x1b0] sm:$0xff] }
 0x8e7   : > { %v9048_v37 = vmul.f32 %v18151_v11, %v9027_v50  ;;  %vm18481_vm2 = vmpackc.low %vm18448_vm1, %vm14635_vm3 }
 0x8e8   : > { %v8804_v26 = vpop.f32.mrf.mxu0  ;;  %9703 = vmatmul.bf16.gmra.mxu3 %v18384_v17  ;;  %10026 = vmatmul.bf16.gmra.mxu1 %v18384_v17 }
 0x8e9   : > { %v9069_v59 = vadd.f32 %v18164_v38, %v9048_v37  ;;  %v8833_v53 = vadd.f32 %v8804_v26, %v8659_v9  ;;  %v8487_v37 = vadd.f32 %v18299_v34, %v18061_v27 }
 0x8eb   : > { %v9089_v30 = vmax.f32 %v9069_v59, 0.0  ;;  %v9007_v40 = vadd.f32 %v8978_v16, %v8833_v53  ;;  %9852 = vmatmul.bf16.gmra.mxu0 %v18391_v5  ;;  %v8983_v16 = vpop.f32.mrf.mxu1  ;;  %v14499_v53 = vld [vmem:[%s18910_s6 + $0x168] sm:$0xff]  ;;  %v8661_v27 = vadd.f32 %v18295_v33, %v8487_v37  ;;  %v8488_v33 = vadd.f32 %v18321_v4, %v18078_v6  ;;  %v14486_v6 = vld [vmem:[%s18910_s6 + $0x100] sm:$0xff]  ;;  %v14509_v4 = vld [vmem:[%s18910_s6 + $0x1b8] sm:$0xff] }
 0x8ec   : > { %v9431_v52 = vld [vmem:[#allocation4 + $0x7f] sm:$0xff]  ;;  %10343 = vmatpush.bf16.msrb.mxu3 %v14499_v53  ;;  %10515 = vmatpush.bf16.msra.mxu0 %v14509_v4 }
 0x8ed   : > { %v9390_v28 = vsel %vm18393_vm15, %v9089_v30, 0.0  ;;  %v9028_v55 = vadd.f32 %v18144_v19, %v9007_v40  ;;  %v18420_v58 = vpack.c.bf16 %v9089_v30, %v9088_v41  ;;  %v9737_v45 = vld [vmem:[#allocation4 + $0x79] sm:$0xff]  ;;  %v8662_v15 = vadd.f32 %v18319_v1, %v8488_v33  ;;  %10174 = vmatpush.bf16.msrb.mxu2 %v14486_v6 }
 0x8ee   : > { %9410 = vst [vmem:[#allocation4 + $0x88] sm:$0xff] %v9390_v28  ;;  %v14496_v37 = vld [vmem:[%s18910_s6 + $0x150] sm:$0xff] }
 0x8ef   : > { %v9049_v54 = vmul.f32 %v18151_v11, %v9028_v55  ;;  %14571 = vmatmul.msk.bf16.gmra.mxu2 %vm18416_vm0, %v18420_v58 }
 0x8f0   : > { %v8806_v36 = vpop.f32.mrf.mxu0  ;;  %10344 = vmatpush.bf16.msrb.mxu3 %v14498_v23  ;;  %10516 = vmatpush.bf16.msra.mxu0 %v14508_v42  ;;  %v14513_v42 = vld [vmem:[%s18910_s6 + $0x1d8] sm:$0xff] }
 0x8f1   : > { %v9070_v39 = vadd.f32 %v18164_v38, %v9049_v54  ;;  %v8834_v20 = vadd.f32 %v8806_v36, %v8660_v48 }
 0x8f3   : > { %v9090_v9 = vmax.f32 %v9070_v39, 0.0  ;;  %v9008_v41 = vadd.f32 %v8980_v56, %v8834_v20  ;;  %v9736_v56 = vld [vmem:[#allocation4 + $0x71] sm:$0xff]  ;;  %v8985_v28 = vpop.f32.mrf.mxu1  ;;  %v14497_v20 = vld [vmem:[%s18910_s6 + $0x158] sm:$0xff] }
 0x8f4   : > { %v18443_v55 = vpack.c.bf16 %v9737_v45, %v9736_v56  ;;  %10345 = vmatpush.bf16.msrb.mxu3 %v14497_v20  ;;  %v9114_v45 = vadd.s32 136, %v18166_v62  ;;  %v14495_v56 = vld [vmem:[%s18910_s6 + $0x148] sm:$0xff] }
 0x8f5   : > { %9411 = vst [vmem:[#allocation4 + $0x90] sm:$0xff] %v9090_v9  ;;  %v9029_v26 = vadd.f32 %v18144_v19, %v9008_v41  ;;  %v9432_v59 = vld [vmem:[#allocation4 + $0x87] sm:$0xff] }
 0x8f6   : > { %v18436_v63 = vpack.c.bf16 %v9432_v59, %v9431_v52  ;;  %v14516_v41 = vld [vmem:[%s18910_s6 + $0x1f0] sm:$0xff] }
 0x8f7   : > { %v9050_v47 = vmul.f32 %v18151_v11, %v9029_v26  ;;  %10690 = vmatpush.bf16.msrb.mxu1 %v14516_v41  ;;  %v9738_v20 = vld [vmem:[#allocation4 + $0x81] sm:$0xff]  ;;  %v8490_v41 = vadd.f32 %v18377_v18, %v18122_v14 }
 0x8f8   : > { %v8809_v34 = vpop.f32.mrf.mxu0  ;;  %9708 = vmatmul.bf16.gmra.mxu3 %v18436_v63  ;;  %10031 = vmatmul.bf16.gmra.mxu1 %v18436_v63  ;;  %v14505_v14 = vld [vmem:[%s18910_s6 + $0x198] sm:$0xff] }
 0x8f9   : > { %v9071_v30 = vadd.f32 %v18164_v38, %v9050_v47  ;;  %v8835_v40 = vadd.f32 %v8809_v34, %v8661_v27  ;;  %v8489_v47 = vadd.f32 %v18350_v7, %v18100_v24  ;;  %10346 = vmatpush.bf16.msrb.mxu3 %v14496_v37  ;;  %v14507_v24 = vld [vmem:[%s18910_s6 + $0x1a8] sm:$0xff]  ;;  %v9240_v7 = vand.u32 15, %v9114_v45 }
 0x8fa   : > { %10517 = vmatpush.bf16.msra.mxu0 %v14507_v24  ;;  %v14504_v24 = vld [vmem:[%s18910_s6 + $0x190] sm:$0xff] }
 0x8fb   : > { %v9091_v54 = vmax.f32 %v9071_v30, 0.0  ;;  %v9009_v48 = vadd.f32 %v8983_v16, %v8835_v40  ;;  %9857 = vmatmul.bf16.gmra.mxu0 %v18443_v55  ;;  %v8988_v34 = vpop.f32.mrf.mxu1  ;;  %v14515_v30 = vld [vmem:[%s18910_s6 + $0x1e8] sm:$0xff]  ;;  %vm18528_vm4 = vcmp.lt.s32.totalorder %v9240_v7, 10 }
 0x8fc   : > { %v9433_v23 = vld [vmem:[#allocation4 + $0x8f] sm:$0xff]  ;;  %10691 = vmatpush.bf16.msrb.mxu1 %v14515_v30  ;;  %vm18551_vm5 = vmpackc.low %vm18528_vm4, %vm14635_vm3 }
 0x8fd   : > { %v9392_v36 = vsel %vm18448_vm1, %v9091_v54, 0.0  ;;  %v9030_v39 = vadd.f32 %v18144_v19, %v9009_v48  ;;  %v18485_v59 = vpack.c.bf16 %v9091_v54, %v9090_v9  ;;  %v9739_v33 = vld [vmem:[#allocation4 + $0x89] sm:$0xff]  ;;  %v8663_v48 = vadd.f32 %v18348_v44, %v8489_v47  ;;  %10347 = vmatpush.bf16.msrb.mxu3 %v14495_v56 }
 0x8fe   : > { %9412 = vst [vmem:[#allocation4 + $0x98] sm:$0xff] %v9392_v36  ;;  %v14494_v36 = vld [vmem:[%s18910_s6 + $0x140] sm:$0xff]  ;;  %v18520_v44 = vpack.c.bf16 %v9739_v33, %v9738_v20  ;;  %v9676_v33 = vpop.f32.mrf.mxu3 }
 0x8ff   : > { %v9051_v16 = vmul.f32 %v18151_v11, %v9030_v39  ;;  %14574 = vmatmul.msk.bf16.gmra.mxu2 %vm18481_vm2, %v18485_v59 }
 0x900   : > { %v8811_v26 = vpop.f32.mrf.mxu0  ;;  %10692 = vmatpush.bf16.msrb.mxu1 %v14514_v8 }
 0x901   : > { %v9072_v1 = vadd.f32 %v18164_v38, %v9051_v16  ;;  %v8836_v53 = vadd.f32 %v8811_v26, %v8662_v15  ;;  %v14506_v16 = vld [vmem:[%s18910_s6 + $0x1a0] sm:$0xff]  ;;  %v14525_v15 = vld [vmem:[%s18910_s6 + $0x238] sm:$0xff]  ;;  %10348 = vmatpush.bf16.msrb.mxu3 %v14494_v36 }
 0x902   : > { %10863 = vmatpush.bf16.msra.mxu2 %v14525_v15  ;;  %10518 = vmatpush.bf16.msra.mxu0 %v14506_v16 }
 0x903   : > { %v9092_v9 = vmax.f32 %v9072_v1, 0.0  ;;  %v9010_v27 = vadd.f32 %v8985_v28, %v8836_v53  ;;  %v18534_v53 = vpop.f32.mrf.mxu2 }
 0x904   : > { %10693 = vmatpush.bf16.msrb.mxu1 %v14513_v42 }
 0x905   : > { %9413 = vst [vmem:[#allocation4 + $0xa0] sm:$0xff] %v9092_v9  ;;  %v9031_v40 = vadd.f32 %v18144_v19, %v9010_v27  ;;  %v9434_v13 = vld [vmem:[#allocation4 + $0x97] sm:$0xff]  ;;  %v8990_v27 = vpop.f32.mrf.mxu1 }
 0x906   : > { %v18507_v28 = vpack.c.bf16 %v9434_v13, %v9433_v23  ;;  %v14512_v23 = vld [vmem:[%s18910_s6 + $0x1d0] sm:$0xff]  ;;  %10519 = vmatpush.bf16.msra.mxu0 %v14505_v14  ;;  %v10073_v14 = vld [vmem:[#allocation4 + $0x28] sm:$0xff] }
 0x907   : > { %v9052_v54 = vmul.f32 %v18151_v11, %v9031_v40 }
 0x908   : > { %v8814_v39 = vpop.f32.mrf.mxu0  ;;  %9713 = vmatmul.bf16.gmra.mxu3 %v18507_v28  ;;  %10036 = vmatmul.bf16.gmra.mxu1 %v18507_v28 }
 0x909   : > { %v9073_v6 = vadd.f32 %v18164_v38, %v9052_v54  ;;  %v8837_v4 = vadd.f32 %v8814_v39, %v8663_v48  ;;  %10694 = vmatpush.bf16.msrb.mxu1 %v14512_v23 }
 0x90a   : > { %10520 = vmatpush.bf16.msra.mxu0 %v14504_v24  ;;  %v10072_v24 = vld [vmem:[#allocation4 + $0x20] sm:$0xff] }
 0x90b   : > { %v9093_v26 = vmax.f32 %v9073_v6, 0.0  ;;  %v9011_v1 = vadd.f32 %v8988_v34, %v8837_v4  ;;  %9862 = vmatmul.bf16.gmra.mxu0 %v18520_v44  ;;  %v8664_v34 = vadd.f32 %v18375_v46, %v8490_v41  ;;  %v14511_v6 = vld [vmem:[%s18910_s6 + $0x1c8] sm:$0xff] }
 0x90c   : > { %v9435_v36 = vld [vmem:[#allocation4 + $0x9f] sm:$0xff]  ;;  %v9740_v41 = vld [vmem:[#allocation4 + $0x91] sm:$0xff] }
 0x90d   : > { %v9394_v45 = vsel %vm18528_vm4, %v9093_v26, 0.0  ;;  %v9032_v47 = vadd.f32 %v18144_v19, %v9011_v1  ;;  %v18555_v40 = vpack.c.bf16 %v9093_v26, %v9092_v9  ;;  %v9116_v9 = vadd.s32 152, %v18166_v62  ;;  %v14503_v62 = vld [vmem:[%s18910_s6 + $0x188] sm:$0xff]  ;;  %10695 = vmatpush.bf16.msrb.mxu1 %v14511_v6 }
 0x90e   : > { %9414 = vst [vmem:[#allocation4 + $0xa8] sm:$0xff] %v9394_v45  ;;  %v9741_v15 = vld [vmem:[#allocation4 + $0x99] sm:$0xff]  ;;  %10521 = vmatpush.bf16.msra.mxu0 %v14503_v62  ;;  %v14510_v45 = vld [vmem:[%s18910_s6 + $0x1c0] sm:$0xff] }
 0x90f   : > { %v9053_v18 = vmul.f32 %v18151_v11, %v9032_v47  ;;  %14577 = vmatmul.msk.bf16.gmra.mxu2 %vm18551_vm5, %v18555_v40  ;;  %v9254_v4 = vand.u32 15, %v9116_v9  ;;  %v18589_v42 = vpack.c.bf16 %v9741_v15, %v9740_v41  ;;  %v10092_v9 = vpack.c.bf16 %v10073_v14, %v10072_v24  ;;  %v10768_v47 = vld [vmem:[#allocation4 + $0x31] sm:$0xff] }
 0x910   : > { %v8816_v56 = vpop.f32.mrf.mxu0 }
 0x911   : > { %v18564_v46 = vadd.f32 %v18164_v38, %v9053_v18  ;;  %v8838_v13 = vadd.f32 %v8816_v56, %v8664_v34  ;;  %vm18597_vm6 = vcmp.lt.s32.totalorder %v9254_v4, 10  ;;  %v14524_v56 = vld [vmem:[%s18910_s6 + $0x230] sm:$0xff]  ;;  %10696 = vmatpush.bf16.msrb.mxu1 %v14510_v45 }
 0x912   : > { %v9572_v48 = vpop.f32.mrf.mxu2  ;;  %10864 = vmatpush.bf16.msra.mxu2 %v14524_v56  ;;  %vm14620_vm7 = vmpackc.low %vm18597_vm6, %vm14635_vm3 }
 0x913   : > { %v9094_v7 = vmax.f32 %v18564_v46, 0.0  ;;  %v9012_v54 = vadd.f32 %v8990_v27, %v8838_v13 }
 0x915   : > { %9415 = vst [vmem:[#allocation4 + $0xb0] sm:$0xff] %v9094_v7  ;;  %v9033_v39 = vadd.f32 %v18144_v19, %v9012_v54  ;;  %v10002_v20 = vpop.f32.mrf.mxu1  ;;  %v9436_v8 = vld [vmem:[#allocation4 + $0xa7] sm:$0xff]  ;;  %v9677_v54 = vadd.f32 %v9676_v33, %v18534_v53 }
 0x916   : > { %v18580_v16 = vpack.c.bf16 %v9436_v8, %v9435_v36  ;;  %v9742_v53 = vld [vmem:[#allocation4 + $0xa1] sm:$0xff] }
 0x917   : > { %v9054_v37 = vmul.f32 %v18151_v11, %v9033_v39  ;;  %v14502_v11 = vld [vmem:[%s18910_s6 + $0x180] sm:$0xff] }
 0x918   : > { %9718 = vmatmul.bf16.gmra.mxu3 %v18580_v16  ;;  %v9828_v19 = vpop.f32.mrf.mxu0  ;;  %10041 = vmatmul.bf16.gmra.mxu1 %v18580_v16 }
 0x919   : > { %v18586_v26 = vadd.f32 %v18164_v38, %v9054_v37  ;;  %v9878_v1 = vadd.f32 %v9828_v19, %v18397_v61  ;;  %10522 = vmatpush.bf16.msra.mxu0 %v14502_v11 }
 0x91a   : > { %v9574_v61 = vpop.f32.mrf.mxu2 }
 0x91b   : > { %v9095_v38 = vmax.f32 %v18586_v26, 0.0  ;;  %v9679_v27 = vpop.f32.mrf.mxu3  ;;  %9867 = vmatmul.bf16.gmra.mxu0 %v18589_v42  ;;  %v18603_v18 = vadd.f32 %v10002_v20, %v9878_v1 }
 0x91c   : > { %v9680_v34 = vadd.f32 %v9679_v27, %v9572_v48  ;;  %v9916_v4 = vld [vmem:[#allocation4 + $0xaf] sm:$0xff]  ;;  %v10075_v27 = vld [vmem:[#allocation4 + $0x38] sm:$0xff] }
 0x91d   : > { %v9396_v23 = vsel %vm18597_vm6, %v9095_v38, 0.0  ;;  %v10004_v13 = vpop.f32.mrf.mxu1  ;;  %v9743_v19 = vld [vmem:[#allocation4 + $0xa9] sm:$0xff]  ;;  %v14621_v30 = vpack.c.bf16 %v9095_v38, %v9094_v7  ;;  %v10769_v7 = vld [vmem:[#allocation4 + $0x39] sm:$0xff] }
 0x91e   : > { %9416 = vst [vmem:[#allocation4 + $0xb8] sm:$0xff] %v9396_v23  ;;  %v18619_v1 = vpack.c.bf16 %v9743_v19, %v9742_v53  ;;  %v10074_v23 = vld [vmem:[#allocation4 + $0x30] sm:$0xff]  ;;  %v10788_v38 = vpack.c.bf16 %v10769_v7, %v10768_v47 }
 0x91f   : > { %10175 = vmatmul.bf16.vlgmr.msrb.gmra.mxu2 %v10092_v9  ;;  %v10780_v47 = vld [vmem:[#allocation4 + $0x91] sm:$0xff] }
 0x920   : > { %v9830_v36 = vpop.f32.mrf.mxu0 }
 0x921   : > { %v9879_v48 = vadd.f32 %v9830_v36, %v9677_v54 }
 0x922   : > { %v9577_v20 = vpop.f32.mrf.mxu2 }
 0x923   : > { %v9681_v39 = vpop.f32.mrf.mxu3  ;;  %v18613_v8 = vadd.f32 %v10004_v13, %v9879_v48  ;;  %v10093_v13 = vpack.c.bf16 %v10075_v27, %v10074_v23 }
 0x924   : > { %v9682_v6 = vadd.f32 %v9681_v39, %v9574_v61 }
 0x925   : > { %v10007_v62 = vpop.f32.mrf.mxu1  ;;  %v9917_v15 = vld [vmem:[#allocation4 + $0xb7] sm:$0xff] }
 0x926   : > { %v18615_v37 = vpack.c.bf16 %v9917_v15, %v9916_v4  ;;  %v10076_v15 = vld [vmem:[#allocation4 + $0x40] sm:$0xff] }
 0x928   : > { %v9833_v41 = vpop.f32.mrf.mxu0  ;;  %10046 = vmatmul.bf16.gmra.mxu1 %v18615_v37  ;;  %10349 = vmatmul.bf16.vlgmr.msrb.gmra.mxu3 %v18232_v35  ;;  %v14523_v35 = vld [vmem:[%s18910_s6 + $0x228] sm:$0xff] }
 0x929   : > { %v9880_v33 = vadd.f32 %v9833_v41, %v9680_v34  ;;  %10865 = vmatpush.bf16.msra.mxu2 %v14523_v35  ;;  %v10078_v35 = vld [vmem:[#allocation4 + $0x50] sm:$0xff] }
 0x92a   : > { %v9579_v11 = vpop.f32.mrf.mxu2 }
 0x92b   : > { %v9684_v45 = vpop.f32.mrf.mxu3  ;;  %9872 = vmatmul.bf16.gmra.mxu0 %v18619_v1  ;;  %v18622_v61 = vadd.f32 %v10007_v62, %v9880_v33 }
 0x92c   : > { %v9685_v14 = vadd.f32 %v9684_v45, %v9577_v20  ;;  %v14579_v45 = vpack.c.bf16 %v18236_v29, %v10076_v15 }
 0x92d   : > { %v10009_v56 = vpop.f32.mrf.mxu1 }
 0x92f   : > { %10180 = vmatmul.bf16.gmra.mxu2 %v10093_v13 }
 0x930   : > { %v9835_v24 = vpop.f32.mrf.mxu0 }
 0x931   : > { %v9881_v9 = vadd.f32 %v9835_v24, %v9682_v6 }
 0x932   : > { %v9582_v54 = vpop.f32.mrf.mxu2 }
 0x933   : > { %v9686_v34 = vpop.f32.mrf.mxu3  ;;  %v18627_v36 = vadd.f32 %v10009_v56, %v9881_v9 }
 0x934   : > { %v9687_v48 = vadd.f32 %v9686_v34, %v9579_v11 }
 0x935   : > { %v10012_v39 = vpop.f32.mrf.mxu1 }
 0x938   : > { %v9838_v62 = vpop.f32.mrf.mxu0  ;;  %10354 = vmatmul.bf16.gmra.mxu3 %v18274_v3  ;;  %10697 = vmatmul.bf16.vlgmr.msrb.gmra.mxu1 %v10093_v13 }
 0x939   : > { %v9882_v20 = vadd.f32 %v9838_v62, %v9685_v14  ;;  %v14585_v62 = vpack.c.bf16 %v18278_v49, %v10078_v35  ;;  %v14521_v49 = vld [vmem:[%s18910_s6 + $0x218] sm:$0xff] }
 0x93a   : > { %v9584_v6 = vpop.f32.mrf.mxu2 }
 0x93b   : > { %v9689_v4 = vpop.f32.mrf.mxu3  ;;  %10523 = vmatmul.bf16.vlgmr.msra.gmra.mxu0 %v18225_v51  ;;  %v18631_v19 = vadd.f32 %v10012_v39, %v9882_v20  ;;  %v14522_v51 = vld [vmem:[%s18910_s6 + $0x220] sm:$0xff] }
 0x93c   : > { %v9690_v41 = vadd.f32 %v9689_v4, %v9582_v54  ;;  %10866 = vmatpush.bf16.msra.mxu2 %v14522_v51 }
 0x93d   : > { %v10014_v53 = vpop.f32.mrf.mxu1 }
 0x93f   : > { %14580 = vmatmul.msk.bf16.gmra.mxu2 %vm18251_vm8, %v14579_v45 }
 0x940   : > { %v9840_v33 = vpop.f32.mrf.mxu0  ;;  %10867 = vmatpush.bf16.msra.mxu2 %v14521_v49 }
 0x941   : > { %v9883_v11 = vadd.f32 %v9840_v33, %v9687_v48 }
 0x942   : > { %v9587_v3 = vpop.f32.mrf.mxu2 }
 0x943   : > { %v9691_v27 = vpop.f32.mrf.mxu3  ;;  %v18636_v56 = vadd.f32 %v10014_v53, %v9883_v11 }
 0x944   : > { %v9692_v14 = vadd.f32 %v9691_v27, %v9584_v6 }
 0x945   : > { %v10017_v23 = vpop.f32.mrf.mxu1 }
 0x948   : > { %v9843_v13 = vpop.f32.mrf.mxu0  ;;  %10359 = vmatmul.bf16.gmra.mxu3 %v18312_v43  ;;  %14583 = vmatmul.msk.bf16.gmra.mxu1 %vm18251_vm8, %v14579_v45 }
 0x949   : > { %v9884_v29 = vadd.f32 %v9843_v13, %v9690_v41 }
 0x94a   : > { %v9589_v9 = vpop.f32.mrf.mxu2 }
 0x94b   : > { %v9694_v24 = vpop.f32.mrf.mxu3  ;;  %10528 = vmatmul.bf16.gmra.mxu0 %v18263_v12  ;;  %v18645_v34 = vadd.f32 %v10017_v23, %v9884_v29 }
 0x94c   : > { %v9695_v54 = vadd.f32 %v9694_v24, %v9587_v3 }
 0x94d   : > { %v10019_v48 = vpop.f32.mrf.mxu1 }
 0x94f   : > { %14586 = vmatmul.msk.bf16.gmra.mxu2 %vm18286_vm10, %v14585_v62 }
 0x950   : > { %v9845_v39 = vpop.f32.mrf.mxu0 }
 0x951   : > { %v9885_v43 = vadd.f32 %v9845_v39, %v9692_v14  ;;  %v10600_v14 = vld [vmem:[#allocation4 + $0x60] sm:$0xff] }
 0x952   : > { %v9592_v21 = vpop.f32.mrf.mxu2  ;;  %v14594_v24 = vpack.c.bf16 %v18316_v25, %v10600_v14  ;;  %v14520_v39 = vld [vmem:[%s18910_s6 + $0x210] sm:$0xff] }
 0x953   : > { %v9696_v20 = vpop.f32.mrf.mxu3  ;;  %v18650_v4 = vadd.f32 %v10019_v48, %v9885_v43  ;;  %10868 = vmatpush.bf16.msra.mxu2 %v14520_v39 }
 0x954   : > { %v9697_v6 = vadd.f32 %v9696_v20, %v9589_v9 }
 0x955   : > { %v10022_v15 = vpop.f32.mrf.mxu1 }
 0x957   : > { %10869 = vmatpush.bf16.msra.mxu2 %v14519_v2 }
 0x958   : > { %v9848_v12 = vpop.f32.mrf.mxu0  ;;  %10364 = vmatmul.bf16.gmra.mxu3 %v18357_v57  ;;  %14589 = vmatmul.msk.bf16.gmra.mxu1 %vm18286_vm10, %v14585_v62 }
 0x959   : > { %v9886_v41 = vadd.f32 %v9848_v12, %v9695_v54 }
 0x95a   : > { %v9594_v33 = vpop.f32.mrf.mxu2 }
 0x95b   : > { %v9699_v53 = vpop.f32.mrf.mxu3  ;;  %10533 = vmatmul.bf16.gmra.mxu0 %v18305_v60  ;;  %v18659_v45 = vadd.f32 %v10022_v15, %v9886_v41 }
 0x95c   : > { %v9700_v11 = vadd.f32 %v9699_v53, %v9592_v21 }
 0x95d   : > { %v10024_v27 = vpop.f32.mrf.mxu1 }
 0x95f   : > { %14592 = vmatmul.msk.bf16.gmra.mxu2 %vm18328_vm12, %v18333_v31 }
 0x960   : > { %v9850_v3 = vpop.f32.mrf.mxu0 }
 0x961   : > { %v9887_v22 = vadd.f32 %v9850_v3, %v9697_v6 }
 0x962   : > { %v9597_v51 = vpop.f32.mrf.mxu2 }
 0x963   : > { %v9701_v57 = vpop.f32.mrf.mxu3  ;;  %v18664_v23 = vadd.f32 %v10024_v27, %v9887_v22 }
 0x964   : > { %v9702_v13 = vadd.f32 %v9701_v57, %v9594_v33 }
 0x965   : > { %v10027_v29 = vpop.f32.mrf.mxu1 }
 0x968   : > { %v9853_v60 = vpop.f32.mrf.mxu0  ;;  %10369 = vmatmul.bf16.gmra.mxu3 %v18391_v5  ;;  %14595 = vmatmul.msk.bf16.gmra.mxu1 %vm18328_vm12, %v14594_v24 }
 0x969   : > { %v9888_v9 = vadd.f32 %v9853_v60, %v9700_v11 }
 0x96a   : > { %v9599_v31 = vpop.f32.mrf.mxu2 }
 0x96b   : > { %v9704_v35 = vpop.f32.mrf.mxu3  ;;  %10538 = vmatmul.bf16.gmra.mxu0 %v18346_v0  ;;  %v18671_v54 = vadd.f32 %v10027_v29, %v9888_v9 }
 0x96c   : > { %v9705_v48 = vadd.f32 %v9704_v35, %v9597_v51 }
 0x96d   : > { %v10029_v62 = vpop.f32.mrf.mxu1 }
 0x96f   : > { %14598 = vmatmul.msk.bf16.gmra.mxu2 %vm18366_vm14, %v18370_v32 }
 0x970   : > { %v9855_v5 = vpop.f32.mrf.mxu0 }
 0x971   : > { %v9889_v25 = vadd.f32 %v9855_v5, %v9702_v13 }
 0x972   : > { %v9602_v43 = vpop.f32.mrf.mxu2 }
 0x973   : > { %v9706_v10 = vpop.f32.mrf.mxu3  ;;  %v18679_v20 = vadd.f32 %v10029_v62, %v9889_v25 }
 0x974   : > { %v9707_v0 = vadd.f32 %v9706_v10, %v9599_v31 }
 0x975   : > { %v10032_v21 = vpop.f32.mrf.mxu1 }
 0x978   : > { %v9858_v6 = vpop.f32.mrf.mxu0  ;;  %10374 = vmatmul.bf16.gmra.mxu3 %v18443_v55  ;;  %14601 = vmatmul.msk.bf16.gmra.mxu1 %vm18366_vm14, %v18370_v32 }
 0x979   : > { %v9890_v15 = vadd.f32 %v9858_v6, %v9705_v48 }
 0x97a   : > { %v9604_v41 = vpop.f32.mrf.mxu2 }
 0x97b   : > { %v9709_v12 = vpop.f32.mrf.mxu3  ;;  %10543 = vmatmul.bf16.gmra.mxu0 %v18384_v17  ;;  %v18686_v49 = vadd.f32 %v10032_v21, %v9890_v15 }
 0x97c   : > { %v9710_v53 = vadd.f32 %v9709_v12, %v9602_v43 }
 0x97d   : > { %v10034_v33 = vpop.f32.mrf.mxu1 }
 0x97f   : > { %14604 = vmatmul.msk.bf16.gmra.mxu2 %vm18416_vm0, %v18420_v58 }
 0x980   : > { %v9860_v11 = vpop.f32.mrf.mxu0 }
 0x981   : > { %v9891_v27 = vadd.f32 %v9860_v11, %v9707_v0 }
 0x982   : > { %v9607_v55 = vpop.f32.mrf.mxu2 }
 0x983   : > { %v9711_v32 = vpop.f32.mrf.mxu3  ;;  %v18694_v3 = vadd.f32 %v10034_v33, %v9891_v27 }
 0x984   : > { %v9712_v17 = vadd.f32 %v9711_v32, %v9604_v41  ;;  %v10265_v32 = vld [vmem:[#allocation4 + $0xb9] sm:$0xff] }
 0x985   : > { %v10037_v22 = vpop.f32.mrf.mxu1 }
 0x988   : > { %v9863_v57 = vpop.f32.mrf.mxu0  ;;  %10379 = vmatmul.bf16.gmra.mxu3 %v18520_v44  ;;  %14607 = vmatmul.msk.bf16.gmra.mxu1 %vm18416_vm0, %v18420_v58  ;;  %v14518_v58 = vld [vmem:[%s18910_s6 + $0x200] sm:$0xff] }
 0x989   : > { %v9892_v14 = vadd.f32 %v9863_v57, %v9710_v53  ;;  %10870 = vmatpush.bf16.msra.mxu2 %v14518_v58  ;;  %v10773_v58 = vld [vmem:[#allocation4 + $0x59] sm:$0xff] }
 0x98a   : > { %v9609_v13 = vpop.f32.mrf.mxu2 }
 0x98b   : > { %v9714_v51 = vpop.f32.mrf.mxu3  ;;  %10548 = vmatmul.bf16.gmra.mxu0 %v18436_v63  ;;  %v18701_v29 = vadd.f32 %v10037_v22, %v9892_v14 }
 0x98c   : > { %v9715_v60 = vadd.f32 %v9714_v51, %v9607_v55 }
 0x98d   : > { %v10039_v24 = vpop.f32.mrf.mxu1 }
 0x98f   : > { %14610 = vmatmul.msk.bf16.gmra.mxu2 %vm18481_vm2, %v18485_v59 }
 0x990   : > { %v9865_v9 = vpop.f32.mrf.mxu0 }
 0x991   : > { %v9893_v35 = vadd.f32 %v9865_v9, %v9712_v17  ;;  %v10771_v9 = vld [vmem:[#allocation4 + $0x49] sm:$0xff] }
 0x992   : > { %v9612_v31 = vpop.f32.mrf.mxu2 }
 0x993   : > { %v9716_v44 = vpop.f32.mrf.mxu3  ;;  %v18706_v48 = vadd.f32 %v10039_v24, %v9893_v35 }
 0x994   : > { %v9717_v50 = vadd.f32 %v9716_v44, %v9609_v13  ;;  %v10438_v13 = vld [vmem:[#allocation4 + $0xbf] sm:$0xff] }
 0x995   : > { %v10042_v63 = vpop.f32.mrf.mxu1 }
 0x998   : > { %v9868_v39 = vpop.f32.mrf.mxu0  ;;  %10384 = vmatmul.bf16.gmra.mxu3 %v18589_v42  ;;  %14613 = vmatmul.msk.bf16.gmra.mxu1 %vm18481_vm2, %v18485_v59 }
 0x999   : > { %v9894_v62 = vadd.f32 %v9868_v39, %v9715_v60  ;;  %v10439_v60 = vld [vmem:[#allocation4 + $0xc7] sm:$0xff]  ;;  %v10772_v39 = vld [vmem:[#allocation4 + $0x51] sm:$0xff] }
 0x99a   : > { %v9614_v25 = vpop.f32.mrf.mxu2  ;;  %v10449_v24 = vpack.c.bf16 %v10439_v60, %v10438_v13 }
 0x99b   : > { %v9719_v5 = vpop.f32.mrf.mxu3  ;;  %10553 = vmatmul.bf16.gmra.mxu0 %v18507_v28  ;;  %v18716_v10 = vadd.f32 %v10042_v63, %v9894_v62  ;;  %v10790_v62 = vpack.c.bf16 %v10773_v58, %v10772_v39 }
 0x99c   : > { %v9720_v43 = vadd.f32 %v9719_v5, %v9612_v31 }
 0x99d   : > { %v10044_v0 = vpop.f32.mrf.mxu1 }
 0x99f   : > { %14616 = vmatmul.msk.bf16.gmra.mxu2 %vm18551_vm5, %v18555_v40 }
 0x9a0   : > { %v9870_v21 = vpop.f32.mrf.mxu0 }
 0x9a1   : > { %v9895_v6 = vadd.f32 %v9870_v21, %v9717_v50  ;;  %v10774_v21 = vld [vmem:[#allocation4 + $0x61] sm:$0xff] }
 0x9a2   : > { %v10176_v15 = vpop.f32.mrf.mxu2 }
 0x9a3   : > { %v9721_v42 = vpop.f32.mrf.mxu3  ;;  %v18721_v12 = vadd.f32 %v10044_v0, %v9895_v6  ;;  %v18724_v59 = vadd.f32 %v10176_v15, %v18603_v18  ;;  %v10777_v15 = vld [vmem:[#allocation4 + $0x79] sm:$0xff] }
 0x9a4   : > { %v9722_v52 = vadd.f32 %v9721_v42, %v9614_v25 }
 0x9a5   : > { %v10047_v28 = vpop.f32.mrf.mxu1 }
 0x9a8   : > { %v9873_v41 = vpop.f32.mrf.mxu0  ;;  %10389 = vmatmul.bf16.gmra.mxu3 %v18619_v1  ;;  %14619 = vmatmul.msk.bf16.gmra.mxu1 %vm18551_vm5, %v18555_v40 }
 0x9a9   : > { %v9896_v53 = vadd.f32 %v9873_v41, %v9720_v43  ;;  %v10775_v43 = vld [vmem:[#allocation4 + $0x69] sm:$0xff] }
 0x9aa   : > { %v10178_v33 = vpop.f32.mrf.mxu2 }
 0x9ab   : > { %10558 = vmatmul.bf16.gmra.mxu0 %v18580_v16  ;;  %v18731_v11 = vadd.f32 %v10047_v28, %v9896_v53  ;;  %v18734_v27 = vadd.f32 %v10178_v33, %v18613_v8  ;;  %v10264_v16 = vld [vmem:[#allocation4 + $0xb1] sm:$0xff]  ;;  %v10779_v33 = vld [vmem:[#allocation4 + $0x89] sm:$0xff] }
 0x9ac   : > { %v18748_v22 = vpack.c.bf16 %v10265_v32, %v10264_v16  ;;  %v10776_v28 = vld [vmem:[#allocation4 + $0x71] sm:$0xff] }
 0x9ad   : > { %v10049_v18 = vpop.f32.mrf.mxu1 }
 0x9af   : > { %14622 = vmatmul.msk.bf16.gmra.mxu2 %vm14620_vm7, %v14621_v30 }
 0x9b0   : > { %v9875_v2 = vpop.f32.mrf.mxu0 }
 0x9b1   : > { %v9897_v40 = vadd.f32 %v9875_v2, %v9722_v52 }
 0x9b2   : > { %v10181_v55 = vpop.f32.mrf.mxu2 }
 0x9b3   : > { %v18743_v17 = vadd.f32 %v10049_v18, %v9897_v40  ;;  %v18746_v8 = vadd.f32 %v10181_v55, %v18622_v61  ;;  %v14550_v61 = vld [vmem:[#allocation3 + $0xe0] sm:$0xff]  ;;  %v10350_v40 = vpop.f32.mrf.mxu3 }
 0x9b4   : > { %v10623_v51 = vpack.c.bf16 %v14550_v61, %v14550_v61  ;;  %v10400_v58 = vadd.f32 %v10350_v40, %v18724_v59  ;;  %v18815_v59 = vld [vmem:[%s18911_s7 + $0x8] ss:$0 sm:$0xff] }
 0x9b5   : > { %v10698_v32 = vpop.f32.mrf.mxu1 }
 0x9b8   : > { %10394 = vmatmul.bf16.gmra.mxu3 %v18748_v22  ;;  %14625 = vmatmul.msk.bf16.gmra.mxu1 %vm14620_vm7, %v14621_v30  ;;  %v10778_v30 = vld [vmem:[#allocation4 + $0x81] sm:$0xff]  ;;  %v10524_v16 = vpop.f32.mrf.mxu0 }
 0x9ba   : > { %v10183_v46 = vpop.f32.mrf.mxu2 }
 0x9bb   : > { %10563 = vmatmul.bf16.gmra.mxu0 %v18615_v37  ;;  %v18753_v26 = vadd.f32 %v10183_v46, %v18627_v36  ;;  %v10770_v36 = vld [vmem:[#allocation4 + $0x41] sm:$0xff]  ;;  %v10781_v46 = vld [vmem:[#allocation4 + $0x99] sm:$0xff]  ;;  %v10352_v7 = vpop.f32.mrf.mxu3 }
 0x9bc   : > { %v10789_v44 = vpack.c.bf16 %v10771_v9, %v10770_v36 }
 0x9bf   : > { %10871 = vmatmul.bf16.vlgmr.msra.gmra.mxu2 %v10788_v38  ;;  %v10794_v38 = vpack.c.bf16 %v10781_v46, %v10780_v47 }
 0x9c2   : > { %v10186_v57 = vpop.f32.mrf.mxu2 }
 0x9c3   : > { %v18756_v14 = vadd.f32 %v10186_v57, %v18631_v19  ;;  %v10355_v13 = vpop.f32.mrf.mxu3 }
 0x9c8   : > { %10742 = vmatmul.bf16.gmra.mxu1 %v10623_v51  ;;  %v10700_v51 = vpop.f32.mrf.mxu1 }
 0x9ca   : > { %v10188_v37 = vpop.f32.mrf.mxu2 }
 0x9cb   : > { %10568 = vmatmul.bf16.gmra.mxu0 %v10449_v24  ;;  %v18759_v35 = vadd.f32 %v10188_v37, %v18636_v56 }
 0x9cf   : > { %10876 = vmatmul.bf16.gmra.mxu2 %v10789_v44 }
 0x9d0   : > { %v10703_v37 = vpop.f32.mrf.mxu1 }
 0x9d2   : > { %v10191_v31 = vpop.f32.mrf.mxu2 }
 0x9d3   : > { %v18762_v50 = vadd.f32 %v10191_v31, %v18645_v34  ;;  %v10791_v34 = vpack.c.bf16 %v10775_v43, %v10774_v21  ;;  %v10401_v43 = vadd.f32 %v10352_v7, %v18734_v27  ;;  %v10786_v27 = vld [vmem:[#allocation4 + $0xc1] sm:$0xff] }
 0x9d8   : > { %v10705_v31 = vpop.f32.mrf.mxu1 }
 0x9da   : > { %v10193_v19 = vpop.f32.mrf.mxu2 }
 0x9db   : > { %v18765_v63 = vadd.f32 %v10193_v19, %v18650_v4 }
 0x9df   : > { %10881 = vmatmul.bf16.gmra.mxu2 %v10790_v62  ;;  %v10574_v62 = vadd.f32 %v10524_v16, %v10400_v58 }
 0x9e2   : > { %v10196_v5 = vpop.f32.mrf.mxu2 }
 0x9e3   : > { %v18768_v25 = vadd.f32 %v10196_v5, %v18659_v45  ;;  %v10792_v45 = vpack.c.bf16 %v10777_v15, %v10776_v28  ;;  %v18809_v5 = vld [vmem:[%s18911_s7 + $0x7] ss:$0 sm:$0xff]  ;;  %v10787_v15 = vld [vmem:[#allocation4 + $0xc9] sm:$0xff] }
 0x9ea   : > { %v10198_v56 = vpop.f32.mrf.mxu2 }
 0x9eb   : > { %v18771_v0 = vadd.f32 %v10198_v56, %v18664_v23 }
 0x9ef   : > { %10886 = vmatmul.bf16.gmra.mxu2 %v10791_v34 }
 0x9f2   : > { %v10201_v6 = vpop.f32.mrf.mxu2 }
 0x9f3   : > { %v18774_v42 = vadd.f32 %v10201_v6, %v18671_v54  ;;  %v10793_v54 = vpack.c.bf16 %v10779_v33, %v10778_v30  ;;  %v10797_v30 = vpack.c.bf16 %v10787_v15, %v10786_v27 }
 0x9fa   : > { %v10203_v4 = vpop.f32.mrf.mxu2 }
 0x9fb   : > { %v18777_v52 = vadd.f32 %v10203_v4, %v18679_v20 }
 0x9ff   : > { %10891 = vmatmul.bf16.gmra.mxu2 %v10792_v45 }
 0xa02   : > { %v10206_v41 = vpop.f32.mrf.mxu2 }
 0xa03   : > { %v18780_v53 = vadd.f32 %v10206_v41, %v18686_v49 }
 0xa0a   : > { %v10208_v23 = vpop.f32.mrf.mxu2 }
 0xa0b   : > { %v18783_v2 = vadd.f32 %v10208_v23, %v18694_v3  ;;  %v10526_v3 = vpop.f32.mrf.mxu0  ;;  %v10402_v23 = vadd.f32 %v10355_v13, %v18746_v8 }
 0xa0c   : > { %v10575_v34 = vadd.f32 %v10526_v3, %v10401_v43 }
 0xa0e   : > { %v10749_v45 = vadd.f32 %v10700_v51, %v10575_v34 }
 0xa0f   : > { %10896 = vmatmul.bf16.gmra.mxu2 %v10793_v54 }
 0xa12   : > { %v10211_v18 = vpop.f32.mrf.mxu2 }
 0xa13   : > { %v18786_v20 = vadd.f32 %v10211_v18, %v18701_v29  ;;  %v10529_v29 = vpop.f32.mrf.mxu0 }
 0xa14   : > { %v10576_v40 = vadd.f32 %v10529_v29, %v10402_v23 }
 0xa16   : > { %v10750_v7 = vadd.f32 %v10703_v37, %v10576_v40 }
 0xa1a   : > { %v10213_v55 = vpop.f32.mrf.mxu2 }
 0xa1b   : > { %v18789_v49 = vadd.f32 %v10213_v55, %v18706_v48  ;;  %v10357_v48 = vpop.f32.mrf.mxu3  ;;  %v10531_v9 = vpop.f32.mrf.mxu0 }
 0xa1f   : > { %10901 = vmatmul.bf16.gmra.mxu2 %v10794_v38  ;;  %v10403_v38 = vadd.f32 %v10357_v48, %v18753_v26 }
 0xa21   : > { %v10577_v3 = vadd.f32 %v10531_v9, %v10403_v38 }
 0xa22   : > { %v10216_v57 = vpop.f32.mrf.mxu2 }
 0xa23   : > { %v18792_v61 = vadd.f32 %v10216_v57, %v18716_v10  ;;  %v10360_v10 = vpop.f32.mrf.mxu3 }
 0xa2a   : > { %v10218_v60 = vpop.f32.mrf.mxu2 }
 0xa2b   : > { %v18795_v24 = vadd.f32 %v10218_v60, %v18721_v12  ;;  %v10534_v12 = vpop.f32.mrf.mxu0 }
 0xa2f   : > { %10906 = vmatmul.bf16.gmra.mxu2 %v18619_v1  ;;  %v10748_v1 = vadd.f32 %v10698_v32, %v10574_v62  ;;  %v10404_v62 = vadd.f32 %v10360_v10, %v18756_v14 }
 0xa32   : > { %v10221_v36 = vpop.f32.mrf.mxu2 }
 0xa33   : > { %v18799_v44 = vadd.f32 %v10221_v36, %v18731_v11  ;;  %v10708_v11 = vpop.f32.mrf.mxu1  ;;  %v10536_v6 = vpop.f32.mrf.mxu0  ;;  %v10751_v36 = vadd.f32 %v10705_v31, %v10577_v3 }
 0xa3a   : > { %v10223_v19 = vpop.f32.mrf.mxu2 }
 0xa3b   : > { %v18803_v39 = vadd.f32 %v10223_v19, %v18743_v17  ;;  %v10362_v17 = vpop.f32.mrf.mxu3  ;;  %v10710_v54 = vpop.f32.mrf.mxu1 }
 0xa3c   : > { %v10539_v55 = vpop.f32.mrf.mxu0 }
 0xa3f   : > { %10911 = vmatmul.bf16.gmra.mxu2 %v18748_v22 }
 0xa42   : > { %v10872_v56 = vpop.f32.mrf.mxu2 }
 0xa43   : > { %v10922_v21 = vadd.f32 %v10872_v56, %v10748_v1  ;;  %v10365_v16 = vpop.f32.mrf.mxu3  ;;  %v10713_v51 = vpop.f32.mrf.mxu1  ;;  %v10578_v1 = vadd.f32 %v10534_v12, %v10404_v62 }
 0xa44   : > { %v10541_v19 = vpop.f32.mrf.mxu0 }
 0xa45   : > { %v10943_v22 = vmul.f32 %v18809_v5, %v10922_v21  ;;  %v10752_v43 = vadd.f32 %v10708_v11, %v10578_v1 }
 0xa47   : > { %v10964_v4 = vadd.f32 %v18815_v59, %v10943_v22  ;;  %v10405_v22 = vadd.f32 %v10362_v17, %v18759_v35 }
 0xa49   : > { %v10984_v28 = vmax.f32 %v10964_v4, 0.0  ;;  %v10579_v27 = vadd.f32 %v10536_v6, %v10405_v22 }
 0xa4a   : > { %v10874_v41 = vpop.f32.mrf.mxu2 }
 0xa4b   : > { %11004 = vst [vmem:[%s18823_s26] sm:$0xff] %v10984_v28  ;;  %v10923_v33 = vadd.f32 %v10874_v41, %v10749_v45  ;;  %v10367_v29 = vpop.f32.mrf.mxu3  ;;  %v10715_v9 = vpop.f32.mrf.mxu1  ;;  %v10753_v15 = vadd.f32 %v10710_v54, %v10579_v27  ;;  %v10406_v41 = vadd.f32 %v10365_v16, %v18762_v50 }
 0xa4c   : > { %v10544_v4 = vpop.f32.mrf.mxu0 }
 0xa4d   : > { %v10944_v18 = vmul.f32 %v18809_v5, %v10923_v33  ;;  %v10580_v33 = vadd.f32 %v10539_v55, %v10406_v41 }
 0xa4f   : > { %v10965_v32 = vadd.f32 %v18815_v59, %v10944_v18  ;;  %10916 = vmatmul.bf16.gmra.mxu2 %v10797_v30  ;;  %v10754_v40 = vadd.f32 %v10713_v51, %v10580_v33 }
 0xa51   : > { %v10985_v46 = vmax.f32 %v10965_v32, 0.0  ;;  %v10407_v32 = vadd.f32 %v10367_v29, %v18765_v63 }
 0xa52   : > { %v10877_v47 = vpop.f32.mrf.mxu2 }
 0xa53   : > { %11005 = vst [vmem:[%s18823_s26 + $0x8] sm:$0xff] %v10985_v46  ;;  %v10924_v8 = vadd.f32 %v10877_v47, %v10750_v7  ;;  %v10370_v21 = vpop.f32.mrf.mxu3  ;;  %v10718_v28 = vpop.f32.mrf.mxu1  ;;  %v10581_v7 = vadd.f32 %v10541_v19, %v10407_v32 }
 0xa54   : > { %v10546_v17 = vpop.f32.mrf.mxu0 }
 0xa55   : > { %v10945_v57 = vmul.f32 %v18809_v5, %v10924_v8  ;;  %v10755_v8 = vadd.f32 %v10715_v9, %v10581_v7 }
 0xa57   : > { %v10966_v13 = vadd.f32 %v18815_v59, %v10945_v57  ;;  %v10408_v57 = vadd.f32 %v10370_v21, %v18768_v25 }
 0xa59   : > { %v10986_v60 = vmax.f32 %v10966_v13, 0.0  ;;  %v10582_v13 = vadd.f32 %v10544_v4, %v10408_v57 }
 0xa5a   : > { %v10879_v58 = vpop.f32.mrf.mxu2 }
 0xa5b   : > { %11006 = vst [vmem:[%s18823_s26 + $0x10] sm:$0xff] %v10986_v60  ;;  %v10925_v37 = vadd.f32 %v10879_v58, %v10751_v36  ;;  %v10372_v23 = vpop.f32.mrf.mxu3  ;;  %v10720_v46 = vpop.f32.mrf.mxu1  ;;  %v10756_v58 = vadd.f32 %v10718_v28, %v10582_v13 }
 0xa5c   : > { %v10549_v47 = vpop.f32.mrf.mxu0  ;;  %v10409_v1 = vadd.f32 %v10372_v23, %v18771_v0 }
 0xa5d   : > { %v10946_v26 = vmul.f32 %v18809_v5, %v10925_v37 }
 0xa5f   : > { %v10967_v48 = vadd.f32 %v18815_v59, %v10946_v26 }
 0xa61   : > { %v10987_v56 = vmax.f32 %v10967_v48, 0.0  ;;  %v10583_v48 = vadd.f32 %v10546_v17, %v10409_v1 }
 0xa62   : > { %v10882_v34 = vpop.f32.mrf.mxu2 }
 0xa63   : > { %11007 = vst [vmem:[%s18823_s26 + $0x18] sm:$0xff] %v10987_v56  ;;  %v10926_v31 = vadd.f32 %v10882_v34, %v10752_v43  ;;  %v10375_v16 = vpop.f32.mrf.mxu3  ;;  %v10723_v29 = vpop.f32.mrf.mxu1  ;;  %v10757_v21 = vadd.f32 %v10720_v46, %v10583_v48 }
 0xa64   : > { %v10551_v62 = vpop.f32.mrf.mxu0 }
 0xa65   : > { %v10947_v14 = vmul.f32 %v18809_v5, %v10926_v31  ;;  %v10410_v31 = vadd.f32 %v10375_v16, %v18774_v42 }
 0xa67   : > { %v10968_v10 = vadd.f32 %v18815_v59, %v10947_v14  ;;  %v10584_v14 = vadd.f32 %v10549_v47, %v10410_v31 }
 0xa69   : > { %v10988_v12 = vmax.f32 %v10968_v10, 0.0 }
 0xa6a   : > { %v10884_v45 = vpop.f32.mrf.mxu2 }
 0xa6b   : > { %11008 = vst [vmem:[%s18823_s26 + $0x20] sm:$0xff] %v10988_v12  ;;  %v10927_v11 = vadd.f32 %v10884_v45, %v10753_v15  ;;  %v10377_v36 = vpop.f32.mrf.mxu3  ;;  %v10725_v56 = vpop.f32.mrf.mxu1  ;;  %v10758_v15 = vadd.f32 %v10723_v29, %v10584_v14 }
 0xa6c   : > { %v10554_v27 = vpop.f32.mrf.mxu0  ;;  %v10411_v41 = vadd.f32 %v10377_v36, %v18777_v52 }
 0xa6d   : > { %v10948_v35 = vmul.f32 %v18809_v5, %v10927_v11 }
 0xa6e   : > { %v10585_v33 = vadd.f32 %v10551_v62, %v10411_v41 }
 0xa6f   : > { %v10969_v6 = vadd.f32 %v18815_v59, %v10948_v35 }
 0xa71   : > { %v10989_v30 = vmax.f32 %v10969_v6, 0.0 }
 0xa72   : > { %v10887_v18 = vpop.f32.mrf.mxu2 }
 0xa73   : > { %11009 = vst [vmem:[%s18823_s26 + $0x28] sm:$0xff] %v10989_v30  ;;  %v10928_v54 = vadd.f32 %v10887_v18, %v10754_v40  ;;  %v10380_v34 = vpop.f32.mrf.mxu3  ;;  %v10728_v28 = vpop.f32.mrf.mxu1  ;;  %v10759_v30 = vadd.f32 %v10725_v56, %v10585_v33 }
 0xa74   : > { %v10556_v35 = vpop.f32.mrf.mxu0  ;;  %v10412_v18 = vadd.f32 %v10380_v34, %v18780_v53 }
 0xa75   : > { %v10949_v50 = vmul.f32 %v18809_v5, %v10928_v54 }
 0xa76   : > { %v10586_v46 = vadd.f32 %v10554_v27, %v10412_v18 }
 0xa77   : > { %v10970_v55 = vadd.f32 %v18815_v59, %v10949_v50 }
 0xa78   : > { %v10760_v47 = vadd.f32 %v10728_v28, %v10586_v46 }
 0xa79   : > { %v10990_v38 = vmax.f32 %v10970_v55, 0.0 }
 0xa7a   : > { %v10889_v3 = vpop.f32.mrf.mxu2 }
 0xa7b   : > { %11010 = vst [vmem:[%s18823_s26 + $0x30] sm:$0xff] %v10990_v38  ;;  %v10929_v51 = vadd.f32 %v10889_v3, %v10755_v8  ;;  %v10382_v23 = vpop.f32.mrf.mxu3  ;;  %v10730_v54 = vpop.f32.mrf.mxu1 }
 0xa7c   : > { %v10559_v16 = vpop.f32.mrf.mxu0  ;;  %v10413_v8 = vadd.f32 %v10382_v23, %v18783_v2 }
 0xa7d   : > { %v10950_v63 = vmul.f32 %v18809_v5, %v10929_v51 }
 0xa7e   : > { %v10587_v57 = vadd.f32 %v10556_v35, %v10413_v8 }
 0xa7f   : > { %v10971_v60 = vadd.f32 %v18815_v59, %v10950_v63 }
 0xa81   : > { %v10991_v19 = vmax.f32 %v10971_v60, 0.0  ;;  %v10761_v60 = vadd.f32 %v10730_v54, %v10587_v57 }
 0xa82   : > { %v10892_v37 = vpop.f32.mrf.mxu2 }
 0xa83   : > { %11011 = vst [vmem:[%s18823_s26 + $0x38] sm:$0xff] %v10991_v19  ;;  %v10930_v26 = vadd.f32 %v10892_v37, %v10756_v58  ;;  %v10385_v7 = vpop.f32.mrf.mxu3  ;;  %v10733_v51 = vpop.f32.mrf.mxu1 }
 0xa84   : > { %v10561_v36 = vpop.f32.mrf.mxu0  ;;  %v10414_v58 = vadd.f32 %v10385_v7, %v18786_v20 }
 0xa85   : > { %v10951_v25 = vmul.f32 %v18809_v5, %v10930_v26 }
 0xa86   : > { %v10588_v37 = vadd.f32 %v10559_v16, %v10414_v58 }
 0xa87   : > { %v10972_v9 = vadd.f32 %v18815_v59, %v10951_v25 }
 0xa88   : > { %v10762_v25 = vadd.f32 %v10733_v51, %v10588_v37 }
 0xa89   : > { %v10992_v43 = vmax.f32 %v10972_v9, 0.0 }
 0xa8a   : > { %v10894_v22 = vpop.f32.mrf.mxu2 }
 0xa8b   : > { %11012 = vst [vmem:[%s18823_s26 + $0x40] sm:$0xff] %v10992_v43  ;;  %v10931_v4 = vadd.f32 %v10894_v22, %v10757_v21  ;;  %v10387_v63 = vpop.f32.mrf.mxu3  ;;  %v10735_v26 = vpop.f32.mrf.mxu1 }
 0xa8c   : > { %v10415_v43 = vadd.f32 %v10387_v63, %v18789_v49  ;;  %v10564_v34 = vpop.f32.mrf.mxu0 }
 0xa8d   : > { %v10952_v0 = vmul.f32 %v18809_v5, %v10931_v4 }
 0xa8e   : > { %v10589_v22 = vadd.f32 %v10561_v36, %v10415_v43 }
 0xa8f   : > { %v10973_v10 = vadd.f32 %v18815_v59, %v10952_v0 }
 0xa90   : > { %v10763_v27 = vadd.f32 %v10735_v26, %v10589_v22 }
 0xa91   : > { %v10993_v12 = vmax.f32 %v10973_v10, 0.0 }
 0xa92   : > { %v10897_v45 = vpop.f32.mrf.mxu2 }
 0xa93   : > { %11013 = vst [vmem:[%s18823_s26 + $0x48] sm:$0xff] %v10993_v12  ;;  %v10932_v11 = vadd.f32 %v10897_v45, %v10758_v15  ;;  %v10390_v9 = vpop.f32.mrf.mxu3  ;;  %v10738_v14 = vpop.f32.mrf.mxu1 }
 0xa94   : > { %v10416_v10 = vadd.f32 %v10390_v9, %v18792_v61  ;;  %v10566_v45 = vpop.f32.mrf.mxu0 }
 0xa95   : > { %v10953_v42 = vmul.f32 %v18809_v5, %v10932_v11 }
 0xa96   : > { %v10590_v28 = vadd.f32 %v10564_v34, %v10416_v10 }
 0xa97   : > { %v10974_v17 = vadd.f32 %v18815_v59, %v10953_v42 }
 0xa98   : > { %v10764_v23 = vadd.f32 %v10738_v14, %v10590_v28 }
 0xa99   : > { %v10994_v6 = vmax.f32 %v10974_v17, 0.0 }
 0xa9a   : > { %v10899_v40 = vpop.f32.mrf.mxu2 }
 0xa9b   : > { %11014 = vst [vmem:[%s18823_s26 + $0x50] sm:$0xff] %v10994_v6  ;;  %v10933_v32 = vadd.f32 %v10899_v40, %v10759_v30  ;;  %v10392_v15 = vpop.f32.mrf.mxu3  ;;  %v10740_v17 = vpop.f32.mrf.mxu1 }
 0xa9c   : > { %v10417_v42 = vadd.f32 %v10392_v15, %v18795_v24  ;;  %v10569_v18 = vpop.f32.mrf.mxu0 }
 0xa9d   : > { %v10954_v52 = vmul.f32 %v18809_v5, %v10933_v32 }
 0xa9e   : > { %v10591_v6 = vadd.f32 %v10566_v45, %v10417_v42 }
 0xa9f   : > { %v10975_v50 = vadd.f32 %v18815_v59, %v10954_v52 }
 0xaa0   : > { %v10765_v54 = vadd.f32 %v10740_v17, %v10591_v6 }
 0xaa1   : > { %v10995_v55 = vmax.f32 %v10975_v50, 0.0 }
 0xaa2   : > { %v10902_v38 = vpop.f32.mrf.mxu2 }
 0xaa3   : > { %11015 = vst [vmem:[%s18823_s26 + $0x58] sm:$0xff] %v10995_v55  ;;  %v10934_v3 = vadd.f32 %v10902_v38, %v10760_v47  ;;  %v10395_v30 = vpop.f32.mrf.mxu3  ;;  %v10743_v50 = vpop.f32.mrf.mxu1 }
 0xaa4   : > { %v10418_v52 = vadd.f32 %v10395_v30, %v18799_v44 }
 0xaa5   : > { %v10955_v53 = vmul.f32 %v18809_v5, %v10934_v3  ;;  %v10571_v3 = vpop.f32.mrf.mxu0 }
 0xaa6   : > { %v10592_v24 = vadd.f32 %v10569_v18, %v10418_v52 }
 0xaa7   : > { %v10976_v13 = vadd.f32 %v18815_v59, %v10955_v53 }
 0xaa8   : > { %v10766_v38 = vadd.f32 %v10743_v50, %v10592_v24 }
 0xaa9   : > { %v10996_v29 = vmax.f32 %v10976_v13, 0.0 }
 0xaaa   : > { %v10904_v19 = vpop.f32.mrf.mxu2 }
 0xaab   : > { %11016 = vst [vmem:[%s18823_s26 + $0x60] sm:$0xff] %v10996_v29  ;;  %v10935_v62 = vadd.f32 %v10904_v19, %v10761_v60  ;;  %v10397_v47 = vpop.f32.mrf.mxu3  ;;  %v10745_v63 = vpop.f32.mrf.mxu1 }
 0xaac   : > { %v10419_v53 = vadd.f32 %v10397_v47, %v18803_v39 }
 0xaad   : > { %v10956_v2 = vmul.f32 %v18809_v5, %v10935_v62 }
 0xaae   : > { %v10593_v44 = vadd.f32 %v10571_v3, %v10419_v53 }
 0xaaf   : > { %v10977_v1 = vadd.f32 %v18815_v59, %v10956_v2 }
 0xab0   : > { %v10767_v60 = vadd.f32 %v10745_v63, %v10593_v44 }
 0xab1   : > { %v10997_v48 = vmax.f32 %v10977_v1, 0.0 }
 0xab2   : > { %v10907_v56 = vpop.f32.mrf.mxu2 }
 0xab3   : > { %11017 = vst [vmem:[%s18823_s26 + $0x68] sm:$0xff] %v10997_v48  ;;  %v10936_v21 = vadd.f32 %v10907_v56, %v10762_v25 }
 0xab5   : > { %v10957_v20 = vmul.f32 %v18809_v5, %v10936_v21 }
 0xab7   : > { %v10978_v31 = vadd.f32 %v18815_v59, %v10957_v20 }
 0xab9   : > { %v10998_v4 = vmax.f32 %v10978_v31, 0.0 }
 0xaba   : > { %v10909_v0 = vpop.f32.mrf.mxu2 }
 0xabb   : > { %11018 = vst [vmem:[%s18823_s26 + $0x70] sm:$0xff] %v10998_v4  ;;  %v10937_v12 = vadd.f32 %v10909_v0, %v10763_v27 }
 0xabd   : > { %v10958_v49 = vmul.f32 %v18809_v5, %v10937_v12 }
 0xabf   : > { %v10979_v41 = vadd.f32 %v18815_v59, %v10958_v49 }
 0xac1   : > { %v10999_v11 = vmax.f32 %v10979_v41, 0.0 }
 0xac2   : > { %v10912_v33 = vpop.f32.mrf.mxu2 }
 0xac3   : > { %11019 = vst [vmem:[%s18823_s26 + $0x78] sm:$0xff] %v10999_v11  ;;  %v10938_v35 = vadd.f32 %v10912_v33, %v10764_v23 }
 0xac5   : > { %v10959_v61 = vmul.f32 %v18809_v5, %v10938_v35 }
 0xac7   : > { %v10980_v40 = vadd.f32 %v18815_v59, %v10959_v61 }
 0xac9   : > { %v11000_v32 = vmax.f32 %v10980_v40, 0.0 }
 0xaca   : > { %v10914_v46 = vpop.f32.mrf.mxu2 }
 0xacb   : > { %11020 = vst [vmem:[%s18823_s26 + $0x80] sm:$0xff] %v11000_v32  ;;  %v10939_v7 = vadd.f32 %v10914_v46, %v10765_v54 }
 0xacd   : > { %v10960_v16 = vmul.f32 %v18809_v5, %v10939_v7 }
 0xacf   : > { %v10981_v55 = vadd.f32 %v18815_v59, %v10960_v16 }
 0xad1   : > { %v11001_v8 = vmax.f32 %v10981_v55, 0.0 }
 0xad2   : > { %v10917_v57 = vpop.f32.mrf.mxu2 }
 0xad3   : > { %11021 = vst [vmem:[%s18823_s26 + $0x88] sm:$0xff] %v11001_v8  ;;  %v10940_v51 = vadd.f32 %v10917_v57, %v10766_v38 }
 0xad5   : > { %v10961_v13 = vmul.f32 %v18809_v5, %v10940_v51 }
 0xad7   : > { %v10982_v29 = vadd.f32 %v18815_v59, %v10961_v13 }
 0xad9   : > { %v11002_v36 = vmax.f32 %v10982_v29, 0.0 }
 0xada   : > { %v10919_v19 = vpop.f32.mrf.mxu2 }
 0xadb   : > { %11022 = vst [vmem:[%s18823_s26 + $0x90] sm:$0xff] %v11002_v36  ;;  %v10941_v58 = vadd.f32 %v10919_v19, %v10767_v60 }
 0xadd   : > { %v10962_v62 = vmul.f32 %v18809_v5, %v10941_v58 }
 0xadf   : > { %v10983_v37 = vadd.f32 %v18815_v59, %v10962_v62 }
 0xae1   : > { %v11003_v2 = vmax.f32 %v10983_v37, 0.0 }
 0xae3   : > { %11023 = vst [vmem:[%s18823_s26 + $0x98] sm:$0xff] %v11003_v2 }
 0xae4 PF: > { %s18_s27 = sadd.s32 1, %s14632_s27  }
 0xae5   : > { %p15_p4 = scmp.ge.s32.totalorder %s18_s27, 4  }
 0xae7   :  { %17 = sbr.rel (!%p15_p4) target bundleno = 1 (0x1), region = 157 }

</bundles_post_ra>
